<compile_context>
chip_gen: v5e
topology: v5e:2x2
jax: 0.10.0
libtpu: 0.0.40
codegen_flags: <defaults>
</compile_context>

<pallas_src>
import functools

import jax
import jax.numpy as jnp
from jax import lax
from jax.experimental import pallas as pl
from jax.experimental.pallas import tpu as pltpu


_ALIGN = 16        # bf16 packs 2 rows per sublane -> align row offsets to 16.
_ROW_CHUNK = 256   # rows per in-register conv / deconv accumulation chunk.


def _round_up(x, m):
    return -(-x // m) * m


def _chunks(total, size):
    out, c0 = [], 0
    while c0 < total:
        out.append((c0, min(size, total - c0)))
        c0 += size
    return out


# ----------------------------------------------------------------------------
# Fused head kernel factory.
# ----------------------------------------------------------------------------
def _make_head_kernel(num_conv, H, W, Cd, base, pad, m_rows, r_total, nb_hpwp):
    Hp, Wp = H + 2, W + 2
    n_bufs = min(num_conv, 2)
    conv_chunks = _chunks(m_rows, _ROW_CHUNK)   # aligned: starts % 256 == 0
    tail_chunks = _chunks(nb_hpwp, _ROW_CHUNK)
    n_trail = r_total - pad - m_rows

    def kernel(*refs):
        x_ref, mask_ref = refs[0], refs[1]
        conv_refs = refs[2:2 + 2 * num_conv]
        wd4_ref, bd4_ref, wpb_ref, bp4_ref = refs[2 + 2 * num_conv:
                                                  6 + 2 * num_conv]
        o_ref = refs[6 + 2 * num_conv]
        bufs = refs[7 + 2 * num_conv:]

        # The masked interior stores only cover rows [pad, pad+m_rows); the
        # halo rows outside that range must read as zero.  Re-zeroed every
        # grid step so there is no cross-step scratch state (safe with a fully
        # "parallel" grid sharded across megacore / dual TensorCores).
        for buf in bufs:
            buf[0:pad, :] = jnp.zeros((pad, Cd), jnp.bfloat16)
            buf[pad + m_rows:r_total, :] = jnp.zeros((n_trail, Cd),
                                                     jnp.bfloat16)

        # --- num_conv x (3x3 conv + ReLU), activations never leave VMEM ----
        src = x_ref                              # (r_total, Cin) bf16 block
        for l in range(num_conv):
            w_ref = conv_refs[2 * l]             # (3, 3, Ci, Cd) bf16
            bias = conv_refs[2 * l + 1][...]     # (1, Cd) f32
            dst = bufs[l % n_bufs]               # (r_total, Cd) bf16 scratch
            for c0, csz in conv_chunks:
                # All 9 taps accumulate into one small f32 value; each tap is
                # a contiguous row-offset bf16 slice feeding one MXU matmul.
                acc = None
                for dy in range(3):
                    for dx in range(3):
                        off = base + dy * Wp + dx + c0
                        d = jnp.dot(src[off:off + csz, :], w_ref[dy, dx],
                                    preferred_element_type=jnp.float32)
                        acc = d if acc is None else acc + d
                # bias + ReLU, then zero the pad/garbage rows so the buffer
                # keeps an exact zero halo for the next layer's taps.
                keep = mask_ref[c0:c0 + csz, :]              # (csz, 1) f32
                acc = jnp.maximum(acc + bias, 0.0) * keep
                # Aligned, unmasked slab store (pad, c0, csz all mult of 16).
                dst[pad + c0:pad + c0 + csz, :] = acc.astype(jnp.bfloat16)
            src = dst

        # --- ConvTranspose2d(2,2) + ReLU + 1x1 predictor, fused & chunked ---
        # One (csz, C) x (C, 4*Cd) matmul covers all four deconv taps, then
        # one (csz, 4*Cd) x (4*Cd, 4*K) matmul against a block-diagonal
        # predictor weight -> lane-dense (4*K wide) chunk stores.
        bd4 = bd4_ref[...]
        bp4 = bp4_ref[...]
        for c0, csz in tail_chunks:
            act = src[base + c0:base + c0 + csz, :]          # bf16 (csz, Ci)
            h = jnp.dot(act, wd4_ref[...], preferred_element_type=jnp.float32)
            h = jnp.maximum(h + bd4, 0.0)                    # (csz, 4*Cd)
            p = jnp.dot(h.astype(jnp.bfloat16), wpb_ref[...],
                        preferred_element_type=jnp.float32) + bp4
            o_ref[0, c0:c0 + csz, :] = p.astype(o_ref.dtype)

    return kernel


def _pick_roi_block(n_roi, max_block=4):
    """Largest divisor of n_roi <= max_block, keeping >=2 grid steps when
    possible so both TensorCores get work."""
    cap = max(1, min(max_block, n_roi // 2 if n_roi >= 2 else 1))
    for nb in range(cap, 0, -1):
        if n_roi % nb == 0:
            return nb
    return 1


# ----------------------------------------------------------------------------
# Full head forward (Pallas), matching MaskRCNNConvUpsampleHead.forward.
# ----------------------------------------------------------------------------
@functools.partial(jax.jit, static_argnames=("roi_block",))
def mask_head_forward(x_nchw, params, *, roi_block=None):
    N, Cin, H, W = x_nchw.shape
    num_conv = len(params["convs"])
    Cd = params["wd"].shape[3]
    K = params["wp"].shape[1]
    Hp, Wp = H + 2, W + 2
    HpWp = Hp * Wp
    Nb = roi_block if roi_block is not None else _pick_roi_block(N)
    assert N % Nb == 0, (N, Nb)
    G = N // Nb
    nb_hpwp = Nb * HpWp

    # Aligned flattened layout: `base` leading zero rows shift the content
    # origin `pad` to a multiple of 16; M is rounded up to a multiple of 16.
    pad0 = Wp + 1
    base = (-pad0) % _ALIGN
    pad = base + pad0
    m_needed = nb_hpwp - 2 * Wp - 2
    m_rows = _round_up(m_needed, _ALIGN)
    r_total = _round_up(base + m_rows + 2 * Wp + 2, _ALIGN)

    # NCHW -> NHWC, pad the spatial halo ONCE, flatten rows, add the alignment
    # pad, cast to bf16.  Later layers keep their halo inside VMEM.
    x = jnp.transpose(x_nchw, (0, 2, 3, 1)).astype(jnp.bfloat16)
    xp = jnp.pad(x, ((0, 0), (1, 1), (1, 1), (0, 0)))
    x3 = xp.reshape(G, nb_hpwp, Cin)
    x3 = jnp.pad(x3, ((0, 0), (base, r_total - base - nb_hpwp), (0, 0)))
    x_flat = x3.reshape(G * r_total, Cin)

    # Content-vs-pad mask over the extended output rows of one grid step.
    # (Kept as a tiny input instead of in-kernel iota//% to avoid relying on
    #  vector integer div/rem lowering; ~0.5 MiB VMEM.)
    ridx = jnp.arange(m_rows, dtype=jnp.int32)
    interior = ((ridx % Wp) < W) & (((ridx // Wp) % Hp) < H)
    mask = interior.astype(jnp.float32)[:, None]               # (m_rows, 1)

    # Weight operands: bf16 for the MXU, f32 biases.
    conv_args, conv_specs = [], []
    for l, (w, b) in enumerate(params["convs"]):
        ci = Cin if l == 0 else Cd
        conv_args += [w.astype(jnp.bfloat16), b.astype(jnp.float32)]
        conv_specs += [pl.BlockSpec((3, 3, ci, Cd), lambda i: (0, 0, 0, 0)),
                       pl.BlockSpec((1, Cd), lambda i: (0, 0))]
    wd = params["wd"]                                          # (2,2,Ci,Cd)
    ci_dec = wd.shape[2]
    wd4 = jnp.transpose(wd, (2, 0, 1, 3)).reshape(ci_dec, 4 * Cd)
    wd4 = wd4.astype(jnp.bfloat16)                             # (Ci, 4*Cd)
    bd4 = jnp.tile(params["bd"].astype(jnp.float32), (1, 4))   # (1, 4*Cd)
    wpb = jnp.kron(jnp.eye(4, dtype=jnp.bfloat16),
                   params["wp"].astype(jnp.bfloat16))          # (4Cd, 4K)
    bp4 = jnp.tile(params["bp"].astype(jnp.float32), (1, 4))   # (1, 4*K)

    kernel = _make_head_kernel(num_conv, H, W, Cd, base, pad, m_rows, r_total,
                               nb_hpwp)
    in_specs = ([pl.BlockSpec((r_total, Cin), lambda i: (i, 0)),
                 pl.BlockSpec((m_rows, 1), lambda i: (0, 0))]
                + conv_specs
                + [pl.BlockSpec((ci_dec, 4 * Cd), lambda i: (0, 0)),
                   pl.BlockSpec((1, 4 * Cd), lambda i: (0, 0)),
                   pl.BlockSpec((4 * Cd, 4 * K), lambda i: (0, 0)),
                   pl.BlockSpec((1, 4 * K), lambda i: (0, 0))])
    scratch = [pltpu.VMEM((r_total, Cd), jnp.bfloat16)] * min(num_conv, 2)

    out = pl.pallas_call(
        kernel,
        out_shape=jax.ShapeDtypeStruct((G, nb_hpwp, 4 * K), jnp.float32),
        grid=(G,),
        in_specs=in_specs,
        out_specs=pl.BlockSpec((1, nb_hpwp, 4 * K), lambda i: (i, 0, 0)),
        scratch_shapes=scratch,
        compiler_params=pltpu.CompilerParams(
            dimension_semantics=("parallel",),
            vmem_limit_bytes=48 * 1024 * 1024),
    )(x_flat, mask, *conv_args, wd4, bd4, wpb, bp4)

    # Drop the pad ring, interleave the 2x2 deconv taps and go NHWC->NCHW in
    # one fused slice+transpose+reshape.
    y = out.reshape(N, Hp, Wp, 2, 2, K)[:, 1:H + 1, 1:W + 1]
    y = jnp.transpose(y, (0, 5, 1, 3, 2, 4)).reshape(N, K, 2 * H, 2 * W)
    return y


# ----------------------------------------------------------------------------
# Pure-JAX reference (independent path) for a correctness check.
# ----------------------------------------------------------------------------
def mask_head_reference(x_nchw, params):
    x = jnp.transpose(x_nchw, (0, 2, 3, 1)).astype(jnp.float32)
    for w, b in params["convs"]:
        x = lax.conv_general_dilated(
            x, w, window_strides=(1, 1), padding=((1, 1), (1, 1)),
            dimension_numbers=("NHWC", "HWIO", "NHWC"),
            precision=lax.Precision.HIGHEST)
        x = jnp.maximum(x + b[0], 0.0)
    wd, bd, wp, bp = params["wd"], params["bd"], params["wp"], params["bp"]
    sub = jnp.einsum("nijc,yxcf->nyxijf", x, wd,
                     precision=lax.Precision.HIGHEST)           # (N,2,2,H,W,Cd)
    N, _, _, H, W, Cd = sub.shape
    y = sub.transpose(0, 3, 1, 4, 2, 5).reshape(N, 2 * H, 2 * W, Cd)
    y = jnp.maximum(y + bd[0], 0.0)
    p = jnp.einsum("nhwc,ck->nhwk", y, wp,
                   precision=lax.Precision.HIGHEST) + bp[0]
    return jnp.transpose(p, (0, 3, 1, 2))


# ----------------------------------------------------------------------------
# Deterministic parameter init (shapes from MaskRCNNConvUpsampleHead.__init__).
#   conv layers / deconv: c2_msra_fill (kaiming normal, fan_out, relu), bias 0
#   predictor: normal(std=0.001), bias 0
# ----------------------------------------------------------------------------
def init_params(key, input_channels, conv_dims, num_conv, num_classes):
    keys = jax.random.split(key, num_conv + 2)
    convs = []
    cin = input_channels
    for k in range(num_conv):
        fan_out = conv_dims * 3 * 3
        std = (2.0 / fan_out) ** 0.5
        w = std * jax.random.normal(keys[k], (3, 3, cin, conv_dims), jnp.float32)
        b = jnp.zeros((1, conv_dims), jnp.float32)
        convs.append((w, b))
        cin = conv_dims
    fan_out_d = conv_dims * 2 * 2
    std_d = (2.0 / fan_out_d) ** 0.5
    wd = std_d * jax.random.normal(keys[num_conv], (2, 2, cin, conv_dims),
                                   jnp.float32)
    bd = jnp.zeros((1, conv_dims), jnp.float32)
    wp = 0.001 * jax.random.normal(keys[num_conv + 1], (conv_dims, num_classes),
                                   jnp.float32)
    bp = jnp.zeros((1, num_classes), jnp.float32)
    return {"convs": convs, "wd": wd, "bd": bd, "wp": wp, "bp": bp}


if __name__ == "__main__":
    # Small, deterministic config: N=2, Cin=4, H=W=16, conv_dim=8,
    # num_conv=2, num_classes=3 (cls_agnostic_mask=False), norm="".
    # (Toy channel counts are lane-sparse by nature; production shapes are
    #  256 channels / 80 classes, for which the lane-dense 4*K output applies.)
    N, Cin, H, W = 2, 4, 16, 16
    conv_dims, num_conv, num_classes = 8, 2, 3

    key = jax.random.PRNGKey(0)
    kx, kp = jax.random.split(key)
    x = jax.random.normal(kx, (N, Cin, H, W), jnp.float32)        # NCHW input
    params = init_params(kp, Cin, conv_dims, num_conv, num_classes)

    out = jax.block_until_ready(mask_head_forward(x, params))
    ref = jax.block_until_ready(mask_head_reference(x, params))

    assert out.shape == (N, num_classes, 2 * H, 2 * W), out.shape
    max_err = float(jnp.max(jnp.abs(out - ref)))
    assert jnp.allclose(out, ref, rtol=2e-2, atol=2e-2), max_err

    print("KERNEL_OK")
</pallas_src>

<mosaic_0001>
module attributes {stable_mosaic.version = 11 : i64} {
  func.func @kernel(%arg0: i32, %arg1: memref<352x4xbf16, #tpu.memory_space<vmem>>, %arg2: memref<288x1xf32, #tpu.memory_space<vmem>>, %arg3: memref<3x3x4x8xbf16, #tpu.memory_space<vmem>>, %arg4: memref<1x8xf32, #tpu.memory_space<vmem>>, %arg5: memref<3x3x8x8xbf16, #tpu.memory_space<vmem>>, %arg6: memref<1x8xf32, #tpu.memory_space<vmem>>, %arg7: memref<8x32xbf16, #tpu.memory_space<vmem>>, %arg8: memref<1x32xf32, #tpu.memory_space<vmem>>, %arg9: memref<32x12xbf16, #tpu.memory_space<vmem>>, %arg10: memref<1x12xf32, #tpu.memory_space<vmem>>, %arg11: memref<1x324x12xf32, #tpu.memory_space<vmem>>, %arg12: memref<352x8xbf16, #tpu.memory_space<vmem>>, %arg13: memref<352x8xbf16, #tpu.memory_space<vmem>>) attributes {dimension_semantics = [#tpu.dimension_semantics<parallel>], iteration_bounds = array<i64: 2>, scalar_prefetch = 0 : i64, scratch_operands = 2 : i64, tpu.core_type = #tpu.core_type<tc>, window_params = [{transform_indices = @transform_0, window_bounds = array<i64: 352, 4>}, {pipeline_mode = #tpu.pipeline_mode<synchronous>, transform_indices = @transform_1, window_bounds = array<i64: 288, 1>}, {pipeline_mode = #tpu.pipeline_mode<synchronous>, transform_indices = @transform_2, window_bounds = array<i64: 3, 3, 4, 8>}, {pipeline_mode = #tpu.pipeline_mode<synchronous>, transform_indices = @transform_3, window_bounds = array<i64: 1, 8>}, {pipeline_mode = #tpu.pipeline_mode<synchronous>, transform_indices = @transform_4, window_bounds = array<i64: 3, 3, 8, 8>}, {pipeline_mode = #tpu.pipeline_mode<synchronous>, transform_indices = @transform_5, window_bounds = array<i64: 1, 8>}, {pipeline_mode = #tpu.pipeline_mode<synchronous>, transform_indices = @transform_6, window_bounds = array<i64: 8, 32>}, {pipeline_mode = #tpu.pipeline_mode<synchronous>, transform_indices = @transform_7, window_bounds = array<i64: 1, 32>}, {pipeline_mode = #tpu.pipeline_mode<synchronous>, transform_indices = @transform_8, window_bounds = array<i64: 32, 12>}, {pipeline_mode = #tpu.pipeline_mode<synchronous>, transform_indices = @transform_9, window_bounds = array<i64: 1, 12>}, {transform_indices = @transform_10, window_bounds = array<i64: 1, 324, 12>}]} {
    %cst = arith.constant 0.000000e+00 : bf16
    %0 = vector.broadcast %cst : bf16 to vector<32x8xbf16>
    %c0 = arith.constant 0 : index
    %c0_0 = arith.constant 0 : index
    %1 = vector.load %arg12[%c0, %c0_0] : memref<352x8xbf16, #tpu.memory_space<vmem>>, vector<32x8xbf16>
    tpu.vector_store %arg12[%c0, %c0_0], %0 {strides = array<i32>} : memref<352x8xbf16, #tpu.memory_space<vmem>>, vector<32x8xbf16>,
    %cst_1 = arith.constant 0.000000e+00 : bf16
    %2 = vector.broadcast %cst_1 : bf16 to vector<32x8xbf16>
    %c320 = arith.constant 320 : index
    %c0_2 = arith.constant 0 : index
    %3 = vector.load %arg12[%c320, %c0_2] : memref<352x8xbf16, #tpu.memory_space<vmem>>, vector<32x8xbf16>
    tpu.vector_store %arg12[%c320, %c0_2], %2 {strides = array<i32>} : memref<352x8xbf16, #tpu.memory_space<vmem>>, vector<32x8xbf16>,
    %cst_3 = arith.constant 0.000000e+00 : bf16
    %4 = vector.broadcast %cst_3 : bf16 to vector<32x8xbf16>
    %c0_4 = arith.constant 0 : index
    %c0_5 = arith.constant 0 : index
    %5 = vector.load %arg13[%c0_4, %c0_5] : memref<352x8xbf16, #tpu.memory_space<vmem>>, vector<32x8xbf16>
    tpu.vector_store %arg13[%c0_4, %c0_5], %4 {strides = array<i32>} : memref<352x8xbf16, #tpu.memory_space<vmem>>, vector<32x8xbf16>,
    %cst_6 = arith.constant 0.000000e+00 : bf16
    %6 = vector.broadcast %cst_6 : bf16 to vector<32x8xbf16>
    %c320_7 = arith.constant 320 : index
    %c0_8 = arith.constant 0 : index
    %7 = vector.load %arg13[%c320_7, %c0_8] : memref<352x8xbf16, #tpu.memory_space<vmem>>, vector<32x8xbf16>
    tpu.vector_store %arg13[%c320_7, %c0_8], %6 {strides = array<i32>} : memref<352x8xbf16, #tpu.memory_space<vmem>>, vector<32x8xbf16>,
    %c0_9 = arith.constant 0 : index
    %c0_10 = arith.constant 0 : index
    %8 = vector.load %arg4[%c0_9, %c0_10] : memref<1x8xf32, #tpu.memory_space<vmem>>, vector<1x8xf32>
    %c13 = arith.constant 13 : index
    %c0_11 = arith.constant 0 : index
    %9 = vector.load %arg1[%c13, %c0_11] : memref<352x4xbf16, #tpu.memory_space<vmem>>, vector<256x4xbf16>
    %c0_12 = arith.constant 0 : index
    %c0_13 = arith.constant 0 : index
    %c0_14 = arith.constant 0 : index
    %c0_15 = arith.constant 0 : index
    %10 = vector.load %arg3[%c0_12, %c0_13, %c0_14, %c0_15] : memref<3x3x4x8xbf16, #tpu.memory_space<vmem>>, vector<1x1x4x8xbf16>
    %11 = vector.shape_cast %10 : vector<1x1x4x8xbf16> to vector<4x8xbf16>
    %cst_16 = arith.constant dense<0.000000e+00> : vector<256x8xf32>
    %12 = tpu.matmul %9, %11, %cst_16 {dimension_numbers = #tpu.dot_dimension_numbers<[1], [0], [0], [1], [0, 0, 1, 1], [], []>} : vector<256x4xbf16>, vector<4x8xbf16>, vector<256x8xf32> -> vector<256x8xf32>
    %c14 = arith.constant 14 : index
    %c0_17 = arith.constant 0 : index
    %13 = vector.load %arg1[%c14, %c0_17] : memref<352x4xbf16, #tpu.memory_space<vmem>>, vector<256x4xbf16>
    %c0_18 = arith.constant 0 : index
    %c1 = arith.constant 1 : index
    %c0_19 = arith.constant 0 : index
    %c0_20 = arith.constant 0 : index
    %14 = vector.load %arg3[%c0_18, %c1, %c0_19, %c0_20] : memref<3x3x4x8xbf16, #tpu.memory_space<vmem>>, vector<1x1x4x8xbf16>
    %15 = vector.shape_cast %14 : vector<1x1x4x8xbf16> to vector<4x8xbf16>
    %cst_21 = arith.constant dense<0.000000e+00> : vector<256x8xf32>
    %16 = tpu.matmul %13, %15, %cst_21 {dimension_numbers = #tpu.dot_dimension_numbers<[1], [0], [0], [1], [0, 0, 1, 1], [], []>} : vector<256x4xbf16>, vector<4x8xbf16>, vector<256x8xf32> -> vector<256x8xf32>
    %17 = arith.addf %12, %16 : vector<256x8xf32>
    %c15 = arith.constant 15 : index
    %c0_22 = arith.constant 0 : index
    %18 = vector.load %arg1[%c15, %c0_22] : memref<352x4xbf16, #tpu.memory_space<vmem>>, vector<256x4xbf16>
    %c0_23 = arith.constant 0 : index
    %c2 = arith.constant 2 : index
    %c0_24 = arith.constant 0 : index
    %c0_25 = arith.constant 0 : index
    %19 = vector.load %arg3[%c0_23, %c2, %c0_24, %c0_25] : memref<3x3x4x8xbf16, #tpu.memory_space<vmem>>, vector<1x1x4x8xbf16>
    %20 = vector.shape_cast %19 : vector<1x1x4x8xbf16> to vector<4x8xbf16>
    %cst_26 = arith.constant dense<0.000000e+00> : vector<256x8xf32>
    %21 = tpu.matmul %18, %20, %cst_26 {dimension_numbers = #tpu.dot_dimension_numbers<[1], [0], [0], [1], [0, 0, 1, 1], [], []>} : vector<256x4xbf16>, vector<4x8xbf16>, vector<256x8xf32> -> vector<256x8xf32>
    %22 = arith.addf %17, %21 : vector<256x8xf32>
    %c31 = arith.constant 31 : index
    %c0_27 = arith.constant 0 : index
    %23 = vector.load %arg1[%c31, %c0_27] : memref<352x4xbf16, #tpu.memory_space<vmem>>, vector<256x4xbf16>
    %c1_28 = arith.constant 1 : index
    %c0_29 = arith.constant 0 : index
    %c0_30 = arith.constant 0 : index
    %c0_31 = arith.constant 0 : index
    %24 = vector.load %arg3[%c1_28, %c0_29, %c0_30, %c0_31] : memref<3x3x4x8xbf16, #tpu.memory_space<vmem>>, vector<1x1x4x8xbf16>
    %25 = vector.shape_cast %24 : vector<1x1x4x8xbf16> to vector<4x8xbf16>
    %cst_32 = arith.constant dense<0.000000e+00> : vector<256x8xf32>
    %26 = tpu.matmul %23, %25, %cst_32 {dimension_numbers = #tpu.dot_dimension_numbers<[1], [0], [0], [1], [0, 0, 1, 1], [], []>} : vector<256x4xbf16>, vector<4x8xbf16>, vector<256x8xf32> -> vector<256x8xf32>
    %27 = arith.addf %22, %26 : vector<256x8xf32>
    %c32 = arith.constant 32 : index
    %c0_33 = arith.constant 0 : index
    %28 = vector.load %arg1[%c32, %c0_33] : memref<352x4xbf16, #tpu.memory_space<vmem>>, vector<256x4xbf16>
    %c1_34 = arith.constant 1 : index
    %c1_35 = arith.constant 1 : index
    %c0_36 = arith.constant 0 : index
    %c0_37 = arith.constant 0 : index
    %29 = vector.load %arg3[%c1_34, %c1_35, %c0_36, %c0_37] : memref<3x3x4x8xbf16, #tpu.memory_space<vmem>>, vector<1x1x4x8xbf16>
    %30 = vector.shape_cast %29 : vector<1x1x4x8xbf16> to vector<4x8xbf16>
    %cst_38 = arith.constant dense<0.000000e+00> : vector<256x8xf32>
    %31 = tpu.matmul %28, %30, %cst_38 {dimension_numbers = #tpu.dot_dimension_numbers<[1], [0], [0], [1], [0, 0, 1, 1], [], []>} : vector<256x4xbf16>, vector<4x8xbf16>, vector<256x8xf32> -> vector<256x8xf32>
    %32 = arith.addf %27, %31 : vector<256x8xf32>
    %c33 = arith.constant 33 : index
    %c0_39 = arith.constant 0 : index
    %33 = vector.load %arg1[%c33, %c0_39] : memref<352x4xbf16, #tpu.memory_space<vmem>>, vector<256x4xbf16>
    %c1_40 = arith.constant 1 : index
    %c2_41 = arith.constant 2 : index
    %c0_42 = arith.constant 0 : index
    %c0_43 = arith.constant 0 : index
    %34 = vector.load %arg3[%c1_40, %c2_41, %c0_42, %c0_43] : memref<3x3x4x8xbf16, #tpu.memory_space<vmem>>, vector<1x1x4x8xbf16>
    %35 = vector.shape_cast %34 : vector<1x1x4x8xbf16> to vector<4x8xbf16>
    %cst_44 = arith.constant dense<0.000000e+00> : vector<256x8xf32>
    %36 = tpu.matmul %33, %35, %cst_44 {dimension_numbers = #tpu.dot_dimension_numbers<[1], [0], [0], [1], [0, 0, 1, 1], [], []>} : vector<256x4xbf16>, vector<4x8xbf16>, vector<256x8xf32> -> vector<256x8xf32>
    %37 = arith.addf %32, %36 : vector<256x8xf32>
    %c49 = arith.constant 49 : index
    %c0_45 = arith.constant 0 : index
    %38 = vector.load %arg1[%c49, %c0_45] : memref<352x4xbf16, #tpu.memory_space<vmem>>, vector<256x4xbf16>
    %c2_46 = arith.constant 2 : index
    %c0_47 = arith.constant 0 : index
    %c0_48 = arith.constant 0 : index
    %c0_49 = arith.constant 0 : index
    %39 = vector.load %arg3[%c2_46, %c0_47, %c0_48, %c0_49] : memref<3x3x4x8xbf16, #tpu.memory_space<vmem>>, vector<1x1x4x8xbf16>
    %40 = vector.shape_cast %39 : vector<1x1x4x8xbf16> to vector<4x8xbf16>
    %cst_50 = arith.constant dense<0.000000e+00> : vector<256x8xf32>
    %41 = tpu.matmul %38, %40, %cst_50 {dimension_numbers = #tpu.dot_dimension_numbers<[1], [0], [0], [1], [0, 0, 1, 1], [], []>} : vector<256x4xbf16>, vector<4x8xbf16>, vector<256x8xf32> -> vector<256x8xf32>
    %42 = arith.addf %37, %41 : vector<256x8xf32>
    %c50 = arith.constant 50 : index
    %c0_51 = arith.constant 0 : index
    %43 = vector.load %arg1[%c50, %c0_51] : memref<352x4xbf16, #tpu.memory_space<vmem>>, vector<256x4xbf16>
    %c2_52 = arith.constant 2 : index
    %c1_53 = arith.constant 1 : index
    %c0_54 = arith.constant 0 : index
    %c0_55 = arith.constant 0 : index
    %44 = vector.load %arg3[%c2_52, %c1_53, %c0_54, %c0_55] : memref<3x3x4x8xbf16, #tpu.memory_space<vmem>>, vector<1x1x4x8xbf16>
    %45 = vector.shape_cast %44 : vector<1x1x4x8xbf16> to vector<4x8xbf16>
    %cst_56 = arith.constant dense<0.000000e+00> : vector<256x8xf32>
    %46 = tpu.matmul %43, %45, %cst_56 {dimension_numbers = #tpu.dot_dimension_numbers<[1], [0], [0], [1], [0, 0, 1, 1], [], []>} : vector<256x4xbf16>, vector<4x8xbf16>, vector<256x8xf32> -> vector<256x8xf32>
    %47 = arith.addf %42, %46 : vector<256x8xf32>
    %c51 = arith.constant 51 : index
    %c0_57 = arith.constant 0 : index
    %48 = vector.load %arg1[%c51, %c0_57] : memref<352x4xbf16, #tpu.memory_space<vmem>>, vector<256x4xbf16>
    %c2_58 = arith.constant 2 : index
    %c2_59 = arith.constant 2 : index
    %c0_60 = arith.constant 0 : index
    %c0_61 = arith.constant 0 : index
    %49 = vector.load %arg3[%c2_58, %c2_59, %c0_60, %c0_61] : memref<3x3x4x8xbf16, #tpu.memory_space<vmem>>, vector<1x1x4x8xbf16>
    %50 = vector.shape_cast %49 : vector<1x1x4x8xbf16> to vector<4x8xbf16>
    %cst_62 = arith.constant dense<0.000000e+00> : vector<256x8xf32>
    %51 = tpu.matmul %48, %50, %cst_62 {dimension_numbers = #tpu.dot_dimension_numbers<[1], [0], [0], [1], [0, 0, 1, 1], [], []>} : vector<256x4xbf16>, vector<4x8xbf16>, vector<256x8xf32> -> vector<256x8xf32>
    %52 = arith.addf %47, %51 : vector<256x8xf32>
    %c0_63 = arith.constant 0 : index
    %c0_64 = arith.constant 0 : index
    %53 = vector.load %arg2[%c0_63, %c0_64] : memref<288x1xf32, #tpu.memory_space<vmem>>, vector<256x1xf32>
    %54 = vector.broadcast %8 : vector<1x8xf32> to vector<256x8xf32>
    %55 = arith.addf %52, %54 : vector<256x8xf32>
    %cst_65 = arith.constant 0.000000e+00 : f32
    %56 = vector.broadcast %cst_65 : f32 to vector<256x8xf32>
    %57 = arith.maximumf %55, %56 : vector<256x8xf32>
    %58 = vector.broadcast %53 : vector<256x1xf32> to vector<256x8xf32>
    %59 = arith.mulf %57, %58 : vector<256x8xf32>
    %60 = arith.truncf %59 : vector<256x8xf32> to vector<256x8xbf16>
    %c32_66 = arith.constant 32 : index
    %c0_67 = arith.constant 0 : index
    %61 = vector.load %arg12[%c32_66, %c0_67] : memref<352x8xbf16, #tpu.memory_space<vmem>>, vector<256x8xbf16>
    tpu.vector_store %arg12[%c32_66, %c0_67], %60 {strides = array<i32>} : memref<352x8xbf16, #tpu.memory_space<vmem>>, vector<256x8xbf16>,
    %c269 = arith.constant 269 : index
    %c0_68 = arith.constant 0 : index
    %62 = vector.load %arg1[%c269, %c0_68] : memref<352x4xbf16, #tpu.memory_space<vmem>>, vector<32x4xbf16>
    %c0_69 = arith.constant 0 : index
    %c0_70 = arith.constant 0 : index
    %c0_71 = arith.constant 0 : index
    %c0_72 = arith.constant 0 : index
    %63 = vector.load %arg3[%c0_69, %c0_70, %c0_71, %c0_72] : memref<3x3x4x8xbf16, #tpu.memory_space<vmem>>, vector<1x1x4x8xbf16>
    %64 = vector.shape_cast %63 : vector<1x1x4x8xbf16> to vector<4x8xbf16>
    %cst_73 = arith.constant dense<0.000000e+00> : vector<32x8xf32>
    %65 = tpu.matmul %62, %64, %cst_73 {dimension_numbers = #tpu.dot_dimension_numbers<[1], [0], [0], [1], [0, 0, 1, 1], [], []>} : vector<32x4xbf16>, vector<4x8xbf16>, vector<32x8xf32> -> vector<32x8xf32>
    %c270 = arith.constant 270 : index
    %c0_74 = arith.constant 0 : index
    %66 = vector.load %arg1[%c270, %c0_74] : memref<352x4xbf16, #tpu.memory_space<vmem>>, vector<32x4xbf16>
    %c0_75 = arith.constant 0 : index
    %c1_76 = arith.constant 1 : index
    %c0_77 = arith.constant 0 : index
    %c0_78 = arith.constant 0 : index
    %67 = vector.load %arg3[%c0_75, %c1_76, %c0_77, %c0_78] : memref<3x3x4x8xbf16, #tpu.memory_space<vmem>>, vector<1x1x4x8xbf16>
    %68 = vector.shape_cast %67 : vector<1x1x4x8xbf16> to vector<4x8xbf16>
    %cst_79 = arith.constant dense<0.000000e+00> : vector<32x8xf32>
    %69 = tpu.matmul %66, %68, %cst_79 {dimension_numbers = #tpu.dot_dimension_numbers<[1], [0], [0], [1], [0, 0, 1, 1], [], []>} : vector<32x4xbf16>, vector<4x8xbf16>, vector<32x8xf32> -> vector<32x8xf32>
    %70 = arith.addf %65, %69 : vector<32x8xf32>
    %c271 = arith.constant 271 : index
    %c0_80 = arith.constant 0 : index
    %71 = vector.load %arg1[%c271, %c0_80] : memref<352x4xbf16, #tpu.memory_space<vmem>>, vector<32x4xbf16>
    %c0_81 = arith.constant 0 : index
    %c2_82 = arith.constant 2 : index
    %c0_83 = arith.constant 0 : index
    %c0_84 = arith.constant 0 : index
    %72 = vector.load %arg3[%c0_81, %c2_82, %c0_83, %c0_84] : memref<3x3x4x8xbf16, #tpu.memory_space<vmem>>, vector<1x1x4x8xbf16>
    %73 = vector.shape_cast %72 : vector<1x1x4x8xbf16> to vector<4x8xbf16>
    %cst_85 = arith.constant dense<0.000000e+00> : vector<32x8xf32>
    %74 = tpu.matmul %71, %73, %cst_85 {dimension_numbers = #tpu.dot_dimension_numbers<[1], [0], [0], [1], [0, 0, 1, 1], [], []>} : vector<32x4xbf16>, vector<4x8xbf16>, vector<32x8xf32> -> vector<32x8xf32>
    %75 = arith.addf %70, %74 : vector<32x8xf32>
    %c287 = arith.constant 287 : index
    %c0_86 = arith.constant 0 : index
    %76 = vector.load %arg1[%c287, %c0_86] : memref<352x4xbf16, #tpu.memory_space<vmem>>, vector<32x4xbf16>
    %c1_87 = arith.constant 1 : index
    %c0_88 = arith.constant 0 : index
    %c0_89 = arith.constant 0 : index
    %c0_90 = arith.constant 0 : index
    %77 = vector.load %arg3[%c1_87, %c0_88, %c0_89, %c0_90] : memref<3x3x4x8xbf16, #tpu.memory_space<vmem>>, vector<1x1x4x8xbf16>
    %78 = vector.shape_cast %77 : vector<1x1x4x8xbf16> to vector<4x8xbf16>
    %cst_91 = arith.constant dense<0.000000e+00> : vector<32x8xf32>
    %79 = tpu.matmul %76, %78, %cst_91 {dimension_numbers = #tpu.dot_dimension_numbers<[1], [0], [0], [1], [0, 0, 1, 1], [], []>} : vector<32x4xbf16>, vector<4x8xbf16>, vector<32x8xf32> -> vector<32x8xf32>
    %80 = arith.addf %75, %79 : vector<32x8xf32>
    %c288 = arith.constant 288 : index
    %c0_92 = arith.constant 0 : index
    %81 = vector.load %arg1[%c288, %c0_92] : memref<352x4xbf16, #tpu.memory_space<vmem>>, vector<32x4xbf16>
    %c1_93 = arith.constant 1 : index
    %c1_94 = arith.constant 1 : index
    %c0_95 = arith.constant 0 : index
    %c0_96 = arith.constant 0 : index
    %82 = vector.load %arg3[%c1_93, %c1_94, %c0_95, %c0_96] : memref<3x3x4x8xbf16, #tpu.memory_space<vmem>>, vector<1x1x4x8xbf16>
    %83 = vector.shape_cast %82 : vector<1x1x4x8xbf16> to vector<4x8xbf16>
    %cst_97 = arith.constant dense<0.000000e+00> : vector<32x8xf32>
    %84 = tpu.matmul %81, %83, %cst_97 {dimension_numbers = #tpu.dot_dimension_numbers<[1], [0], [0], [1], [0, 0, 1, 1], [], []>} : vector<32x4xbf16>, vector<4x8xbf16>, vector<32x8xf32> -> vector<32x8xf32>
    %85 = arith.addf %80, %84 : vector<32x8xf32>
    %c289 = arith.constant 289 : index
    %c0_98 = arith.constant 0 : index
    %86 = vector.load %arg1[%c289, %c0_98] : memref<352x4xbf16, #tpu.memory_space<vmem>>, vector<32x4xbf16>
    %c1_99 = arith.constant 1 : index
    %c2_100 = arith.constant 2 : index
    %c0_101 = arith.constant 0 : index
    %c0_102 = arith.constant 0 : index
    %87 = vector.load %arg3[%c1_99, %c2_100, %c0_101, %c0_102] : memref<3x3x4x8xbf16, #tpu.memory_space<vmem>>, vector<1x1x4x8xbf16>
    %88 = vector.shape_cast %87 : vector<1x1x4x8xbf16> to vector<4x8xbf16>
    %cst_103 = arith.constant dense<0.000000e+00> : vector<32x8xf32>
    %89 = tpu.matmul %86, %88, %cst_103 {dimension_numbers = #tpu.dot_dimension_numbers<[1], [0], [0], [1], [0, 0, 1, 1], [], []>} : vector<32x4xbf16>, vector<4x8xbf16>, vector<32x8xf32> -> vector<32x8xf32>
    %90 = arith.addf %85, %89 : vector<32x8xf32>
    %c305 = arith.constant 305 : index
    %c0_104 = arith.constant 0 : index
    %91 = vector.load %arg1[%c305, %c0_104] : memref<352x4xbf16, #tpu.memory_space<vmem>>, vector<32x4xbf16>
    %c2_105 = arith.constant 2 : index
    %c0_106 = arith.constant 0 : index
    %c0_107 = arith.constant 0 : index
    %c0_108 = arith.constant 0 : index
    %92 = vector.load %arg3[%c2_105, %c0_106, %c0_107, %c0_108] : memref<3x3x4x8xbf16, #tpu.memory_space<vmem>>, vector<1x1x4x8xbf16>
    %93 = vector.shape_cast %92 : vector<1x1x4x8xbf16> to vector<4x8xbf16>
    %cst_109 = arith.constant dense<0.000000e+00> : vector<32x8xf32>
    %94 = tpu.matmul %91, %93, %cst_109 {dimension_numbers = #tpu.dot_dimension_numbers<[1], [0], [0], [1], [0, 0, 1, 1], [], []>} : vector<32x4xbf16>, vector<4x8xbf16>, vector<32x8xf32> -> vector<32x8xf32>
    %95 = arith.addf %90, %94 : vector<32x8xf32>
    %c306 = arith.constant 306 : index
    %c0_110 = arith.constant 0 : index
    %96 = vector.load %arg1[%c306, %c0_110] : memref<352x4xbf16, #tpu.memory_space<vmem>>, vector<32x4xbf16>
    %c2_111 = arith.constant 2 : index
    %c1_112 = arith.constant 1 : index
    %c0_113 = arith.constant 0 : index
    %c0_114 = arith.constant 0 : index
    %97 = vector.load %arg3[%c2_111, %c1_112, %c0_113, %c0_114] : memref<3x3x4x8xbf16, #tpu.memory_space<vmem>>, vector<1x1x4x8xbf16>
    %98 = vector.shape_cast %97 : vector<1x1x4x8xbf16> to vector<4x8xbf16>
    %cst_115 = arith.constant dense<0.000000e+00> : vector<32x8xf32>
    %99 = tpu.matmul %96, %98, %cst_115 {dimension_numbers = #tpu.dot_dimension_numbers<[1], [0], [0], [1], [0, 0, 1, 1], [], []>} : vector<32x4xbf16>, vector<4x8xbf16>, vector<32x8xf32> -> vector<32x8xf32>
    %100 = arith.addf %95, %99 : vector<32x8xf32>
    %c307 = arith.constant 307 : index
    %c0_116 = arith.constant 0 : index
    %101 = vector.load %arg1[%c307, %c0_116] : memref<352x4xbf16, #tpu.memory_space<vmem>>, vector<32x4xbf16>
    %c2_117 = arith.constant 2 : index
    %c2_118 = arith.constant 2 : index
    %c0_119 = arith.constant 0 : index
    %c0_120 = arith.constant 0 : index
    %102 = vector.load %arg3[%c2_117, %c2_118, %c0_119, %c0_120] : memref<3x3x4x8xbf16, #tpu.memory_space<vmem>>, vector<1x1x4x8xbf16>
    %103 = vector.shape_cast %102 : vector<1x1x4x8xbf16> to vector<4x8xbf16>
    %cst_121 = arith.constant dense<0.000000e+00> : vector<32x8xf32>
    %104 = tpu.matmul %101, %103, %cst_121 {dimension_numbers = #tpu.dot_dimension_numbers<[1], [0], [0], [1], [0, 0, 1, 1], [], []>} : vector<32x4xbf16>, vector<4x8xbf16>, vector<32x8xf32> -> vector<32x8xf32>
    %105 = arith.addf %100, %104 : vector<32x8xf32>
    %c256 = arith.constant 256 : index
    %c0_122 = arith.constant 0 : index
    %106 = vector.load %arg2[%c256, %c0_122] : memref<288x1xf32, #tpu.memory_space<vmem>>, vector<32x1xf32>
    %107 = vector.broadcast %8 : vector<1x8xf32> to vector<32x8xf32>
    %108 = arith.addf %105, %107 : vector<32x8xf32>
    %cst_123 = arith.constant 0.000000e+00 : f32
    %109 = vector.broadcast %cst_123 : f32 to vector<32x8xf32>
    %110 = arith.maximumf %108, %109 : vector<32x8xf32>
    %111 = vector.broadcast %106 : vector<32x1xf32> to vector<32x8xf32>
    %112 = arith.mulf %110, %111 : vector<32x8xf32>
    %113 = arith.truncf %112 : vector<32x8xf32> to vector<32x8xbf16>
    %c288_124 = arith.constant 288 : index
    %c0_125 = arith.constant 0 : index
    %114 = vector.load %arg12[%c288_124, %c0_125] : memref<352x8xbf16, #tpu.memory_space<vmem>>, vector<32x8xbf16>
    tpu.vector_store %arg12[%c288_124, %c0_125], %113 {strides = array<i32>} : memref<352x8xbf16, #tpu.memory_space<vmem>>, vector<32x8xbf16>,
    %c0_126 = arith.constant 0 : index
    %c0_127 = arith.constant 0 : index
    %115 = vector.load %arg6[%c0_126, %c0_127] : memref<1x8xf32, #tpu.memory_space<vmem>>, vector<1x8xf32>
    %c13_128 = arith.constant 13 : index
    %c0_129 = arith.constant 0 : index
    %116 = vector.load %arg12[%c13_128, %c0_129] : memref<352x8xbf16, #tpu.memory_space<vmem>>, vector<256x8xbf16>
    %c0_130 = arith.constant 0 : index
    %c0_131 = arith.constant 0 : index
    %c0_132 = arith.constant 0 : index
    %c0_133 = arith.constant 0 : index
    %117 = vector.load %arg5[%c0_130, %c0_131, %c0_132, %c0_133] : memref<3x3x8x8xbf16, #tpu.memory_space<vmem>>, vector<1x1x8x8xbf16>
    %118 = vector.shape_cast %117 : vector<1x1x8x8xbf16> to vector<8x8xbf16>
    %cst_134 = arith.constant dense<0.000000e+00> : vector<256x8xf32>
    %119 = tpu.matmul %116, %118, %cst_134 {dimension_numbers = #tpu.dot_dimension_numbers<[1], [0], [0], [1], [0, 0, 1, 1], [], []>} : vector<256x8xbf16>, vector<8x8xbf16>, vector<256x8xf32> -> vector<256x8xf32>
    %c14_135 = arith.constant 14 : index
    %c0_136 = arith.constant 0 : index
    %120 = vector.load %arg12[%c14_135, %c0_136] : memref<352x8xbf16, #tpu.memory_space<vmem>>, vector<256x8xbf16>
    %c0_137 = arith.constant 0 : index
    %c1_138 = arith.constant 1 : index
    %c0_139 = arith.constant 0 : index
    %c0_140 = arith.constant 0 : index
    %121 = vector.load %arg5[%c0_137, %c1_138, %c0_139, %c0_140] : memref<3x3x8x8xbf16, #tpu.memory_space<vmem>>, vector<1x1x8x8xbf16>
    %122 = vector.shape_cast %121 : vector<1x1x8x8xbf16> to vector<8x8xbf16>
    %cst_141 = arith.constant dense<0.000000e+00> : vector<256x8xf32>
    %123 = tpu.matmul %120, %122, %cst_141 {dimension_numbers = #tpu.dot_dimension_numbers<[1], [0], [0], [1], [0, 0, 1, 1], [], []>} : vector<256x8xbf16>, vector<8x8xbf16>, vector<256x8xf32> -> vector<256x8xf32>
    %124 = arith.addf %119, %123 : vector<256x8xf32>
    %c15_142 = arith.constant 15 : index
    %c0_143 = arith.constant 0 : index
    %125 = vector.load %arg12[%c15_142, %c0_143] : memref<352x8xbf16, #tpu.memory_space<vmem>>, vector<256x8xbf16>
    %c0_144 = arith.constant 0 : index
    %c2_145 = arith.constant 2 : index
    %c0_146 = arith.constant 0 : index
    %c0_147 = arith.constant 0 : index
    %126 = vector.load %arg5[%c0_144, %c2_145, %c0_146, %c0_147] : memref<3x3x8x8xbf16, #tpu.memory_space<vmem>>, vector<1x1x8x8xbf16>
    %127 = vector.shape_cast %126 : vector<1x1x8x8xbf16> to vector<8x8xbf16>
    %cst_148 = arith.constant dense<0.000000e+00> : vector<256x8xf32>
    %128 = tpu.matmul %125, %127, %cst_148 {dimension_numbers = #tpu.dot_dimension_numbers<[1], [0], [0], [1], [0, 0, 1, 1], [], []>} : vector<256x8xbf16>, vector<8x8xbf16>, vector<256x8xf32> -> vector<256x8xf32>
    %129 = arith.addf %124, %128 : vector<256x8xf32>
    %c31_149 = arith.constant 31 : index
    %c0_150 = arith.constant 0 : index
    %130 = vector.load %arg12[%c31_149, %c0_150] : memref<352x8xbf16, #tpu.memory_space<vmem>>, vector<256x8xbf16>
    %c1_151 = arith.constant 1 : index
    %c0_152 = arith.constant 0 : index
    %c0_153 = arith.constant 0 : index
    %c0_154 = arith.constant 0 : index
    %131 = vector.load %arg5[%c1_151, %c0_152, %c0_153, %c0_154] : memref<3x3x8x8xbf16, #tpu.memory_space<vmem>>, vector<1x1x8x8xbf16>
    %132 = vector.shape_cast %131 : vector<1x1x8x8xbf16> to vector<8x8xbf16>
    %cst_155 = arith.constant dense<0.000000e+00> : vector<256x8xf32>
    %133 = tpu.matmul %130, %132, %cst_155 {dimension_numbers = #tpu.dot_dimension_numbers<[1], [0], [0], [1], [0, 0, 1, 1], [], []>} : vector<256x8xbf16>, vector<8x8xbf16>, vector<256x8xf32> -> vector<256x8xf32>
    %134 = arith.addf %129, %133 : vector<256x8xf32>
    %c32_156 = arith.constant 32 : index
    %c0_157 = arith.constant 0 : index
    %135 = vector.load %arg12[%c32_156, %c0_157] : memref<352x8xbf16, #tpu.memory_space<vmem>>, vector<256x8xbf16>
    %c1_158 = arith.constant 1 : index
    %c1_159 = arith.constant 1 : index
    %c0_160 = arith.constant 0 : index
    %c0_161 = arith.constant 0 : index
    %136 = vector.load %arg5[%c1_158, %c1_159, %c0_160, %c0_161] : memref<3x3x8x8xbf16, #tpu.memory_space<vmem>>, vector<1x1x8x8xbf16>
    %137 = vector.shape_cast %136 : vector<1x1x8x8xbf16> to vector<8x8xbf16>
    %cst_162 = arith.constant dense<0.000000e+00> : vector<256x8xf32>
    %138 = tpu.matmul %135, %137, %cst_162 {dimension_numbers = #tpu.dot_dimension_numbers<[1], [0], [0], [1], [0, 0, 1, 1], [], []>} : vector<256x8xbf16>, vector<8x8xbf16>, vector<256x8xf32> -> vector<256x8xf32>
    %139 = arith.addf %134, %138 : vector<256x8xf32>
    %c33_163 = arith.constant 33 : index
    %c0_164 = arith.constant 0 : index
    %140 = vector.load %arg12[%c33_163, %c0_164] : memref<352x8xbf16, #tpu.memory_space<vmem>>, vector<256x8xbf16>
    %c1_165 = arith.constant 1 : index
    %c2_166 = arith.constant 2 : index
    %c0_167 = arith.constant 0 : index
    %c0_168 = arith.constant 0 : index
    %141 = vector.load %arg5[%c1_165, %c2_166, %c0_167, %c0_168] : memref<3x3x8x8xbf16, #tpu.memory_space<vmem>>, vector<1x1x8x8xbf16>
    %142 = vector.shape_cast %141 : vector<1x1x8x8xbf16> to vector<8x8xbf16>
    %cst_169 = arith.constant dense<0.000000e+00> : vector<256x8xf32>
    %143 = tpu.matmul %140, %142, %cst_169 {dimension_numbers = #tpu.dot_dimension_numbers<[1], [0], [0], [1], [0, 0, 1, 1], [], []>} : vector<256x8xbf16>, vector<8x8xbf16>, vector<256x8xf32> -> vector<256x8xf32>
    %144 = arith.addf %139, %143 : vector<256x8xf32>
    %c49_170 = arith.constant 49 : index
    %c0_171 = arith.constant 0 : index
    %145 = vector.load %arg12[%c49_170, %c0_171] : memref<352x8xbf16, #tpu.memory_space<vmem>>, vector<256x8xbf16>
    %c2_172 = arith.constant 2 : index
    %c0_173 = arith.constant 0 : index
    %c0_174 = arith.constant 0 : index
    %c0_175 = arith.constant 0 : index
    %146 = vector.load %arg5[%c2_172, %c0_173, %c0_174, %c0_175] : memref<3x3x8x8xbf16, #tpu.memory_space<vmem>>, vector<1x1x8x8xbf16>
    %147 = vector.shape_cast %146 : vector<1x1x8x8xbf16> to vector<8x8xbf16>
    %cst_176 = arith.constant dense<0.000000e+00> : vector<256x8xf32>
    %148 = tpu.matmul %145, %147, %cst_176 {dimension_numbers = #tpu.dot_dimension_numbers<[1], [0], [0], [1], [0, 0, 1, 1], [], []>} : vector<256x8xbf16>, vector<8x8xbf16>, vector<256x8xf32> -> vector<256x8xf32>
    %149 = arith.addf %144, %148 : vector<256x8xf32>
    %c50_177 = arith.constant 50 : index
    %c0_178 = arith.constant 0 : index
    %150 = vector.load %arg12[%c50_177, %c0_178] : memref<352x8xbf16, #tpu.memory_space<vmem>>, vector<256x8xbf16>
    %c2_179 = arith.constant 2 : index
    %c1_180 = arith.constant 1 : index
    %c0_181 = arith.constant 0 : index
    %c0_182 = arith.constant 0 : index
    %151 = vector.load %arg5[%c2_179, %c1_180, %c0_181, %c0_182] : memref<3x3x8x8xbf16, #tpu.memory_space<vmem>>, vector<1x1x8x8xbf16>
    %152 = vector.shape_cast %151 : vector<1x1x8x8xbf16> to vector<8x8xbf16>
    %cst_183 = arith.constant dense<0.000000e+00> : vector<256x8xf32>
    %153 = tpu.matmul %150, %152, %cst_183 {dimension_numbers = #tpu.dot_dimension_numbers<[1], [0], [0], [1], [0, 0, 1, 1], [], []>} : vector<256x8xbf16>, vector<8x8xbf16>, vector<256x8xf32> -> vector<256x8xf32>
    %154 = arith.addf %149, %153 : vector<256x8xf32>
    %c51_184 = arith.constant 51 : index
    %c0_185 = arith.constant 0 : index
    %155 = vector.load %arg12[%c51_184, %c0_185] : memref<352x8xbf16, #tpu.memory_space<vmem>>, vector<256x8xbf16>
    %c2_186 = arith.constant 2 : index
    %c2_187 = arith.constant 2 : index
    %c0_188 = arith.constant 0 : index
    %c0_189 = arith.constant 0 : index
    %156 = vector.load %arg5[%c2_186, %c2_187, %c0_188, %c0_189] : memref<3x3x8x8xbf16, #tpu.memory_space<vmem>>, vector<1x1x8x8xbf16>
    %157 = vector.shape_cast %156 : vector<1x1x8x8xbf16> to vector<8x8xbf16>
    %cst_190 = arith.constant dense<0.000000e+00> : vector<256x8xf32>
    %158 = tpu.matmul %155, %157, %cst_190 {dimension_numbers = #tpu.dot_dimension_numbers<[1], [0], [0], [1], [0, 0, 1, 1], [], []>} : vector<256x8xbf16>, vector<8x8xbf16>, vector<256x8xf32> -> vector<256x8xf32>
    %159 = arith.addf %154, %158 : vector<256x8xf32>
    %c0_191 = arith.constant 0 : index
    %c0_192 = arith.constant 0 : index
    %160 = vector.load %arg2[%c0_191, %c0_192] : memref<288x1xf32, #tpu.memory_space<vmem>>, vector<256x1xf32>
    %161 = vector.broadcast %115 : vector<1x8xf32> to vector<256x8xf32>
    %162 = arith.addf %159, %161 : vector<256x8xf32>
    %cst_193 = arith.constant 0.000000e+00 : f32
    %163 = vector.broadcast %cst_193 : f32 to vector<256x8xf32>
    %164 = arith.maximumf %162, %163 : vector<256x8xf32>
    %165 = vector.broadcast %160 : vector<256x1xf32> to vector<256x8xf32>
    %166 = arith.mulf %164, %165 : vector<256x8xf32>
    %167 = arith.truncf %166 : vector<256x8xf32> to vector<256x8xbf16>
    %c32_194 = arith.constant 32 : index
    %c0_195 = arith.constant 0 : index
    %168 = vector.load %arg13[%c32_194, %c0_195] : memref<352x8xbf16, #tpu.memory_space<vmem>>, vector<256x8xbf16>
    tpu.vector_store %arg13[%c32_194, %c0_195], %167 {strides = array<i32>} : memref<352x8xbf16, #tpu.memory_space<vmem>>, vector<256x8xbf16>,
    %c269_196 = arith.constant 269 : index
    %c0_197 = arith.constant 0 : index
    %169 = vector.load %arg12[%c269_196, %c0_197] : memref<352x8xbf16, #tpu.memory_space<vmem>>, vector<32x8xbf16>
    %c0_198 = arith.constant 0 : index
    %c0_199 = arith.constant 0 : index
    %c0_200 = arith.constant 0 : index
    %c0_201 = arith.constant 0 : index
    %170 = vector.load %arg5[%c0_198, %c0_199, %c0_200, %c0_201] : memref<3x3x8x8xbf16, #tpu.memory_space<vmem>>, vector<1x1x8x8xbf16>
    %171 = vector.shape_cast %170 : vector<1x1x8x8xbf16> to vector<8x8xbf16>
    %cst_202 = arith.constant dense<0.000000e+00> : vector<32x8xf32>
    %172 = tpu.matmul %169, %171, %cst_202 {dimension_numbers = #tpu.dot_dimension_numbers<[1], [0], [0], [1], [0, 0, 1, 1], [], []>} : vector<32x8xbf16>, vector<8x8xbf16>, vector<32x8xf32> -> vector<32x8xf32>
    %c270_203 = arith.constant 270 : index
    %c0_204 = arith.constant 0 : index
    %173 = vector.load %arg12[%c270_203, %c0_204] : memref<352x8xbf16, #tpu.memory_space<vmem>>, vector<32x8xbf16>
    %c0_205 = arith.constant 0 : index
    %c1_206 = arith.constant 1 : index
    %c0_207 = arith.constant 0 : index
    %c0_208 = arith.constant 0 : index
    %174 = vector.load %arg5[%c0_205, %c1_206, %c0_207, %c0_208] : memref<3x3x8x8xbf16, #tpu.memory_space<vmem>>, vector<1x1x8x8xbf16>
    %175 = vector.shape_cast %174 : vector<1x1x8x8xbf16> to vector<8x8xbf16>
    %cst_209 = arith.constant dense<0.000000e+00> : vector<32x8xf32>
    %176 = tpu.matmul %173, %175, %cst_209 {dimension_numbers = #tpu.dot_dimension_numbers<[1], [0], [0], [1], [0, 0, 1, 1], [], []>} : vector<32x8xbf16>, vector<8x8xbf16>, vector<32x8xf32> -> vector<32x8xf32>
    %177 = arith.addf %172, %176 : vector<32x8xf32>
    %c271_210 = arith.constant 271 : index
    %c0_211 = arith.constant 0 : index
    %178 = vector.load %arg12[%c271_210, %c0_211] : memref<352x8xbf16, #tpu.memory_space<vmem>>, vector<32x8xbf16>
    %c0_212 = arith.constant 0 : index
    %c2_213 = arith.constant 2 : index
    %c0_214 = arith.constant 0 : index
    %c0_215 = arith.constant 0 : index
    %179 = vector.load %arg5[%c0_212, %c2_213, %c0_214, %c0_215] : memref<3x3x8x8xbf16, #tpu.memory_space<vmem>>, vector<1x1x8x8xbf16>
    %180 = vector.shape_cast %179 : vector<1x1x8x8xbf16> to vector<8x8xbf16>
    %cst_216 = arith.constant dense<0.000000e+00> : vector<32x8xf32>
    %181 = tpu.matmul %178, %180, %cst_216 {dimension_numbers = #tpu.dot_dimension_numbers<[1], [0], [0], [1], [0, 0, 1, 1], [], []>} : vector<32x8xbf16>, vector<8x8xbf16>, vector<32x8xf32> -> vector<32x8xf32>
    %182 = arith.addf %177, %181 : vector<32x8xf32>
    %c287_217 = arith.constant 287 : index
    %c0_218 = arith.constant 0 : index
    %183 = vector.load %arg12[%c287_217, %c0_218] : memref<352x8xbf16, #tpu.memory_space<vmem>>, vector<32x8xbf16>
    %c1_219 = arith.constant 1 : index
    %c0_220 = arith.constant 0 : index
    %c0_221 = arith.constant 0 : index
    %c0_222 = arith.constant 0 : index
    %184 = vector.load %arg5[%c1_219, %c0_220, %c0_221, %c0_222] : memref<3x3x8x8xbf16, #tpu.memory_space<vmem>>, vector<1x1x8x8xbf16>
    %185 = vector.shape_cast %184 : vector<1x1x8x8xbf16> to vector<8x8xbf16>
    %cst_223 = arith.constant dense<0.000000e+00> : vector<32x8xf32>
    %186 = tpu.matmul %183, %185, %cst_223 {dimension_numbers = #tpu.dot_dimension_numbers<[1], [0], [0], [1], [0, 0, 1, 1], [], []>} : vector<32x8xbf16>, vector<8x8xbf16>, vector<32x8xf32> -> vector<32x8xf32>
    %187 = arith.addf %182, %186 : vector<32x8xf32>
    %c288_224 = arith.constant 288 : index
    %c0_225 = arith.constant 0 : index
    %188 = vector.load %arg12[%c288_224, %c0_225] : memref<352x8xbf16, #tpu.memory_space<vmem>>, vector<32x8xbf16>
    %c1_226 = arith.constant 1 : index
    %c1_227 = arith.constant 1 : index
    %c0_228 = arith.constant 0 : index
    %c0_229 = arith.constant 0 : index
    %189 = vector.load %arg5[%c1_226, %c1_227, %c0_228, %c0_229] : memref<3x3x8x8xbf16, #tpu.memory_space<vmem>>, vector<1x1x8x8xbf16>
    %190 = vector.shape_cast %189 : vector<1x1x8x8xbf16> to vector<8x8xbf16>
    %cst_230 = arith.constant dense<0.000000e+00> : vector<32x8xf32>
    %191 = tpu.matmul %188, %190, %cst_230 {dimension_numbers = #tpu.dot_dimension_numbers<[1], [0], [0], [1], [0, 0, 1, 1], [], []>} : vector<32x8xbf16>, vector<8x8xbf16>, vector<32x8xf32> -> vector<32x8xf32>
    %192 = arith.addf %187, %191 : vector<32x8xf32>
    %c289_231 = arith.constant 289 : index
    %c0_232 = arith.constant 0 : index
    %193 = vector.load %arg12[%c289_231, %c0_232] : memref<352x8xbf16, #tpu.memory_space<vmem>>, vector<32x8xbf16>
    %c1_233 = arith.constant 1 : index
    %c2_234 = arith.constant 2 : index
    %c0_235 = arith.constant 0 : index
    %c0_236 = arith.constant 0 : index
    %194 = vector.load %arg5[%c1_233, %c2_234, %c0_235, %c0_236] : memref<3x3x8x8xbf16, #tpu.memory_space<vmem>>, vector<1x1x8x8xbf16>
    %195 = vector.shape_cast %194 : vector<1x1x8x8xbf16> to vector<8x8xbf16>
    %cst_237 = arith.constant dense<0.000000e+00> : vector<32x8xf32>
    %196 = tpu.matmul %193, %195, %cst_237 {dimension_numbers = #tpu.dot_dimension_numbers<[1], [0], [0], [1], [0, 0, 1, 1], [], []>} : vector<32x8xbf16>, vector<8x8xbf16>, vector<32x8xf32> -> vector<32x8xf32>
    %197 = arith.addf %192, %196 : vector<32x8xf32>
    %c305_238 = arith.constant 305 : index
    %c0_239 = arith.constant 0 : index
    %198 = vector.load %arg12[%c305_238, %c0_239] : memref<352x8xbf16, #tpu.memory_space<vmem>>, vector<32x8xbf16>
    %c2_240 = arith.constant 2 : index
    %c0_241 = arith.constant 0 : index
    %c0_242 = arith.constant 0 : index
    %c0_243 = arith.constant 0 : index
    %199 = vector.load %arg5[%c2_240, %c0_241, %c0_242, %c0_243] : memref<3x3x8x8xbf16, #tpu.memory_space<vmem>>, vector<1x1x8x8xbf16>
    %200 = vector.shape_cast %199 : vector<1x1x8x8xbf16> to vector<8x8xbf16>
    %cst_244 = arith.constant dense<0.000000e+00> : vector<32x8xf32>
    %201 = tpu.matmul %198, %200, %cst_244 {dimension_numbers = #tpu.dot_dimension_numbers<[1], [0], [0], [1], [0, 0, 1, 1], [], []>} : vector<32x8xbf16>, vector<8x8xbf16>, vector<32x8xf32> -> vector<32x8xf32>
    %202 = arith.addf %197, %201 : vector<32x8xf32>
    %c306_245 = arith.constant 306 : index
    %c0_246 = arith.constant 0 : index
    %203 = vector.load %arg12[%c306_245, %c0_246] : memref<352x8xbf16, #tpu.memory_space<vmem>>, vector<32x8xbf16>
    %c2_247 = arith.constant 2 : index
    %c1_248 = arith.constant 1 : index
    %c0_249 = arith.constant 0 : index
    %c0_250 = arith.constant 0 : index
    %204 = vector.load %arg5[%c2_247, %c1_248, %c0_249, %c0_250] : memref<3x3x8x8xbf16, #tpu.memory_space<vmem>>, vector<1x1x8x8xbf16>
    %205 = vector.shape_cast %204 : vector<1x1x8x8xbf16> to vector<8x8xbf16>
    %cst_251 = arith.constant dense<0.000000e+00> : vector<32x8xf32>
    %206 = tpu.matmul %203, %205, %cst_251 {dimension_numbers = #tpu.dot_dimension_numbers<[1], [0], [0], [1], [0, 0, 1, 1], [], []>} : vector<32x8xbf16>, vector<8x8xbf16>, vector<32x8xf32> -> vector<32x8xf32>
    %207 = arith.addf %202, %206 : vector<32x8xf32>
    %c307_252 = arith.constant 307 : index
    %c0_253 = arith.constant 0 : index
    %208 = vector.load %arg12[%c307_252, %c0_253] : memref<352x8xbf16, #tpu.memory_space<vmem>>, vector<32x8xbf16>
    %c2_254 = arith.constant 2 : index
    %c2_255 = arith.constant 2 : index
    %c0_256 = arith.constant 0 : index
    %c0_257 = arith.constant 0 : index
    %209 = vector.load %arg5[%c2_254, %c2_255, %c0_256, %c0_257] : memref<3x3x8x8xbf16, #tpu.memory_space<vmem>>, vector<1x1x8x8xbf16>
    %210 = vector.shape_cast %209 : vector<1x1x8x8xbf16> to vector<8x8xbf16>
    %cst_258 = arith.constant dense<0.000000e+00> : vector<32x8xf32>
    %211 = tpu.matmul %208, %210, %cst_258 {dimension_numbers = #tpu.dot_dimension_numbers<[1], [0], [0], [1], [0, 0, 1, 1], [], []>} : vector<32x8xbf16>, vector<8x8xbf16>, vector<32x8xf32> -> vector<32x8xf32>
    %212 = arith.addf %207, %211 : vector<32x8xf32>
    %c256_259 = arith.constant 256 : index
    %c0_260 = arith.constant 0 : index
    %213 = vector.load %arg2[%c256_259, %c0_260] : memref<288x1xf32, #tpu.memory_space<vmem>>, vector<32x1xf32>
    %214 = vector.broadcast %115 : vector<1x8xf32> to vector<32x8xf32>
    %215 = arith.addf %212, %214 : vector<32x8xf32>
    %cst_261 = arith.constant 0.000000e+00 : f32
    %216 = vector.broadcast %cst_261 : f32 to vector<32x8xf32>
    %217 = arith.maximumf %215, %216 : vector<32x8xf32>
    %218 = vector.broadcast %213 : vector<32x1xf32> to vector<32x8xf32>
    %219 = arith.mulf %217, %218 : vector<32x8xf32>
    %220 = arith.truncf %219 : vector<32x8xf32> to vector<32x8xbf16>
    %c288_262 = arith.constant 288 : index
    %c0_263 = arith.constant 0 : index
    %221 = vector.load %arg13[%c288_262, %c0_263] : memref<352x8xbf16, #tpu.memory_space<vmem>>, vector<32x8xbf16>
    tpu.vector_store %arg13[%c288_262, %c0_263], %220 {strides = array<i32>} : memref<352x8xbf16, #tpu.memory_space<vmem>>, vector<32x8xbf16>,
    %c0_264 = arith.constant 0 : index
    %c0_265 = arith.constant 0 : index
    %222 = vector.load %arg8[%c0_264, %c0_265] : memref<1x32xf32, #tpu.memory_space<vmem>>, vector<1x32xf32>
    %c0_266 = arith.constant 0 : index
    %c0_267 = arith.constant 0 : index
    %223 = vector.load %arg10[%c0_266, %c0_267] : memref<1x12xf32, #tpu.memory_space<vmem>>, vector<1x12xf32>
    %c13_268 = arith.constant 13 : index
    %c0_269 = arith.constant 0 : index
    %224 = vector.load %arg13[%c13_268, %c0_269] : memref<352x8xbf16, #tpu.memory_space<vmem>>, vector<256x8xbf16>
    %c0_270 = arith.constant 0 : index
    %c0_271 = arith.constant 0 : index
    %225 = vector.load %arg7[%c0_270, %c0_271] : memref<8x32xbf16, #tpu.memory_space<vmem>>, vector<8x32xbf16>
    %cst_272 = arith.constant dense<0.000000e+00> : vector<256x32xf32>
    %226 = tpu.matmul %224, %225, %cst_272 {dimension_numbers = #tpu.dot_dimension_numbers<[1], [0], [0], [1], [0, 0, 1, 1], [], []>} : vector<256x8xbf16>, vector<8x32xbf16>, vector<256x32xf32> -> vector<256x32xf32>
    %227 = vector.broadcast %222 : vector<1x32xf32> to vector<256x32xf32>
    %228 = arith.addf %226, %227 : vector<256x32xf32>
    %cst_273 = arith.constant 0.000000e+00 : f32
    %229 = vector.broadcast %cst_273 : f32 to vector<256x32xf32>
    %230 = arith.maximumf %228, %229 : vector<256x32xf32>
    %231 = arith.truncf %230 : vector<256x32xf32> to vector<256x32xbf16>
    %c0_274 = arith.constant 0 : index
    %c0_275 = arith.constant 0 : index
    %232 = vector.load %arg9[%c0_274, %c0_275] : memref<32x12xbf16, #tpu.memory_space<vmem>>, vector<32x12xbf16>
    %cst_276 = arith.constant dense<0.000000e+00> : vector<256x12xf32>
    %233 = tpu.matmul %231, %232, %cst_276 {dimension_numbers = #tpu.dot_dimension_numbers<[1], [0], [0], [1], [0, 0, 1, 1], [], []>} : vector<256x32xbf16>, vector<32x12xbf16>, vector<256x12xf32> -> vector<256x12xf32>
    %234 = vector.broadcast %223 : vector<1x12xf32> to vector<256x12xf32>
    %235 = arith.addf %233, %234 : vector<256x12xf32>
    %c0_277 = arith.constant 0 : index
    %c0_278 = arith.constant 0 : index
    %c0_279 = arith.constant 0 : index
    %236 = vector.load %arg11[%c0_277, %c0_278, %c0_279] : memref<1x324x12xf32, #tpu.memory_space<vmem>>, vector<1x256x12xf32>
    %237 = vector.shape_cast %236 : vector<1x256x12xf32> to vector<256x12xf32>
    %238 = vector.shape_cast %235 : vector<256x12xf32> to vector<1x256x12xf32>
    tpu.vector_store %arg11[%c0_277, %c0_278, %c0_279], %238 {strides = array<i32>} : memref<1x324x12xf32, #tpu.memory_space<vmem>>, vector<1x256x12xf32>,
    %c269_280 = arith.constant 269 : index
    %c0_281 = arith.constant 0 : index
    %239 = vector.load %arg13[%c269_280, %c0_281] : memref<352x8xbf16, #tpu.memory_space<vmem>>, vector<68x8xbf16>
    %c0_282 = arith.constant 0 : index
    %c0_283 = arith.constant 0 : index
    %240 = vector.load %arg7[%c0_282, %c0_283] : memref<8x32xbf16, #tpu.memory_space<vmem>>, vector<8x32xbf16>
    %cst_284 = arith.constant dense<0.000000e+00> : vector<68x32xf32>
    %241 = tpu.matmul %239, %240, %cst_284 {dimension_numbers = #tpu.dot_dimension_numbers<[1], [0], [0], [1], [0, 0, 1, 1], [], []>} : vector<68x8xbf16>, vector<8x32xbf16>, vector<68x32xf32> -> vector<68x32xf32>
    %242 = vector.broadcast %222 : vector<1x32xf32> to vector<68x32xf32>
    %243 = arith.addf %241, %242 : vector<68x32xf32>
    %cst_285 = arith.constant 0.000000e+00 : f32
    %244 = vector.broadcast %cst_285 : f32 to vector<68x32xf32>
    %245 = arith.maximumf %243, %244 : vector<68x32xf32>
    %246 = arith.truncf %245 : vector<68x32xf32> to vector<68x32xbf16>
    %c0_286 = arith.constant 0 : index
    %c0_287 = arith.constant 0 : index
    %247 = vector.load %arg9[%c0_286, %c0_287] : memref<32x12xbf16, #tpu.memory_space<vmem>>, vector<32x12xbf16>
    %cst_288 = arith.constant dense<0.000000e+00> : vector<68x12xf32>
    %248 = tpu.matmul %246, %247, %cst_288 {dimension_numbers = #tpu.dot_dimension_numbers<[1], [0], [0], [1], [0, 0, 1, 1], [], []>} : vector<68x32xbf16>, vector<32x12xbf16>, vector<68x12xf32> -> vector<68x12xf32>
    %249 = vector.broadcast %223 : vector<1x12xf32> to vector<68x12xf32>
    %250 = arith.addf %248, %249 : vector<68x12xf32>
    %c0_289 = arith.constant 0 : index
    %c256_290 = arith.constant 256 : index
    %c0_291 = arith.constant 0 : index
    %251 = vector.load %arg11[%c0_289, %c256_290, %c0_291] : memref<1x324x12xf32, #tpu.memory_space<vmem>>, vector<1x68x12xf32>
    %252 = vector.shape_cast %251 : vector<1x68x12xf32> to vector<68x12xf32>
    %253 = vector.shape_cast %250 : vector<68x12xf32> to vector<1x68x12xf32>
    tpu.vector_store %arg11[%c0_289, %c256_290, %c0_291], %253 {strides = array<i32>} : memref<1x324x12xf32, #tpu.memory_space<vmem>>, vector<1x68x12xf32>,
    return
  }
  func.func @transform_0(%arg0: i32) -> (i32, i32) {
    %c0_i32 = arith.constant 0 : i32
    %c0_i32_0 = arith.constant 0 : i32
    return %arg0, %c0_i32 : i32, i32
  }
  func.func @transform_1(%arg0: i32) -> (i32, i32) {
    %c0_i32 = arith.constant 0 : i32
    %c0_i32_0 = arith.constant 0 : i32
    %c0_i32_1 = arith.constant 0 : i32
    return %c0_i32, %c0_i32_0 : i32, i32
  }
  func.func @transform_2(%arg0: i32) -> (i32, i32, i32, i32) {
    %c0_i32 = arith.constant 0 : i32
    %c0_i32_0 = arith.constant 0 : i32
    %c0_i32_1 = arith.constant 0 : i32
    %c0_i32_2 = arith.constant 0 : i32
    %c0_i32_3 = arith.constant 0 : i32
    return %c0_i32, %c0_i32_0, %c0_i32_1, %c0_i32_2 : i32, i32, i32, i32
  }
  func.func @transform_3(%arg0: i32) -> (i32, i32) {
    %c0_i32 = arith.constant 0 : i32
    %c0_i32_0 = arith.constant 0 : i32
    %c0_i32_1 = arith.constant 0 : i32
    return %c0_i32, %c0_i32_0 : i32, i32
  }
  func.func @transform_4(%arg0: i32) -> (i32, i32, i32, i32) {
    %c0_i32 = arith.constant 0 : i32
    %c0_i32_0 = arith.constant 0 : i32
    %c0_i32_1 = arith.constant 0 : i32
    %c0_i32_2 = arith.constant 0 : i32
    %c0_i32_3 = arith.constant 0 : i32
    return %c0_i32, %c0_i32_0, %c0_i32_1, %c0_i32_2 : i32, i32, i32, i32
  }
  func.func @transform_5(%arg0: i32) -> (i32, i32) {
    %c0_i32 = arith.constant 0 : i32
    %c0_i32_0 = arith.constant 0 : i32
    %c0_i32_1 = arith.constant 0 : i32
    return %c0_i32, %c0_i32_0 : i32, i32
  }
  func.func @transform_6(%arg0: i32) -> (i32, i32) {
    %c0_i32 = arith.constant 0 : i32
    %c0_i32_0 = arith.constant 0 : i32
    %c0_i32_1 = arith.constant 0 : i32
    return %c0_i32, %c0_i32_0 : i32, i32
  }
  func.func @transform_7(%arg0: i32) -> (i32, i32) {
    %c0_i32 = arith.constant 0 : i32
    %c0_i32_0 = arith.constant 0 : i32
    %c0_i32_1 = arith.constant 0 : i32
    return %c0_i32, %c0_i32_0 : i32, i32
  }
  func.func @transform_8(%arg0: i32) -> (i32, i32) {
    %c0_i32 = arith.constant 0 : i32
    %c0_i32_0 = arith.constant 0 : i32
    %c0_i32_1 = arith.constant 0 : i32
    return %c0_i32, %c0_i32_0 : i32, i32
  }
  func.func @transform_9(%arg0: i32) -> (i32, i32) {
    %c0_i32 = arith.constant 0 : i32
    %c0_i32_0 = arith.constant 0 : i32
    %c0_i32_1 = arith.constant 0 : i32
    return %c0_i32, %c0_i32_0 : i32, i32
  }
  func.func @transform_10(%arg0: i32) -> (i32, i32, i32) {
    %c0_i32 = arith.constant 0 : i32
    %c0_i32_0 = arith.constant 0 : i32
    %c0_i32_1 = arith.constant 0 : i32
    return %arg0, %c0_i32, %c0_i32_0 : i32, i32, i32
  }
}

</mosaic_0001>

<bundles_post_ra>
// kernel: mask_head_forward.1
= control target key start
LH: loop header
LB: loop body
LE: loop exit
PB: predicated region body
PF: predicated region fallthrough
CT: control target
= control target key end

     0   :  { %15 = vsyncpa [#allocation5], 0  ;;  %s15033_s0 = inlined_call_operand.vmem [shape: bf16[704,4], index: 0, kind: input, shape index: {}]   ;;  %s15034_s1 = inlined_call_operand.vmem [shape: f32[288,1], index: 1, kind: input, shape index: {}]   ;;  %s15035_s2 = inlined_call_operand.vmem [shape: bf16[3,3,4,8], index: 2, kind: input, shape index: {}]   ;;  %s15036_s3 = inlined_call_operand.hbm [shape: f32[1,8], index: 3, kind: input, shape index: {}]   ;;  %s15037_s4 = inlined_call_operand.vmem [shape: bf16[3,3,8,8], index: 4, kind: input, shape index: {}]   ;;  %s15038_s5 = inlined_call_operand.hbm [shape: f32[1,8], index: 5, kind: input, shape index: {}]   ;;  %s15039_s6 = inlined_call_operand.vmem [shape: bf16[8,32], index: 6, kind: input, shape index: {}]   ;;  %s15040_s7 = inlined_call_operand.vmem [shape: f32[1,32], index: 7, kind: input, shape index: {}]   ;;  %s15041_s8 = inlined_call_operand.vmem [shape: bf16[32,12], index: 8, kind: input, shape index: {}]   ;;  %s15042_s9 = inlined_call_operand.vmem [shape: f32[1,12], index: 9, kind: input, shape index: {}]   ;;  %s15043_s10 = inlined_call_operand.vmem [shape: f32[2,324,12], index: 10, kind: output, shape index: {}]  }
   0x1   :  { %16 = vsyncpa [#allocation7], 0  ;;  %s10455_s13 = smov 0  }
   0x2 LB: > { %s286_s16 = sshll.u32 %s15036_s3, 4  ;;  %s10464_s17 = sadd.s32 4294967295, %s10395_s13   ;;  %s10395_s13 = sphi %s10455_s13, %s22_s13   ;;  %s287_s16 = int_to_ptr.hbm [resolvable:$true] %s286_s16 }
   0x3   : > { %p8786_p0 = scmp.ge.s32.totalorder %s10395_s13, 1  ;;  %p268_p1 = scmp.lt.s32.totalorder %s10395_s13, 3 }
   0x4   : > { %p10294_p2 = scmp.eq.s32.totalorder %s10464_s17, 0  ;;  %s10397_s19 = smov [#allocation4]  }
   0x5   : > { %p10469_p3 = pnand %p8786_p0, %p268_p1  ;;  %s288_s20 = sshll.u32 %s10397_s19, 4  ;;  %s289_s20 = int_to_ptr.vmem [resolvable:$true] %s288_s20 }
   0x6   : > { %s301_s23 = sshll.u32 %s15038_s5, 4  ;;  %s10398_s24 = smov [#allocation6]   ;;  %s302_s23 = int_to_ptr.hbm [resolvable:$true] %s301_s23 }
   0x7   : > { %p10287_p4 = pneg %p10469_p3  ;;  %s303_s25 = sshll.u32 %s10398_s24, 4  ;;  %s304_s25 = int_to_ptr.vmem [resolvable:$true] %s303_s25 }
   0x8   : > { %337 = sbr.rel (%p10469_p3) target bundleno = 1993 (0x7c9), region = 60 }
   0x9   : > { %p10288_p5 = pnand %p10294_p2, %p10287_p4 }
   0xb   : > { %10290 = dma.hbm_to_vmem [thread:$0]  (!%p10288_p5), %s287_s16, 16, %s289_s20, [#allocation5]  }
   0xc   : > { %10293 = dma.hbm_to_vmem [thread:$0]  (!%p10288_p5), %s302_s23, 16, %s304_s25, [#allocation7]  }
   0xd   : > { %10386 = dma.done.wait (%p10294_p2), [#allocation5], 16  }
   0xe   : > { %10388 = vsyncadd (%p10294_p2), [#allocation5], 4294967280 }
   0xf   : > { %10390 = dma.done.wait (%p10294_p2), [#allocation7], 16  }
  0x10   : > { %10392 = vsyncadd (%p10294_p2), [#allocation7], 4294967280  ;;  %s381_s26 = smul.u32 44, %s10464_s17  ;;  %vm614_vm0 = vcmask 1041408   ;;  %v8795_v0 = vld [vmem:[%s15035_s2 + $0x2] sm:$0x3] }
  0x11   : > { %v444_v1 = vld [vmem:[%s15035_s2] sm:$0x3]  ;;  %v8888_v2 = vld [vmem:[%s15035_s2 + $0x4] sm:$0x3]  ;;  %v616_v3 = vsel %vm614_vm0, %v8795_v0, 0  ;;  %vm531_vm1 = vcmask 1044480  }
  0x12   : > { %p382_p6 = scmp.lt.s32.totalorder %s381_s26, 87  ;;  %v912_v6 = vsel %vm614_vm0, %v444_v1, 0  ;;  %10208 = vmatpush.bf16.msra.mxu1 %v616_v3  ;;  %625 = vmatpush.bf16.msra.mxu0 %v616_v3  ;;  %v1136_v11 = vsel %vm614_vm0, %v8888_v2, 0  ;;  %vm565_vm2 = vcmask 31744   ;;  %v8905_v20 = vld [vmem:[%s15035_s2 + $0x6] sm:$0x3] }
  0x13   : > { %1145 = vmatpush.bf16.msra.mxu2 %v1136_v11  ;;  %v1578_v29 = vsel %vm614_vm0, %v8905_v20, 0  ;;  %vm1009_vm3 = vsmask.f32 4352  ;;  %vm710_vm4 = vsmask.f32 5376  ;;  %vm2742_vm5 = vcmask 1046528  }
  0x14   : > { %s15815_s26 = smov (!%p382_p6, %s381_s26), 87  ;;  %10209 = vmatpush.bf16.msra.mxu3 %v1578_v29  ;;  %vm2009_vm6 = vsmask.f32 7424  ;;  %vm393_vm7 = vcmask 60416   ;;  %vm2954_vm8 = vsmask.f32 6400 }
  0x15   : > { %s8793_s27 = sshll.u32 %s15815_s26, 2  ;;  %vm4329_vm9 = vcmask 1043456   ;;  %vm4280_vm10 = vcmask 64512   ;;  %vm8317_vm11 = vcmask 261120   ;;  %p387_p7 = scmp.lt.s32.totalorder %s10464_s17, 1  ;;  %vm8455_vm12 = vcmask 97280  }
  0x16   : > { %s10497_s12 = scalar_lea.vmem %s15033_s0, %s8793_s27  ;;  %921 = vmatpush.bf16.msrb.mxu1 %v912_v6  ;;  %vm8705_vm13 = vcmask 93184  }
  0x17   : > { %v10507_v4 = vld [vmem:[%s10497_s12 + $0x64] sm:$0xff]  ;;  %v10510_v5 = vld [vmem:[%s10497_s12 + $0x6c] sm:$0xff]  ;;  %v10215_v21 = vld [vmem:[%s10497_s12 + $0x1c] sm:$0xff]   ;;  %s15817_s17 = smov (!%p387_p7, %s10464_s17), 1 }
  0x18   : > { %v10514_v7 = vld [vmem:[%s10497_s12 + $0x8] sm:$0xf]  ;;  %v10517_v8 = vld [vmem:[%s10497_s12 + $0xc] sm:$0xff]  ;;  %v445_v9 = vld [vmem:[%s10497_s12 + $0x4] sm:$0x8]  ;;  %v555_v12 = vrot.slane %v10507_v4, 3 }
  0x19   : > { %v482_v10 = vunpack.c.l.b16 %v10514_v7  ;;  %v557_v13 = vrot.slane %v10510_v5, 3  ;;  %v481_v14 = vunpack.c.l.b16 %v445_v9  ;;  %v720_v15 = vshrl.u32 %v10517_v8, 16  ;;  %v10217_v24 = vld [vmem:[%s10497_s12 + $0x24] sm:$0xff]   ;;  %v10546_v38 = vld [vmem:[%s10497_s12 + $0x74] sm:$0xff]  ;;  %v10219_v47 = vld [vmem:[%s10497_s12 + $0x2c] sm:$0xff]   ;;  %s10278_s21 = smul.u32 328, %s15817_s17 }
  0x1a   : > { %v723_v16 = vshll.u32 %v10517_v8, 16  ;;  %v533_v19 = vrot.slane %v10517_v8, 3  ;;  %v1395_v33 = vshrl.u32 %v10215_v21, 16  ;;  %v1398_v34 = vshll.u32 %v10215_v21, 16  ;;  %v10549_v39 = vld [vmem:[%s10497_s12 + $0x14] sm:$0xff]  ;;  %v10573_v0 = vld [vmem:[%s10497_s12 + $0x7c] sm:$0xff] }
  0x1b   : > { %v558_v17 = vsel %vm531_vm1, %v555_v12, %v557_v13  ;;  %v514_v18 = vpack.c.b16 %v482_v10, %v481_v14  ;;  %v1018_v22 = vrot.slane %v720_v15, 3  ;;  %v1404_v35 = vshrl.u32 %v10217_v24, 16  ;;  %v10576_v1 = vld [vmem:[%s10497_s12 + $0x1c] sm:$0xff]  ;;  %v10221_v3 = vld [vmem:[%s10497_s12 + $0x34] sm:$0xff]   ;;  %v443_v21 = vld [vmem:[%s10497_s12 + $0x84] sm:$0x7]  ;;  %s14859_s26 = scalar_lea.vmem %s15043_s10, %s10278_s21 }
  0x1c   : > { %8868 = vmatmul.msk.bf16.vlgmr.msra.gmra.mxu1 %vm565_vm2, %v558_v17  ;;  %v1019_v23 = vrot.slane %v723_v16, 4  ;;  %v1407_v36 = vshll.u32 %v10217_v24, 16  ;;  %v1397_v40 = vrot.slane %v1395_v33, 3  ;;  %v1400_v41 = vrot.slane %v1398_v34, 4 }
  0x1d   : > { %v532_v25 = vrot.slane %v514_v18, 3  ;;  %v1011_v26 = vshrl.u32 %v514_v18, 16  ;;  %v1014_v27 = vshll.u32 %v514_v18, 16  ;;  %1587 = vmatpush.bf16.msra.mxu1 %v1578_v29  ;;  %v1406_v42 = vrot.slane %v1404_v35, 3  ;;  %v10223_v35 = vld [vmem:[%s10497_s12 + $0x3c] sm:$0xff]  }
  0x1e   : > { %v1020_v28 = vor.u32 %v1019_v23, %v1018_v22  ;;  %v1409_v43 = vrot.slane %v1407_v36, 4  ;;  %v10553_v45 = vor.u32 %v1400_v41, %v1397_v40  ;;  %v559_v48 = vrot.slane %v10546_v38, 3 }
  0x1f   : > { %v534_v30 = vsel %vm531_vm1, %v532_v25, %v533_v19  ;;  %v1013_v31 = vrot.slane %v1011_v26, 3  ;;  %v1016_v32 = vrot.slane %v1014_v27, 4  ;;  %v729_v49 = vshrl.u32 %v10549_v39, 16  ;;  %v10596_v27 = vld [vmem:[%s10497_s12 + $0x24] sm:$0xff] }
  0x20   : > { %8856 = vmatmul.msk.bf16.vlgmr.msra.gmra.mxu0 %vm565_vm2, %v534_v30  ;;  %v1410_v46 = vor.u32 %v1409_v43, %v1406_v42  ;;  %v732_v50 = vshll.u32 %v10549_v39, 16  ;;  %v1413_v52 = vshrl.u32 %v10219_v47, 16  ;;  %v1416_v53 = vshll.u32 %v10219_v47, 16 }
  0x21   : > { %v1017_v37 = vor.u32 %v1016_v32, %v1013_v31  ;;  %v560_v54 = vsel %vm531_vm1, %v557_v13, %v559_v48  ;;  %v535_v55 = vrot.slane %v10549_v39, 3  ;;  %v1022_v56 = vrot.slane %v729_v49, 3  ;;  %v411_v31 = vld [vmem:[%s10497_s12 + $0x4] sm:$0xc] }
  0x22   : > { %v1411_v51 = vsel %vm1009_vm3, %v10553_v45, %v1410_v46  ;;  %v1023_v57 = vrot.slane %v732_v50, 4  ;;  %v1415_v58 = vrot.slane %v1413_v52, 3  ;;  %v1418_v59 = vrot.slane %v1416_v53, 4 }
  0x23   : > { %v1021_v44 = vsel %vm1009_vm3, %v1017_v37, %v1020_v28  ;;  %8908 = vmatmul.msk.bf16.vlgmr.msra.gmra.mxu3 %vm565_vm2, %v1411_v51  ;;  %v536_v60 = vsel %vm531_vm1, %v533_v19, %v535_v55  ;;  %v561_v6 = vrot.slane %v10573_v0, 3  ;;  %v738_v9 = vshrl.u32 %v10576_v1, 16 }
  0x24   : > { %8889 = vmatmul.msk.bf16.vlgmr.msra.gmra.mxu2 %vm565_vm2, %v1021_v44  ;;  %v1024_v61 = vor.u32 %v1023_v57, %v1022_v56  ;;  %v1419_v62 = vor.u32 %v1418_v59, %v1415_v58  ;;  %v741_v11 = vshll.u32 %v10576_v1, 16  ;;  %v1422_v13 = vshrl.u32 %v10221_v3, 16 }
  0x25   : > { %v1425_v14 = vshll.u32 %v10221_v3, 16  ;;  %v562_v17 = vsel %vm531_vm1, %v559_v48, %v561_v6  ;;  %v537_v18 = vrot.slane %v10576_v1, 3  ;;  %v1026_v19 = vrot.slane %v738_v9, 3 }
  0x26   : > { %v1025_v63 = vsel %vm1009_vm3, %v1020_v28, %v1024_v61  ;;  %v1420_v2 = vsel %vm1009_vm3, %v1410_v46, %v1419_v62  ;;  %v1027_v20 = vrot.slane %v741_v11, 4  ;;  %v1424_v22 = vrot.slane %v1422_v13, 3 }
  0x27   : > { %v1427_v23 = vrot.slane %v1425_v14, 4  ;;  %v538_v24 = vsel %vm531_vm1, %v535_v55, %v537_v18  ;;  %v513_v26 = vunpack.c.l.b16 %v443_v21  ;;  %v747_v32 = vshrl.u32 %v10596_v27, 16 }
  0x28   : > { %v1028_v25 = vor.u32 %v1027_v20, %v1026_v19  ;;  %v750_v33 = vshll.u32 %v10596_v27, 16  ;;  %v708_v37 = vunpack.c.l.b16 %v411_v31  ;;  %v1431_v42 = vshrl.u32 %v10223_v35, 16  ;;  %v8922_v31 = vld [vmem:[%s15035_s2 + $0x8] sm:$0x3] }
  0x29   : > { %v1428_v28 = vor.u32 %v1427_v23, %v1424_v22  ;;  %v10599_v30 = vpack.c.b16 %v513_v26, %v513_v26  ;;  %v1030_v40 = vrot.slane %v747_v32, 3  ;;  %v1434_v43 = vshll.u32 %v10223_v35, 16  ;;  %v10649_v26 = vld [vmem:[%s10497_s12 + $0x34] sm:$0xff] }
  0x2a   : > { %v1029_v29 = vsel %vm1009_vm3, %v1024_v61, %v1028_v25  ;;  %v1031_v41 = vrot.slane %v750_v33, 4  ;;  %v539_v46 = vrot.slane %v10596_v27, 3  ;;  %v709_v47 = vpack.c.b16 %v482_v10, %v708_v37 }
  0x2b   : > { %v1429_v34 = vsel %vm1009_vm3, %v1419_v62, %v1428_v28  ;;  %v563_v36 = vrot.slane %v10599_v30, 3  ;;  %v1433_v51 = vrot.slane %v1431_v42, 3  ;;  %v1436_v52 = vrot.slane %v1434_v43, 4  ;;  %v10225_v62 = vld [vmem:[%s10497_s12 + $0x44] sm:$0xff]  }
  0x2c   : > { %8869 = vmatmul.msk.bf16.gmra.mxu1 %vm565_vm2, %v560_v54  ;;  %v1032_v48 = vor.u32 %v1031_v41, %v1030_v40  ;;  %v540_v53 = vsel %vm531_vm1, %v537_v18, %v539_v46  ;;  %v712_v54 = vshrl.u32 %v709_v47, 16  ;;  %v715_v55 = vshll.u32 %v709_v47, 16 }
  0x2d   : > { %v564_v44 = vsel %vm531_vm1, %v561_v6, %v563_v36  ;;  %v1437_v57 = vor.u32 %v1436_v52, %v1433_v51  ;;  %v722_v7 = vrot.slane %v720_v15, 2  ;;  %v725_v10 = vrot.slane %v723_v16, 3 }
  0x2e   : > { %v1033_v56 = vsel %vm1009_vm3, %v1028_v25, %v1032_v48  ;;  %v714_v58 = vrot.slane %v712_v54, 2  ;;  %v717_v59 = vrot.slane %v715_v55, 3  ;;  %v1440_v15 = vshrl.u32 %v10225_v62, 16  ;;  %v10676_v54 = vld [vmem:[%s10497_s12 + $0x3c] sm:$0xff] }
  0x2f   : > { %v1438_v61 = vsel %vm1009_vm3, %v1428_v28, %v1437_v57  ;;  %v1443_v8 = vshll.u32 %v10225_v62, 16  ;;  %v734_v25 = vrot.slane %v732_v50, 3  ;;  %v765_v35 = vshrl.u32 %v10649_v26, 16 }
  0x30   : > { %8857 = vmatmul.msk.bf16.gmra.mxu0 %vm565_vm2, %v536_v60  ;;  %v10626_v60 = vld [vmem:[%s10497_s12 + $0x2c] sm:$0xff]  ;;  %v1442_v18 = vrot.slane %v1440_v15, 3  ;;  %v768_v36 = vshll.u32 %v10649_v26, 16  ;;  %v543_v40 = vrot.slane %v10649_v26, 3  ;;  %v740_v52 = vrot.slane %v738_v9, 2 }
  0x31   : > { %v756_v3 = vshrl.u32 %v10626_v60, 16  ;;  %v759_v6 = vshll.u32 %v10626_v60, 16  ;;  %v541_v13 = vrot.slane %v10626_v60, 3  ;;  %v1445_v19 = vrot.slane %v1443_v8, 4 }
  0x32   : > { %v1038_v41 = vrot.slane %v765_v35, 3  ;;  %v1039_v42 = vrot.slane %v768_v36, 4 }
  0x33   : > { %8909 = vmatmul.msk.bf16.gmra.mxu3 %vm565_vm2, %v1420_v2  ;;  %v726_v2 = vor.u32 %v725_v10, %v722_v7  ;;  %v1034_v14 = vrot.slane %v756_v3, 3  ;;  %v542_v20 = vsel %vm531_vm1, %v539_v46, %v541_v13  ;;  %v1446_v22 = vor.u32 %v1445_v19, %v1442_v18  ;;  %v10231_v19 = vld [vmem:[%s10497_s12 + $0x5c] sm:$0xff]  }
  0x34   : > { %8890 = vmatmul.msk.bf16.gmra.mxu2 %vm565_vm2, %v1025_v63  ;;  %v718_v63 = vor.u32 %v717_v59, %v714_v58  ;;  %v544_v46 = vsel %vm531_vm1, %v541_v13, %v543_v40  ;;  %v1040_v47 = vor.u32 %v1039_v42, %v1038_v41  ;;  %v774_v58 = vshrl.u32 %v10676_v54, 16  ;;  %v10233_v42 = vld [vmem:[%s10497_s12 + $0x64] sm:$0xff]  }
  0x35   : > { %v1447_v28 = vsel %vm1009_vm3, %v1437_v57, %v1446_v22  ;;  %v777_v59 = vshll.u32 %v10676_v54, 16  ;;  %v749_v13 = vrot.slane %v747_v32, 2  ;;  %v1470_v32 = vshll.u32 %v10231_v19, 16 }
  0x36   : > { %v727_v16 = vsel %vm710_vm4, %v718_v63, %v726_v2  ;;  %v1042_v10 = vrot.slane %v774_v58, 3 }
  0x3c   : > { %8870 = vmatmul.msk.bf16.gmra.mxu1 %vm565_vm2, %v562_v17  ;;  %v1035_v17 = vrot.slane %v759_v6, 4 }
  0x3e   : > { %v1036_v21 = vor.u32 %v1035_v17, %v1034_v14  ;;  %v752_v14 = vrot.slane %v750_v33, 3  ;;  %v10699_v17 = vld [vmem:[%s10497_s12 + $0x44] sm:$0xff] }
  0x3f   : > { %v547_v33 = vrot.slane %v10699_v17, 3 }
  0x40   : > { %8858 = vmatmul.msk.bf16.gmra.mxu0 %vm565_vm2, %v538_v24  ;;  %v1037_v23 = vsel %vm1009_vm3, %v1032_v48, %v1036_v21  ;;  %v731_v24 = vrot.slane %v729_v49, 2  ;;  %v1768_v49 = vsel %vm614_vm0, %v8922_v31, 0  ;;  %v1041_v51 = vsel %vm1009_vm3, %v1036_v21, %v1040_v47 }
  0x41   : > { %1777 = vmatpush.bf16.msrb.mxu0 %v1768_v49  ;;  %v783_v21 = vshrl.u32 %v10699_v17, 16 }
  0x43   : > { %8910 = vmatmul.msk.bf16.gmra.mxu3 %vm565_vm2, %v1429_v34  ;;  %v735_v34 = vor.u32 %v734_v25, %v731_v24  ;;  %v1046_v24 = vrot.slane %v783_v21, 3 }
  0x44   : > { %8891 = vmatmul.msk.bf16.gmra.mxu2 %vm565_vm2, %v1029_v29  ;;  %v10227_v29 = vld [vmem:[%s10497_s12 + $0x4c] sm:$0xff]  }
  0x45   : > { %v1449_v39 = vshrl.u32 %v10227_v29, 16  ;;  %v1452_v50 = vshll.u32 %v10227_v29, 16  ;;  %v736_v37 = vsel %vm710_vm4, %v726_v2, %v735_v34  ;;  %v1472_v29 = vrot.slane %v1470_v32, 4 }
  0x47   : > { %v1451_v43 = vrot.slane %v1449_v39, 3 }
  0x4c   : > { %8871 = vmatmul.msk.bf16.gmra.mxu1 %vm565_vm2, %v564_v44  ;;  %v1454_v44 = vrot.slane %v1452_v50, 4  ;;  %v758_v50 = vrot.slane %v756_v3, 2 }
  0x4e   : > { %v1455_v48 = vor.u32 %v1454_v44, %v1451_v43 }
  0x50   : > { %8859 = vmatmul.msk.bf16.gmra.mxu0 %vm565_vm2, %v540_v53  ;;  %v743_v53 = vrot.slane %v741_v11, 3  ;;  %v1456_v55 = vsel %vm1009_vm3, %v1446_v22, %v1455_v48  ;;  %v545_v11 = vrot.slane %v10676_v54, 3  ;;  %v786_v22 = vshll.u32 %v10699_v17, 16 }
  0x52   : > { %v744_v57 = vor.u32 %v743_v53, %v740_v52  ;;  %v546_v2 = vsel %vm531_vm1, %v543_v40, %v545_v11  ;;  %v1047_v25 = vrot.slane %v786_v22, 4  ;;  %v548_v31 = vsel %vm531_vm1, %v545_v11, %v547_v33  ;;  %v10722_v40 = vld [vmem:[%s10497_s12 + $0x4c] sm:$0xff] }
  0x53   : > { %8911 = vmatmul.msk.bf16.gmra.mxu3 %vm565_vm2, %v1438_v61  ;;  %v1043_v61 = vrot.slane %v777_v59, 4  ;;  %v792_v44 = vshrl.u32 %v10722_v40, 16 }
  0x54   : > { %8892 = vmatmul.msk.bf16.gmra.mxu2 %vm565_vm2, %v1033_v56  ;;  %v10229_v56 = vld [vmem:[%s10497_s12 + $0x54] sm:$0xff]   ;;  %v745_v1 = vsel %vm710_vm4, %v735_v34, %v744_v57  ;;  %v1048_v34 = vor.u32 %v1047_v25, %v1046_v24 }
  0x55   : > { %v1458_v7 = vshrl.u32 %v10229_v56, 16  ;;  %v1461_v9 = vshll.u32 %v10229_v56, 16  ;;  %v1044_v15 = vor.u32 %v1043_v61, %v1042_v10  ;;  %v767_v10 = vrot.slane %v765_v35, 2 }
  0x56   : > { %v770_v61 = vrot.slane %v768_v36, 3 }
  0x57   : > { %v1460_v62 = vrot.slane %v1458_v7, 3  ;;  %v1463_v63 = vrot.slane %v1461_v9, 4  ;;  %v1049_v39 = vsel %vm1009_vm3, %v1044_v15, %v1048_v34 }
  0x59   : > { %v1464_v8 = vor.u32 %v1463_v63, %v1460_v62  ;;  %v10751_v62 = vld [vmem:[%s10497_s12 + $0x54] sm:$0xff] }
  0x5b   : > { %v1465_v18 = vsel %vm1009_vm3, %v1455_v48, %v1464_v8  ;;  %v1479_v48 = vshll.u32 %v10233_v42, 16 }
  0x5c   : > { %8872 = vmatmul.msk.bf16.vlgmr.msrb.gmra.mxu1 %vm565_vm2, %v727_v16  ;;  %v1045_v16 = vsel %vm1009_vm3, %v1040_v47, %v1044_v15  ;;  %v1476_v47 = vshrl.u32 %v10233_v42, 16 }
  0x5e   : > { %v1478_v53 = vrot.slane %v1476_v47, 3 }
  0x60   : > { %8860 = vmatmul.msk.bf16.gmra.mxu0 %vm565_vm2, %v542_v20  ;;  %v753_v20 = vor.u32 %v752_v14, %v749_v13  ;;  %v804_v13 = vshll.u32 %v10751_v62, 16 }
  0x62   : > { %v754_v27 = vsel %vm710_vm4, %v744_v57, %v753_v20 }
  0x63   : > { %8912 = vmatmul.msk.bf16.gmra.mxu3 %vm565_vm2, %v1447_v28 }
  0x64   : > { %8893 = vmatmul.msk.bf16.gmra.mxu2 %vm565_vm2, %v1037_v23  ;;  %v1467_v23 = vshrl.u32 %v10231_v19, 16  ;;  %v551_v19 = vrot.slane %v10751_v62, 3 }
  0x66   : > { %v1469_v28 = vrot.slane %v1467_v23, 3  ;;  %v1055_v23 = vrot.slane %v804_v13, 4 }
  0x68   : > { %v1473_v49 = vor.u32 %v1472_v29, %v1469_v28 }
  0x6a   : > { %v1474_v41 = vsel %vm1009_vm3, %v1464_v8, %v1473_v49  ;;  %v771_v8 = vor.u32 %v770_v61, %v767_v10 }
  0x6c   : > { %8873 = vmatmul.msk.bf16.gmra.mxu1 %vm565_vm2, %v736_v37  ;;  %v761_v37 = vrot.slane %v759_v6, 3  ;;  %v549_v6 = vrot.slane %v10722_v40, 3 }
  0x6e   : > { %v762_v43 = vor.u32 %v761_v37, %v758_v50  ;;  %v550_v57 = vsel %vm531_vm1, %v547_v33, %v549_v6  ;;  %v552_v25 = vsel %vm531_vm1, %v549_v6, %v551_v19  ;;  %v779_v50 = vrot.slane %v777_v59, 3  ;;  %v10788_v37 = vld [vmem:[%s10497_s12 + $0x5c] sm:$0xff] }
  0x6f   : > { %v813_v6 = vshll.u32 %v10788_v37, 16 }
  0x70   : > { %8861 = vmatmul.msk.bf16.gmra.mxu0 %vm565_vm2, %v544_v46  ;;  %v795_v46 = vshll.u32 %v10722_v40, 16  ;;  %v763_v60 = vsel %vm710_vm4, %v753_v20, %v762_v43 }
  0x72   : > { %v1051_v52 = vrot.slane %v795_v46, 4 }
  0x73   : > { %8913 = vmatmul.msk.bf16.gmra.mxu3 %vm565_vm2, %v1456_v55  ;;  %v1481_v55 = vrot.slane %v1479_v48, 4 }
  0x74   : > { %8894 = vmatmul.msk.bf16.gmra.mxu2 %vm565_vm2, %v1041_v51  ;;  %v1050_v51 = vrot.slane %v792_v44, 3 }
  0x75   : > { %v1482_v9 = vor.u32 %v1481_v55, %v1478_v53  ;;  %v553_v53 = vrot.slane %v10788_v37, 3 }
  0x76   : > { %v1052_v7 = vor.u32 %v1051_v52, %v1050_v51 }
  0x77   : > { %v1483_v63 = vsel %vm1009_vm3, %v1473_v49, %v1482_v9  ;;  %v554_v61 = vsel %vm531_vm1, %v551_v19, %v553_v53 }
  0x78   : > { %v1053_v11 = vsel %vm1009_vm3, %v1048_v34, %v1052_v7 }
  0x7c   : > { %8874 = vmatmul.msk.bf16.gmra.mxu1 %vm565_vm2, %v745_v1 }
  0x80   : > { %8862 = vmatmul.msk.bf16.gmra.mxu0 %vm565_vm2, %v546_v2  ;;  %v10235_v2 = vld [vmem:[%s10497_s12 + $0x6c] sm:$0xff]  }
  0x81   : > { %v1485_v26 = vshrl.u32 %v10235_v2, 16  ;;  %v1488_v35 = vshll.u32 %v10235_v2, 16 }
  0x83   : > { %8914 = vmatmul.msk.bf16.gmra.mxu3 %vm565_vm2, %v1465_v18  ;;  %v772_v18 = vsel %vm710_vm4, %v762_v43, %v771_v8  ;;  %v1490_v33 = vrot.slane %v1488_v35, 4  ;;  %v10237_v43 = vld [vmem:[%s10497_s12 + $0x74] sm:$0xff]  }
  0x84   : > { %8895 = vmatmul.msk.bf16.gmra.mxu2 %vm565_vm2, %v1045_v16  ;;  %v801_v16 = vshrl.u32 %v10751_v62, 16  ;;  %v1494_v54 = vshrl.u32 %v10237_v43, 16  ;;  %v1497_v59 = vshll.u32 %v10237_v43, 16  ;;  %v15045_v62 = vshrl.u32 %v10546_v38, 16 }
  0x86   : > { %v1054_v20 = vrot.slane %v801_v16, 3 }
  0x88   : > { %v1056_v28 = vor.u32 %v1055_v23, %v1054_v20  ;;  %v788_v20 = vrot.slane %v786_v22, 3 }
  0x8a   : > { %v1057_v49 = vsel %vm1009_vm3, %v1052_v7, %v1056_v28 }
  0x8c   : > { %8875 = vmatmul.msk.bf16.gmra.mxu1 %vm565_vm2, %v754_v27  ;;  %v1487_v27 = vrot.slane %v1485_v26, 3 }
  0x90   : > { %8863 = vmatmul.msk.bf16.gmra.mxu0 %vm565_vm2, %v548_v31  ;;  %v1491_v31 = vor.u32 %v1490_v33, %v1487_v27  ;;  %v10239_v27 = vld [vmem:[%s10497_s12 + $0x7c] sm:$0xff]  }
  0x91   : > { %v1503_v17 = vshrl.u32 %v10239_v27, 16 }
  0x92   : > { %v1492_v42 = vsel %vm1009_vm3, %v1482_v9, %v1491_v31  ;;  %v1496_v9 = vrot.slane %v1494_v54, 3 }
  0x93   : > { %8915 = vmatmul.msk.bf16.gmra.mxu3 %vm565_vm2, %v1474_v41  ;;  %v1505_v54 = vrot.slane %v1503_v17, 3 }
  0x94   : > { %8896 = vmatmul.msk.bf16.gmra.mxu2 %vm565_vm2, %v1049_v39  ;;  %v776_v39 = vrot.slane %v774_v58, 2 }
  0x96   : > { %v780_v48 = vor.u32 %v779_v50, %v776_v39 }
  0x98   : > { %v781_v52 = vsel %vm710_vm4, %v771_v8, %v780_v48 }
  0x99   : > { %v10730_v3 = vpop.f32.mrf.mxu1 }
  0x9c   : > { %8876 = vmatmul.msk.bf16.gmra.mxu1 %vm565_vm2, %v763_v60  ;;  %v810_v60 = vshrl.u32 %v10788_v37, 16 }
  0x9d   : > { %v10739_v56 = vpop.f32.mrf.mxu0 }
  0x9e   : > { %v1058_v55 = vrot.slane %v810_v60, 3 }
  0xa0   : > { %8864 = vmatmul.msk.bf16.gmra.mxu0 %vm565_vm2, %v550_v57  ;;  %v1059_v57 = vrot.slane %v813_v6, 4 }
  0xa1   : > { %v10743_v1 = vpop.f32.mrf.mxu1 }
  0xa3   : > { %8916 = vmatmul.msk.bf16.gmra.mxu3 %vm565_vm2, %v1483_v63  ;;  %v1060_v63 = vor.u32 %v1059_v57, %v1058_v55  ;;  %v556_v55 = vsel %vm531_vm1, %v553_v53, %v555_v12  ;;  %v797_v12 = vrot.slane %v795_v46, 3 }
  0xa4   : > { %8897 = vmatmul.msk.bf16.gmra.mxu2 %vm565_vm2, %v1053_v11  ;;  %v1499_v11 = vrot.slane %v1497_v59, 4 }
  0xa5   : > { %v10756_v15 = vpop.f32.mrf.mxu0  ;;  %v1061_v35 = vsel %vm1009_vm3, %v1056_v28, %v1060_v63  ;;  %v15050_v28 = vshll.u32 %v10507_v4, 16 }
  0xa6   : > { %v10771_v32 = vpop.f32.mrf.mxu3  ;;  %v1500_v8 = vor.u32 %v1499_v11, %v1496_v9  ;;  %v9020_v11 = vld [vmem:[%s15035_s2 + $0xc] sm:$0x3] }
  0xa7   : > { %v10760_v14 = vpop.f32.mrf.mxu2  ;;  %v2613_v53 = vsel %vm614_vm0, %v9020_v11, 0 }
  0xa8   : > { %v1501_v19 = vsel %vm1009_vm3, %v1491_v31, %v1500_v8  ;;  %2622 = vmatpush.bf16.msrb.mxu2 %v2613_v53 }
  0xa9   : > { %v10763_v36 = vpop.f32.mrf.mxu1 }
  0xac   : > { %8877 = vmatmul.msk.bf16.gmra.mxu1 %vm565_vm2, %v772_v18  ;;  %v785_v18 = vrot.slane %v783_v21, 2  ;;  %v1506_v21 = vshll.u32 %v10239_v27, 16  ;;  %v10240_v27 = vld [vmem:[%s10497_s12 + $0x84] sm:$0xff]  }
  0xad   : > { %v10774_v24 = vpop.f32.mrf.mxu0  ;;  %v1512_v46 = vshrl.u32 %v10240_v27, 16 }
  0xae   : > { %v10790_v41 = vpop.f32.mrf.mxu3  ;;  %v1508_v59 = vrot.slane %v1506_v21, 4 }
  0xaf   : > { %v10777_v29 = vpop.f32.mrf.mxu2  ;;  %v1514_v11 = vrot.slane %v1512_v46, 3 }
  0xb0   : > { %8865 = vmatmul.msk.bf16.gmra.mxu0 %vm565_vm2, %v552_v25  ;;  %v789_v25 = vor.u32 %v788_v20, %v785_v18  ;;  %v1509_v9 = vor.u32 %v1508_v59, %v1505_v54  ;;  %v794_v18 = vrot.slane %v792_v44, 2  ;;  %v15044_v44 = vshll.u32 %v10510_v5, 16 }
  0xb1   : > { %v10780_v34 = vpop.f32.mrf.mxu1 }
  0xb2   : > { %v790_v50 = vsel %vm710_vm4, %v780_v48, %v789_v25  ;;  %v798_v21 = vor.u32 %v797_v12, %v794_v18  ;;  %v1067_v54 = vrot.slane %v15044_v44, 4 }
  0xb3   : > { %8917 = vmatmul.msk.bf16.gmra.mxu3 %vm565_vm2, %v1492_v42  ;;  %v1063_v42 = vrot.slane %v15050_v28, 4 }
  0xb4   : > { %8898 = vmatmul.msk.bf16.gmra.mxu2 %vm565_vm2, %v1057_v49  ;;  %v819_v49 = vshrl.u32 %v10507_v4, 16 }
  0xb5   : > { %v10795_v47 = vpop.f32.mrf.mxu0 }
  0xb6   : > { %v10810_v7 = vpop.f32.mrf.mxu3  ;;  %v1062_v31 = vrot.slane %v819_v49, 3 }
  0xb7   : > { %v10799_v58 = vpop.f32.mrf.mxu2 }
  0xb8   : > { %v1064_v48 = vor.u32 %v1063_v42, %v1062_v31  ;;  %v799_v42 = vsel %vm710_vm4, %v789_v25, %v798_v21  ;;  %v9980_v25 = vld [vmem:[%s10497_s12 + $0x10] sm:$0xff]  }
  0xb9   : > { %v10802_v51 = vpop.f32.mrf.mxu1 }
  0xbc   : > { %8878 = vmatmul.msk.bf16.gmra.mxu1 %vm565_vm2, %v781_v52 }
  0xbd   : > { %v10813_v10 = vpop.f32.mrf.mxu0 }
  0xbe   : > { %v10826_v23 = vpop.f32.mrf.mxu3 }
  0xbf   : > { %v10816_v2 = vpop.f32.mrf.mxu2 }
  0xc0   : > { %8866 = vmatmul.msk.bf16.gmra.mxu0 %vm565_vm2, %v554_v61 }
  0xc1   : > { %v10819_v26 = vpop.f32.mrf.mxu1 }
  0xc3   : > { %8918 = vmatmul.msk.bf16.gmra.mxu3 %vm565_vm2, %v1501_v19  ;;  %v1510_v19 = vsel %vm1009_vm3, %v1500_v8, %v1509_v9 }
  0xc4   : > { %8899 = vmatmul.msk.bf16.gmra.mxu2 %vm565_vm2, %v1061_v35  ;;  %v1065_v35 = vsel %vm1009_vm3, %v1060_v63, %v1064_v48  ;;  %v15049_v63 = vshrl.u32 %v10510_v5, 16 }
  0xc5   : > { %v10831_v33 = vpop.f32.mrf.mxu0 }
  0xc6   : > { %v10845_v43 = vpop.f32.mrf.mxu3  ;;  %v1066_v8 = vrot.slane %v15049_v63, 3 }
  0xc7   : > { %v10835_v39 = vpop.f32.mrf.mxu2 }
  0xc8   : > { %v1068_v53 = vor.u32 %v1067_v54, %v1066_v8 }
  0xc9   : > { %v10838_v22 = vpop.f32.mrf.mxu1 }
  0xca   : > { %15168 = vst [vmem:[#allocation10_spill] sm:$0xff] %v10838_v22  ;;  %v11194_v22 = vld [vmem:[%s10497_s12 + $0x48] sm:$0xff] }
  0xcb   : > { %15199 = vst [vmem:[#allocation34_spill] sm:$0xff] %v11194_v22 }
  0xcc   : > { %8879 = vmatmul.msk.bf16.gmra.mxu1 %vm565_vm2, %v790_v50  ;;  %v1515_v50 = vshll.u32 %v10240_v27, 16 }
  0xcd   : > { %v10848_v52 = vpop.f32.mrf.mxu0 }
  0xce   : > { %v10867_v20 = vpop.f32.mrf.mxu3 }
  0xcf   : > { %v10853_v57 = vpop.f32.mrf.mxu2 }
  0xd0   : > { %8867 = vmatmul.msk.bf16.gmra.mxu0 %vm565_vm2, %v556_v55 }
  0xd1   : > { %v10859_v61 = vpop.f32.mrf.mxu1 }
  0xd2   : > { %15169 = vst [vmem:[#allocation11_spill] sm:$0xff] %v10859_v61 }
  0xd3   : > { %8919 = vmatmul.msk.bf16.gmra.mxu3 %vm565_vm2, %v1510_v19  ;;  %v9995_v19 = vld [vmem:[%s10497_s12 + $0x88] sm:$0xff]  }
  0xd4   : > { %8900 = vmatmul.msk.bf16.gmra.mxu2 %vm565_vm2, %v1065_v35  ;;  %v1517_v35 = vrot.slane %v1515_v50, 4  ;;  %v1069_v50 = vsel %vm1009_vm3, %v1064_v48, %v1068_v53 }
  0xd5   : > { %v10872_v17 = vpop.f32.mrf.mxu0 }
  0xd6   : > { %v10885_v55 = vpop.f32.mrf.mxu3  ;;  %v1518_v44 = vor.u32 %v1517_v35, %v1514_v11 }
  0xd7   : > { %v10876_v40 = vpop.f32.mrf.mxu2 }
  0xd8   : > { %v1519_v11 = vsel %vm1009_vm3, %v1509_v9, %v1518_v44 }
  0xd9   : > { %v923_v31 = vpop.f32.mrf.mxu1 }
  0xda   : > { %v924_v59 = vadd.f32 %v923_v31, %v10739_v56  ;;  %v9097_v56 = vld [vmem:[%s15035_s2 + $0xe] sm:$0x3]  ;;  %v9883_v31 = vunpack.c.h.b16 %v9995_v19 }
  0xdb   : > { %v2825_v8 = vsel %vm614_vm0, %v9097_v56, 0 }
  0xdc   : > { %8880 = vmatmul.msk.bf16.gmra.mxu1 %vm565_vm2, %v799_v42  ;;  %v10889_v18 = vadd.f32 %v10760_v14, %v924_v59  ;;  %v803_v14 = vrot.slane %v801_v16, 2  ;;  %v806_v42 = vrot.slane %v804_v13, 3  ;;  %2834 = vmatpush.bf16.msrb.mxu3 %v2825_v8  ;;  %v1376_v35 = vpack.c.b16 %v9883_v31, %v9883_v31 }
  0xdd   : > { %v10891_v12 = vpop.f32.mrf.mxu0  ;;  %v15046_v13 = vshll.u32 %v10546_v38, 16 }
  0xde   : > { %15170 = vst [vmem:[#allocation12_spill] sm:$0xff] %v10889_v18  ;;  %v10908_v59 = vpop.f32.mrf.mxu3  ;;  %v807_v16 = vor.u32 %v806_v42, %v803_v14  ;;  %v1521_v19 = vshrl.u32 %v1376_v35, 16  ;;  %v1524_v56 = vshll.u32 %v1376_v35, 16 }
  0xdf   : > { %v10895_v27 = vpop.f32.mrf.mxu2  ;;  %v1071_v31 = vrot.slane %v15046_v13, 4 }
  0xe0   : > { %8923 = vmatmul.msk.bf16.vlgmr.msrb.gmra.mxu0 %vm565_vm2, %v9980_v25  ;;  %v808_v9 = vsel %vm710_vm4, %v798_v21, %v807_v16  ;;  %v1523_v42 = vrot.slane %v1521_v19, 3  ;;  %v1526_v8 = vrot.slane %v1524_v56, 4  ;;  %v10937_v21 = vld [vmem:[%s10497_s12 + $0x18] sm:$0xff]   ;;  %v812_v19 = vrot.slane %v810_v60, 2 }
  0xe1   : > { %v925_v46 = vpop.f32.mrf.mxu1 }
  0xe2   : > { %v926_v54 = vadd.f32 %v925_v46, %v10756_v15 }
  0xe3   : > { %8920 = vmatmul.msk.bf16.gmra.mxu3 %vm565_vm2, %v1519_v11 }
  0xe4   : > { %8901 = vmatmul.msk.bf16.gmra.mxu2 %vm565_vm2, %v1069_v50  ;;  %v10913_v48 = vadd.f32 %v10777_v29, %v926_v54  ;;  %v1070_v29 = vrot.slane %v15045_v62, 3 }
  0xe5   : > { %v10915_v25 = vpop.f32.mrf.mxu0 }
  0xe6   : > { %15171 = vst [vmem:[#allocation13_spill] sm:$0xff] %v10913_v48  ;;  %v10928_v14 = vpop.f32.mrf.mxu3  ;;  %v1072_v35 = vor.u32 %v1071_v31, %v1070_v29  ;;  %v15047_v29 = vshrl.u32 %v10573_v0, 16  ;;  %v15048_v31 = vshll.u32 %v10573_v0, 16 }
  0xe7   : > { %v10919_v15 = vpop.f32.mrf.mxu2 }
  0xe8   : > { %v1073_v13 = vsel %vm1009_vm3, %v1068_v53, %v1072_v35 }
  0xe9   : > { %v928_v46 = vpop.f32.mrf.mxu1 }
  0xea   : > { %v929_v50 = vadd.f32 %v928_v46, %v10774_v24  ;;  %v1527_v24 = vor.u32 %v1526_v8, %v1523_v42  ;;  %v9998_v8 = vld [vmem:[%s10497_s12 + $0x18] sm:$0xe] }
  0xec   : > { %8881 = vmatmul.msk.bf16.gmra.mxu1 %vm565_vm2, %v808_v9  ;;  %v10932_v54 = vadd.f32 %v10799_v58, %v929_v50  ;;  %v815_v58 = vrot.slane %v813_v6, 3  ;;  %v1528_v53 = vsel %vm1009_vm3, %v1518_v44, %v1527_v24  ;;  %v1075_v50 = vrot.slane %v15048_v31, 4 }
  0xed   : > { %v10934_v11 = vpop.f32.mrf.mxu0 }
  0xee   : > { %15172 = vst [vmem:[#allocation14_spill] sm:$0xff] %v10932_v54  ;;  %v10949_v9 = vpop.f32.mrf.mxu3  ;;  %v816_v6 = vor.u32 %v815_v58, %v812_v19  ;;  %v1003_v19 = vld [vmem:[%s10497_s12 + $0x84] sm:$0xf] }
  0xef   : > { %v10939_v62 = vpop.f32.mrf.mxu2  ;;  %15173 = vst [vmem:[#allocation15_spill] sm:$0xff] %v10949_v9  ;;  %v1007_v63 = vunpack.c.l.b16 %v1003_v19 }
  0xf0   : > { %8924 = vmatmul.msk.bf16.gmra.mxu0 %vm565_vm2, %v10937_v21  ;;  %v817_v44 = vsel %vm710_vm4, %v807_v16, %v816_v6  ;;  %v9982_v16 = vld [vmem:[%s10497_s12 + $0x20] sm:$0xff]  }
  0xf1   : > { %v930_v46 = vpop.f32.mrf.mxu1 }
  0xf2   : > { %v931_v56 = vadd.f32 %v930_v46, %v10795_v47 }
  0xf3   : > { %8921 = vmatmul.msk.bf16.gmra.mxu3 %vm565_vm2, %v1528_v53  ;;  %v10979_v53 = vld [vmem:[%s10497_s12 + $0x20] sm:$0xff] }
  0xf4   : > { %8902 = vmatmul.msk.bf16.gmra.mxu2 %vm565_vm2, %v1073_v13  ;;  %v10956_v60 = vadd.f32 %v10816_v2, %v931_v56  ;;  %v1074_v13 = vrot.slane %v15047_v29, 3  ;;  %v9997_v2 = vld [vmem:[%s10497_s12 + $0x18] sm:$0xf0] }
  0xf5   : > { %v10958_v37 = vpop.f32.mrf.mxu0  ;;  %v10981_v29 = vor.u32 %v9998_v8, %v9997_v2  ;;  %v1008_v8 = vpack.c.b16 %v1007_v63, %v1007_v63 }
  0xf6   : > { %15174 = vst [vmem:[#allocation16_spill] sm:$0xff] %v10956_v60  ;;  %v10971_v46 = vpop.f32.mrf.mxu3  ;;  %v1076_v56 = vor.u32 %v1075_v50, %v1074_v13  ;;  %v821_v13 = vrot.slane %v819_v49, 2  ;;  %v15177_v50 = vshll.u32 %v10507_v4, 16 }
  0xf7   : > { %v10960_v47 = vpop.f32.mrf.mxu2  ;;  %15175 = vst [vmem:[#allocation17_spill] sm:$0xff] %v10971_v46  ;;  %v1079_v4 = vshrl.u32 %v1008_v8, 16  ;;  %v10034_v46 = vld [vmem:[%s10497_s12 + $0xc] sm:$0x8] }
  0xf8   : > { %15176 = vst [vmem:[#allocation18_spill] sm:$0xff] %v10981_v29  ;;  %v824_v2 = vrot.slane %v15177_v50, 3  ;;  %v1082_v50 = vshll.u32 %v1008_v8, 16  ;;  %v9983_v8 = vld [vmem:[%s10497_s12 + $0x28] sm:$0xff]  }
  0xf9   : > { %v933_v42 = vpop.f32.mrf.mxu1 }
  0xfa   : > { %v934_v24 = vadd.f32 %v933_v42, %v10813_v10  ;;  %v1077_v10 = vsel %vm1009_vm3, %v1072_v35, %v1076_v56  ;;  %v2744_v42 = vrot.slane %v10979_v53, 1  ;;  %v825_v49 = vor.u32 %v824_v2, %v821_v13  ;;  %v11018_v13 = vld [vmem:[%s10497_s12 + $0x28] sm:$0xff] }
  0xfb   : > { %15180 = vst [vmem:[#allocation21_spill] sm:$0xff] %v11018_v13 }
  0xfc   : > { %v10975_v58 = vadd.f32 %v10835_v39, %v934_v24  ;;  %8882 = vmatmul.msk.bf16.gmra.mxu1 %vm565_vm2, %v817_v44  ;;  %v2743_v39 = vrot.slane %v10981_v29, 1 }
  0xfd   : > { %v10983_v31 = vpop.f32.mrf.mxu0 }
  0xfe   : > { %v10997_v19 = vpop.f32.mrf.mxu3  ;;  %v2745_v35 = vsel %vm2742_vm5, %v2743_v39, %v2744_v42 }
  0xff   : > { %v10986_v28 = vpop.f32.mrf.mxu2  ;;  %15178 = vst [vmem:[#allocation19_spill] sm:$0xff] %v10997_v19 }
 0x100   : > { %8925 = vmatmul.msk.bf16.gmra.mxu0 %vm565_vm2, %v9982_v16 }
 0x101   : > { %v935_v44 = vpop.f32.mrf.mxu1 }
 0x102   : > { %v936_v24 = vadd.f32 %v935_v44, %v10831_v33  ;;  %v826_v44 = vsel %vm710_vm4, %v816_v6, %v825_v49  ;;  %v2746_v6 = vrot.slane %v11018_v13, 1 }
 0x103   : > { %9098 = vmatmul.msk.bf16.vlgmr.msrb.gmra.mxu3 %vm565_vm2, %v2745_v35 }
 0x104   : > { %v11000_v16 = vadd.f32 %v10853_v57, %v936_v24  ;;  %8903 = vmatmul.msk.bf16.gmra.mxu2 %vm565_vm2, %v1077_v10  ;;  %v1081_v57 = vrot.slane %v1079_v4, 3  ;;  %v1084_v24 = vrot.slane %v1082_v50, 4 }
 0x105   : > { %v11004_v60 = vpop.f32.mrf.mxu0 }
 0x106   : > { %v11011_v54 = vpop.f32.mrf.mxu3  ;;  %v1085_v35 = vor.u32 %v1084_v24, %v1081_v57  ;;  %v2747_v24 = vsel %vm2742_vm5, %v2744_v42, %v2746_v6 }
 0x107   : > { %v11006_v63 = vpop.f32.mrf.mxu2  ;;  %15179 = vst [vmem:[#allocation20_spill] sm:$0xff] %v11011_v54 }
 0x108   : > { %v1086_v4 = vsel %vm1009_vm3, %v1076_v56, %v1085_v35  ;;  %v2435_v35 = vshll.u32 %v10937_v21, 16 }
 0x109   : > { %v938_v33 = vpop.f32.mrf.mxu1 }
 0x10a   : > { %v939_v10 = vadd.f32 %v938_v33, %v10848_v52  ;;  %v15182_v33 = vshll.u32 %v10510_v5, 16 }
 0x10c   : > { %v11014_v39 = vadd.f32 %v10876_v40, %v939_v10  ;;  %8883 = vmatmul.msk.bf16.gmra.mxu1 %vm565_vm2, %v826_v44  ;;  %v15181_v40 = vshrl.u32 %v10510_v5, 16  ;;  %v833_v44 = vrot.slane %v15182_v33, 3 }
 0x10d   : > { %v11020_v2 = vpop.f32.mrf.mxu0 }
 0x10e   : > { %v830_v50 = vrot.slane %v15181_v40, 2  ;;  %v11033_v54 = vpop.f32.mrf.mxu3  ;;  %v2437_v40 = vrot.slane %v2435_v35, 1 }
 0x10f   : > { %v11023_v48 = vpop.f32.mrf.mxu2  ;;  %15183 = vst [vmem:[#allocation22_spill] sm:$0xff] %v11033_v54 }
 0x110   : > { %8926 = vmatmul.msk.bf16.gmra.mxu0 %vm565_vm2, %v9983_v8  ;;  %v834_v56 = vor.u32 %v833_v44, %v830_v50  ;;  %v11057_v44 = vld [vmem:[%s10497_s12 + $0x30] sm:$0xff] }
 0x111   : > { %v940_v52 = vpop.f32.mrf.mxu1  ;;  %15185 = vst [vmem:[#allocation24_spill] sm:$0xff] %v11057_v44 }
 0x112   : > { %v941_v10 = vadd.f32 %v940_v52, %v10872_v17  ;;  %v835_v52 = vsel %vm710_vm4, %v825_v49, %v834_v56 }
 0x113   : > { %9099 = vmatmul.msk.bf16.gmra.mxu3 %vm565_vm2, %v2747_v24  ;;  %v9984_v24 = vld [vmem:[%s10497_s12 + $0x30] sm:$0xff]  }
 0x114   : > { %v11036_v57 = vadd.f32 %v10895_v27, %v941_v10  ;;  %8904 = vmatmul.msk.bf16.gmra.mxu2 %vm565_vm2, %v1086_v4  ;;  %v2433_v27 = vshrl.u32 %v10937_v21, 16  ;;  %v15051_v4 = vshll.u32 %v10979_v53, 16 }
 0x115   : > { %v11040_v8 = vpop.f32.mrf.mxu0 }
 0x116   : > { %v11050_v33 = vpop.f32.mrf.mxu3  ;;  %v2438_v49 = vor.u32 %v2437_v40, %v2433_v27  ;;  %v2442_v21 = vrot.slane %v15051_v4, 1 }
 0x117   : > { %v11043_v5 = vpop.f32.mrf.mxu2  ;;  %15184 = vst [vmem:[#allocation23_spill] sm:$0xff] %v11050_v33  ;;  %v15187_v33 = vshll.u32 %v10546_v38, 16 }
 0x119   : > { %v943_v17 = vpop.f32.mrf.mxu1  ;;  %v842_v54 = vrot.slane %v15187_v33, 3 }
 0x11a   : > { %v944_v42 = vadd.f32 %v943_v17, %v10891_v12  ;;  %v2748_v12 = vrot.slane %v11057_v44, 1  ;;  %v2443_v17 = vsel %vm2009_vm6, %v2438_v49, %v2442_v21 }
 0x11c   : > { %v11053_v50 = vadd.f32 %v10919_v15, %v944_v42  ;;  %8884 = vmatmul.msk.bf16.gmra.mxu1 %vm565_vm2, %v835_v52  ;;  %v15186_v52 = vshrl.u32 %v10546_v38, 16  ;;  %v9114_v38 = vld [vmem:[%s15035_s2 + $0x10] sm:$0x3] }
 0x11d   : > { %v11059_v10 = vpop.f32.mrf.mxu0 }
 0x11e   : > { %v839_v42 = vrot.slane %v15186_v52, 2  ;;  %v11074_v40 = vpop.f32.mrf.mxu3 }
 0x11f   : > { %v11064_v35 = vpop.f32.mrf.mxu2  ;;  %15188 = vst [vmem:[#allocation25_spill] sm:$0xff] %v11074_v40 }
 0x120   : > { %8927 = vmatmul.msk.bf16.gmra.mxu0 %vm565_vm2, %v9984_v24  ;;  %v2749_v24 = vsel %vm2742_vm5, %v2746_v6, %v2748_v12  ;;  %v843_v49 = vor.u32 %v842_v54, %v839_v42  ;;  %v15052_v6 = vshrl.u32 %v10979_v53, 16 }
 0x121   : > { %v945_v15 = vpop.f32.mrf.mxu1 }
 0x122   : > { %v946_v27 = vadd.f32 %v945_v15, %v10915_v25  ;;  %v3081_v25 = vsel %vm614_vm0, %v9114_v38, 0  ;;  %v844_v33 = vsel %vm710_vm4, %v834_v56, %v843_v49  ;;  %v15053_v15 = vshll.u32 %v11018_v13, 16  ;;  %v9985_v38 = vld [vmem:[%s10497_s12 + $0x38] sm:$0xff]  }
 0x123   : > { %9100 = vmatmul.msk.bf16.gmra.mxu3 %vm565_vm2, %v2749_v24  ;;  %3090 = vmatpush.bf16.msra.mxu0 %v3081_v25  ;;  %v2446_v56 = vor.u32 %v15052_v6, %v2442_v21 }
 0x124   : > { %v11077_v4 = vadd.f32 %v10939_v62, %v946_v27  ;;  %9081 = vmatmul.msk.bf16.vlgmr.msrb.gmra.mxu2 %vm565_vm2, %v2443_v17  ;;  %v11101_v27 = vld [vmem:[%s10497_s12 + $0x38] sm:$0xff]  ;;  %v2450_v25 = vrot.slane %v15053_v15, 1 }
 0x125   : > { %v11081_v18 = vpop.f32.mrf.mxu0  ;;  %15190 = vst [vmem:[#allocation27_spill] sm:$0xff] %v11101_v27 }
 0x126   : > { %v11094_v17 = vpop.f32.mrf.mxu3 }
 0x127   : > { %v11083_v52 = vpop.f32.mrf.mxu2  ;;  %15189 = vst [vmem:[#allocation26_spill] sm:$0xff] %v11094_v17  ;;  %v15192_v17 = vshll.u32 %v10573_v0, 16 }
 0x129   : > { %v948_v62 = vpop.f32.mrf.mxu1  ;;  %v851_v19 = vrot.slane %v15192_v17, 3  ;;  %v15055_v17 = vshrl.u32 %v11018_v13, 16 }
 0x12a   : > { %v949_v54 = vadd.f32 %v948_v62, %v10934_v11  ;;  %v2750_v11 = vrot.slane %v11101_v27, 1  ;;  %v2451_v62 = vsel %vm2009_vm6, %v2446_v56, %v2450_v25 }
 0x12c   : > { %v11097_v42 = vadd.f32 %v10960_v47, %v949_v54  ;;  %8885 = vmatmul.msk.bf16.gmra.mxu1 %vm565_vm2, %v844_v33  ;;  %v15191_v33 = vshrl.u32 %v10573_v0, 16 }
 0x12d   : > { %v11103_v24 = vpop.f32.mrf.mxu0 }
 0x12e   : > { %v848_v54 = vrot.slane %v15191_v33, 2  ;;  %v11120_v6 = vpop.f32.mrf.mxu3 }
 0x12f   : > { %v11110_v40 = vpop.f32.mrf.mxu2  ;;  %15193 = vst [vmem:[#allocation28_spill] sm:$0xff] %v11120_v6 }
 0x130   : > { %8928 = vmatmul.msk.bf16.gmra.mxu0 %vm565_vm2, %v9985_v38  ;;  %v2751_v38 = vsel %vm2742_vm5, %v2748_v12, %v2750_v11  ;;  %v852_v61 = vor.u32 %v851_v19, %v848_v54  ;;  %v11143_v19 = vld [vmem:[%s10497_s12 + $0x40] sm:$0xff] }
 0x131   : > { %v950_v47 = vpop.f32.mrf.mxu1  ;;  %15195 = vst [vmem:[#allocation30_spill] sm:$0xff] %v11143_v19 }
 0x132   : > { %v951_v21 = vadd.f32 %v950_v47, %v10958_v37  ;;  %v853_v37 = vsel %vm710_vm4, %v843_v49, %v852_v61  ;;  %v2454_v49 = vor.u32 %v15055_v17, %v2450_v25  ;;  %v2752_v25 = vrot.slane %v11143_v19, 1 }
 0x133   : > { %9101 = vmatmul.msk.bf16.gmra.mxu3 %vm565_vm2, %v2751_v38 }
 0x134   : > { %v11123_v15 = vadd.f32 %v10986_v28, %v951_v21  ;;  %9082 = vmatmul.msk.bf16.gmra.mxu2 %vm565_vm2, %v2451_v62  ;;  %v15054_v28 = vshll.u32 %v11057_v44, 16  ;;  %v9986_v21 = vld [vmem:[%s10497_s12 + $0x40] sm:$0xff]  }
 0x135   : > { %v11127_v56 = vpop.f32.mrf.mxu0 }
 0x136   : > { %v11136_v62 = vpop.f32.mrf.mxu3  ;;  %v2458_v38 = vrot.slane %v15054_v28, 1 }
 0x137   : > { %v11129_v33 = vpop.f32.mrf.mxu2  ;;  %15194 = vst [vmem:[#allocation29_spill] sm:$0xff] %v11136_v62 }
 0x138   : > { %v2459_v17 = vsel %vm2009_vm6, %v2454_v49, %v2458_v38  ;;  %v10211_v49 = vld [vmem:[%s10497_s12 + $0xc] sm:$0xf0]  }
 0x139   : > { %v953_v0 = vpop.f32.mrf.mxu1 }
 0x13a   : > { %v954_v47 = vadd.f32 %v953_v0, %v10983_v31  ;;  %v855_v31 = vshrl.u32 %v10599_v30, 16  ;;  %v858_v0 = vshll.u32 %v10599_v30, 16 }
 0x13c   : > { %v11139_v12 = vadd.f32 %v11006_v63, %v954_v47  ;;  %8886 = vmatmul.msk.bf16.gmra.mxu1 %vm565_vm2, %v853_v37  ;;  %v8939_v63 = vld [vmem:[%s15035_s2 + $0xa] sm:$0x3]  ;;  %v857_v62 = vrot.slane %v855_v31, 2  ;;  %v860_v30 = vrot.slane %v858_v0, 3 }
 0x13d   : > { %v11145_v54 = vpop.f32.mrf.mxu0  ;;  %v2191_v37 = vsel %vm614_vm0, %v8939_v63, 0 }
 0x13e   : > { %2200 = vmatpush.bf16.msrb.mxu1 %v2191_v37  ;;  %v11164_v13 = vpop.f32.mrf.mxu3  ;;  %v2753_v37 = vsel %vm2742_vm5, %v2750_v11, %v2752_v25  ;;  %v861_v29 = vor.u32 %v860_v30, %v857_v62  ;;  %v10035_v11 = vor.u32 %v10211_v49, %v10034_v46 }
 0x13f   : > { %v11158_v47 = vpop.f32.mrf.mxu2  ;;  %15196 = vst [vmem:[#allocation31_spill] sm:$0xff] %v11164_v13 }
 0x140   : > { %8929 = vmatmul.msk.bf16.gmra.mxu0 %vm565_vm2, %v9986_v21  ;;  %v1378_v46 = vshrl.u32 %v10035_v11, 16 }
 0x141   : > { %v955_v28 = vpop.f32.mrf.mxu1 }
 0x142   : > { %v956_v6 = vadd.f32 %v955_v28, %v11004_v60  ;;  %v15061_v60 = vshrl.u32 %v11057_v44, 16  ;;  %v10213_v28 = vld [vmem:[%s10497_s12 + $0x14] sm:$0xff]  }
 0x143   : > { %9102 = vmatmul.msk.bf16.gmra.mxu3 %vm565_vm2, %v2753_v37  ;;  %v1386_v49 = vshrl.u32 %v10213_v28, 16 }
 0x144   : > { %v11167_v63 = vadd.f32 %v11023_v48, %v956_v6  ;;  %9083 = vmatmul.msk.bf16.gmra.mxu2 %vm565_vm2, %v2459_v17  ;;  %v15060_v48 = vshll.u32 %v11101_v27, 16  ;;  %v862_v17 = vsel %vm710_vm4, %v852_v61, %v861_v29  ;;  %v2462_v37 = vor.u32 %v15061_v60, %v2458_v38  ;;  %v9987_v29 = vld [vmem:[%s10497_s12 + $0x48] sm:$0xff]  }
 0x145   : > { %v11171_v21 = vpop.f32.mrf.mxu0  ;;  %v2754_v38 = vrot.slane %v11194_v22, 1  ;;  %v1388_v60 = vrot.slane %v1386_v49, 3 }
 0x146   : > { %v11183_v62 = vpop.f32.mrf.mxu3  ;;  %v2466_v13 = vrot.slane %v15060_v48, 1 }
 0x147   : > { %v11175_v31 = vpop.f32.mrf.mxu2  ;;  %15197 = vst [vmem:[#allocation32_spill] sm:$0xff] %v11183_v62 }
 0x149   : > { %v958_v6 = vpop.f32.mrf.mxu1 }
 0x14a   : > { %v959_v0 = vadd.f32 %v958_v6, %v11020_v2  ;;  %v1381_v2 = vshll.u32 %v10035_v11, 16  ;;  %v1389_v6 = vshll.u32 %v10213_v28, 16  ;;  %v2755_v28 = vsel %vm2742_vm5, %v2752_v25, %v2754_v38 }
 0x14c   : > { %v11186_v30 = vadd.f32 %v11043_v5, %v959_v0  ;;  %8887 = vmatmul.msk.bf16.gmra.mxu1 %vm565_vm2, %v862_v17  ;;  %v2467_v5 = vsel %vm2009_vm6, %v2462_v37, %v2466_v13  ;;  %v1380_v0 = vrot.slane %v1378_v46, 3  ;;  %v1383_v48 = vrot.slane %v1381_v2, 4 }
 0x14d   : > { %v11196_v61 = vpop.f32.mrf.mxu0  ;;  %v1391_v44 = vrot.slane %v1389_v6, 4 }
 0x14e   : > { %15198 = vst [vmem:[#allocation33_spill] sm:$0xff] %v11186_v30  ;;  %v11205_v9 = vpop.f32.mrf.mxu3 }
 0x14f   : > { %v11199_v62 = vpop.f32.mrf.mxu2  ;;  %15200 = vst [vmem:[#allocation35_spill] sm:$0xff] %v11205_v9  ;;  %v1392_v46 = vor.u32 %v1391_v44, %v1388_v60  ;;  %v11228_v44 = vld [vmem:[%s10497_s12 + $0x50] sm:$0xff]  ;;  %v9711_v9 = vld [vmem:[%s10497_s12 + $0x18] sm:$0xff] }
 0x150   : > { %8930 = vmatmul.msk.bf16.gmra.mxu0 %vm565_vm2, %v9987_v29  ;;  %v1384_v29 = vor.u32 %v1383_v48, %v1380_v0  ;;  %15202 = vst [vmem:[#allocation37_spill] sm:$0xff] %v11228_v44  ;;  %v9988_v48 = vld [vmem:[%s10497_s12 + $0x50] sm:$0xff]  }
 0x151   : > { %v960_v17 = vpop.f32.mrf.mxu1 }
 0x152   : > { %v961_v30 = vadd.f32 %v960_v17, %v11040_v8  ;;  %v1393_v49 = vsel %vm1009_vm3, %v1384_v29, %v1392_v46  ;;  %v2756_v29 = vrot.slane %v11228_v44, 1 }
 0x153   : > { %9103 = vmatmul.msk.bf16.gmra.mxu3 %vm565_vm2, %v2755_v28 }
 0x154   : > { %v11208_v11 = vadd.f32 %v11064_v35, %v961_v30  ;;  %9084 = vmatmul.msk.bf16.gmra.mxu2 %vm565_vm2, %v2467_v5  ;;  %v15065_v35 = vshrl.u32 %v11101_v27, 16  ;;  %v15064_v30 = vshll.u32 %v11143_v19, 16  ;;  %v2018_v27 = vshll.u32 %v9711_v9, 16 }
 0x155   : > { %v11212_v37 = vpop.f32.mrf.mxu0 }
 0x156   : > { %v11221_v5 = vpop.f32.mrf.mxu3  ;;  %v2470_v17 = vor.u32 %v15065_v35, %v2466_v13  ;;  %v2474_v0 = vrot.slane %v15064_v30, 1 }
 0x157   : > { %v11214_v2 = vpop.f32.mrf.mxu2  ;;  %15201 = vst [vmem:[#allocation36_spill] sm:$0xff] %v11221_v5  ;;  %v9989_v5 = vld [vmem:[%s10497_s12 + $0x58] sm:$0xff]  }
 0x158   : > { %v2475_v13 = vsel %vm2009_vm6, %v2470_v17, %v2474_v0 }
 0x159   : > { %v963_v8 = vpop.f32.mrf.mxu1 }
 0x15a   : > { %v964_v6 = vadd.f32 %v963_v8, %v11059_v10  ;;  %v9131_v10 = vld [vmem:[%s15035_s2 + $0x2] sm:$0x3] }
 0x15c   : > { %v11224_v25 = vadd.f32 %v11083_v52, %v964_v6  ;;  %8906 = vmatmul.msk.bf16.vlgmr.msra.gmra.mxu1 %vm565_vm2, %v1393_v49  ;;  %v3592_v52 = vsel %vm614_vm0, %v9131_v10, 0 }
 0x15d   : > { %v11230_v60 = vpop.f32.mrf.mxu0  ;;  %3601 = vmatpush.bf16.msra.mxu1 %v3592_v52  ;;  %v15071_v52 = vshrl.u32 %v11143_v19, 16 }
 0x15e   : > { %v11247_v6 = vpop.f32.mrf.mxu3 }
 0x15f   : > { %v11240_v28 = vpop.f32.mrf.mxu2  ;;  %15203 = vst [vmem:[#allocation38_spill] sm:$0xff] %v11247_v6  ;;  %v11272_v6 = vld [vmem:[%s10497_s12 + $0x58] sm:$0xff] }
 0x160   : > { %8931 = vmatmul.msk.bf16.gmra.mxu0 %vm565_vm2, %v9988_v48  ;;  %v2757_v48 = vsel %vm2742_vm5, %v2754_v38, %v2756_v29  ;;  %15206 = vst [vmem:[#allocation41_spill] sm:$0xff] %v11272_v6 }
 0x161   : > { %v965_v8 = vpop.f32.mrf.mxu1 }
 0x162   : > { %v966_v49 = vadd.f32 %v965_v8, %v11081_v18  ;;  %v1402_v18 = vsel %vm1009_vm3, %v1392_v46, %v10553_v45  ;;  %v9710_v8 = vld [vmem:[%s10497_s12 + $0x10] sm:$0xff]  ;;  %v2478_v45 = vor.u32 %v15071_v52, %v2474_v0 }
 0x163   : > { %9104 = vmatmul.msk.bf16.gmra.mxu3 %vm565_vm2, %v2757_v48 }
 0x164   : > { %v11250_v30 = vadd.f32 %v11110_v40, %v966_v49  ;;  %9085 = vmatmul.msk.bf16.gmra.mxu2 %vm565_vm2, %v2475_v13  ;;  %v15070_v40 = vshll.u32 %v11194_v22, 16 }
 0x165   : > { %v11254_v10 = vpop.f32.mrf.mxu0 }
 0x166   : > { %15204 = vst [vmem:[#allocation39_spill] sm:$0xff] %v11254_v10  ;;  %v11265_v49 = vpop.f32.mrf.mxu3  ;;  %v2482_v46 = vrot.slane %v15070_v40, 1 }
 0x167   : > { %v11256_v35 = vpop.f32.mrf.mxu2  ;;  %15205 = vst [vmem:[#allocation40_spill] sm:$0xff] %v11265_v49  ;;  %v2011_v49 = vshrl.u32 %v9710_v8, 16 }
 0x169   : > { %v968_v17 = vpop.f32.mrf.mxu1 }
 0x16a   : > { %v969_v13 = vadd.f32 %v968_v17, %v11103_v24  ;;  %v2013_v24 = vshll.u32 %v9710_v8, 16 }
 0x16c   : > { %v11268_v38 = vadd.f32 %v11129_v33, %v969_v13  ;;  %8907 = vmatmul.msk.bf16.gmra.mxu1 %vm565_vm2, %v1402_v18  ;;  %v2758_v33 = vrot.slane %v11272_v6, 1  ;;  %v2483_v13 = vsel %vm2009_vm6, %v2478_v45, %v2482_v46  ;;  %v2020_v45 = vrot.slane %v2018_v27, 1 }
 0x16d   : > { %v11274_v48 = vpop.f32.mrf.mxu0  ;;  %v1673_v27 = vadd.f32 %v10771_v32, %v10975_v58  ;;  %v11332_v58 = vld [vmem:[%s15034_s1] sm:$0xff] }
 0x16e   : > { %15207 = vst [vmem:[#allocation42_spill] sm:$0xff] %v11274_v48  ;;  %v2015_v48 = vrot.slane %v2013_v24, 1  ;;  %v11288_v0 = vpop.f32.mrf.mxu3 }
 0x16f   : > { %v11282_v17 = vpop.f32.mrf.mxu2  ;;  %15208 = vst [vmem:[#allocation43_spill] sm:$0xff] %v11288_v0 }
 0x170   : > { %8932 = vmatmul.msk.bf16.gmra.mxu0 %vm565_vm2, %v9989_v5  ;;  %v2759_v5 = vsel %vm2742_vm5, %v2756_v29, %v2758_v33  ;;  %v2016_v10 = vor.u32 %v2015_v48, %v2011_v49  ;;  %v11313_v49 = vld [vmem:[%s10497_s12 + $0x60] sm:$0xff] }
 0x171   : > { %v970_v18 = vpop.f32.mrf.mxu1  ;;  %15210 = vst [vmem:[#allocation45_spill] sm:$0xff] %v11313_v49  ;;  %v15076_v32 = vrot.slane %v11313_v49, 1 }
 0x172   : > { %v971_v19 = vadd.f32 %v970_v18, %v11127_v56  ;;  %v2021_v24 = vsel %vm2009_vm6, %v2016_v10, %v2020_v45  ;;  %v9990_v10 = vld [vmem:[%s10497_s12 + $0x60] sm:$0xff]  }
 0x173   : > { %9105 = vmatmul.msk.bf16.gmra.mxu3 %vm565_vm2, %v2759_v5 }
 0x174   : > { %v11291_v40 = vadd.f32 %v11158_v47, %v971_v19  ;;  %9086 = vmatmul.msk.bf16.gmra.mxu2 %vm565_vm2, %v2483_v13  ;;  %v15073_v19 = vshrl.u32 %v11194_v22, 16  ;;  %v15072_v47 = vshll.u32 %v11228_v44, 16 }
 0x175   : > { %v11295_v52 = vpop.f32.mrf.mxu0 }
 0x176   : > { %v11304_v29 = vpop.f32.mrf.mxu3  ;;  %v2486_v5 = vor.u32 %v15073_v19, %v2482_v46 }
 0x177   : > { %v11297_v8 = vpop.f32.mrf.mxu2  ;;  %15209 = vst [vmem:[#allocation44_spill] sm:$0xff] %v11304_v29 }
 0x179   : > { %v973_v56 = vpop.f32.mrf.mxu1 }
 0x17a   : > { %v974_v18 = vadd.f32 %v973_v56, %v11145_v54  ;;  %v2490_v54 = vrot.slane %v15072_v47, 1  ;;  %v11321_v56 = vld [vmem:[%s10497_s12 + $0x20] sm:$0xff] }
 0x17b   : > { %v2026_v47 = vshll.u32 %v11321_v56, 16 }
 0x17c   : > { %v11307_v13 = vadd.f32 %v11175_v31, %v974_v18  ;;  %9004 = vmatmul.msk.bf16.vlgmr.msrb.gmra.mxu1 %vm565_vm2, %v2021_v24  ;;  %v2491_v24 = vsel %vm2009_vm6, %v2486_v5, %v2490_v54  ;;  %v2022_v18 = vshrl.u32 %v9711_v9, 16  ;;  %v1674_v9 = vadd.f32 %v10790_v41, %v11000_v16  ;;  %v11360_v41 = vld [vmem:[%s15034_s1 + $0x8] sm:$0xff] }
 0x17d   : > { %v1789_v48 = vpop.f32.mrf.mxu0  ;;  %v2761_v5 = vsel %vm2742_vm5, %v2758_v33, %v15076_v32  ;;  %v11389_v32 = vld [vmem:[%s10497_s12 + $0x28] sm:$0xff] }
 0x17e   : > { %v11323_v29 = vadd.f32 %v1789_v48, %v1673_v27  ;;  %v10399_v27 = vmov 0   ;;  %v2024_v22 = vor.u32 %v2022_v18, %v2020_v45  ;;  %v15077_v45 = vshll.u32 %v11272_v6, 16 }
 0x17f   : > { %v11325_v31 = vpop.f32.mrf.mxu2  ;;  %10309 = vset.pattern.permute.xlu0 %v10399_v27  ;;  %10310 = vset.pattern.permute.xlu1 %v10399_v27  ;;  %395 = vst.msk [vmem:[#allocation2 + $0x4] sm:$0xf] %vm393_vm7, %v10399_v27 }
 0x180   : > { %8933 = vmatmul.msk.bf16.gmra.mxu0 %vm565_vm2, %v9990_v10  ;;  %v11337_v10 = vpop.f32.mrf.mxu3  ;;  %3305 = vperm.xlu0 %10309, %v11332_v58   ;;  %396 = vst.msk [vmem:[#allocation2 + $0x8] sm:$0xf] %vm393_vm7, %v10399_v27 }
 0x181   : > { %v975_v46 = vpop.f32.mrf.mxu1  ;;  %15211 = vst [vmem:[#allocation46_spill] sm:$0xff] %v11337_v10  ;;  %10311 = vset.pattern.permute.xlu2 %v10399_v27 }
 0x182   : > { %v976_v48 = vadd.f32 %v975_v46, %v11171_v21  ;;  %v2028_v21 = vrot.slane %v2026_v47, 1  ;;  %397 = vst.msk [vmem:[#allocation2 + $0xc] sm:$0xf] %vm393_vm7, %v10399_v27 }
 0x183   : > { %9106 = vmatmul.msk.bf16.gmra.mxu3 %vm565_vm2, %v2761_v5  ;;  %398 = vst.msk [vmem:[#allocation2 + $0xa0] sm:$0xf] %vm393_vm7, %v10399_v27 }
 0x184   : > { %v11341_v19 = vadd.f32 %v11199_v62, %v976_v48  ;;  %9087 = vmatmul.msk.bf16.gmra.mxu2 %vm565_vm2, %v2491_v24  ;;  %v2029_v33 = vsel %vm2009_vm6, %v2024_v22, %v2028_v21  ;;  %399 = vst.msk [vmem:[#allocation2 + $0xa4] sm:$0xf] %vm393_vm7, %v10399_v27  ;;  %v1675_v22 = vadd.f32 %v10810_v7, %v11014_v39  ;;  %v11381_v48 = vld [vmem:[%s10497_s12 + $0x68] sm:$0xff] }
 0x185   : > { %v1791_v0 = vpop.f32.mrf.mxu0  ;;  %400 = vst.msk [vmem:[#allocation2 + $0xa8] sm:$0xf] %vm393_vm7, %v10399_v27  ;;  %v2762_v39 = vrot.slane %v11381_v48, 1 }
 0x186   : > { %v11350_v46 = vadd.f32 %v1791_v0, %v1674_v9  ;;  %v15078_v0 = vshrl.u32 %v11228_v44, 16  ;;  %403 = vst.msk [vmem:[#allocation3 + $0x4] sm:$0xf] %vm393_vm7, %v10399_v27  ;;  %v9991_v9 = vld [vmem:[%s10497_s12 + $0x68] sm:$0xff]  }
 0x187   : > { %v11353_v62 = vpop.f32.mrf.mxu2  ;;  %404 = vst.msk [vmem:[#allocation3 + $0x8] sm:$0xf] %vm393_vm7, %v10399_v27 }
 0x188   : > { %15212 = vst [vmem:[#allocation47_spill] sm:$0xff] %v11350_v46  ;;  %v11368_v24 = vpop.f32.mrf.mxu3  ;;  %3310 = vperm.xlu0 %10309, %v11360_v41   ;;  %v2494_v5 = vor.u32 %v15078_v0, %v2490_v54  ;;  %v11404_v54 = vld [vmem:[%s15034_s1 + $0x10] sm:$0xff] }
 0x189   : > { %v978_v16 = vpop.f32.mrf.mxu1  ;;  %15213 = vst [vmem:[#allocation48_spill] sm:$0xff] %v11368_v24  ;;  %3315 = vperm.xlu1 %10310, %v11404_v54  }
 0x18a   : > { %v979_v47 = vadd.f32 %v978_v16, %v11196_v61  ;;  %15214 = vst [vmem:[#allocation49_spill] sm:$0xff] %v11381_v48  ;;  %v2498_v16 = vrot.slane %v15077_v45, 1 }
 0x18b   : > { %405 = vst.msk [vmem:[#allocation3 + $0xc] sm:$0xf] %vm393_vm7, %v10399_v27 }
 0x18c   : > { %v11374_v18 = vadd.f32 %v11214_v2, %v979_v47  ;;  %9005 = vmatmul.msk.bf16.gmra.mxu1 %vm565_vm2, %v2029_v33  ;;  %406 = vst.msk [vmem:[#allocation3 + $0xa0] sm:$0xf] %vm393_vm7, %v10399_v27  ;;  %v11409_v33 = vld [vmem:[%s15034_s1 + $0x30] sm:$0xff] }
 0x18d   : > { %v1794_v61 = vpop.f32.mrf.mxu0  ;;  %407 = vst.msk [vmem:[#allocation3 + $0xa4] sm:$0xf] %vm393_vm7, %v10399_v27 }
 0x18e   : > { %v11392_v2 = vadd.f32 %v1794_v61, %v1675_v22  ;;  %408 = vst.msk [vmem:[#allocation3 + $0xa8] sm:$0xf] %vm393_vm7, %v10399_v27  ;;  %v2499_v22 = vsel %vm2009_vm6, %v2494_v5, %v2498_v16  ;;  %v2030_v61 = vshrl.u32 %v11321_v56, 16  ;;  %v1676_v5 = vadd.f32 %v10826_v23, %v11036_v57  ;;  %v11441_v23 = vld [vmem:[%s15034_s1 + $0x48] sm:$0xff] }
 0x18f   : > { %v11395_v7 = vpop.f32.mrf.mxu2  ;;  %v15217_v56 = vrot.slane %v11313_v49, 1 }
 0x190   : > { %15215 = vst [vmem:[#allocation50_spill] sm:$0xff] %v11392_v2  ;;  %8934 = vmatmul.msk.bf16.gmra.mxu0 %vm565_vm2, %v9991_v9  ;;  %v2034_v9 = vshll.u32 %v11389_v32, 16  ;;  %v11416_v45 = vpop.f32.mrf.mxu3  ;;  %3335 = vperm.xlu0 %10309, %v11409_v33   ;;  %v2032_v44 = vor.u32 %v2030_v61, %v2028_v21  ;;  %v15081_v21 = vshrl.u32 %v11272_v6, 16 }
 0x191   : > { %v980_v47 = vpop.f32.mrf.mxu1  ;;  %15216 = vst [vmem:[#allocation51_spill] sm:$0xff] %v11416_v45  ;;  %v2763_v24 = vsel %vm2742_vm5, %v15217_v56, %v2762_v39  ;;  %v9992_v56 = vld [vmem:[%s10497_s12 + $0x70] sm:$0xff]  }
 0x192   : > { %v981_v27 = vadd.f32 %v980_v47, %v11212_v37  ;;  %v2036_v2 = vrot.slane %v2034_v9, 1 }
 0x193   : > { %9107 = vmatmul.msk.bf16.gmra.mxu3 %vm565_vm2, %v2763_v24 }
 0x194   : > { %v11420_v0 = vadd.f32 %v11240_v28, %v981_v27  ;;  %9088 = vmatmul.msk.bf16.gmra.mxu2 %vm565_vm2, %v2499_v22  ;;  %v11436_v28 = vld [vmem:[%s15034_s1 + $0x18] sm:$0xff]  ;;  %v1677_v27 = vadd.f32 %v10845_v43, %v11053_v50  ;;  %v2502_v22 = vor.u32 %v15081_v21, %v2498_v16  ;;  %v11482_v16 = vld [vmem:[%s15034_s1 + $0x60] sm:$0xff] }
 0x195   : > { %v1796_v10 = vpop.f32.mrf.mxu0  ;;  %3320 = vperm.xlu1 %10310, %v11436_v28   ;;  %v11477_v50 = vld [vmem:[%s15034_s1 + $0x38] sm:$0xff] }
 0x196   : > { %v11428_v37 = vadd.f32 %v1796_v10, %v1676_v5  ;;  %v2037_v10 = vsel %vm2009_vm6, %v2032_v44, %v2036_v2  ;;  %v11458_v44 = vld [vmem:[%s10497_s12 + $0x70] sm:$0xff] }
 0x197   : > { %v11430_v47 = vpop.f32.mrf.mxu2  ;;  %15220 = vst [vmem:[#allocation54_spill] sm:$0xff] %v11458_v44  ;;  %v2764_v43 = vrot.slane %v11458_v44, 1 }
 0x198   : > { %15218 = vst [vmem:[#allocation52_spill] sm:$0xff] %v11428_v37  ;;  %v11448_v61 = vpop.f32.mrf.mxu3  ;;  %3350 = vperm.xlu0 %10309, %v11441_v23  }
 0x199   : > { %v983_v57 = vpop.f32.mrf.mxu1  ;;  %15219 = vst [vmem:[#allocation53_spill] sm:$0xff] %v11448_v61  ;;  %v11466_v61 = vld [vmem:[%s10497_s12 + $0x30] sm:$0xff] }
 0x19a   : > { %v984_v24 = vadd.f32 %v983_v57, %v10730_v3  ;;  %v15221_v3 = vshll.u32 %v11313_v49, 16 }
 0x19c   : > { %v11452_v9 = vadd.f32 %v11256_v35, %v984_v24  ;;  %9006 = vmatmul.msk.bf16.gmra.mxu1 %vm565_vm2, %v2037_v10  ;;  %v2506_v57 = vrot.slane %v15221_v3, 1 }
 0x19d   : > { %v1799_v5 = vpop.f32.mrf.mxu0  ;;  %3340 = vperm.xlu1 %10310, %v11477_v50  }
 0x19e   : > { %v11468_v45 = vadd.f32 %v1799_v5, %v1677_v27  ;;  %v2507_v24 = vsel %vm2009_vm6, %v2502_v22, %v2506_v57  ;;  %v2038_v27 = vshrl.u32 %v11389_v32, 16  ;;  %v2042_v5 = vshll.u32 %v11466_v61, 16 }
 0x19f   : > { %v11470_v35 = vpop.f32.mrf.mxu2  ;;  %v1678_v22 = vadd.f32 %v10867_v20, %v11077_v4  ;;  %v2765_v32 = vsel %vm2742_vm5, %v2762_v39, %v2764_v43  ;;  %v11512_v20 = vld [vmem:[%s15034_s1 + $0x78] sm:$0xff]  ;;  %v15084_v39 = vshll.u32 %v11381_v48, 16 }
 0x1a0   : > { %15222 = vst [vmem:[#allocation55_spill] sm:$0xff] %v11468_v45  ;;  %8935 = vmatmul.msk.bf16.gmra.mxu0 %vm565_vm2, %v9992_v56  ;;  %v11489_v3 = vpop.f32.mrf.mxu3  ;;  %3365 = vperm.xlu0 %10309, %v11482_v16   ;;  %v2040_v45 = vor.u32 %v2038_v27, %v2036_v2  ;;  %v2044_v37 = vrot.slane %v2042_v5, 1  ;;  %v15085_v2 = vshrl.u32 %v11313_v49, 16  ;;  %v1679_v5 = vadd.f32 %v10885_v55, %v11097_v42  ;;  %v11548_v42 = vld [vmem:[%s15034_s1 + $0x68] sm:$0xff] }
 0x1a1   : > { %v985_v10 = vpop.f32.mrf.mxu1  ;;  %15223 = vst [vmem:[#allocation56_spill] sm:$0xff] %v11489_v3 }
 0x1a2   : > { %v986_v56 = vadd.f32 %v985_v10, %v10743_v1 }
 0x1a3   : > { %9108 = vmatmul.msk.bf16.gmra.mxu3 %vm565_vm2, %v2765_v32  ;;  %v2510_v32 = vor.u32 %v15085_v2, %v2506_v57  ;;  %v11553_v57 = vld [vmem:[%s15034_s1 + $0x90] sm:$0xff] }
 0x1a4   : > { %v11493_v21 = vadd.f32 %v11282_v17, %v986_v56  ;;  %9089 = vmatmul.msk.bf16.gmra.mxu2 %vm565_vm2, %v2507_v24  ;;  %v11507_v17 = vld [vmem:[%s15034_s1 + $0x50] sm:$0xff] }
 0x1a5   : > { %v1801_v6 = vpop.f32.mrf.mxu0  ;;  %3355 = vperm.xlu1 %10310, %v11507_v17  }
 0x1a6   : > { %v11499_v46 = vadd.f32 %v1801_v6, %v1678_v22  ;;  %v2045_v6 = vsel %vm2009_vm6, %v2040_v45, %v2044_v37  ;;  %v11529_v45 = vld [vmem:[%s10497_s12 + $0x78] sm:$0xff] }
 0x1a7   : > { %v11501_v1 = vpop.f32.mrf.mxu2  ;;  %15227 = vst [vmem:[#allocation60_spill] sm:$0xff] %v11529_v45  ;;  %v9993_v22 = vld [vmem:[%s10497_s12 + $0x78] sm:$0xff]   ;;  %v15086_v55 = vrot.slane %v11529_v45, 1 }
 0x1a8   : > { %15224 = vst [vmem:[#allocation57_spill] sm:$0xff] %v11499_v46  ;;  %v11519_v24 = vpop.f32.mrf.mxu3  ;;  %3380 = vperm.xlu0 %10309, %v11512_v20  }
 0x1a9   : > { %15225 = vst [vmem:[#allocation58_spill] sm:$0xff] %v11501_v1  ;;  %v988_v4 = vpop.f32.mrf.mxu1 }
 0x1aa   : > { %v989_v10 = vadd.f32 %v988_v4, %v10763_v36  ;;  %15226 = vst [vmem:[#allocation59_spill] sm:$0xff] %v11519_v24  ;;  %v2514_v36 = vrot.slane %v15084_v39, 1  ;;  %v11537_v4 = vld [vmem:[%s10497_s12 + $0x38] sm:$0xff] }
 0x1ac   : > { %v11523_v27 = vadd.f32 %v11297_v8, %v989_v10  ;;  %9007 = vmatmul.msk.bf16.gmra.mxu1 %vm565_vm2, %v2045_v6  ;;  %v2515_v10 = vsel %vm2009_vm6, %v2510_v32, %v2514_v36  ;;  %v1680_v32 = vadd.f32 %v10908_v59, %v11123_v15  ;;  %v11585_v59 = vld [vmem:[%s15034_s1 + $0x80] sm:$0xff]  ;;  %v11590_v15 = vld [vmem:[%s15034_s1 + $0xa8] sm:$0xff] }
 0x1ad   : > { %v1804_v56 = vpop.f32.mrf.mxu0  ;;  %3370 = vperm.xlu1 %10310, %v11548_v42  }
 0x1ae   : > { %v11539_v24 = vadd.f32 %v1804_v56, %v1679_v5  ;;  %v2046_v5 = vshrl.u32 %v11466_v61, 16  ;;  %v2050_v56 = vshll.u32 %v11537_v4, 16  ;;  %v2767_v61 = vsel %vm2742_vm5, %v2764_v43, %v15086_v55 }
 0x1af   : > { %v11541_v8 = vpop.f32.mrf.mxu2 }
 0x1b0   : > { %15228 = vst [vmem:[#allocation61_spill] sm:$0xff] %v11539_v24  ;;  %8936 = vmatmul.msk.bf16.gmra.mxu0 %vm565_vm2, %v9993_v22  ;;  %v11560_v39 = vpop.f32.mrf.mxu3  ;;  %3395 = vperm.xlu0 %10309, %v11553_v57   ;;  %v2052_v1 = vrot.slane %v2050_v56, 1 }
 0x1b1   : > { %15229 = vst [vmem:[#allocation62_spill] sm:$0xff] %v11541_v8  ;;  %v990_v6 = vpop.f32.mrf.mxu1  ;;  %v2048_v8 = vor.u32 %v2046_v5, %v2044_v37  ;;  %v15233_v37 = vshll.u32 %v10979_v53, 16 }
 0x1b2   : > { %v991_v22 = vadd.f32 %v990_v6, %v10780_v34  ;;  %15230 = vst [vmem:[#allocation63_spill] sm:$0xff] %v11560_v39 }
 0x1b3   : > { %9109 = vmatmul.msk.bf16.gmra.mxu3 %vm565_vm2, %v2767_v61  ;;  %v2964_v43 = vrot.slane %v15233_v37, 2  ;;  %v2053_v56 = vsel %vm2009_vm6, %v2048_v8, %v2052_v1  ;;  %v11612_v8 = vld [vmem:[%s10497_s12 + $0x80] sm:$0xff] }
 0x1b4   : > { %v11564_v2 = vadd.f32 %v11325_v31, %v991_v22  ;;  %9090 = vmatmul.msk.bf16.gmra.mxu2 %vm565_vm2, %v2515_v10  ;;  %v11580_v31 = vld [vmem:[%s15034_s1 + $0x20] sm:$0xff]  ;;  %v15087_v22 = vshrl.u32 %v11381_v48, 16  ;;  %15236 = vst [vmem:[#allocation67_spill] sm:$0xff] %v11612_v8  ;;  %v15243_v48 = vrot.slane %v11612_v8, 1 }
 0x1b5   : > { %v1806_v3 = vpop.f32.mrf.mxu0  ;;  %3325 = vperm.xlu2 %10311, %v11580_v31   ;;  %3385 = vperm.xlu1 %10310, %v11585_v59  }
 0x1b6   : > { %v11572_v34 = vadd.f32 %v1806_v3, %v1680_v32  ;;  %v15234_v3 = vshrl.u32 %v10979_v53, 16  ;;  %v1681_v53 = vadd.f32 %v10928_v14, %v11139_v12  ;;  %v9994_v32 = vld [vmem:[%s10497_s12 + $0x80] sm:$0xff]   ;;  %v2518_v39 = vor.u32 %v15087_v22, %v2514_v36  ;;  %v11633_v12 = vld [vmem:[%s15034_s1 + $0x28] sm:$0xff]  ;;  %v11638_v36 = vld [vmem:[%s15034_s1 + $0x98] sm:$0xff] }
 0x1b7   : > { %v11574_v6 = vpop.f32.mrf.mxu2  ;;  %v15242_v14 = vld [vmem:[#allocation15_spill] sm:$0xff] }
 0x1b8   : > { %15231 = vst [vmem:[#allocation64_spill] sm:$0xff] %v11572_v34  ;;  %v2963_v10 = vrot.slane %v15234_v3, 1  ;;  %v11602_v55 = vpop.f32.mrf.mxu3  ;;  %3410 = vperm.xlu0 %10309, %v11590_v15  }
 0x1b9   : > { %15232 = vst [vmem:[#allocation65_spill] sm:$0xff] %v11574_v6  ;;  %v993_v5 = vpop.f32.mrf.mxu1 }
 0x1ba   : > { %v994_v61 = vadd.f32 %v993_v5, %v10802_v51  ;;  %15235 = vst [vmem:[#allocation66_spill] sm:$0xff] %v11602_v55  ;;  %v15237_v51 = vshll.u32 %v11458_v44, 16  ;;  %v11620_v55 = vld [vmem:[%s10497_s12 + $0x40] sm:$0xff]  ;;  %v11622_v6 = vor.u32 %v2964_v43, %v2963_v10 }
 0x1bb   : > { %v11643_v43 = vld [vmem:[%s15034_s1 + $0xc0] sm:$0xff] }
 0x1bc   : > { %v11606_v37 = vadd.f32 %v11353_v62, %v994_v61  ;;  %9008 = vmatmul.msk.bf16.gmra.mxu1 %vm565_vm2, %v2053_v56  ;;  %v2522_v5 = vrot.slane %v15237_v51, 1 }
 0x1bd   : > { %v1809_v3 = vpop.f32.mrf.mxu0  ;;  %3330 = vperm.xlu2 %10311, %v11633_v12   ;;  %3400 = vperm.xlu1 %10310, %v11638_v36  }
 0x1be   : > { %v11624_v62 = vadd.f32 %v1809_v3, %v1681_v53  ;;  %v2523_v56 = vsel %vm2009_vm6, %v2518_v39, %v2522_v5  ;;  %v2058_v53 = vshll.u32 %v11620_v55, 16  ;;  %v9140_v3 = vld [vmem:[%s15035_s2 + $0x4] sm:$0x3] }
 0x1bf   : > { %v11626_v61 = vpop.f32.mrf.mxu2  ;;  %v3703_v39 = vsel %vm614_vm0, %v9140_v3, 0 }
 0x1c0   : > { %15238 = vst [vmem:[#allocation68_spill] sm:$0xff] %v11624_v62  ;;  %8937 = vmatmul.msk.bf16.gmra.mxu0 %vm565_vm2, %v9994_v32  ;;  %v2054_v32 = vshrl.u32 %v11537_v4, 16  ;;  %v11654_v22 = vpop.f32.mrf.mxu3  ;;  %3425 = vperm.xlu0 %10309, %v11643_v43   ;;  %v15244_v62 = vrot.slane %v11529_v45, 1  ;;  %v2060_v49 = vrot.slane %v2058_v53, 1 }
 0x1c1   : > { %15239 = vst [vmem:[#allocation69_spill] sm:$0xff] %v11626_v61  ;;  %v995_v10 = vpop.f32.mrf.mxu1  ;;  %3712 = vmatpush.bf16.msra.mxu3 %v3703_v39  ;;  %v1682_v61 = vadd.f32 %v15242_v14, %v11167_v63  ;;  %v3226_v63 = vld [vmem:[%s15034_s1 + $0xb0] sm:$0xff]  ;;  %v15250_v39 = vld [vmem:[#allocation33_spill] sm:$0xff] }
 0x1c2   : > { %v996_v51 = vadd.f32 %v995_v10, %v10819_v26  ;;  %15240 = vst [vmem:[#allocation70_spill] sm:$0xff] %v11654_v22  ;;  %v2769_v26 = vsel %vm2742_vm5, %v15244_v62, %v15243_v48  ;;  %v2056_v22 = vor.u32 %v2054_v32, %v2052_v1  ;;  %v3231_v48 = vld [vmem:[%s15034_s1 + $0xd8] sm:$0xff]  ;;  %v15093_v1 = vshrl.u32 %v11458_v44, 16 }
 0x1c3   : > { %9110 = vmatmul.msk.bf16.gmra.mxu3 %vm565_vm2, %v2769_v26  ;;  %v15092_v62 = vshll.u32 %v11529_v45, 16  ;;  %v15251_v26 = vld [vmem:[#allocation17_spill] sm:$0xff] }
 0x1c4   : > { %v11659_v4 = vadd.f32 %v11395_v7, %v996_v51  ;;  %9091 = vmatmul.msk.bf16.gmra.mxu2 %vm565_vm2, %v2523_v56  ;;  %v11677_v7 = vld [vmem:[%s15034_s1 + $0x40] sm:$0xff]  ;;  %v2061_v14 = vsel %vm2009_vm6, %v2056_v22, %v2060_v49  ;;  %v2526_v22 = vor.u32 %v15093_v1, %v2522_v5 }
 0x1c5   : > { %v1811_v10 = vpop.f32.mrf.mxu0  ;;  %3345 = vperm.xlu2 %10311, %v11677_v7   ;;  %3415 = vperm.xlu1 %10310, %v3226_v63   ;;  %v15247_v56 = vld [vmem:[#allocation10_spill] sm:$0xff] }
 0x1c6   : > { %15241 = vst [vmem:[#allocation71_spill] sm:$0xff] %v11659_v4  ;;  %v11669_v34 = vadd.f32 %v1811_v10, %v1682_v61  ;;  %v1683_v10 = vadd.f32 %v15251_v26, %v15250_v39  ;;  %v11703_v63 = vld [vmem:[%s10497_s12 + $0x88] sm:$0xff]  ;;  %v2062_v39 = vshrl.u32 %v11620_v55, 16  ;;  %v3564_v26 = vld [vmem:[%s15035_s2] sm:$0x3] }
 0x1c7   : > { %v11671_v3 = vpop.f32.mrf.mxu2  ;;  %v3649_v5 = vsel %vm614_vm0, %v3564_v26, 0 }
 0x1c8   : > { %15245 = vst [vmem:[#allocation15_spill] sm:$0xff] %v11669_v34  ;;  %v11690_v53 = vpop.f32.mrf.mxu3  ;;  %3440 = vperm.xlu0 %10309, %v3231_v48   ;;  %3658 = vmatpush.bf16.msra.mxu2 %v3649_v5 }
 0x1c9   : > { %15246 = vst [vmem:[#allocation72_spill] sm:$0xff] %v11671_v3  ;;  %v998_v61 = vpop.f32.mrf.mxu1  ;;  %v2530_v3 = vrot.slane %v15092_v62, 1  ;;  %v15254_v62 = vld [vmem:[#allocation18_spill] sm:$0xff] }
 0x1ca   : > { %v999_v32 = vadd.f32 %v998_v61, %v15247_v56  ;;  %15248 = vst [vmem:[#allocation10_spill] sm:$0xff] %v11690_v53  ;;  %v11706_v56 = vld [vmem:[%s10497_s12 + $0x48] sm:$0xff]  ;;  %v2956_v55 = vshrl.u32 %v15254_v62, 16  ;;  %v2959_v1 = vshll.u32 %v15254_v62, 16  ;;  %v11736_v53 = vld [vmem:[%s15034_s1 + $0xf0] sm:$0xff] }
 0x1cb   : > { %v15258_v62 = vld [vmem:[#allocation19_spill] sm:$0xff] }
 0x1cc   : > { %v11693_v51 = vadd.f32 %v11430_v47, %v999_v32  ;;  %9009 = vmatmul.msk.bf16.gmra.mxu1 %vm565_vm2, %v2061_v14  ;;  %v10316_v32 = vld [vmem:[%s10497_s12 + $0x88] sm:$0xff]   ;;  %v2531_v14 = vsel %vm2009_vm6, %v2526_v22, %v2530_v3  ;;  %v2066_v22 = vshll.u32 %v11706_v56, 16  ;;  %v1684_v26 = vadd.f32 %v15258_v62, %v11208_v11  ;;  %v11761_v11 = vld [vmem:[%s15034_s1 + $0x70] sm:$0xff] }
 0x1cd   : > { %v1814_v61 = vpop.f32.mrf.mxu0  ;;  %v2958_v5 = vrot.slane %v2956_v55, 1  ;;  %v2961_v4 = vrot.slane %v2959_v1, 2 }
 0x1ce   : > { %15249 = vst [vmem:[#allocation73_spill] sm:$0xff] %v11693_v51  ;;  %v11708_v48 = vadd.f32 %v1814_v61, %v1683_v10  ;;  %v11723_v10 = vld [vmem:[%s15034_s1 + $0x58] sm:$0xff]  ;;  %v3229_v61 = vld [vmem:[%s15034_s1 + $0xc8] sm:$0xff]  ;;  %v15260_v51 = vrot.slane %v11612_v8, 1 }
 0x1cf   : > { %v11710_v47 = vpop.f32.mrf.mxu2  ;;  %3360 = vperm.xlu2 %10311, %v11723_v10   ;;  %3430 = vperm.xlu1 %10310, %v3229_v61   ;;  %v15259_v61 = vrot.slane %v11703_v63, 1 }
 0x1d0   : > { %15252 = vst [vmem:[#allocation33_spill] sm:$0xff] %v11708_v48  ;;  %8938 = vmatmul.msk.bf16.gmra.mxu0 %vm565_vm2, %v10316_v32  ;;  %v11739_v48 = vpop.f32.mrf.mxu3  ;;  %3455 = vperm.xlu0 %10309, %v11736_v53  }
 0x1d1   : > { %15253 = vst [vmem:[#allocation17_spill] sm:$0xff] %v11710_v47  ;;  %v1000_v32 = vpop.f32.mrf.mxu1  ;;  %v15255_v47 = vld [vmem:[#allocation11_spill] sm:$0xff]  ;;  %v2771_v24 = vsel %vm2742_vm5, %v15260_v51, %v15259_v61 }
 0x1d2   : > { %v1001_v44 = vadd.f32 %v1000_v32, %v15255_v47  ;;  %15256 = vst [vmem:[#allocation18_spill] sm:$0xff] %v11739_v48  ;;  %v2064_v32 = vor.u32 %v2062_v39, %v2060_v49  ;;  %v2068_v48 = vrot.slane %v2066_v22, 1  ;;  %v11769_v49 = vld [vmem:[%s15034_s1 + $0x108] sm:$0xff]  ;;  %v15096_v39 = vshll.u32 %v11612_v8, 16  ;;  %v15263_v22 = vld [vmem:[#allocation12_spill] sm:$0xff] }
 0x1d3   : > { %9111 = vmatmul.msk.bf16.gmra.mxu3 %vm565_vm2, %v2771_v24  ;;  %v15097_v24 = vshrl.u32 %v11529_v45, 16 }
 0x1d4   : > { %v11743_v34 = vadd.f32 %v11470_v35, %v1001_v44  ;;  %9092 = vmatmul.msk.bf16.gmra.mxu2 %vm565_vm2, %v2531_v14  ;;  %v3232_v35 = vld [vmem:[%s15034_s1 + $0xe0] sm:$0xff]  ;;  %v2069_v51 = vsel %vm2009_vm6, %v2064_v32, %v2068_v48  ;;  %v2962_v14 = vor.u32 %v2961_v4, %v2958_v5  ;;  %v11785_v4 = vld [vmem:[%s10497_s12 + $0x90] sm:$0xff] }
 0x1d5   : > { %v1816_v47 = vpop.f32.mrf.mxu0  ;;  %v2534_v5 = vor.u32 %v15097_v24, %v2530_v3  ;;  %v11810_v3 = vld [vmem:[%s15034_s1 + $0xf8] sm:$0xff] }
 0x1d6   : > { %15257 = vst [vmem:[#allocation11_spill] sm:$0xff] %v11743_v34  ;;  %v11753_v46 = vadd.f32 %v1816_v47, %v1684_v26  ;;  %v15265_v26 = vld [vmem:[#allocation20_spill] sm:$0xff]  ;;  %v2966_v32 = vsel %vm2954_vm8, %v2962_v14, %v11622_v6 }
 0x1d7   : > { %v11755_v44 = vpop.f32.mrf.mxu2  ;;  %3375 = vperm.xlu2 %10311, %v11761_v11   ;;  %3445 = vperm.xlu1 %10310, %v3232_v35   ;;  %v1685_v61 = vadd.f32 %v15265_v26, %v11224_v25  ;;  %v2538_v35 = vrot.slane %v15096_v39, 1  ;;  %15269 = vst [vmem:[#allocation77_spill] sm:$0xff] %v11810_v3 }
 0x1d8   : > { %15261 = vst [vmem:[#allocation19_spill] sm:$0xff] %v11753_v46  ;;  %v11778_v62 = vpop.f32.mrf.mxu3  ;;  %4101 = vperm.xlu0 %10309, %v11769_v49  }
 0x1d9   : > { %15262 = vst [vmem:[#allocation74_spill] sm:$0xff] %v11755_v44  ;;  %v1589_v1 = vpop.f32.mrf.mxu1  ;;  %v2539_v26 = vsel %vm2009_vm6, %v2534_v5, %v2538_v35  ;;  %v15272_v5 = vld [vmem:[#allocation22_spill] sm:$0xff] }
 0x1da   : > { %v11776_v55 = vadd.f32 %v1589_v1, %v15263_v22  ;;  %15264 = vst [vmem:[#allocation12_spill] sm:$0xff] %v11778_v62  ;;  %v11794_v1 = vld [vmem:[%s10497_s12 + $0x50] sm:$0xff]  ;;  %v1686_v25 = vadd.f32 %v15272_v5, %v11250_v30  ;;  %v11844_v30 = vld [vmem:[%s15034_s1 + $0xa0] sm:$0xff] }
 0x1db   : > { %15280 = vst [vmem:[#allocation78_spill] sm:$0xff] %v11844_v30 }
 0x1dc   : > { %9010 = vmatmul.msk.bf16.gmra.mxu1 %vm565_vm2, %v2069_v51  ;;  %v11805_v51 = vld [vmem:[%s15034_s1 + $0x88] sm:$0xff] }
 0x1dd   : > { %v1819_v47 = vpop.f32.mrf.mxu0  ;;  %15268 = vst [vmem:[#allocation76_spill] sm:$0xff] %v11805_v51 }
 0x1de   : > { %v11796_v22 = vadd.f32 %v1819_v47, %v1685_v61  ;;  %v2070_v61 = vshrl.u32 %v11706_v56, 16  ;;  %v2074_v47 = vshll.u32 %v11794_v1, 16  ;;  %v15273_v56 = vrot.slane %v11785_v4, 1 }
 0x1df   : > { %v11798_v62 = vpop.f32.mrf.mxu2  ;;  %3390 = vperm.xlu2 %10311, %v11805_v51   ;;  %3460 = vperm.xlu1 %10310, %v11810_v3   ;;  %v2346_v3 = vld [vmem:[%s10497_s12 + $0x98] sm:$0x1] }
 0x1e0   : > { %15266 = vst [vmem:[#allocation20_spill] sm:$0xff] %v11796_v22  ;;  %9115 = vmatmul.msk.bf16.vlgmr.msra.gmra.mxu0 %vm565_vm2, %v2966_v32  ;;  %v15270_v32 = vld [vmem:[#allocation13_spill] sm:$0xff]  ;;  %v11820_v24 = vpop.f32.mrf.mxu3  ;;  %7015 = vperm.xlu0 %10309, %v11332_v58   ;;  %v2072_v22 = vor.u32 %v2070_v61, %v2068_v48  ;;  %v2076_v46 = vrot.slane %v2074_v47, 1  ;;  %v11849_v48 = vld [vmem:[%s15034_s1 + $0x110] sm:$0xff]  ;;  %v15281_v47 = vld [vmem:[#allocation14_spill] sm:$0xff] }
 0x1e1   : > { %15267 = vst [vmem:[#allocation75_spill] sm:$0xff] %v11798_v62  ;;  %v1591_v14 = vpop.f32.mrf.mxu1  ;;  %v15274_v62 = vrot.slane %v11703_v63, 1 }
 0x1e2   : > { %v11818_v39 = vadd.f32 %v1591_v14, %v15270_v32  ;;  %15271 = vst [vmem:[#allocation13_spill] sm:$0xff] %v11820_v24  ;;  %v15275_v14 = vld [vmem:[#allocation21_spill] sm:$0xff] }
 0x1e3   : > { %v2773_v44 = vsel %vm2742_vm5, %v15274_v62, %v15273_v56  ;;  %v15276_v32 = vshrl.u32 %v15275_v14, 16  ;;  %v15277_v24 = vshll.u32 %v15275_v14, 16  ;;  %v2414_v62 = vunpack.c.l.b16 %v2346_v3 }
 0x1e4   : > { %9093 = vmatmul.msk.bf16.gmra.mxu2 %vm565_vm2, %v2539_v26  ;;  %9112 = vmatmul.msk.bf16.gmra.mxu3 %vm565_vm2, %v2773_v44  ;;  %v15103_v44 = vshrl.u32 %v11612_v8, 16  ;;  %v11910_v8 = vld [vmem:[%s10497_s12 + $0x8c] sm:$0xff] }
 0x1e5   : > { %v1821_v45 = vpop.f32.mrf.mxu0  ;;  %v2967_v34 = vrot.slane %v15276_v32, 1  ;;  %v2968_v58 = vrot.slane %v15277_v24, 2  ;;  %v2077_v24 = vsel %vm2009_vm6, %v2072_v22, %v2076_v46  ;;  %v11867_v56 = vpack.c.b16 %v2414_v62, %v2414_v62 }
 0x1e6   : > { %v11836_v26 = vadd.f32 %v1821_v45, %v1686_v25  ;;  %v15102_v25 = vshll.u32 %v11703_v63, 16 }
 0x1e7   : > { %v11838_v51 = vpop.f32.mrf.mxu2  ;;  %v11852_v45 = vor.u32 %v2968_v58, %v2967_v34  ;;  %3405 = vperm.xlu2 %10311, %v11844_v30   ;;  %4106 = vperm.xlu1 %10310, %v11849_v48   ;;  %v15283_v34 = vld [vmem:[#allocation23_spill] sm:$0xff]  ;;  %v2542_v58 = vor.u32 %v15103_v44, %v2538_v35 }
 0x1e8   : > { %15278 = vst [vmem:[#allocation22_spill] sm:$0xff] %v11836_v26  ;;  %v11861_v3 = vpop.f32.mrf.mxu3  ;;  %7030 = vperm.xlu0 %10309, %v11436_v28   ;;  %v1687_v22 = vadd.f32 %v15283_v34, %v11268_v38  ;;  %v11880_v28 = vld [vmem:[%s10497_s12 + $0x88] sm:$0xf]  ;;  %v3565_v38 = vld [vmem:[%s10497_s12 + $0x84] sm:$0x8] }
 0x1e9   : > { %15279 = vst [vmem:[#allocation21_spill] sm:$0xff] %v11838_v51  ;;  %v1594_v61 = vpop.f32.mrf.mxu1  ;;  %v2970_v32 = vsel %vm2954_vm8, %v11622_v6, %v11852_v45  ;;  %v3227_v6 = vld [vmem:[%s15034_s1 + $0xb8] sm:$0xff]  ;;  %v3572_v35 = vunpack.c.l.b16 %v3565_v38 }
 0x1ea   : > { %v11859_v5 = vadd.f32 %v1594_v61, %v15281_v47  ;;  %15282 = vst [vmem:[#allocation14_spill] sm:$0xff] %v11861_v3  ;;  %v2546_v61 = vrot.slane %v15102_v25, 1  ;;  %v11877_v47 = vld [vmem:[%s10497_s12 + $0x58] sm:$0xff] }
 0x1eb   : > { %v15288_v38 = vld [vmem:[#allocation25_spill] sm:$0xff] }
 0x1ec   : > { %9011 = vmatmul.msk.bf16.gmra.mxu1 %vm565_vm2, %v2077_v24  ;;  %v2774_v24 = vrot.slane %v11867_v56, 1  ;;  %v2547_v3 = vsel %vm2009_vm6, %v2542_v58, %v2546_v61  ;;  %v1688_v25 = vadd.f32 %v15288_v38, %v11291_v40  ;;  %v15289_v58 = vrot.slane %v11785_v4, 1 }
 0x1ed   : > { %v1824_v14 = vpop.f32.mrf.mxu0 }
 0x1ee   : > { %v11883_v34 = vadd.f32 %v1824_v14, %v1687_v22  ;;  %v2078_v22 = vshrl.u32 %v11794_v1, 16  ;;  %v2082_v14 = vshll.u32 %v11877_v47, 16  ;;  %v2775_v1 = vsel %vm2742_vm5, %v15289_v58, %v2774_v24 }
 0x1ef   : > { %v11885_v62 = vpop.f32.mrf.mxu2  ;;  %3420 = vperm.xlu2 %10311, %v3227_v6   ;;  %7020 = vperm.xlu1 %10310, %v11360_v41   ;;  %v15290_v41 = vunpack.c.l.b16 %v11880_v28  ;;  %v1859_v24 = vadd.f32 %v11230_v60, %v11776_v55  ;;  %v15109_v60 = vshrl.u32 %v11703_v63, 16 }
 0x1f0   : > { %15284 = vst [vmem:[#allocation23_spill] sm:$0xff] %v11883_v34  ;;  %9116 = vmatmul.msk.bf16.gmra.mxu0 %vm565_vm2, %v2970_v32  ;;  %v15286_v32 = vld [vmem:[#allocation16_spill] sm:$0xff]  ;;  %v11900_v51 = vpop.f32.mrf.mxu3  ;;  %7045 = vperm.xlu0 %10309, %v11409_v33  }
 0x1f1   : > { %15285 = vst [vmem:[#allocation79_spill] sm:$0xff] %v11885_v62  ;;  %v1596_v44 = vpop.f32.mrf.mxu1  ;;  %v11914_v6 = vpack.c.b16 %v15290_v41, %v3572_v35  ;;  %v15291_v34 = vld [vmem:[#allocation24_spill] sm:$0xff]  ;;  %v15108_v35 = vshrl.u32 %v11910_v8, 16 }
 0x1f2   : > { %v11898_v62 = vadd.f32 %v1596_v44, %v15286_v32  ;;  %15287 = vst [vmem:[#allocation16_spill] sm:$0xff] %v11900_v51  ;;  %v2080_v32 = vor.u32 %v2078_v22, %v2076_v46  ;;  %v2084_v51 = vrot.slane %v2082_v14, 1  ;;  %v15292_v33 = vshrl.u32 %v15291_v34, 16  ;;  %v11930_v46 = vld [vmem:[%s15034_s1 + $0xd0] sm:$0xff] }
 0x1f3   : > { %v15107_v22 = vshll.u32 %v11910_v8, 16 }
 0x1f4   : > { %9094 = vmatmul.msk.bf16.gmra.mxu2 %vm565_vm2, %v2547_v3  ;;  %v2971_v26 = vrot.slane %v15292_v33, 1  ;;  %v15293_v3 = vshll.u32 %v15291_v34, 16  ;;  %9113 = vmatmul.msk.bf16.gmra.mxu3 %vm565_vm2, %v2775_v1  ;;  %v3676_v34 = vshrl.u32 %v11914_v6, 16  ;;  %v2085_v58 = vsel %vm2009_vm6, %v2080_v32, %v2084_v51  ;;  %v15296_v32 = vld [vmem:[#allocation26_spill] sm:$0xff] }
 0x1f5   : > { %v1826_v44 = vpop.f32.mrf.mxu0  ;;  %v3684_v55 = vrot.slane %v15107_v22, 4  ;;  %v15299_v22 = vld [vmem:[#allocation39_spill] sm:$0xff] }
 0x1f6   : > { %v2972_v30 = vrot.slane %v15293_v3, 2  ;;  %v11920_v40 = vadd.f32 %v1826_v44, %v1688_v25  ;;  %v3679_v25 = vshll.u32 %v11914_v6, 16  ;;  %v3683_v3 = vrot.slane %v15108_v35, 3 }
 0x1f7   : > { %v11922_v38 = vpop.f32.mrf.mxu2  ;;  %3435 = vperm.xlu2 %10311, %v11930_v46   ;;  %7035 = vperm.xlu1 %10310, %v11580_v31   ;;  %v1860_v35 = vadd.f32 %v15299_v22, %v11818_v39 }
 0x1f8   : > { %15294 = vst [vmem:[#allocation25_spill] sm:$0xff] %v11922_v38  ;;  %v11937_v41 = vor.u32 %v2972_v30, %v2971_v26  ;;  %v11945_v44 = vpop.f32.mrf.mxu3  ;;  %7060 = vperm.xlu0 %10309, %v11441_v23   ;;  %v1689_v26 = vadd.f32 %v15296_v32, %v11307_v13  ;;  %v3678_v30 = vrot.slane %v3676_v34, 3  ;;  %v3681_v33 = vrot.slane %v3679_v25, 4  ;;  %v3670_v34 = vld [vmem:[%s10497_s12 + $0x94] sm:$0xf] }
 0x1f9   : > { %v2202_v14 = vpop.f32.mrf.mxu1  ;;  %15295 = vst [vmem:[#allocation24_spill] sm:$0xff] %v11945_v44  ;;  %v2550_v23 = vor.u32 %v15109_v60, %v2546_v61  ;;  %v15297_v13 = vshll.u32 %v11785_v4, 16  ;;  %v11978_v61 = vld [vmem:[%s15034_s1 + $0xe8] sm:$0xff] }
 0x1fa   : > { %v11943_v1 = vadd.f32 %v2202_v14, %v1859_v24  ;;  %v2974_v24 = vsel %vm2954_vm8, %v11852_v45, %v11937_v41  ;;  %v3682_v44 = vor.u32 %v3681_v33, %v3678_v30  ;;  %v11973_v45 = vor.u32 %v3684_v55, %v3683_v3  ;;  %v15301_v55 = vld [vmem:[#allocation28_spill] sm:$0xff] }
 0x1fb   : > { %v2554_v14 = vrot.slane %v15297_v13, 1  ;;  %v3673_v13 = vunpack.c.l.b16 %v3670_v34  ;;  %v1690_v30 = vadd.f32 %v15301_v55, %v11341_v19  ;;  %v15302_v34 = vld [vmem:[#allocation27_spill] sm:$0xff]  ;;  %v12007_v19 = vld [vmem:[%s15034_s1 + $0x100] sm:$0xff] }
 0x1fc   : > { %9012 = vmatmul.msk.bf16.gmra.mxu1 %vm565_vm2, %v2085_v58  ;;  %v11963_v58 = vld [vmem:[%s10497_s12 + $0x60] sm:$0xff] }
 0x1fd   : > { %v1829_v31 = vpop.f32.mrf.mxu0  ;;  %v3674_v33 = vpack.c.b16 %v3673_v13, %v3673_v13 }
 0x1fe   : > { %v11966_v25 = vadd.f32 %v1829_v31, %v1689_v26  ;;  %v2555_v26 = vsel %vm2009_vm6, %v2550_v23, %v2554_v14  ;;  %v2086_v31 = vshrl.u32 %v11877_v47, 16  ;;  %v3686_v47 = vsel %vm1009_vm3, %v3682_v44, %v11973_v45 }
 0x1ff   : > { %v11968_v32 = vpop.f32.mrf.mxu2  ;;  %3450 = vperm.xlu2 %10311, %v11978_v61   ;;  %7050 = vperm.xlu1 %10310, %v11477_v50   ;;  %v15303_v50 = vshrl.u32 %v15302_v34, 16  ;;  %v3691_v13 = vshll.u32 %v3674_v33, 16 }
 0x200   : > { %15298 = vst [vmem:[#allocation26_spill] sm:$0xff] %v11968_v32  ;;  %9117 = vmatmul.msk.bf16.gmra.mxu0 %vm565_vm2, %v2974_v24  ;;  %v2090_v32 = vshll.u32 %v11963_v58, 16  ;;  %v11987_v22 = vpop.f32.mrf.mxu3  ;;  %7075 = vperm.xlu0 %10309, %v11482_v16   ;;  %v2088_v24 = vor.u32 %v2086_v31, %v2084_v51  ;;  %v15305_v51 = vld [vmem:[#allocation42_spill] sm:$0xff] }
 0x201   : > { %v2204_v60 = vpop.f32.mrf.mxu1  ;;  %15300 = vst [vmem:[#allocation39_spill] sm:$0xff] %v11987_v22  ;;  %v1861_v44 = vadd.f32 %v15305_v51, %v11859_v5  ;;  %v3559_v5 = vld [vmem:[%s10497_s12 + $0x84] sm:$0xc] }
 0x202   : > { %v11985_v39 = vadd.f32 %v2204_v60, %v1860_v35  ;;  %v2092_v23 = vrot.slane %v2090_v32, 1  ;;  %v2975_v35 = vrot.slane %v15303_v50, 1  ;;  %v15304_v60 = vshll.u32 %v15302_v34, 16 }
 0x203   : > { %v3688_v32 = vshrl.u32 %v3674_v33, 16  ;;  %v12025_v33 = vld [vmem:[%s10497_s12 + $0x68] sm:$0xff] }
 0x204   : > { %9095 = vmatmul.msk.bf16.gmra.mxu2 %vm565_vm2, %v2555_v26  ;;  %v2976_v22 = vrot.slane %v15304_v60, 2  ;;  %9141 = vmatmul.msk.bf16.vlgmr.msra.gmra.mxu3 %vm565_vm2, %v3686_v47  ;;  %v2093_v31 = vsel %vm2009_vm6, %v2088_v24, %v2092_v23  ;;  %v2560_v47 = vshll.u32 %v11867_v56, 16  ;;  %v3693_v56 = vrot.slane %v3691_v13, 4 }
 0x205   : > { %v1831_v3 = vpop.f32.mrf.mxu0  ;;  %v3690_v50 = vrot.slane %v3688_v32, 3  ;;  %v1862_v32 = vadd.f32 %v11295_v52, %v11898_v62  ;;  %v15309_v62 = vld [vmem:[#allocation31_spill] sm:$0xff] }
 0x206   : > { %v11999_v38 = vadd.f32 %v1831_v3, %v1690_v30  ;;  %v12012_v55 = vor.u32 %v2976_v22, %v2975_v35  ;;  %v15110_v30 = vshrl.u32 %v11785_v4, 16  ;;  %v15306_v22 = vld [vmem:[#allocation29_spill] sm:$0xff]  ;;  %v2562_v51 = vrot.slane %v2560_v47, 1 }
 0x207   : > { %v12001_v16 = vpop.f32.mrf.mxu2  ;;  %4096 = vperm.xlu2 %10311, %v12007_v19   ;;  %7065 = vperm.xlu1 %10310, %v11507_v17   ;;  %v1691_v24 = vadd.f32 %v15306_v22, %v11374_v18  ;;  %v2094_v18 = vshrl.u32 %v11963_v58, 16  ;;  %v3694_v13 = vor.u32 %v3693_v56, %v3690_v50 }
 0x208   : > { %v12020_v34 = vpop.f32.mrf.mxu3  ;;  %7090 = vperm.xlu0 %10309, %v11512_v20   ;;  %v2978_v17 = vsel %vm2954_vm8, %v11937_v41, %v12012_v55  ;;  %v2558_v60 = vor.u32 %v15110_v30, %v2554_v14  ;;  %v12047_v41 = vld [vmem:[%s15034_s1 + $0x118] sm:$0xff] }
 0x209   : > { %v2207_v26 = vpop.f32.mrf.mxu1  ;;  %v2096_v50 = vor.u32 %v2094_v18, %v2092_v23  ;;  %v9742_v23 = vld [vmem:[%s10497_s12 + $0x90] sm:$0xff] }
 0x20a   : > { %v12018_v3 = vadd.f32 %v2207_v26, %v1861_v44  ;;  %v3614_v44 = vunpack.c.l.b16 %v3559_v5  ;;  %v2563_v47 = vsel %vm2009_vm6, %v2558_v60, %v2562_v51  ;;  %v15307_v5 = vunpack.c.l.b16 %v11880_v28  ;;  %v9149_v28 = vld [vmem:[%s15035_s2 + $0xa] sm:$0x3] }
 0x20c   : > { %9013 = vmatmul.msk.bf16.gmra.mxu1 %vm565_vm2, %v2093_v31  ;;  %v2098_v31 = vshll.u32 %v12025_v33, 16  ;;  %v3615_v58 = vpack.c.b16 %v15307_v5, %v3614_v44 }
 0x20d   : > { %v1834_v35 = vpop.f32.mrf.mxu0 }
 0x20e   : > { %v12035_v20 = vadd.f32 %v1834_v35, %v1691_v24  ;;  %v1692_v24 = vadd.f32 %v15309_v62, %v11420_v0  ;;  %v2100_v56 = vrot.slane %v2098_v31, 1  ;;  %v15310_v35 = vld [vmem:[#allocation30_spill] sm:$0xff]  ;;  %v3886_v0 = vsel %vm614_vm0, %v9149_v28, 0 }
 0x20f   : > { %v12037_v26 = vpop.f32.mrf.mxu2  ;;  %4111 = vperm.xlu2 %10311, %v12047_v41   ;;  %7080 = vperm.xlu1 %10310, %v11548_v42   ;;  %v15311_v42 = vshrl.u32 %v15310_v35, 16  ;;  %v15312_v60 = vshll.u32 %v15310_v35, 16  ;;  %v3617_v18 = vshrl.u32 %v3615_v58, 16  ;;  %v3620_v31 = vshll.u32 %v3615_v58, 16 }
 0x210   : > { %9118 = vmatmul.msk.bf16.gmra.mxu0 %vm565_vm2, %v2978_v17  ;;  %v12056_v52 = vpop.f32.mrf.mxu3  ;;  %7105 = vperm.xlu0 %10309, %v11553_v57   ;;  %v3695_v57 = vsel %vm1009_vm3, %v11973_v45, %v3694_v13  ;;  %v12082_v45 = vld [vmem:[%s10497_s12 + $0x98] sm:$0xff]  ;;  %v3862_v13 = vshll.u32 %v9742_v23, 16  ;;  %v15313_v58 = vshrl.u32 %v11910_v8, 16 }
 0x211   : > { %v2209_v14 = vpop.f32.mrf.mxu1  ;;  %15308 = vst [vmem:[#allocation28_spill] sm:$0xff] %v12056_v52  ;;  %v2979_v17 = vrot.slane %v15311_v42, 1  ;;  %v2980_v51 = vrot.slane %v15312_v60, 2  ;;  %3895 = vmatpush.bf16.msrb.mxu3 %v3886_v0  ;;  %v3619_v28 = vrot.slane %v3617_v18, 2  ;;  %v3622_v35 = vrot.slane %v3620_v31, 3 }
 0x212   : > { %v12054_v22 = vadd.f32 %v2209_v14, %v1862_v32  ;;  %v15314_v42 = vshll.u32 %v11910_v8, 16  ;;  %v3860_v18 = vshrl.u32 %v9742_v23, 16  ;;  %v3864_v31 = vrot.slane %v3862_v13, 1  ;;  %v9146_v23 = vld [vmem:[%s15035_s2 + $0x8] sm:$0x3] }
 0x213   : > { %v12079_v5 = vor.u32 %v2980_v51, %v2979_v17  ;;  %v3563_v51 = vld [vmem:[%s10497_s12 + $0x94] sm:$0x7] }
 0x214   : > { %9096 = vmatmul.msk.bf16.gmra.mxu2 %vm565_vm2, %v2563_v47  ;;  %9142 = vmatmul.msk.bf16.gmra.mxu3 %vm565_vm2, %v3695_v57  ;;  %v2101_v47 = vsel %vm2009_vm6, %v2096_v50, %v2100_v56  ;;  %v3630_v60 = vrot.slane %v15314_v42, 3  ;;  %v15316_v57 = vld [vmem:[#allocation32_spill] sm:$0xff] }
 0x215   : > { %v1836_v44 = vpop.f32.mrf.mxu0  ;;  %v1693_v0 = vadd.f32 %v15316_v57, %v11452_v9  ;;  %v3865_v57 = vor.u32 %v3864_v31, %v3860_v18  ;;  %v15319_v18 = vld [vmem:[#allocation35_spill] sm:$0xff] }
 0x216   : > { %v12073_v32 = vadd.f32 %v1836_v44, %v1692_v24  ;;  %v3627_v24 = vrot.slane %v15313_v58, 2  ;;  %v12101_v44 = vld [vmem:[%s10497_s12 + $0x70] sm:$0xff]  ;;  %v1694_v31 = vadd.f32 %v15319_v18, %v11493_v21  ;;  %v15323_v18 = vld [vmem:[#allocation50_spill] sm:$0xff] }
 0x217   : > { %v12075_v14 = vpop.f32.mrf.mxu2  ;;  %7025 = vperm.xlu2 %10311, %v11404_v54   ;;  %7095 = vperm.xlu1 %10310, %v11585_v59   ;;  %v3867_v54 = vshll.u32 %v12082_v45, 16  ;;  %v2106_v13 = vshll.u32 %v12101_v44, 16 }
 0x218   : > { %v12093_v17 = vpop.f32.mrf.mxu3  ;;  %7160 = vperm.xlu0 %10309, %v11978_v61   ;;  %v3631_v58 = vor.u32 %v3630_v60, %v3627_v24  ;;  %v3576_v61 = vunpack.c.l.b16 %v3563_v51  ;;  %v15317_v51 = vld [vmem:[#allocation47_spill] sm:$0xff] }
 0x219   : > { %v2212_v62 = vpop.f32.mrf.mxu1  ;;  %15315 = vst [vmem:[#allocation27_spill] sm:$0xff] %v12093_v17  ;;  %v1923_v17 = vld [vmem:[%s10497_s12 + $0x90] sm:$0x1] }
 0x21a   : > { %v12091_v50 = vadd.f32 %v2212_v62, %v11323_v29  ;;  %v2982_v29 = vsel %vm2954_vm8, %v12012_v55, %v12079_v5  ;;  %v3623_v62 = vor.u32 %v3622_v35, %v3619_v28  ;;  %v3869_v55 = vrot.slane %v3867_v54, 1 }
 0x21b   : > { %v3815_v28 = vsel %vm614_vm0, %v9146_v23, 0  ;;  %v12119_v60 = vpack.c.b16 %v3576_v61, %v3576_v61  ;;  %v15320_v23 = vld [vmem:[#allocation34_spill] sm:$0xff] }
 0x21c   : > { %9014 = vmatmul.msk.bf16.gmra.mxu1 %vm565_vm2, %v2101_v47  ;;  %v2102_v47 = vshrl.u32 %v12025_v33, 16  ;;  %v3632_v24 = vsel %vm710_vm4, %v3623_v62, %v3631_v58  ;;  %3824 = vmatpush.bf16.msrb.mxu2 %v3815_v28  ;;  %v3844_v33 = vld [vmem:[%s10497_s12 + $0xa0] sm:$0x1]  ;;  %v3870_v62 = vsel %vm2009_vm6, %v3865_v57, %v3869_v55  ;;  %v15321_v28 = vshrl.u32 %v15320_v23, 16 }
 0x21d   : > { %v1839_v59 = vpop.f32.mrf.mxu0 }
 0x21e   : > { %v12107_v42 = vadd.f32 %v1839_v59, %v1693_v0  ;;  %v2104_v54 = vor.u32 %v2102_v47, %v2100_v56 }
 0x21f   : > { %v12109_v9 = vpop.f32.mrf.mxu2  ;;  %7040 = vperm.xlu2 %10311, %v11633_v12   ;;  %7110 = vperm.xlu1 %10310, %v11638_v36   ;;  %v3855_v12 = vunpack.c.l.b16 %v3844_v33  ;;  %v3634_v36 = vshrl.u32 %v12119_v60, 16 }
 0x220   : > { %9119 = vmatmul.msk.bf16.gmra.mxu0 %vm565_vm2, %v2982_v29  ;;  %v12126_v59 = vpop.f32.mrf.mxu3  ;;  %7806 = vperm.xlu0 %10309, %v12007_v19   ;;  %v2108_v29 = vrot.slane %v2106_v13, 1  ;;  %v3637_v19 = vshll.u32 %v12119_v60, 16 }
 0x221   : > { %v2214_v35 = vpop.f32.mrf.mxu1  ;;  %15318 = vst [vmem:[#allocation42_spill] sm:$0xff] %v12126_v59  ;;  %v3858_v56 = vpack.c.b16 %v3855_v12, %v3855_v12 }
 0x222   : > { %v12124_v0 = vadd.f32 %v2214_v35, %v15317_v51  ;;  %v2983_v35 = vrot.slane %v15321_v28, 1  ;;  %v15322_v51 = vshll.u32 %v15320_v23, 16  ;;  %v2109_v13 = vsel %vm2009_vm6, %v2104_v54, %v2108_v29 }
 0x223   : > { %v3639_v33 = vrot.slane %v3637_v19, 3  ;;  %v3875_v54 = vshll.u32 %v3858_v56, 16  ;;  %v2110_v19 = vshrl.u32 %v12101_v44, 16  ;;  %v15329_v44 = vld [vmem:[#allocation38_spill] sm:$0xff] }
 0x224   : > { %9138 = vmatmul.msk.bf16.vlgmr.msra.gmra.mxu2 %vm565_vm2, %v3632_v24  ;;  %v2984_v30 = vrot.slane %v15322_v51, 2  ;;  %9158 = vmatmul.msk.bf16.vlgmr.msrb.gmra.mxu3 %vm565_vm2, %v3870_v62  ;;  %v3636_v24 = vrot.slane %v3634_v36, 2  ;;  %v15325_v62 = vld [vmem:[#allocation36_spill] sm:$0xff] }
 0x225   : > { %v1841_v61 = vpop.f32.mrf.mxu0  ;;  %v1695_v12 = vadd.f32 %v15325_v62, %v11523_v27  ;;  %v3877_v51 = vrot.slane %v3875_v54, 1  ;;  %v12193_v62 = vld [vmem:[%s10497_s12 + $0xa0] sm:$0xff] }
 0x226   : > { %v12140_v59 = vadd.f32 %v1841_v61, %v1694_v31  ;;  %v12146_v57 = vor.u32 %v2984_v30, %v2983_v35  ;;  %v3871_v30 = vshrl.u32 %v12082_v45, 16  ;;  %v3640_v28 = vor.u32 %v3639_v33, %v3636_v24  ;;  %v12164_v35 = vld [vmem:[%s10497_s12 + $0x78] sm:$0xff] }
 0x227   : > { %v12142_v21 = vpop.f32.mrf.mxu2  ;;  %7055 = vperm.xlu2 %10311, %v11677_v7   ;;  %7165 = vperm.xlu1 %10310, %v11736_v53   ;;  %v2114_v56 = vshll.u32 %v12164_v35, 16  ;;  %v15330_v54 = vld [vmem:[#allocation37_spill] sm:$0xff] }
 0x228   : > { %v12152_v31 = vpop.f32.mrf.mxu3  ;;  %7811 = vperm.xlu0 %10309, %v11769_v49   ;;  %v2986_v61 = vsel %vm2954_vm8, %v12079_v5, %v12146_v57  ;;  %v3873_v27 = vor.u32 %v3871_v30, %v3869_v55  ;;  %v3641_v36 = vsel %vm710_vm4, %v3631_v58, %v3640_v28  ;;  %v10003_v5 = vld [vmem:[%s10497_s12 + $0x98] sm:$0xf0]  ;;  %v9170_v58 = vld [vmem:[%s15035_s2 + $0x10] sm:$0x3]  ;;  %v2112_v30 = vor.u32 %v2110_v19, %v2108_v29 }
 0x229   : > { %v2217_v47 = vpop.f32.mrf.mxu1  ;;  %15324 = vst [vmem:[#allocation29_spill] sm:$0xff] %v12152_v31  ;;  %v15332_v28 = vshll.u32 %v15330_v54, 16 }
 0x22a   : > { %v12150_v23 = vadd.f32 %v2217_v47, %v15323_v18  ;;  %v10004_v47 = vld [vmem:[%s10497_s12 + $0x98] sm:$0xe]  ;;  %v3878_v55 = vsel %vm2009_vm6, %v3873_v27, %v3877_v51  ;;  %v4057_v18 = vsel %vm614_vm0, %v9170_v58, 0  ;;  %v15112_v27 = vshll.u32 %v12193_v62, 16 }
 0x22b   : > { %4066 = vmatpush.bf16.msra.mxu3 %v4057_v18  ;;  %v15111_v51 = vshrl.u32 %v12193_v62, 16 }
 0x22c   : > { %9015 = vmatmul.msk.bf16.gmra.mxu1 %vm565_vm2, %v2109_v13  ;;  %v15327_v13 = vld [vmem:[#allocation52_spill] sm:$0xff] }
 0x22d   : > { %v1844_v7 = vpop.f32.mrf.mxu0 }
 0x22e   : > { %v12166_v53 = vadd.f32 %v1844_v7, %v1695_v12  ;;  %v12195_v12 = vor.u32 %v10004_v47, %v10003_v5  ;;  %v15331_v7 = vshrl.u32 %v15330_v54, 16 }
 0x22f   : > { %v12168_v49 = vpop.f32.mrf.mxu2  ;;  %7070 = vperm.xlu2 %10311, %v11723_v10   ;;  %7120 = vperm.xlu1 %10310, %v11590_v15   ;;  %v1696_v10 = vadd.f32 %v15329_v44, %v11564_v2 }
 0x230   : > { %15326 = vst [vmem:[#allocation31_spill] sm:$0xff] %v12168_v49  ;;  %9120 = vmatmul.msk.bf16.gmra.mxu0 %vm565_vm2, %v2986_v61  ;;  %v12180_v33 = vpop.f32.mrf.mxu3  ;;  %7135 = vperm.xlu0 %10309, %v11643_v43   ;;  %v2116_v43 = vrot.slane %v2114_v56, 1  ;;  %v2987_v61 = vrot.slane %v15331_v7, 1  ;;  %v4030_v29 = vshrl.u32 %v12195_v12, 16  ;;  %v4033_v19 = vshll.u32 %v12195_v12, 16  ;;  %v12229_v7 = vld [vmem:[%s10497_s12 + $0x80] sm:$0xff] }
 0x231   : > { %v2219_v45 = vpop.f32.mrf.mxu1  ;;  %15328 = vst [vmem:[#allocation30_spill] sm:$0xff] %v12180_v33 }
 0x232   : > { %v12178_v24 = vadd.f32 %v2219_v45, %v15327_v13  ;;  %v2988_v45 = vrot.slane %v15332_v28, 2  ;;  %v2117_v5 = vsel %vm2009_vm6, %v2112_v30, %v2116_v43  ;;  %v15334_v13 = vld [vmem:[#allocation55_spill] sm:$0xff]  ;;  %v4032_v18 = vrot.slane %v4030_v29, 1 }
 0x233   : > { %v4038_v30 = vrot.slane %v15112_v27, 2  ;;  %v9167_v28 = vld [vmem:[%s15035_s2 + $0xe] sm:$0x3] }
 0x234   : > { %9139 = vmatmul.msk.bf16.gmra.mxu2 %vm565_vm2, %v3641_v36  ;;  %9159 = vmatmul.msk.bf16.gmra.mxu3 %vm565_vm2, %v3878_v55  ;;  %v2989_v47 = vor.u32 %v2988_v45, %v2987_v61 }
 0x235   : > { %v1846_v15 = vpop.f32.mrf.mxu0 }
 0x236   : > { %v12201_v36 = vadd.f32 %v1846_v15, %v1696_v10  ;;  %v15336_v10 = vld [vmem:[#allocation40_spill] sm:$0xff]  ;;  %v4035_v15 = vrot.slane %v4033_v19, 2  ;;  %v3999_v19 = vsel %vm614_vm0, %v9167_v28, 0 }
 0x237   : > { %v12203_v2 = vpop.f32.mrf.mxu2  ;;  %7085 = vperm.xlu2 %10311, %v11761_v11   ;;  %7816 = vperm.xlu1 %10310, %v11849_v48   ;;  %v1697_v55 = vadd.f32 %v15336_v10, %v11606_v37  ;;  %v4037_v11 = vrot.slane %v15111_v51, 1  ;;  %v2990_v48 = vsel %vm2954_vm8, %v12146_v57, %v2989_v47  ;;  %v10000_v57 = vld [vmem:[%s10497_s12 + $0x90] sm:$0xff]   ;;  %v2122_v10 = vshll.u32 %v12229_v7, 16 }
 0x238   : > { %15333 = vst [vmem:[#allocation32_spill] sm:$0xff] %v12203_v2  ;;  %v12215_v44 = vpop.f32.mrf.mxu3  ;;  %7145 = vperm.xlu0 %10309, %v11930_v46   ;;  %v4024_v46 = vld [vmem:[%s10497_s12 + $0xa8] sm:$0x3]  ;;  %v4036_v45 = vor.u32 %v4035_v15, %v4032_v18  ;;  %4008 = vmatpush.bf16.msra.mxu2 %v3999_v19  ;;  %v15341_v18 = vld [vmem:[#allocation71_spill] sm:$0xff]  ;;  %v15343_v19 = vld [vmem:[#allocation41_spill] sm:$0xff] }
 0x239   : > { %v2222_v56 = vpop.f32.mrf.mxu1  ;;  %15335 = vst [vmem:[#allocation47_spill] sm:$0xff] %v12215_v44  ;;  %v4039_v29 = vor.u32 %v4038_v30, %v4037_v11  ;;  %v15342_v15 = vld [vmem:[#allocation43_spill] sm:$0xff]  ;;  %v2124_v28 = vrot.slane %v2122_v10, 1  ;;  %v6941_v10 = vld [vmem:[%s15034_s1 + $0xd8] sm:$0xff] }
 0x23a   : > { %v12213_v58 = vadd.f32 %v2222_v56, %v15334_v13  ;;  %v4027_v56 = vunpack.c.l.b16 %v4024_v46  ;;  %v2118_v13 = vshrl.u32 %v12164_v35, 16  ;;  %v1698_v11 = vadd.f32 %v15342_v15, %v15341_v18  ;;  %v15349_v15 = vld [vmem:[#allocation61_spill] sm:$0xff] }
 0x23b   : > { %v4040_v30 = vsel %vm2954_vm8, %v4036_v45, %v4039_v29  ;;  %v15374_v2 = vld [vmem:[#allocation49_spill] sm:$0xff] }
 0x23c   : > { %9016 = vmatmul.msk.bf16.gmra.mxu1 %vm565_vm2, %v2117_v5  ;;  %v4028_v35 = vpack.c.b16 %v4027_v56, %v4027_v56  ;;  %v2120_v46 = vor.u32 %v2118_v13, %v2116_v43  ;;  %v15348_v13 = vld [vmem:[#allocation78_spill] sm:$0xff] }
 0x23d   : > { %v1849_v54 = vpop.f32.mrf.mxu0 }
 0x23e   : > { %v12232_v61 = vadd.f32 %v1849_v54, %v1697_v55  ;;  %v15338_v55 = vld [vmem:[#allocation76_spill] sm:$0xff]  ;;  %v15339_v54 = vld [vmem:[#allocation57_spill] sm:$0xff]  ;;  %v4045_v18 = vshll.u32 %v4028_v35, 16  ;;  %v2125_v56 = vsel %vm2009_vm6, %v2120_v46, %v2124_v28 }
 0x23f   : > { %v12234_v37 = vpop.f32.mrf.mxu2  ;;  %7100 = vperm.xlu2 %10311, %v15338_v55   ;;  %7821 = vperm.xlu1 %10310, %v12047_v41   ;;  %v15344_v55 = vshrl.u32 %v15343_v19, 16 }
 0x240   : > { %15337 = vst [vmem:[#allocation35_spill] sm:$0xff] %v12234_v37  ;;  %9121 = vmatmul.msk.bf16.gmra.mxu0 %vm565_vm2, %v2990_v48  ;;  %v12248_v27 = vpop.f32.mrf.mxu3 }
 0x241   : > { %v2224_v5 = vpop.f32.mrf.mxu1  ;;  %15340 = vst [vmem:[#allocation34_spill] sm:$0xff] %v12248_v27  ;;  %v2991_v44 = vrot.slane %v15344_v55, 1 }
 0x242   : > { %v12246_v51 = vadd.f32 %v2224_v5, %v15339_v54  ;;  %v15345_v5 = vshll.u32 %v15343_v19, 16  ;;  %v15352_v19 = vld [vmem:[#allocation44_spill] sm:$0xff] }
 0x244   : > { %9147 = vmatmul.msk.bf16.vlgmr.msrb.gmra.mxu2 %vm565_vm2, %v10000_v57  ;;  %v2992_v54 = vrot.slane %v15345_v5, 2  ;;  %9171 = vmatmul.msk.bf16.vlgmr.msra.gmra.mxu3 %vm565_vm2, %v4040_v30  ;;  %v4042_v57 = vshrl.u32 %v4028_v35, 16  ;;  %v15351_v30 = vld [vmem:[#allocation73_spill] sm:$0xff] }
 0x245   : > { %v1851_v48 = vpop.f32.mrf.mxu0  ;;  %v1699_v35 = vadd.f32 %v15352_v19, %v15351_v30  ;;  %v2126_v30 = vshrl.u32 %v12229_v7, 16  ;;  %v15359_v7 = vld [vmem:[#allocation46_spill] sm:$0xff] }
 0x246   : > { %v12259_v27 = vadd.f32 %v1851_v48, %v1698_v11  ;;  %v2993_v43 = vor.u32 %v2992_v54, %v2991_v44  ;;  %v4044_v46 = vrot.slane %v4042_v57, 1  ;;  %v4047_v44 = vrot.slane %v4045_v18, 2  ;;  %v12279_v54 = vld [vmem:[%s10497_s12 + $0x88] sm:$0xff]  ;;  %v15355_v18 = vld [vmem:[#allocation77_spill] sm:$0xff] }
 0x247   : > { %v12261_v41 = vpop.f32.mrf.mxu2  ;;  %7115 = vperm.xlu2 %10311, %v15348_v13   ;;  %7150 = vperm.xlu1 %10310, %v6941_v10   ;;  %v2130_v57 = vshll.u32 %v12279_v54, 16 }
 0x248   : > { %15346 = vst [vmem:[#allocation50_spill] sm:$0xff] %v12259_v27  ;;  %v12272_v48 = vpop.f32.mrf.mxu3  ;;  %v2994_v5 = vsel %vm2954_vm8, %v2989_v47, %v2993_v43 }
 0x249   : > { %15347 = vst [vmem:[#allocation36_spill] sm:$0xff] %v12261_v41  ;;  %v2227_v45 = vpop.f32.mrf.mxu1 }
 0x24a   : > { %v12270_v11 = vadd.f32 %v2227_v45, %v15349_v15  ;;  %15350 = vst [vmem:[#allocation52_spill] sm:$0xff] %v12272_v48  ;;  %v4048_v45 = vor.u32 %v4047_v44, %v4044_v46  ;;  %v12287_v15 = vld [vmem:[%s10497_s12 + $0x98] sm:$0xff]   ;;  %v15358_v46 = vld [vmem:[#allocation11_spill] sm:$0xff] }
 0x24b   : > { %v1700_v44 = vadd.f32 %v15359_v7, %v15358_v46  ;;  %v15360_v48 = vld [vmem:[#allocation45_spill] sm:$0xff]  ;;  %v15368_v7 = vld [vmem:[#allocation48_spill] sm:$0xff] }
 0x24c   : > { %9017 = vmatmul.msk.bf16.gmra.mxu1 %vm565_vm2, %v2125_v56  ;;  %v15356_v56 = vld [vmem:[#allocation64_spill] sm:$0xff]  ;;  %v15362_v31 = vshll.u32 %v15360_v48, 16 }
 0x24d   : > { %v1854_v55 = vpop.f32.mrf.mxu0 }
 0x24e   : > { %v12281_v13 = vadd.f32 %v1854_v55, %v1699_v35  ;;  %v9266_v35 = vld [vmem:[%s15037_s4 + $0x8] sm:$0xf]  ;;  %v4049_v55 = vsel %vm2954_vm8, %v4039_v29, %v4048_v45  ;;  %v2996_v41 = vrot.slane %v15362_v31, 2  ;;  %v6936_v31 = vld [vmem:[%s15034_s1 + $0xb0] sm:$0xff] }
 0x24f   : > { %v12283_v33 = vpop.f32.mrf.mxu2  ;;  %7170 = vperm.xlu2 %10311, %v15355_v18   ;;  %v15365_v29 = vld [vmem:[#allocation58_spill] sm:$0xff] }
 0x250   : > { %15353 = vst [vmem:[#allocation38_spill] sm:$0xff] %v12281_v13  ;;  %9122 = vmatmul.msk.bf16.gmra.mxu0 %vm565_vm2, %v2994_v5  ;;  %v12295_v19 = vpop.f32.mrf.mxu3  ;;  %v4849_v5 = vsel %vm4329_vm9, %v9266_v35, 0  ;;  %v2704_v45 = vadd.f32 %v15365_v29, %v11943_v1  ;;  %v4160_v29 = vld [vmem:[%s15037_s4] sm:$0xf] }
 0x251   : > { %15354 = vst [vmem:[#allocation37_spill] sm:$0xff] %v12283_v33  ;;  %v2229_v10 = vpop.f32.mrf.mxu1  ;;  %4858 = vmatpush.bf16.msrb.mxu3 %v4849_v5 }
 0x252   : > { %v12293_v47 = vadd.f32 %v2229_v10, %v15356_v56  ;;  %15357 = vst [vmem:[#allocation55_spill] sm:$0xff] %v12295_v19  ;;  %v2128_v10 = vor.u32 %v2126_v30, %v2124_v28  ;;  %v2132_v56 = vrot.slane %v2130_v57, 1  ;;  %v15361_v19 = vshrl.u32 %v15360_v48, 16  ;;  %v15366_v48 = vld [vmem:[#allocation68_spill] sm:$0xff] }
 0x253   : > { %v1991_v57 = vunpack.c.l.b16 %v1923_v17 }
 0x254   : > { %9148 = vmatmul.msk.bf16.gmra.mxu2 %vm565_vm2, %v12287_v15  ;;  %v2995_v33 = vrot.slane %v15361_v19, 1  ;;  %9172 = vmatmul.msk.bf16.gmra.mxu3 %vm565_vm2, %v4049_v55  ;;  %v2133_v28 = vsel %vm2009_vm6, %v2128_v10, %v2132_v56  ;;  %v12330_v55 = vld [vmem:[#allocation4] ss:$0 sm:$0xff] }
 0x255   : > { %v1856_v18 = vpop.f32.mrf.mxu0  ;;  %v2008_v5 = vpack.c.b16 %v1991_v57, %v1991_v57  ;;  %v4161_v57 = vld [vmem:[#allocation2 + $0x4] sm:$0x8] }
 0x256   : > { %v12310_v37 = vadd.f32 %v1856_v18, %v1700_v44  ;;  %v12319_v30 = vor.u32 %v2996_v41, %v2995_v33  ;;  %v2916_v44 = vadd.f32 %v15368_v7, %v2704_v45  ;;  %v3987_v33 = vrot.slane %v12195_v12, 1  ;;  %v15370_v45 = vld [vmem:[#allocation62_spill] sm:$0xff] }
 0x257   : > { %v12313_v13 = vpop.f32.mrf.mxu2  ;;  %7125 = vperm.xlu2 %10311, %v6936_v31   ;;  %v15113_v41 = vrot.slane %v12193_v62, 1  ;;  %v2134_v12 = vshrl.u32 %v12279_v54, 16  ;;  %v4626_v31 = vsel %vm4329_vm9, %v4160_v29, 0  ;;  %v4197_v29 = vunpack.c.l.b16 %v4161_v57 }
 0x258   : > { %15363 = vst [vmem:[#allocation40_spill] sm:$0xff] %v12310_v37  ;;  %v12327_v46 = vpop.f32.mrf.mxu3  ;;  %v2998_v17 = vsel %vm2954_vm8, %v2993_v43, %v12319_v30  ;;  %v12347_v43 = vld [vmem:[#allocation2 + $0x8] sm:$0xf]  ;;  %4635 = vmatpush.bf16.msrb.mxu2 %v4626_v31 }
 0x259   : > { %15364 = vst [vmem:[#allocation76_spill] sm:$0xff] %v12313_v13  ;;  %v2232_v35 = vpop.f32.mrf.mxu1  ;;  %v2136_v31 = vor.u32 %v2134_v12, %v2132_v56 }
 0x25a   : > { %v12325_v19 = vadd.f32 %v2232_v35, %v15366_v48  ;;  %15367 = vst [vmem:[#allocation57_spill] sm:$0xff] %v12327_v46  ;;  %v2705_v35 = vadd.f32 %v15370_v45, %v11985_v39  ;;  %v3306_v48 = vpop.permute.xlu0 %3305  ;;  %v6937_v39 = vld [vmem:[%s15034_s1 + $0xb8] sm:$0xff]  ;;  %v3915_v46 = vld [vmem:[%s10497_s12 + $0xa8] sm:$0x1] }
 0x25c   : > { %9018 = vmatmul.msk.bf16.gmra.mxu1 %vm565_vm2, %v2133_v28 }
 0x25d   : > { %v3092_v1 = vpop.f32.mrf.mxu0 }
 0x25e   : > { %v3172_v18 = vadd.f32 %v3092_v1, %v2916_v44  ;;  %v3989_v44 = vsel %vm2742_vm5, %v3987_v33, %v15113_v41  ;;  %v2138_v1 = vshll.u32 %v2008_v5, 16  ;;  %v15373_v33 = vld [vmem:[#allocation51_spill] sm:$0xff] }
 0x25f   : > { %v12337_v10 = vpop.f32.mrf.mxu2  ;;  %7130 = vperm.xlu2 %10311, %v6937_v39   ;;  %v2917_v5 = vadd.f32 %v15373_v33, %v2705_v35 }
 0x260   : > { %15369 = vst [vmem:[#allocation71_spill] sm:$0xff] %v12337_v10  ;;  %v3239_v28 = vadd.f32 %v12330_v55, %v3172_v18  ;;  %9123 = vmatmul.msk.bf16.gmra.mxu0 %vm565_vm2, %v2998_v17  ;;  %v15371_v18 = vld [vmem:[#allocation15_spill] sm:$0xff]  ;;  %v12359_v45 = vpop.f32.mrf.mxu3  ;;  %v15114_v10 = vunpack.c.l.b16 %v12347_v43  ;;  %v2140_v37 = vrot.slane %v2138_v1, 1 }
 0x261   : > { %v2234_v7 = vpop.f32.mrf.mxu1  ;;  %15372 = vst [vmem:[#allocation43_spill] sm:$0xff] %v12359_v45  ;;  %v3926_v45 = vunpack.c.l.b16 %v3915_v46 }
 0x262   : > { %v3271_v17 = vmax.f32 %v3239_v28, 0.0  ;;  %v12357_v54 = vadd.f32 %v2234_v7, %v15371_v18  ;;  %v15375_v28 = vshrl.u32 %v15374_v2, 16  ;;  %v15376_v7 = vshll.u32 %v15374_v2, 16  ;;  %v9143_v2 = vld [vmem:[%s15035_s2 + $0x6] sm:$0x3] }
 0x263   : > { %v3780_v1 = vsel %vm614_vm0, %v9143_v2, 0 }
 0x264   : > { %v3463_v13 = vmul.f32 %v3306_v48, %v3271_v17  ;;  %9168 = vmatmul.msk.bf16.vlgmr.msra.gmra.mxu2 %vm565_vm2, %v3989_v44  ;;  %v2999_v52 = vrot.slane %v15375_v28, 1  ;;  %v3000_v18 = vrot.slane %v15376_v7, 2  ;;  %v4230_v48 = vpack.c.b16 %v15114_v10, %v4197_v29  ;;  %v15378_v44 = vld [vmem:[#allocation65_spill] sm:$0xff]  ;;  %3789 = vmatpush.bf16.msrb.mxu1 %v3780_v1  ;;  %v4127_v7 = vld [vmem:[#allocation2 + $0x4] sm:$0xc] }
 0x265   : > { %v3094_v41 = vpop.f32.mrf.mxu0  ;;  %v2706_v35 = vadd.f32 %v15378_v44, %v12018_v3  ;;  %v6939_v3 = vld [vmem:[%s15034_s1 + $0xc8] sm:$0xff]  ;;  %v15379_v17 = vld [vmem:[#allocation33_spill] sm:$0xff] }
 0x266   : > { %v3495_v27 = vpack.c.bf16 %v3463_v13, %v3463_v13  ;;  %v3173_v39 = vadd.f32 %v3094_v41, %v2917_v5  ;;  %v2141_v13 = vsel %vm2009_vm6, %v2136_v31, %v2140_v37  ;;  %v12381_v46 = vor.u32 %v3000_v18, %v2999_v52  ;;  %v3311_v5 = vpop.permute.xlu0 %3310 }
 0x267   : > { %v12369_v57 = vpop.f32.mrf.mxu2  ;;  %v12383_v41 = vpack.c.b16 %v3926_v45, %v3926_v45  ;;  %7140 = vperm.xlu2 %10311, %v6939_v3   ;;  %v4724_v37 = vshrl.u32 %v4230_v48, 16  ;;  %v4727_v52 = vshll.u32 %v4230_v48, 16  ;;  %v15381_v45 = vld [vmem:[#allocation53_spill] sm:$0xff] }
 0x268   : > { %15377 = vst [vmem:[#allocation41_spill] sm:$0xff] %v12369_v57  ;;  %v3240_v56 = vadd.f32 %v12330_v55, %v3173_v39  ;;  %v12392_v33 = vpop.f32.mrf.mxu3  ;;  %v2918_v28 = vadd.f32 %v15381_v45, %v2706_v35  ;;  %v3002_v39 = vsel %vm2954_vm8, %v12319_v30, %v12381_v46  ;;  %v4247_v30 = vrot.slane %v4230_v48, 3  ;;  %v3316_v45 = vpop.permute.xlu1 %3315  ;;  %v15386_v48 = vld [vmem:[#allocation56_spill] sm:$0xff] }
 0x269   : > { %3527 = vst.msk [vmem:[#allocation2 + $0x10] sm:$0xf] %vm393_vm7, %v3495_v27  ;;  %v2237_v12 = vpop.f32.mrf.mxu1  ;;  %v3990_v44 = vrot.slane %v12383_v41, 1  ;;  %v4726_v35 = vrot.slane %v4724_v37, 3  ;;  %v6942_v37 = vld [vmem:[%s15034_s1 + $0xe0] sm:$0xff] }
 0x26a   : > { %v3272_v27 = vmax.f32 %v3240_v56, 0.0  ;;  %v12390_v29 = vadd.f32 %v2237_v12, %v15379_v17  ;;  %15380 = vst [vmem:[#allocation78_spill] sm:$0xff] %v12392_v33  ;;  %v15382_v56 = vld [vmem:[#allocation69_spill] sm:$0xff]  ;;  %v4729_v17 = vrot.slane %v4727_v52, 4 }
 0x26b   : > { %v2707_v2 = vadd.f32 %v15382_v56, %v12054_v22  ;;  %v15384_v22 = vrot.slane %v12193_v62, 1  ;;  %v15385_v56 = vld [vmem:[#allocation19_spill] sm:$0xff] }
 0x26c   : > { %v3464_v31 = vmul.f32 %v3311_v5, %v3272_v27  ;;  %9019 = vmatmul.msk.bf16.gmra.mxu1 %vm565_vm2, %v2141_v13  ;;  %v4423_v13 = vunpack.c.l.b16 %v4127_v7 }
 0x26d   : > { %v3097_v18 = vpop.f32.mrf.mxu0 }
 0x26e   : > { %v3496_v12 = vpack.c.bf16 %v3464_v31, %v3464_v31  ;;  %v3174_v1 = vadd.f32 %v3097_v18, %v2918_v28  ;;  %v3991_v31 = vsel %vm2742_vm5, %v15384_v22, %v3990_v44  ;;  %v4730_v44 = vor.u32 %v4729_v17, %v4726_v35  ;;  %v15390_v17 = vld [vmem:[#allocation54_spill] sm:$0xff] }
 0x26f   : > { %v12402_v3 = vpop.f32.mrf.mxu2  ;;  %7155 = vperm.xlu2 %10311, %v6942_v37   ;;  %v15116_v35 = vrot.slane %v11910_v8, 3  ;;  %v15391_v37 = vshrl.u32 %v15390_v17, 16 }
 0x270   : > { %15383 = vst [vmem:[#allocation61_spill] sm:$0xff] %v12402_v3  ;;  %v12404_v27 = vld [vmem:[#allocation2 + $0xc] sm:$0xff]  ;;  %v3241_v5 = vadd.f32 %v12330_v55, %v3174_v1  ;;  %9124 = vmatmul.msk.bf16.gmra.mxu0 %vm565_vm2, %v3002_v39  ;;  %v12422_v1 = vpop.f32.mrf.mxu3  ;;  %v15388_v3 = vunpack.c.l.b16 %v12347_v43 }
 0x271   : > { %3528 = vst.msk [vmem:[#allocation2 + $0x14] sm:$0xf] %vm393_vm7, %v3496_v12  ;;  %v2239_v10 = vpop.f32.mrf.mxu1  ;;  %v4434_v28 = vshrl.u32 %v12404_v27, 16  ;;  %v4437_v18 = vshll.u32 %v12404_v27, 16  ;;  %v15115_v52 = vrot.slane %v12404_v27, 3  ;;  %v2919_v12 = vadd.f32 %v15386_v48, %v2707_v2 }
 0x272   : > { %v3273_v7 = vmax.f32 %v3241_v5, 0.0  ;;  %v12419_v39 = vadd.f32 %v2239_v10, %v15385_v56  ;;  %15387 = vst [vmem:[#allocation73_spill] sm:$0xff] %v12422_v1  ;;  %v4424_v57 = vpack.c.b16 %v15388_v3, %v4423_v13  ;;  %v3580_v5 = vrot.slane %v11914_v6, 3 }
 0x273   : > { %v4731_v22 = vrot.slane %v4434_v28, 3  ;;  %v4732_v33 = vrot.slane %v4437_v18, 4  ;;  %v12431_v10 = vsel %vm531_vm1, %v4247_v30, %v15115_v52  ;;  %v3003_v43 = vrot.slane %v15391_v37, 1 }
 0x274   : > { %v3465_v49 = vmul.f32 %v3316_v45, %v3273_v7  ;;  %9169 = vmatmul.msk.bf16.gmra.mxu2 %vm565_vm2, %v3991_v31  ;;  %15389 = vst [vmem:[#allocation44_spill] sm:$0xff] %v12431_v10  ;;  %v15392_v3 = vshll.u32 %v15390_v17, 16  ;;  %v4426_v30 = vshrl.u32 %v4424_v57, 16  ;;  %v4429_v48 = vshll.u32 %v4424_v57, 16 }
 0x275   : > { %v3099_v2 = vpop.f32.mrf.mxu0  ;;  %v12433_v56 = vor.u32 %v4732_v33, %v4731_v22  ;;  %v15394_v33 = vld [vmem:[#allocation72_spill] sm:$0xff] }
 0x276   : > { %v3004_v13 = vrot.slane %v15392_v3, 2  ;;  %v3497_v45 = vpack.c.bf16 %v3465_v49, %v3465_v49  ;;  %v3175_v31 = vadd.f32 %v3099_v2, %v2919_v12  ;;  %v2708_v22 = vadd.f32 %v15394_v33, %v12091_v50  ;;  %v3321_v50 = vpop.permute.xlu1 %3320 }
 0x277   : > { %v12440_v7 = vpop.f32.mrf.mxu2  ;;  %v4734_v6 = vsel %vm1009_vm3, %v4730_v44, %v12433_v56  ;;  %v3582_v49 = vsel %vm531_vm1, %v3580_v5, %v15116_v35  ;;  %v15395_v44 = vld [vmem:[#allocation20_spill] sm:$0xff]  ;;  %v4428_v3 = vrot.slane %v4426_v30, 2  ;;  %v4436_v33 = vrot.slane %v4434_v28, 2  ;;  %v15399_v28 = vld [vmem:[#allocation17_spill] sm:$0xff] }
 0x278   : > { %15393 = vst [vmem:[#allocation77_spill] sm:$0xff] %v12440_v7  ;;  %v3242_v52 = vadd.f32 %v12330_v55, %v3175_v31  ;;  %9267 = vmatmul.msk.bf16.vlgmr.msrb.gmra.mxu3 %vm4280_vm10, %v4734_v6  ;;  %v12452_v12 = vor.u32 %v3004_v13, %v3003_v43  ;;  %v12457_v57 = vpop.f32.mrf.mxu3  ;;  %v4439_v31 = vrot.slane %v4437_v18, 3  ;;  %v15397_v6 = vld [vmem:[#allocation59_spill] sm:$0xff]  ;;  %v2709_v18 = vadd.f32 %v15399_v28, %v12124_v0 }
 0x279   : > { %3529 = vst.msk [vmem:[#allocation2 + $0x18] sm:$0xf] %vm393_vm7, %v3497_v45  ;;  %v2242_v17 = vpop.f32.mrf.mxu1  ;;  %v4431_v45 = vrot.slane %v4429_v48, 3  ;;  %v2920_v7 = vadd.f32 %v15397_v6, %v2708_v22  ;;  %v3326_v22 = vpop.permute.xlu2 %3325  ;;  %v15402_v6 = vld [vmem:[#allocation63_spill] sm:$0xff] }
 0x27a   : > { %v3274_v2 = vmax.f32 %v3242_v52, 0.0  ;;  %v12455_v37 = vadd.f32 %v2242_v17, %v15395_v44  ;;  %15396 = vst [vmem:[#allocation64_spill] sm:$0xff] %v12457_v57  ;;  %v3006_v52 = vsel %vm2954_vm8, %v12381_v46, %v12452_v12  ;;  %v12466_v44 = vor.u32 %v4439_v31, %v4436_v33 }
 0x27b   : > { %v4432_v17 = vor.u32 %v4431_v45, %v4428_v3 }
 0x27c   : > { %v3466_v1 = vmul.f32 %v3321_v50, %v3274_v2  ;;  %9136 = vmatmul.msk.bf16.vlgmr.msra.gmra.mxu1 %vm565_vm2, %v3582_v49  ;;  %v15400_v49 = vld [vmem:[#allocation22_spill] sm:$0xff] }
 0x27d   : > { %v3102_v10 = vpop.f32.mrf.mxu0  ;;  %v4441_v3 = vsel %vm710_vm4, %v4432_v17, %v12466_v44  ;;  %v10113_v17 = vld [vmem:[%s10497_s12 + $0x8c] sm:$0x8] }
 0x27e   : > { %v3498_v5 = vpack.c.bf16 %v3466_v1, %v3466_v1  ;;  %v3176_v43 = vadd.f32 %v3102_v10, %v2920_v7 }
 0x27f   : > { %v12464_v13 = vpop.f32.mrf.mxu2 }
 0x280   : > { %15398 = vst [vmem:[#allocation11_spill] sm:$0xff] %v12464_v13  ;;  %v12468_v30 = vld [vmem:[#allocation2 + $0x14] sm:$0xff]  ;;  %v3243_v48 = vadd.f32 %v12330_v55, %v3176_v43  ;;  %9125 = vmatmul.msk.bf16.gmra.mxu0 %vm565_vm2, %v3006_v52  ;;  %v12480_v50 = vpop.f32.mrf.mxu3  ;;  %v2921_v52 = vadd.f32 %v15402_v6, %v2709_v18 }
 0x281   : > { %3530 = vst.msk [vmem:[#allocation2 + $0x1c] sm:$0xf] %vm393_vm7, %v3498_v5  ;;  %v2244_v46 = vpop.f32.mrf.mxu1  ;;  %v4443_v1 = vshrl.u32 %v12468_v30, 16  ;;  %v4446_v10 = vshll.u32 %v12468_v30, 16  ;;  %v3583_v5 = vrot.slane %v12119_v60, 3 }
 0x282   : > { %v3275_v7 = vmax.f32 %v3243_v48, 0.0  ;;  %v12478_v2 = vadd.f32 %v2244_v46, %v15400_v49  ;;  %15401 = vst [vmem:[#allocation46_spill] sm:$0xff] %v12480_v50  ;;  %v15403_v48 = vld [vmem:[#allocation60_spill] sm:$0xff]  ;;  %v10242_v50 = vld [vmem:[%s10497_s12 + $0x8c] sm:$0xf0]  }
 0x283   : > { %v4735_v45 = vrot.slane %v4443_v1, 3  ;;  %v4736_v33 = vrot.slane %v4446_v10, 4  ;;  %v15404_v46 = vshrl.u32 %v15403_v48, 16  ;;  %v15405_v35 = vshll.u32 %v15403_v48, 16  ;;  %v10243_v48 = vld [vmem:[%s10497_s12 + $0x94] sm:$0xff]  }
 0x284   : > { %v3467_v31 = vmul.f32 %v3326_v22, %v3275_v7  ;;  %9250 = vmatmul.msk.bf16.vlgmr.msrb.gmra.mxu2 %vm4280_vm10, %v4441_v3  ;;  %v15406_v22 = vrot.slane %v12468_v30, 3  ;;  %v15407_v7 = vrot.slane %v12404_v27, 3  ;;  %v10114_v27 = vor.u32 %v10242_v50, %v10113_v17  ;;  %v3331_v50 = vpop.permute.xlu2 %3330  ;;  %v15413_v17 = vld [vmem:[#allocation66_spill] sm:$0xff] }
 0x285   : > { %v3104_v43 = vpop.f32.mrf.mxu0  ;;  %v12488_v28 = vor.u32 %v4736_v33, %v4735_v45  ;;  %v3007_v49 = vrot.slane %v15404_v46, 1  ;;  %v3008_v0 = vrot.slane %v15405_v35, 2  ;;  %v15408_v45 = vld [vmem:[#allocation74_spill] sm:$0xff]  ;;  %v4445_v57 = vrot.slane %v4443_v1, 2 }
 0x286   : > { %v12501_v3 = vsel %vm531_vm1, %v15407_v7, %v15406_v22  ;;  %v3499_v18 = vpack.c.bf16 %v3467_v31, %v3467_v31  ;;  %v3177_v60 = vadd.f32 %v3104_v43, %v2921_v52  ;;  %v2710_v33 = vadd.f32 %v15408_v45, %v12150_v23  ;;  %v9160_v31 = vld [vmem:[%s15035_s2 + $0xc] sm:$0x3] }
 0x287   : > { %v12505_v6 = vpop.f32.mrf.mxu2  ;;  %v4738_v35 = vsel %vm1009_vm3, %v12433_v56, %v12488_v28  ;;  %v15410_v23 = vrot.slane %v11910_v8, 3  ;;  %v12520_v22 = vor.u32 %v3008_v0, %v3007_v49  ;;  %v3957_v56 = vsel %vm614_vm0, %v9160_v31, 0 }
 0x288   : > { %15409 = vst [vmem:[#allocation45_spill] sm:$0xff] %v12505_v6  ;;  %v3244_v46 = vadd.f32 %v12330_v55, %v3177_v60  ;;  %9268 = vmatmul.msk.bf16.gmra.mxu3 %vm4280_vm10, %v4738_v35  ;;  %v12526_v60 = vpop.f32.mrf.mxu3  ;;  %3966 = vmatpush.bf16.msra.mxu1 %v3957_v56  ;;  %v2922_v35 = vadd.f32 %v15413_v17, %v2710_v33  ;;  %v4448_v6 = vrot.slane %v4446_v10, 3  ;;  %v3756_v13 = vshrl.u32 %v10243_v48, 16  ;;  %v15414_v56 = vld [vmem:[#allocation75_spill] sm:$0xff] }
 0x289   : > { %3531 = vst.msk [vmem:[#allocation2 + $0x20] sm:$0xf] %vm393_vm7, %v3499_v18  ;;  %v2247_v52 = vpop.f32.mrf.mxu1  ;;  %v3584_v43 = vsel %vm531_vm1, %v15410_v23, %v3583_v5  ;;  %v15411_v18 = vld [vmem:[#allocation23_spill] sm:$0xff]  ;;  %v3748_v0 = vshrl.u32 %v10114_v27, 16  ;;  %v3751_v5 = vshll.u32 %v10114_v27, 16  ;;  %v3759_v49 = vshll.u32 %v10243_v48, 16 }
 0x28a   : > { %v3276_v7 = vmax.f32 %v3244_v46, 0.0  ;;  %v12524_v45 = vadd.f32 %v2247_v52, %v15411_v18  ;;  %15412 = vst [vmem:[#allocation58_spill] sm:$0xff] %v12526_v60  ;;  %v3010_v46 = vsel %vm2954_vm8, %v12452_v12, %v12520_v22  ;;  %v2711_v18 = vadd.f32 %v15414_v56, %v12178_v24 }
 0x28b   : > { %v12537_v1 = vor.u32 %v4448_v6, %v4445_v57  ;;  %v3750_v27 = vrot.slane %v3748_v0, 3  ;;  %v3753_v12 = vrot.slane %v3751_v5, 4 }
 0x28c   : > { %v3468_v8 = vmul.f32 %v3331_v50, %v3276_v7  ;;  %9137 = vmatmul.msk.bf16.gmra.mxu1 %vm565_vm2, %v3584_v43  ;;  %v3758_v43 = vrot.slane %v3756_v13, 3  ;;  %v3761_v7 = vrot.slane %v3759_v49, 4  ;;  %v15419_v13 = vld [vmem:[#allocation67_spill] sm:$0xff] }
 0x28d   : > { %v3107_v31 = vpop.f32.mrf.mxu0  ;;  %v4450_v0 = vsel %vm710_vm4, %v12466_v44, %v12537_v1  ;;  %v15421_v60 = vshll.u32 %v15419_v13, 16 }
 0x28e   : > { %v3500_v52 = vpack.c.bf16 %v3468_v8, %v3468_v8  ;;  %v3178_v23 = vadd.f32 %v3107_v31, %v2922_v35  ;;  %v3336_v8 = vpop.permute.xlu0 %3335  ;;  %v9895_v31 = vunpack.c.h.b16 %v12287_v15  ;;  %v12558_v56 = vor.u32 %v3761_v7, %v3758_v43 }
 0x28f   : > { %v12535_v33 = vpop.f32.mrf.mxu2 }
 0x290   : > { %15415 = vst [vmem:[#allocation68_spill] sm:$0xff] %v12535_v33  ;;  %v12539_v10 = vld [vmem:[#allocation2 + $0x1c] sm:$0xff]  ;;  %v3245_v48 = vadd.f32 %v12330_v55, %v3178_v23  ;;  %9126 = vmatmul.msk.bf16.gmra.mxu0 %vm565_vm2, %v3010_v46  ;;  %v12549_v6 = vpop.f32.mrf.mxu3  ;;  %v15420_v33 = vshrl.u32 %v15419_v13, 16  ;;  %v3746_v13 = vpack.c.b16 %v9895_v31, %v9895_v31  ;;  %v3341_v31 = vpop.permute.xlu1 %3340 }
 0x291   : > { %3532 = vst.msk [vmem:[#allocation2 + $0x24] sm:$0xf] %vm393_vm7, %v3500_v52  ;;  %v2249_v50 = vpop.f32.mrf.mxu1  ;;  %v4452_v17 = vshrl.u32 %v12539_v10, 16  ;;  %v4455_v24 = vshll.u32 %v12539_v10, 16  ;;  %v15418_v52 = vld [vmem:[#allocation70_spill] sm:$0xff]  ;;  %v15422_v44 = vrot.slane %v12539_v10, 3 }
 0x292   : > { %v3277_v35 = vmax.f32 %v3245_v48, 0.0  ;;  %v12547_v57 = vadd.f32 %v2249_v50, %v11920_v40  ;;  %15417 = vst [vmem:[#allocation62_spill] sm:$0xff] %v12549_v6  ;;  %v2923_v23 = vadd.f32 %v15418_v52, %v2711_v18  ;;  %v3754_v40 = vor.u32 %v3753_v12, %v3750_v27 }
 0x293   : > { %v4739_v5 = vrot.slane %v4452_v17, 3  ;;  %v4740_v49 = vrot.slane %v4455_v24, 4  ;;  %v3011_v6 = vrot.slane %v15420_v33, 1  ;;  %v15425_v33 = vld [vmem:[#allocation21_spill] sm:$0xff]  ;;  %v4457_v52 = vrot.slane %v4455_v24, 3 }
 0x294   : > { %15416 = vst [vmem:[#allocation48_spill] sm:$0xff] %v12547_v57  ;;  %v3469_v46 = vmul.f32 %v3336_v8, %v3277_v35  ;;  %9251 = vmatmul.msk.bf16.gmra.mxu2 %vm4280_vm10, %v4450_v0  ;;  %v3012_v57 = vrot.slane %v15421_v60, 2  ;;  %v15423_v35 = vrot.slane %v12468_v30, 3  ;;  %v2712_v7 = vadd.f32 %v15425_v33, %v12213_v58  ;;  %v10023_v33 = vld [vmem:[#allocation2 + $0x18] sm:$0xf0] }
 0x295   : > { %v3109_v48 = vpop.f32.mrf.mxu0  ;;  %v12560_v50 = vor.u32 %v4740_v49, %v4739_v5  ;;  %v3763_v0 = vsel %vm1009_vm3, %v3754_v40, %v12558_v56 }
 0x296   : > { %v12571_v8 = vsel %vm531_vm1, %v15423_v35, %v15422_v44  ;;  %v3501_v18 = vpack.c.bf16 %v3469_v46, %v3469_v46  ;;  %v3179_v27 = vadd.f32 %v3109_v48, %v2923_v23  ;;  %v12585_v5 = vor.u32 %v3012_v57, %v3011_v6  ;;  %v15429_v57 = vld [vmem:[#allocation79_spill] sm:$0xff] }
 0x297   : > { %v12573_v43 = vpop.f32.mrf.mxu2  ;;  %v4742_v12 = vsel %vm1009_vm3, %v12488_v28, %v12560_v50  ;;  %v4454_v28 = vrot.slane %v4452_v17, 2  ;;  %v3765_v48 = vshrl.u32 %v3746_v13, 16  ;;  %v3768_v44 = vshll.u32 %v3746_v13, 16 }
 0x298   : > { %15424 = vst [vmem:[#allocation15_spill] sm:$0xff] %v12573_v43  ;;  %v3246_v60 = vadd.f32 %v12330_v55, %v3179_v27  ;;  %9269 = vmatmul.msk.bf16.gmra.mxu3 %vm4280_vm10, %v4742_v12  ;;  %v12590_v58 = vpop.f32.mrf.mxu3  ;;  %v12592_v23 = vld [vmem:[#allocation2 + $0x20] sm:$0xff]  ;;  %v2713_v6 = vadd.f32 %v15429_v57, %v12246_v51 }
 0x299   : > { %3533 = vst.msk [vmem:[#allocation2 + $0x28] sm:$0xf] %vm393_vm7, %v3501_v18  ;;  %v2252_v30 = vpop.f32.mrf.mxu1  ;;  %v15428_v18 = vld [vmem:[#allocation10_spill] sm:$0xff]  ;;  %v12601_v12 = vor.u32 %v4457_v52, %v4454_v28  ;;  %v3770_v51 = vrot.slane %v3768_v44, 4 }
 0x29a   : > { %v3278_v49 = vmax.f32 %v3246_v60, 0.0  ;;  %v12588_v46 = vadd.f32 %v2252_v30, %v11966_v25  ;;  %15426 = vst [vmem:[#allocation51_spill] sm:$0xff] %v12590_v58  ;;  %v2924_v27 = vadd.f32 %v15428_v18, %v2712_v7  ;;  %v3014_v25 = vsel %vm2954_vm8, %v12520_v22, %v12585_v5  ;;  %v10024_v22 = vld [vmem:[#allocation2 + $0x18] sm:$0xe]  ;;  %v15431_v52 = vld [vmem:[#allocation18_spill] sm:$0xff] }
 0x29b   : > { %15427 = vst [vmem:[#allocation49_spill] sm:$0xff] %v12592_v23  ;;  %v15118_v7 = vshll.u32 %v12592_v23, 16  ;;  %v15117_v30 = vshrl.u32 %v12592_v23, 16  ;;  %v4459_v44 = vsel %vm710_vm4, %v12537_v1, %v12601_v12 }
 0x29c   : > { %v3470_v35 = vmul.f32 %v3341_v31, %v3278_v49  ;;  %9144 = vmatmul.msk.bf16.vlgmr.msrb.gmra.mxu1 %vm565_vm2, %v3763_v0  ;;  %v3767_v0 = vrot.slane %v3765_v48, 3  ;;  %v2925_v31 = vadd.f32 %v15431_v52, %v2713_v6 }
 0x29d   : > { %v3112_v40 = vpop.f32.mrf.mxu0  ;;  %v6673_v52 = vrot.slane %v15117_v30, 1  ;;  %v15437_v30 = vrot.slane %v12539_v10, 3 }
 0x29e   : > { %v3502_v17 = vpack.c.bf16 %v3470_v35, %v3470_v35  ;;  %v3180_v24 = vadd.f32 %v3112_v40, %v2924_v27  ;;  %v12615_v27 = vor.u32 %v10024_v22, %v10023_v33  ;;  %v6674_v33 = vrot.slane %v15118_v7, 2 }
 0x29f   : > { %v12603_v60 = vpop.f32.mrf.mxu2  ;;  %v15434_v22 = vshrl.u32 %v11703_v63, 16  ;;  %v15445_v7 = vshll.u32 %v12193_v62, 16 }
 0x2a0   : > { %15430 = vst [vmem:[#allocation65_spill] sm:$0xff] %v12603_v60  ;;  %v12605_v13 = vld [vmem:[#allocation2 + $0x24] sm:$0xff]  ;;  %v3247_v49 = vadd.f32 %v12330_v55, %v3180_v24  ;;  %9127 = vmatmul.msk.bf16.gmra.mxu0 %vm565_vm2, %v3014_v25  ;;  %v12623_v40 = vpop.f32.mrf.mxu3 }
 0x2a1   : > { %3534 = vst.msk [vmem:[#allocation2 + $0x2c] sm:$0xf] %vm393_vm7, %v3502_v17  ;;  %v2254_v28 = vpop.f32.mrf.mxu1  ;;  %v4461_v35 = vshrl.u32 %v12605_v13, 16  ;;  %v4464_v18 = vshll.u32 %v12605_v13, 16  ;;  %v3346_v17 = vpop.permute.xlu2 %3345  ;;  %v3015_v1 = vrot.slane %v15434_v22, 1  ;;  %v15436_v43 = vrot.slane %v12605_v13, 3 }
 0x2a2   : > { %15432 = vst [vmem:[#allocation33_spill] sm:$0xff] %v12615_v27  ;;  %v3279_v57 = vmax.f32 %v3247_v49, 0.0  ;;  %v12618_v48 = vadd.f32 %v2254_v28, %v11999_v38  ;;  %v3771_v38 = vor.u32 %v3770_v51, %v3767_v0  ;;  %v15435_v28 = vshll.u32 %v11703_v63, 16 }
 0x2a3   : > { %15433 = vst [vmem:[#allocation53_spill] sm:$0xff] %v12623_v40  ;;  %v4743_v6 = vrot.slane %v4461_v35, 3  ;;  %v4744_v24 = vrot.slane %v4464_v18, 4  ;;  %v12642_v58 = vsel %vm531_vm1, %v15437_v30, %v15436_v43  ;;  %v6669_v0 = vshll.u32 %v12615_v27, 16 }
 0x2a4   : > { %v3471_v49 = vmul.f32 %v3346_v17, %v3279_v57  ;;  %9252 = vmatmul.msk.bf16.gmra.mxu2 %vm4280_vm10, %v4459_v44  ;;  %v3016_v60 = vrot.slane %v15435_v28, 2  ;;  %v6666_v57 = vshrl.u32 %v12615_v27, 16  ;;  %v3772_v30 = vsel %vm1009_vm3, %v12558_v56, %v3771_v38  ;;  %v3351_v28 = vpop.permute.xlu0 %3350 }
 0x2a5   : > { %v3114_v25 = vpop.f32.mrf.mxu0  ;;  %v12635_v40 = vor.u32 %v4744_v24, %v4743_v6  ;;  %v12651_v6 = vor.u32 %v6674_v33, %v6673_v52  ;;  %v15438_v24 = vld [vmem:[#allocation25_spill] sm:$0xff] }
 0x2a6   : > { %v3503_v51 = vpack.c.bf16 %v3471_v49, %v3471_v49  ;;  %v3181_v44 = vadd.f32 %v3114_v25, %v2925_v31  ;;  %v2714_v10 = vadd.f32 %v15438_v24, %v12270_v11  ;;  %v9173_v31 = vld [vmem:[%s15037_s4 + $0x4] sm:$0xf]  ;;  %v6668_v33 = vrot.slane %v6666_v57, 1  ;;  %v15440_v24 = vld [vmem:[#allocation12_spill] sm:$0xff] }
 0x2a7   : > { %v12646_v17 = vpop.f32.mrf.mxu2  ;;  %v4746_v63 = vsel %vm1009_vm3, %v12560_v50, %v12635_v40  ;;  %v12663_v50 = vor.u32 %v3016_v60, %v3015_v1  ;;  %v4331_v52 = vsel %vm4329_vm9, %v9173_v31, 0  ;;  %v6671_v11 = vrot.slane %v6669_v0, 2 }
 0x2a8   : > { %3535 = vst.msk [vmem:[#allocation2 + $0x30] sm:$0xf] %vm393_vm7, %v3503_v51  ;;  %v3248_v43 = vadd.f32 %v12330_v55, %v3181_v44  ;;  %9270 = vmatmul.msk.bf16.gmra.mxu3 %vm4280_vm10, %v4746_v63  ;;  %4340 = vmatpush.bf16.msrb.mxu1 %v4331_v52  ;;  %v4463_v51 = vrot.slane %v4461_v35, 2  ;;  %v4466_v44 = vrot.slane %v4464_v18, 3  ;;  %v12669_v56 = vpop.f32.mrf.mxu3  ;;  %v12671_v38 = vld [vmem:[#allocation2 + $0x28] sm:$0xff]  ;;  %v2926_v60 = vadd.f32 %v15440_v24, %v2714_v10 }
 0x2a9   : > { %v2257_v25 = vpop.f32.mrf.mxu1  ;;  %15439 = vst [vmem:[#allocation69_spill] sm:$0xff] %v12671_v38  ;;  %v3933_v1 = vshll.u32 %v12287_v15, 16  ;;  %v6672_v0 = vor.u32 %v6671_v11, %v6668_v33  ;;  %v15441_v18 = vld [vmem:[#allocation26_spill] sm:$0xff]  ;;  %v15119_v11 = vrot.slane %v12592_v23, 1 }
 0x2aa   : > { %v3280_v49 = vmax.f32 %v3248_v43, 0.0  ;;  %v12667_v22 = vadd.f32 %v2257_v25, %v12035_v20  ;;  %v3018_v20 = vsel %vm2954_vm8, %v12585_v5, %v12663_v50  ;;  %v2715_v31 = vadd.f32 %v15441_v18, %v12293_v47 }
 0x2ab   : > { %v12683_v52 = vor.u32 %v4466_v44, %v4463_v51  ;;  %v3931_v47 = vshrl.u32 %v12287_v15, 16  ;;  %v3935_v33 = vrot.slane %v3933_v1, 1  ;;  %v3356_v1 = vpop.permute.xlu1 %3355 }
 0x2ac   : > { %v3472_v63 = vmul.f32 %v3351_v28, %v3280_v49  ;;  %9145 = vmatmul.msk.bf16.gmra.mxu1 %vm565_vm2, %v3772_v30  ;;  %v6457_v30 = vrot.slane %v12671_v38, 1  ;;  %v12690_v49 = vsel %vm2954_vm8, %v6672_v0, %v12651_v6 }
 0x2ad   : > { %v3117_v57 = vpop.f32.mrf.mxu0  ;;  %15442 = vst [vmem:[#allocation19_spill] sm:$0xff] %v12690_v49  ;;  %v15446_v49 = vshrl.u32 %v11785_v4, 16 }
 0x2ae   : > { %v3504_v43 = vpack.c.bf16 %v3472_v63, %v3472_v63  ;;  %v3182_v35 = vadd.f32 %v3117_v57, %v2926_v60  ;;  %v12707_v15 = vsel %vm2742_vm5, %v15119_v11, %v6457_v30  ;;  %v12717_v11 = vrot.slane %v15445_v7, 1 }
 0x2af   : > { %v12681_v25 = vpop.f32.mrf.mxu2  ;;  %v12685_v10 = vld [vmem:[#allocation2 + $0x2c] sm:$0xff]  ;;  %15443 = vst [vmem:[#allocation56_spill] sm:$0xff] %v12707_v15  ;;  %v15447_v15 = vshll.u32 %v11785_v4, 16 }
 0x2b0   : > { %3536 = vst.msk [vmem:[#allocation2 + $0x34] sm:$0xf] %vm393_vm7, %v3504_v43  ;;  %v3249_v5 = vadd.f32 %v12330_v55, %v3182_v35  ;;  %9128 = vmatmul.msk.bf16.gmra.mxu0 %vm565_vm2, %v3018_v20  ;;  %v4470_v51 = vshrl.u32 %v12685_v10, 16  ;;  %v4473_v44 = vshll.u32 %v12685_v10, 16  ;;  %v4468_v20 = vsel %vm710_vm4, %v12601_v12, %v12683_v52  ;;  %v12725_v35 = vpop.f32.mrf.mxu3 }
 0x2b1   : > { %v2259_v28 = vpop.f32.mrf.mxu1  ;;  %v3019_v12 = vrot.slane %v15446_v49, 1  ;;  %v3020_v27 = vrot.slane %v15447_v15, 2  ;;  %v2716_v49 = vadd.f32 %v12001_v16, %v12325_v19 }
 0x2b2   : > { %v3281_v24 = vmax.f32 %v3249_v5, 0.0  ;;  %v12701_v60 = vadd.f32 %v2259_v28, %v12073_v32  ;;  %v4747_v0 = vrot.slane %v4470_v51, 3  ;;  %v4748_v43 = vrot.slane %v4473_v44, 4  ;;  %v15444_v32 = vld [vmem:[#allocation13_spill] sm:$0xff] }
 0x2b3   : > { %v2927_v5 = vadd.f32 %v15444_v32, %v2715_v31  ;;  %v3936_v28 = vor.u32 %v3935_v33, %v3931_v47  ;;  %v15449_v31 = vrot.slane %v12605_v13, 3  ;;  %v15452_v13 = vshll.u32 %v12671_v38, 16 }
 0x2b4   : > { %v3473_v18 = vmul.f32 %v3356_v1, %v3281_v24  ;;  %9253 = vmatmul.msk.bf16.gmra.mxu2 %vm4280_vm10, %v4468_v20  ;;  %v12719_v57 = vor.u32 %v4748_v43, %v4747_v0  ;;  %v2948_v24 = vld [vmem:[%s10497_s12 + $0x98] sm:$0x3]  ;;  %v15448_v1 = vrot.slane %v12685_v10, 3  ;;  %v15450_v20 = vshrl.u32 %v12671_v38, 16 }
 0x2b5   : > { %v3119_v63 = vpop.f32.mrf.mxu0  ;;  %v6678_v32 = vrot.slane %v15452_v13, 2  ;;  %v3941_v16 = vsel %vm2009_vm6, %v3936_v28, %v12717_v11  ;;  %v12753_v19 = vor.u32 %v3020_v27, %v3019_v12  ;;  %v15453_v13 = vld [vmem:[#allocation14_spill] sm:$0xff]  ;;  %v4472_v38 = vrot.slane %v4470_v51, 2  ;;  %v9283_v27 = vld [vmem:[%s15037_s4 + $0xc] sm:$0xf] }
 0x2b6   : > { %v12733_v47 = vsel %vm531_vm1, %v15449_v31, %v15448_v1  ;;  %v3505_v7 = vpack.c.bf16 %v3473_v18, %v3473_v18  ;;  %v3183_v33 = vadd.f32 %v3119_v63, %v2927_v5  ;;  %v6677_v0 = vrot.slane %v15450_v20, 1 }
 0x2b7   : > { %v12739_v4 = vpop.f32.mrf.mxu2  ;;  %v4750_v15 = vsel %vm1009_vm3, %v12635_v40, %v12719_v57  ;;  %v12744_v43 = vld [vmem:[#allocation2 + $0x30] sm:$0xff]  ;;  %v2952_v18 = vunpack.c.l.b16 %v2948_v24  ;;  %v5291_v12 = vsel %vm4329_vm9, %v9283_v27, 0 }
 0x2b8   : > { %15451 = vst [vmem:[#allocation54_spill] sm:$0xff] %v12744_v43  ;;  %v3250_v63 = vadd.f32 %v12330_v55, %v3183_v33  ;;  %9271 = vmatmul.msk.bf16.gmra.mxu3 %vm4280_vm10, %v4750_v15  ;;  %v15125_v31 = vrot.slane %v12744_v43, 1  ;;  %v12759_v20 = vor.u32 %v6678_v32, %v6677_v0  ;;  %v2928_v33 = vadd.f32 %v15453_v13, %v2716_v49 }
 0x2b9   : > { %3537 = vst.msk [vmem:[#allocation2 + $0x38] sm:$0xf] %vm393_vm7, %v3505_v7  ;;  %v2262_v5 = vpop.f32.mrf.mxu1  ;;  %v3361_v7 = vpop.permute.xlu2 %3360  ;;  %v4475_v15 = vrot.slane %v4473_v44, 3  ;;  %v2953_v23 = vpack.c.b16 %v2952_v18, %v2952_v18  ;;  %v3022_v44 = vsel %vm2954_vm8, %v12663_v50, %v12753_v19  ;;  %v2717_v0 = vadd.f32 %v12037_v26, %v12357_v54  ;;  %5300 = vmatpush.bf16.msrb.mxu0 %v5291_v12 }
 0x2ba   : > { %v3282_v1 = vmax.f32 %v3250_v63, 0.0  ;;  %v12756_v40 = vadd.f32 %v2262_v5, %v12107_v42  ;;  %v12769_v42 = vsel %vm2742_vm5, %v6457_v30, %v15125_v31  ;;  %v12774_v28 = vsel %vm2954_vm8, %v12651_v6, %v12759_v20  ;;  %v12788_v6 = vpop.f32.mrf.mxu3 }
 0x2bb   : > { %15454 = vst [vmem:[#allocation72_spill] sm:$0xff] %v12769_v42  ;;  %v12784_v63 = vor.u32 %v4475_v15, %v4472_v38  ;;  %v15126_v5 = vshrl.u32 %v12744_v43, 16  ;;  %v3946_v26 = vshll.u32 %v12383_v41, 16  ;;  %v3024_v54 = vshrl.u32 %v2953_v23, 16 }
 0x2bc   : > { %v3474_v24 = vmul.f32 %v3361_v7, %v3282_v1  ;;  %9165 = vmatmul.msk.bf16.vlgmr.msra.gmra.mxu1 %vm565_vm2, %v3941_v16  ;;  %15455 = vst [vmem:[#allocation20_spill] sm:$0xff] %v12774_v28  ;;  %v3027_v7 = vshll.u32 %v2953_v23, 16 }
 0x2bd   : > { %v3122_v51 = vpop.f32.mrf.mxu0  ;;  %v4477_v41 = vsel %vm710_vm4, %v12683_v52, %v12784_v63  ;;  %v6681_v23 = vrot.slane %v15126_v5, 1  ;;  %v15458_v52 = vrot.slane %v12685_v10, 3  ;;  %v2718_v10 = vadd.f32 %v12075_v14, %v12390_v29 }
 0x2be   : > { %v3506_v49 = vpack.c.bf16 %v3474_v24, %v3474_v24  ;;  %v3184_v32 = vadd.f32 %v3122_v51, %v2928_v33  ;;  %v15456_v24 = vld [vmem:[#allocation16_spill] sm:$0xff]  ;;  %v3029_v13 = vrot.slane %v3027_v7, 2 }
 0x2bf   : > { %v12782_v30 = vpop.f32.mrf.mxu2  ;;  %v2929_v27 = vadd.f32 %v15456_v24, %v2717_v0  ;;  %v3948_v0 = vrot.slane %v3946_v26, 1 }
 0x2c0   : > { %v12786_v18 = vld [vmem:[#allocation2 + $0x34] sm:$0xff]  ;;  %3538 = vst.msk [vmem:[#allocation2 + $0x3c] sm:$0xf] %vm393_vm7, %v3506_v49  ;;  %v3251_v50 = vadd.f32 %v12330_v55, %v3184_v32  ;;  %9129 = vmatmul.msk.bf16.gmra.mxu0 %vm565_vm2, %v3022_v44  ;;  %v3366_v44 = vpop.permute.xlu0 %3365 }
 0x2c1   : > { %v2264_v16 = vpop.f32.mrf.mxu1  ;;  %v4479_v1 = vshrl.u32 %v12786_v18, 16  ;;  %v4482_v38 = vshll.u32 %v12786_v18, 16  ;;  %v4258_v51 = vrot.slane %v12786_v18, 3  ;;  %v2720_v18 = vadd.f32 %v12142_v21, %v12455_v37 }
 0x2c2   : > { %v3283_v33 = vmax.f32 %v3251_v50, 0.0  ;;  %v12799_v15 = vadd.f32 %v2264_v16, %v12140_v59  ;;  %v15457_v59 = vshrl.u32 %v12193_v62, 16  ;;  %v3026_v16 = vrot.slane %v3024_v54, 1 }
 0x2c3   : > { %v4751_v12 = vrot.slane %v4479_v1, 3  ;;  %v4752_v49 = vrot.slane %v4482_v38, 4  ;;  %v12819_v28 = vsel %vm531_vm1, %v15458_v52, %v4258_v51  ;;  %v4484_v52 = vrot.slane %v4482_v38, 3  ;;  %v10122_v38 = vld [vmem:[#allocation2 + $0xc] sm:$0x8] }
 0x2c4   : > { %v3475_v32 = vmul.f32 %v3366_v44, %v3283_v33  ;;  %9254 = vmatmul.msk.bf16.gmra.mxu2 %vm4280_vm10, %v4477_v41  ;;  %v3944_v50 = vor.u32 %v15457_v59, %v12717_v11  ;;  %v15459_v33 = vshll.u32 %v12744_v43, 16 }
 0x2c5   : > { %v3124_v24 = vpop.f32.mrf.mxu0  ;;  %v12812_v31 = vor.u32 %v4752_v49, %v4751_v12  ;;  %v3030_v49 = vor.u32 %v3029_v13, %v3026_v16 }
 0x2c6   : > { %v6682_v44 = vrot.slane %v15459_v33, 2  ;;  %v3507_v41 = vpack.c.bf16 %v3475_v32, %v3475_v32  ;;  %v3185_v5 = vadd.f32 %v3124_v24, %v2929_v27  ;;  %v9300_v27 = vld [vmem:[%s15037_s4 + $0x10] sm:$0xf]  ;;  %v12841_v32 = vpop.f32.mrf.mxu3  ;;  %v4481_v24 = vrot.slane %v4479_v1, 2 }
 0x2c7   : > { %v12823_v62 = vpop.f32.mrf.mxu2  ;;  %v4754_v11 = vsel %vm1009_vm3, %v12719_v57, %v12812_v31  ;;  %v12828_v26 = vld [vmem:[#allocation2 + $0x38] sm:$0xff]  ;;  %v3949_v57 = vsel %vm2009_vm6, %v3944_v50, %v3948_v0  ;;  %15461 = vst [vmem:[#allocation17_spill] sm:$0xff] %v12841_v32  ;;  %v3031_v1 = vsel %vm2954_vm8, %v12753_v19, %v3030_v49 }
 0x2c8   : > { %15460 = vst [vmem:[#allocation59_spill] sm:$0xff] %v12828_v26  ;;  %v12830_v54 = vor.u32 %v6682_v44, %v6681_v23  ;;  %v3252_v7 = vadd.f32 %v12330_v55, %v3185_v5  ;;  %9272 = vmatmul.msk.bf16.gmra.mxu3 %vm4280_vm10, %v4754_v11  ;;  %v5481_v23 = vsel %vm4329_vm9, %v9300_v27, 0  ;;  %v15127_v29 = vrot.slane %v12828_v26, 1  ;;  %v3371_v5 = vpop.permute.xlu1 %3370  ;;  %v15463_v50 = vld [vmem:[#allocation24_spill] sm:$0xff]  ;;  %v3381_v37 = vpop.permute.xlu0 %3380 }
 0x2c9   : > { %3539 = vst.msk [vmem:[#allocation2 + $0x40] sm:$0xf] %vm393_vm7, %v3507_v41  ;;  %v2267_v12 = vpop.f32.mrf.mxu1  ;;  %5490 = vmatpush.bf16.msra.mxu1 %v5481_v23  ;;  %v2930_v0 = vadd.f32 %v15463_v50, %v2718_v10  ;;  %v10245_v41 = vld [vmem:[#allocation2 + $0xc] sm:$0xf0]   ;;  %v12866_v10 = vor.u32 %v4484_v52, %v4481_v24  ;;  %v2719_v23 = vadd.f32 %v12109_v9, %v12419_v39 }
 0x2ca   : > { %v3284_v59 = vmax.f32 %v3252_v7, 0.0  ;;  %v12845_v14 = vadd.f32 %v2267_v12, %v12166_v53  ;;  %v12851_v33 = vsel %vm2954_vm8, %v12759_v20, %v12830_v54  ;;  %v15464_v53 = vrot.slane %v12744_v43, 1  ;;  %v10247_v20 = vld [vmem:[#allocation2 + $0x14] sm:$0xff]  }
 0x2cb   : > { %15462 = vst [vmem:[#allocation22_spill] sm:$0xff] %v12851_v33  ;;  %v10123_v49 = vor.u32 %v10245_v41, %v10122_v38  ;;  %v5099_v52 = vshrl.u32 %v10247_v20, 16  ;;  %v5102_v9 = vshll.u32 %v10247_v20, 16 }
 0x2cc   : > { %v3476_v13 = vmul.f32 %v3371_v5, %v3284_v59  ;;  %9166 = vmatmul.msk.bf16.gmra.mxu1 %vm565_vm2, %v3949_v57  ;;  %v12860_v16 = vsel %vm2742_vm5, %v15464_v53, %v15127_v29  ;;  %v15128_v57 = vshrl.u32 %v12828_v26, 16  ;;  %v3376_v53 = vpop.permute.xlu2 %3375 }
 0x2cd   : > { %15465 = vst [vmem:[#allocation63_spill] sm:$0xff] %v12860_v16  ;;  %v3127_v44 = vpop.f32.mrf.mxu0  ;;  %v5091_v20 = vshrl.u32 %v10123_v49, 16  ;;  %v5094_v29 = vshll.u32 %v10123_v49, 16  ;;  %v5104_v49 = vrot.slane %v5102_v9, 4 }
 0x2ce   : > { %v3508_v11 = vpack.c.bf16 %v3476_v13, %v3476_v13  ;;  %v3186_v7 = vadd.f32 %v3127_v44, %v2930_v0  ;;  %v15129_v13 = vshll.u32 %v12828_v26, 16  ;;  %v12886_v38 = vpop.f32.mrf.mxu3  ;;  %v6685_v41 = vrot.slane %v15128_v57, 1 }
 0x2cf   : > { %v12864_v27 = vpop.f32.mrf.mxu2 }
 0x2d0   : > { %v12868_v12 = vld [vmem:[#allocation2 + $0x3c] sm:$0xff]  ;;  %3540 = vst.msk [vmem:[#allocation2 + $0x44] sm:$0xf] %vm393_vm7, %v3508_v11  ;;  %v3253_v19 = vadd.f32 %v12330_v55, %v3186_v7  ;;  %9130 = vmatmul.msk.bf16.gmra.mxu0 %vm565_vm2, %v3031_v1  ;;  %v4486_v55 = vsel %vm710_vm4, %v12784_v63, %v12866_v10  ;;  %v6686_v57 = vrot.slane %v15129_v13, 2 }
 0x2d1   : > { %v2269_v59 = vpop.f32.mrf.mxu1  ;;  %v4488_v5 = vshrl.u32 %v12868_v12, 16  ;;  %v4491_v24 = vshll.u32 %v12868_v12, 16  ;;  %v15131_v39 = vrot.slane %v12868_v12, 3 }
 0x2d2   : > { %v3285_v50 = vmax.f32 %v3253_v19, 0.0  ;;  %v12880_v0 = vadd.f32 %v2269_v59, %v12201_v36  ;;  %v15466_v36 = vld [vmem:[#allocation39_spill] sm:$0xff] }
 0x2d3   : > { %v4755_v44 = vrot.slane %v4488_v5, 3  ;;  %v4756_v1 = vrot.slane %v4491_v24, 4  ;;  %v2931_v7 = vadd.f32 %v15466_v36, %v2719_v23  ;;  %v12899_v63 = vsel %vm531_vm1, %v4258_v51, %v15131_v39  ;;  %v12915_v51 = vld [vmem:[#allocation4] ss:$0 sm:$0xff] }
 0x2d4   : > { %v3477_v11 = vmul.f32 %v3376_v53, %v3285_v50  ;;  %9255 = vmatmul.msk.bf16.gmra.mxu2 %vm4280_vm10, %v4486_v55  ;;  %v12910_v36 = vor.u32 %v6686_v57, %v6685_v41 }
 0x2d5   : > { %v3129_v19 = vpop.f32.mrf.mxu0  ;;  %v12892_v59 = vor.u32 %v4756_v1, %v4755_v44  ;;  %v5101_v44 = vrot.slane %v5099_v52, 3 }
 0x2d6   : > { %v3509_v50 = vpack.c.bf16 %v3477_v11, %v3477_v11  ;;  %v3187_v53 = vadd.f32 %v3129_v19, %v2931_v7  ;;  %v5093_v19 = vrot.slane %v5091_v20, 3  ;;  %v12926_v21 = vsel %vm2954_vm8, %v12830_v54, %v12910_v36  ;;  %v12940_v13 = vpop.f32.mrf.mxu3 }
 0x2d7   : > { %v12903_v55 = vpop.f32.mrf.mxu2  ;;  %v4758_v23 = vsel %vm1009_vm3, %v12812_v31, %v12892_v59  ;;  %v12908_v1 = vld [vmem:[#allocation2 + $0x40] sm:$0xff]  ;;  %v5096_v31 = vrot.slane %v5094_v29, 4  ;;  %15468 = vst [vmem:[#allocation74_spill] sm:$0xff] %v12926_v21  ;;  %v12928_v41 = vor.u32 %v5104_v49, %v5101_v44  ;;  %v2932_v20 = vadd.f32 %v12020_v34, %v2720_v18  ;;  %v15469_v29 = vld [vmem:[#allocation44_spill] sm:$0xff] }
 0x2d8   : > { %15467 = vst [vmem:[#allocation60_spill] sm:$0xff] %v12908_v1  ;;  %v3254_v11 = vadd.f32 %v12915_v51, %v3187_v53  ;;  %9273 = vmatmul.msk.bf16.gmra.mxu3 %vm4280_vm10, %v4758_v23  ;;  %v15130_v57 = vrot.slane %v12908_v1, 1  ;;  %v4493_v53 = vrot.slane %v4491_v24, 3  ;;  %v10249_v44 = vld [vmem:[#allocation2 + $0x1c] sm:$0xff]  }
 0x2d9   : > { %3541 = vst.msk [vmem:[#allocation2 + $0x48] sm:$0xf] %vm393_vm7, %v3509_v50  ;;  %v2272_v7 = vpop.f32.mrf.mxu1  ;;  %v4490_v50 = vrot.slane %v4488_v5, 2  ;;  %v5111_v39 = vshll.u32 %v10249_v44, 16 }
 0x2da   : > { %v3286_v52 = vmax.f32 %v3254_v11, 0.0  ;;  %v12920_v9 = vadd.f32 %v2272_v7, %v12232_v61  ;;  %v15470_v61 = vrot.slane %v12828_v26, 1  ;;  %v5097_v7 = vor.u32 %v5096_v31, %v5093_v19 }
 0x2db   : > { %v12946_v18 = vor.u32 %v4493_v53, %v4490_v50  ;;  %v5108_v50 = vshrl.u32 %v10249_v44, 16  ;;  %v15475_v44 = vrot.slane %v12868_v12, 3 }
 0x2dc   : > { %v3478_v23 = vmul.f32 %v3381_v37, %v3286_v52  ;;  %9234 = vmatmul.msk.bf16.vlgmr.msrb.gmra.mxu1 %vm4280_vm10, %v15469_v29  ;;  %v12938_v11 = vsel %vm2742_vm5, %v15470_v61, %v15130_v57  ;;  %v5106_v34 = vsel %vm1009_vm3, %v5097_v7, %v12928_v41  ;;  %v15132_v37 = vshrl.u32 %v12908_v1, 16  ;;  %v15472_v29 = vld [vmem:[#allocation31_spill] sm:$0xff]  ;;  %v15473_v7 = vld [vmem:[#allocation50_spill] sm:$0xff] }
 0x2dd   : > { %15471 = vst [vmem:[#allocation23_spill] sm:$0xff] %v12938_v11  ;;  %v3132_v54 = vpop.f32.mrf.mxu0  ;;  %v2721_v61 = vadd.f32 %v15472_v29, %v12478_v2 }
 0x2de   : > { %v3510_v5 = vpack.c.bf16 %v3478_v23, %v3478_v23  ;;  %v3188_v24 = vadd.f32 %v3132_v54, %v2932_v20  ;;  %v6689_v21 = vrot.slane %v15132_v37, 1 }
 0x2df   : > { %v12942_v49 = vpop.f32.mrf.mxu2 }
 0x2e0   : > { %v12948_v52 = vld [vmem:[#allocation2 + $0x44] sm:$0xff]  ;;  %3542 = vst.msk [vmem:[#allocation2 + $0x4c] sm:$0xf] %vm393_vm7, %v3510_v5  ;;  %v3255_v19 = vadd.f32 %v12915_v51, %v3188_v24  ;;  %9284 = vmatmul.msk.bf16.vlgmr.msrb.gmra.mxu0 %vm4280_vm10, %v5106_v34  ;;  %v3386_v5 = vpop.permute.xlu1 %3385  ;;  %v4495_v24 = vsel %vm710_vm4, %v12866_v10, %v12946_v18  ;;  %v15476_v10 = vshll.u32 %v12908_v1, 16 }
 0x2e1   : > { %v2274_v31 = vpop.f32.mrf.mxu1  ;;  %v4497_v23 = vshrl.u32 %v12948_v52, 16  ;;  %v4500_v20 = vshll.u32 %v12948_v52, 16  ;;  %v15133_v2 = vrot.slane %v12948_v52, 3 }
 0x2e2   : > { %v3287_v54 = vmax.f32 %v3255_v19, 0.0  ;;  %v12960_v57 = vadd.f32 %v2274_v31, %v15473_v7  ;;  %v15474_v19 = vld [vmem:[#allocation28_spill] sm:$0xff]  ;;  %v6690_v16 = vrot.slane %v15476_v10, 2 }
 0x2e3   : > { %v4759_v34 = vrot.slane %v4497_v23, 3  ;;  %v4760_v29 = vrot.slane %v4500_v20, 4  ;;  %v2933_v53 = vadd.f32 %v15474_v19, %v2721_v61  ;;  %v12977_v11 = vsel %vm531_vm1, %v15475_v44, %v15133_v2  ;;  %v15479_v19 = vld [vmem:[#allocation32_spill] sm:$0xff] }
 0x2e4   : > { %v3479_v33 = vmul.f32 %v3386_v5, %v3287_v54  ;;  %9256 = vmatmul.msk.bf16.gmra.mxu2 %vm4280_vm10, %v4495_v24  ;;  %v12986_v5 = vpop.f32.mrf.mxu3  ;;  %v5110_v24 = vrot.slane %v5108_v50, 3  ;;  %v12990_v12 = vor.u32 %v6690_v16, %v6689_v21  ;;  %v2722_v44 = vadd.f32 %v15479_v19, %v12524_v45  ;;  %v3391_v21 = vpop.permute.xlu2 %3390  ;;  %v15482_v19 = vld [vmem:[#allocation27_spill] sm:$0xff] }
 0x2e5   : > { %v3134_v31 = vpop.f32.mrf.mxu0  ;;  %v12970_v7 = vor.u32 %v4760_v29, %v4759_v34  ;;  %15477 = vst [vmem:[#allocation66_spill] sm:$0xff] %v12986_v5  ;;  %v5113_v34 = vrot.slane %v5111_v39, 4  ;;  %v4502_v50 = vrot.slane %v4500_v20, 3 }
 0x2e6   : > { %v3511_v42 = vpack.c.bf16 %v3479_v33, %v3479_v33  ;;  %v3189_v37 = vadd.f32 %v3134_v31, %v2933_v53  ;;  %v13004_v16 = vsel %vm2954_vm8, %v12910_v36, %v12990_v12 }
 0x2e7   : > { %v12981_v54 = vpop.f32.mrf.mxu2  ;;  %v4762_v61 = vsel %vm1009_vm3, %v12892_v59, %v12970_v7  ;;  %v12988_v29 = vld [vmem:[#allocation2 + $0x48] sm:$0xff]  ;;  %15481 = vst [vmem:[#allocation70_spill] sm:$0xff] %v13004_v16  ;;  %v13006_v45 = vor.u32 %v5113_v34, %v5110_v24 }
 0x2e8   : > { %15478 = vst [vmem:[#allocation75_spill] sm:$0xff] %v12988_v29  ;;  %v3256_v33 = vadd.f32 %v12915_v51, %v3189_v37  ;;  %9274 = vmatmul.msk.bf16.gmra.mxu3 %vm4280_vm10, %v4762_v61  ;;  %v15480_v59 = vld [vmem:[#allocation38_spill] sm:$0xff]  ;;  %v15134_v39 = vrot.slane %v12988_v29, 1  ;;  %v2934_v61 = vadd.f32 %v15482_v19, %v2722_v44  ;;  %v15488_v44 = vld [vmem:[#allocation40_spill] sm:$0xff] }
 0x2e9   : > { %3543 = vst.msk [vmem:[#allocation2 + $0x50] sm:$0xf] %vm393_vm7, %v3511_v42  ;;  %v2277_v53 = vpop.f32.mrf.mxu1  ;;  %v4499_v42 = vrot.slane %v4497_v23, 2  ;;  %v5115_v23 = vsel %vm1009_vm3, %v12928_v41, %v13006_v45 }
 0x2ea   : > { %v3288_v31 = vmax.f32 %v3256_v33, 0.0  ;;  %v12998_v10 = vadd.f32 %v2277_v53, %v15480_v59  ;;  %v15483_v33 = vrot.slane %v12908_v1, 1  ;;  %v10251_v59 = vld [vmem:[#allocation2 + $0x24] sm:$0xff]   ;;  %v15489_v1 = vshrl.u32 %v12988_v29, 16 }
 0x2eb   : > { %v13023_v20 = vor.u32 %v4502_v50, %v4499_v42  ;;  %v5117_v50 = vshrl.u32 %v10251_v59, 16 }
 0x2ec   : > { %v3480_v37 = vmul.f32 %v3391_v21, %v3288_v31  ;;  %9235 = vmatmul.msk.bf16.gmra.mxu1 %vm4280_vm10, %v12501_v3  ;;  %v13016_v53 = vsel %vm2742_vm5, %v15483_v33, %v15134_v39  ;;  %v15485_v31 = vld [vmem:[#allocation48_spill] sm:$0xff]  ;;  %v15486_v21 = vld [vmem:[#allocation35_spill] sm:$0xff]  ;;  %v13033_v33 = vpop.f32.mrf.mxu3  ;;  %v6693_v26 = vrot.slane %v15489_v1, 1 }
 0x2ed   : > { %15484 = vst [vmem:[#allocation67_spill] sm:$0xff] %v13016_v53  ;;  %v3137_v36 = vpop.f32.mrf.mxu0  ;;  %v2723_v19 = vadd.f32 %v15486_v21, %v15485_v31  ;;  %v5120_v31 = vshll.u32 %v10251_v59, 16  ;;  %v15491_v59 = vrot.slane %v12948_v52, 3  ;;  %v15495_v52 = vld [vmem:[#allocation36_spill] sm:$0xff] }
 0x2ee   : > { %v3512_v2 = vpack.c.bf16 %v3480_v37, %v3480_v37  ;;  %v3190_v24 = vadd.f32 %v3137_v36, %v2934_v61  ;;  %15487 = vst [vmem:[#allocation21_spill] sm:$0xff] %v13033_v33 }
 0x2ef   : > { %v13018_v34 = vpop.f32.mrf.mxu2 }
 0x2f0   : > { %v13025_v3 = vld [vmem:[#allocation2 + $0x4c] sm:$0xff]  ;;  %3544 = vst.msk [vmem:[#allocation2 + $0x54] sm:$0xf] %vm393_vm7, %v3512_v2  ;;  %v3257_v37 = vadd.f32 %v12915_v51, %v3190_v24  ;;  %9285 = vmatmul.msk.bf16.gmra.mxu0 %vm4280_vm10, %v5115_v23  ;;  %v3396_v24 = vpop.permute.xlu0 %3395  ;;  %v4504_v23 = vsel %vm710_vm4, %v12946_v18, %v13023_v20  ;;  %v15493_v18 = vshll.u32 %v12988_v29, 16 }
 0x2f1   : > { %v2279_v61 = vpop.f32.mrf.mxu1  ;;  %v4506_v41 = vshrl.u32 %v13025_v3, 16  ;;  %v4509_v42 = vshll.u32 %v13025_v3, 16  ;;  %v15141_v2 = vrot.slane %v13025_v3, 3 }
 0x2f2   : > { %v3289_v39 = vmax.f32 %v3257_v37, 0.0  ;;  %v13039_v16 = vadd.f32 %v2279_v61, %v15488_v44  ;;  %v15490_v37 = vld [vmem:[#allocation42_spill] sm:$0xff]  ;;  %v6694_v32 = vrot.slane %v15493_v18, 2  ;;  %v15498_v18 = vld [vmem:[#allocation29_spill] sm:$0xff] }
 0x2f3   : > { %v4763_v21 = vrot.slane %v4506_v41, 3  ;;  %v4764_v53 = vrot.slane %v4509_v42, 4  ;;  %v2935_v36 = vadd.f32 %v15490_v37, %v2723_v19  ;;  %v13056_v33 = vsel %vm531_vm1, %v15491_v59, %v15141_v2 }
 0x2f4   : > { %v3481_v43 = vmul.f32 %v3396_v24, %v3289_v39  ;;  %9257 = vmatmul.msk.bf16.gmra.mxu2 %vm4280_vm10, %v4504_v23  ;;  %15492 = vst [vmem:[#allocation10_spill] sm:$0xff] %v13056_v33  ;;  %v5122_v24 = vrot.slane %v5120_v31, 4  ;;  %v2724_v37 = vadd.f32 %v15495_v52, %v12588_v46  ;;  %v4511_v31 = vrot.slane %v4509_v42, 3 }
 0x2f5   : > { %v3139_v44 = vpop.f32.mrf.mxu0  ;;  %v13049_v61 = vor.u32 %v4764_v53, %v4763_v21  ;;  %v5119_v53 = vrot.slane %v5117_v50, 3  ;;  %v13067_v21 = vor.u32 %v6694_v32, %v6693_v26  ;;  %v3401_v26 = vpop.permute.xlu1 %3400  ;;  %v15505_v33 = vrot.slane %v13025_v3, 3  ;;  %v15509_v3 = vld [vmem:[#allocation76_spill] sm:$0xff] }
 0x2f6   : > { %v3513_v5 = vpack.c.bf16 %v3481_v43, %v3481_v43  ;;  %v3191_v1 = vadd.f32 %v3139_v44, %v2935_v36 }
 0x2f7   : > { %v13060_v39 = vpop.f32.mrf.mxu2  ;;  %v4766_v19 = vsel %vm1009_vm3, %v12970_v7, %v13049_v61  ;;  %v13065_v23 = vld [vmem:[#allocation2 + $0x50] sm:$0xff]  ;;  %v13080_v50 = vsel %vm2954_vm8, %v12990_v12, %v13067_v21  ;;  %v13084_v46 = vor.u32 %v5122_v24, %v5119_v53 }
 0x2f8   : > { %15494 = vst [vmem:[#allocation79_spill] sm:$0xff] %v13065_v23  ;;  %v3258_v43 = vadd.f32 %v12915_v51, %v3191_v1  ;;  %9275 = vmatmul.msk.bf16.gmra.mxu3 %vm4280_vm10, %v4766_v19  ;;  %v15142_v7 = vrot.slane %v13065_v23, 1  ;;  %v2936_v1 = vadd.f32 %v15498_v18, %v2724_v37  ;;  %v15499_v19 = vrot.slane %v12988_v29, 1  ;;  %v10253_v53 = vld [vmem:[#allocation2 + $0x2c] sm:$0xff]  }
 0x2f9   : > { %3545 = vst.msk [vmem:[#allocation2 + $0x58] sm:$0xf] %vm393_vm7, %v3513_v5  ;;  %v13074_v36 = vpop.f32.mrf.mxu1  ;;  %v4508_v5 = vrot.slane %v4506_v41, 2  ;;  %v5124_v41 = vsel %vm1009_vm3, %v13006_v45, %v13084_v46  ;;  %v15145_v37 = vshrl.u32 %v13065_v23, 16 }
 0x2fa   : > { %v3290_v44 = vmax.f32 %v3258_v43, 0.0  ;;  %15496 = vst [vmem:[#allocation18_spill] sm:$0xff] %v13080_v50  ;;  %v13094_v12 = vsel %vm2742_vm5, %v15499_v19, %v15142_v7  ;;  %v5126_v19 = vshrl.u32 %v10253_v53, 16 }
 0x2fb   : > { %v13082_v32 = vpop.f32.mrf.mxu3  ;;  %15500 = vst [vmem:[#allocation12_spill] sm:$0xff] %v13094_v12  ;;  %v13101_v42 = vor.u32 %v4511_v31, %v4508_v5  ;;  %v6697_v50 = vrot.slane %v15145_v37, 1 }
 0x2fc   : > { %15497 = vst [vmem:[#allocation25_spill] sm:$0xff] %v13082_v32  ;;  %v3482_v59 = vmul.f32 %v3401_v26, %v3290_v44  ;;  %9236 = vmatmul.msk.bf16.gmra.mxu1 %vm4280_vm10, %v12571_v8  ;;  %v15502_v44 = vld [vmem:[#allocation37_spill] sm:$0xff] }
 0x2fd   : > { %v3142_v52 = vpop.f32.mrf.mxu0  ;;  %v2725_v26 = vadd.f32 %v15502_v44, %v12618_v48  ;;  %v3406_v48 = vpop.permute.xlu2 %3405 }
 0x2fe   : > { %v3514_v43 = vpack.c.bf16 %v3482_v59, %v3482_v59  ;;  %v3192_v2 = vadd.f32 %v3142_v52, %v2936_v1  ;;  %v5129_v52 = vshll.u32 %v10253_v53, 16 }
 0x2ff   : > { %v13096_v24 = vpop.f32.mrf.mxu2 }
 0x300   : > { %15501 = vst [vmem:[#allocation26_spill] sm:$0xff] %v13096_v24  ;;  %v13103_v8 = vld [vmem:[#allocation2 + $0x54] sm:$0xff]  ;;  %v3259_v59 = vadd.f32 %v12915_v51, %v3192_v2  ;;  %9286 = vmatmul.msk.bf16.gmra.mxu0 %vm4280_vm10, %v5124_v41  ;;  %v4513_v2 = vsel %vm710_vm4, %v13023_v20, %v13101_v42 }
 0x301   : > { %3546 = vst.msk [vmem:[#allocation2 + $0x5c] sm:$0xf] %vm393_vm7, %v3514_v43  ;;  %v13111_v18 = vpop.f32.mrf.mxu1  ;;  %v4515_v1 = vshrl.u32 %v13103_v8, 16  ;;  %v4518_v45 = vshll.u32 %v13103_v8, 16  ;;  %v15146_v7 = vrot.slane %v13103_v8, 3 }
 0x302   : > { %v3291_v31 = vmax.f32 %v3259_v59, 0.0  ;;  %v15504_v59 = vld [vmem:[#allocation30_spill] sm:$0xff] }
 0x303   : > { %v13120_v43 = vpop.f32.mrf.mxu3  ;;  %v4767_v41 = vrot.slane %v4515_v1, 3  ;;  %v4768_v44 = vrot.slane %v4518_v45, 4  ;;  %v2937_v5 = vadd.f32 %v15504_v59, %v2725_v26  ;;  %v13133_v20 = vsel %vm531_vm1, %v15505_v33, %v15146_v7  ;;  %v15512_v59 = vld [vmem:[#allocation47_spill] sm:$0xff] }
 0x304   : > { %15503 = vst [vmem:[#allocation13_spill] sm:$0xff] %v13120_v43  ;;  %v3483_v12 = vmul.f32 %v3406_v48, %v3291_v31  ;;  %9258 = vmatmul.msk.bf16.gmra.mxu2 %vm4280_vm10, %v4513_v2  ;;  %v15507_v43 = vshll.u32 %v13065_v23, 16  ;;  %v5128_v48 = vrot.slane %v5126_v19, 3  ;;  %v5131_v2 = vrot.slane %v5129_v52, 4 }
 0x305   : > { %v3144_v53 = vpop.f32.mrf.mxu0  ;;  %v13126_v29 = vor.u32 %v4768_v44, %v4767_v41  ;;  %15506 = vst [vmem:[#allocation14_spill] sm:$0xff] %v13133_v20  ;;  %v2726_v33 = vadd.f32 %v15509_v3, %v12667_v22  ;;  %v4520_v52 = vrot.slane %v4518_v45, 3  ;;  %v15519_v20 = vrot.slane %v13103_v8, 3  ;;  %v15523_v8 = vld [vmem:[#allocation41_spill] sm:$0xff] }
 0x306   : > { %v6698_v32 = vrot.slane %v15507_v43, 2  ;;  %v3515_v24 = vpack.c.bf16 %v3483_v12, %v3483_v12  ;;  %v3193_v37 = vadd.f32 %v3144_v53, %v2937_v5  ;;  %v13161_v22 = vor.u32 %v5131_v2, %v5128_v48  ;;  %v10255_v48 = vld [vmem:[#allocation2 + $0x34] sm:$0xff]  }
 0x307   : > { %v13137_v31 = vpop.f32.mrf.mxu2  ;;  %v4770_v26 = vsel %vm1009_vm3, %v13049_v61, %v13126_v29  ;;  %v2938_v53 = vadd.f32 %v15512_v59, %v2726_v33 }
 0x308   : > { %v13142_v41 = vld [vmem:[#allocation2 + $0x58] sm:$0xff]  ;;  %v13144_v44 = vor.u32 %v6698_v32, %v6697_v50  ;;  %3547 = vst.msk [vmem:[#allocation2 + $0x60] sm:$0xf] %vm393_vm7, %v3515_v24  ;;  %v3260_v12 = vadd.f32 %v12915_v51, %v3193_v37  ;;  %9276 = vmatmul.msk.bf16.gmra.mxu3 %vm4280_vm10, %v4770_v26  ;;  %v3411_v50 = vpop.permute.xlu0 %3410  ;;  %v4517_v24 = vrot.slane %v4515_v1, 2  ;;  %v15513_v26 = vrot.slane %v13065_v23, 1 }
 0x309   : > { %15508 = vst [vmem:[#allocation16_spill] sm:$0xff] %v13142_v41  ;;  %v13151_v5 = vpop.f32.mrf.mxu1  ;;  %v15147_v61 = vrot.slane %v13142_v41, 1  ;;  %v5133_v1 = vsel %vm1009_vm3, %v13084_v46, %v13161_v22  ;;  %v15150_v33 = vshrl.u32 %v13142_v41, 16 }
 0x30a   : > { %v3292_v43 = vmax.f32 %v3260_v12, 0.0  ;;  %v13157_v19 = vsel %vm2954_vm8, %v13067_v21, %v13144_v44  ;;  %v13178_v45 = vor.u32 %v4520_v52, %v4517_v24 }
 0x30b   : > { %15510 = vst [vmem:[#allocation24_spill] sm:$0xff] %v13157_v19  ;;  %v13159_v32 = vpop.f32.mrf.mxu3  ;;  %v13171_v21 = vsel %vm2742_vm5, %v15513_v26, %v15147_v61  ;;  %v5135_v26 = vshrl.u32 %v10255_v48, 16  ;;  %v6701_v19 = vrot.slane %v15150_v33, 1 }
 0x30c   : > { %15511 = vst [vmem:[#allocation39_spill] sm:$0xff] %v13159_v32  ;;  %v3484_v37 = vmul.f32 %v3411_v50, %v3292_v43  ;;  %9237 = vmatmul.msk.bf16.gmra.mxu1 %vm4280_vm10, %v12642_v58  ;;  %v15516_v43 = vld [vmem:[#allocation71_spill] sm:$0xff] }
 0x30d   : > { %15514 = vst [vmem:[#allocation44_spill] sm:$0xff] %v13171_v21  ;;  %v3147_v3 = vpop.f32.mrf.mxu0  ;;  %v2727_v50 = vadd.f32 %v15516_v43, %v12701_v60  ;;  %v3416_v60 = vpop.permute.xlu1 %3415 }
 0x30e   : > { %v3516_v12 = vpack.c.bf16 %v3484_v37, %v3484_v37  ;;  %v3194_v7 = vadd.f32 %v3147_v3, %v2938_v53  ;;  %v5138_v3 = vshll.u32 %v10255_v48, 16 }
 0x30f   : > { %v13173_v2 = vpop.f32.mrf.mxu2  ;;  %v13180_v58 = vld [vmem:[#allocation2 + $0x5c] sm:$0xff] }
 0x310   : > { %15515 = vst [vmem:[#allocation31_spill] sm:$0xff] %v13173_v2  ;;  %v3261_v37 = vadd.f32 %v12915_v51, %v3194_v7  ;;  %9287 = vmatmul.msk.bf16.gmra.mxu0 %vm4280_vm10, %v5133_v1  ;;  %v4524_v53 = vshrl.u32 %v13180_v58, 16  ;;  %v4527_v46 = vshll.u32 %v13180_v58, 16  ;;  %v15151_v61 = vrot.slane %v13180_v58, 3 }
 0x311   : > { %3548 = vst.msk [vmem:[#allocation2 + $0x64] sm:$0xf] %vm393_vm7, %v3516_v12  ;;  %v13188_v59 = vpop.f32.mrf.mxu1  ;;  %v4522_v7 = vsel %vm710_vm4, %v13101_v42, %v13178_v45 }
 0x312   : > { %v3293_v52 = vmax.f32 %v3261_v37, 0.0  ;;  %v4771_v1 = vrot.slane %v4524_v53, 3  ;;  %v4772_v43 = vrot.slane %v4527_v46, 4  ;;  %v15518_v37 = vld [vmem:[#allocation34_spill] sm:$0xff]  ;;  %v13210_v42 = vsel %vm531_vm1, %v15519_v20, %v15151_v61 }
 0x313   : > { %v13197_v12 = vpop.f32.mrf.mxu3  ;;  %v2939_v24 = vadd.f32 %v15518_v37, %v2727_v50  ;;  %15520 = vst [vmem:[#allocation28_spill] sm:$0xff] %v13210_v42  ;;  %v2728_v20 = vadd.f32 %v15523_v8, %v12756_v40  ;;  %v15526_v37 = vld [vmem:[#allocation52_spill] sm:$0xff]  ;;  %v15533_v42 = vrot.slane %v13180_v58, 3  ;;  %v15535_v58 = vld [vmem:[#allocation77_spill] sm:$0xff] }
 0x314   : > { %15517 = vst [vmem:[#allocation50_spill] sm:$0xff] %v13197_v12  ;;  %v3485_v21 = vmul.f32 %v3416_v60, %v3293_v52  ;;  %9259 = vmatmul.msk.bf16.gmra.mxu2 %vm4280_vm10, %v4522_v7  ;;  %v13203_v23 = vor.u32 %v4772_v43, %v4771_v1  ;;  %v15521_v12 = vshll.u32 %v13142_v41, 16  ;;  %v5137_v60 = vrot.slane %v5135_v26, 3 }
 0x315   : > { %v3149_v48 = vpop.f32.mrf.mxu0  ;;  %v5140_v7 = vrot.slane %v5138_v3, 4  ;;  %v4529_v3 = vrot.slane %v4527_v46, 3 }
 0x316   : > { %v6702_v32 = vrot.slane %v15521_v12, 2  ;;  %v3517_v2 = vpack.c.bf16 %v3485_v21, %v3485_v21  ;;  %v3195_v33 = vadd.f32 %v3149_v48, %v2939_v24  ;;  %v4774_v50 = vsel %vm1009_vm3, %v13126_v29, %v13203_v23 }
 0x317   : > { %v13214_v52 = vpop.f32.mrf.mxu2  ;;  %v13238_v40 = vor.u32 %v5140_v7, %v5137_v60  ;;  %v2940_v48 = vadd.f32 %v15526_v37, %v2728_v20  ;;  %v10257_v60 = vld [vmem:[#allocation2 + $0x3c] sm:$0xff]  }
 0x318   : > { %v13219_v1 = vld [vmem:[#allocation2 + $0x60] sm:$0xff]  ;;  %v13221_v43 = vor.u32 %v6702_v32, %v6701_v19  ;;  %3549 = vst.msk [vmem:[#allocation2 + $0x68] sm:$0xf] %vm393_vm7, %v3517_v2  ;;  %v3262_v21 = vadd.f32 %v12915_v51, %v3195_v33  ;;  %9277 = vmatmul.msk.bf16.gmra.mxu3 %vm4280_vm10, %v4774_v50  ;;  %v3421_v19 = vpop.permute.xlu2 %3420  ;;  %v4526_v2 = vrot.slane %v4524_v53, 2  ;;  %v15527_v50 = vrot.slane %v13142_v41, 1 }
 0x319   : > { %15522 = vst [vmem:[#allocation32_spill] sm:$0xff] %v13219_v1  ;;  %v13228_v24 = vpop.f32.mrf.mxu1  ;;  %v15152_v29 = vrot.slane %v13219_v1, 1  ;;  %v5142_v53 = vsel %vm1009_vm3, %v13161_v22, %v13238_v40  ;;  %v15155_v20 = vshrl.u32 %v13219_v1, 16 }
 0x31a   : > { %v3294_v12 = vmax.f32 %v3262_v21, 0.0  ;;  %v13234_v26 = vsel %vm2954_vm8, %v13144_v44, %v13221_v43  ;;  %v13255_v46 = vor.u32 %v4529_v3, %v4526_v2 }
 0x31b   : > { %15524 = vst [vmem:[#allocation38_spill] sm:$0xff] %v13234_v26  ;;  %v13236_v32 = vpop.f32.mrf.mxu3  ;;  %v13248_v44 = vsel %vm2742_vm5, %v15527_v50, %v15152_v29  ;;  %v5144_v50 = vshrl.u32 %v10257_v60, 16  ;;  %v6705_v26 = vrot.slane %v15155_v20, 1 }
 0x31c   : > { %15525 = vst [vmem:[#allocation27_spill] sm:$0xff] %v13236_v32  ;;  %v3486_v33 = vmul.f32 %v3421_v19, %v3294_v12  ;;  %9238 = vmatmul.msk.bf16.gmra.mxu1 %vm4280_vm10, %v12733_v47  ;;  %v15530_v12 = vld [vmem:[#allocation61_spill] sm:$0xff] }
 0x31d   : > { %15528 = vst [vmem:[#allocation48_spill] sm:$0xff] %v13248_v44  ;;  %v3152_v8 = vpop.f32.mrf.mxu0  ;;  %v2729_v19 = vadd.f32 %v15530_v12, %v12799_v15  ;;  %v3426_v15 = vpop.permute.xlu0 %3425 }
 0x31e   : > { %v3518_v21 = vpack.c.bf16 %v3486_v33, %v3486_v33  ;;  %v3196_v61 = vadd.f32 %v3152_v8, %v2940_v48  ;;  %v5147_v8 = vshll.u32 %v10257_v60, 16 }
 0x31f   : > { %v13250_v7 = vpop.f32.mrf.mxu2  ;;  %v13257_v47 = vld [vmem:[#allocation2 + $0x64] sm:$0xff] }
 0x320   : > { %15529 = vst [vmem:[#allocation35_spill] sm:$0xff] %v13250_v7  ;;  %v3263_v33 = vadd.f32 %v12915_v51, %v3196_v61  ;;  %9288 = vmatmul.msk.bf16.gmra.mxu0 %vm4280_vm10, %v5142_v53  ;;  %v4533_v48 = vshrl.u32 %v13257_v47, 16  ;;  %v4536_v22 = vshll.u32 %v13257_v47, 16  ;;  %v15156_v29 = vrot.slane %v13257_v47, 3 }
 0x321   : > { %3550 = vst.msk [vmem:[#allocation2 + $0x6c] sm:$0xf] %vm393_vm7, %v3518_v21  ;;  %v13265_v37 = vpop.f32.mrf.mxu1  ;;  %v4531_v61 = vsel %vm710_vm4, %v13178_v45, %v13255_v46 }
 0x322   : > { %v3295_v3 = vmax.f32 %v3263_v33, 0.0  ;;  %v4775_v53 = vrot.slane %v4533_v48, 3  ;;  %v4776_v12 = vrot.slane %v4536_v22, 4  ;;  %v15532_v33 = vld [vmem:[#allocation55_spill] sm:$0xff]  ;;  %v13287_v45 = vsel %vm531_vm1, %v15533_v42, %v15156_v29 }
 0x323   : > { %v13274_v21 = vpop.f32.mrf.mxu3  ;;  %v2941_v2 = vadd.f32 %v15532_v33, %v2729_v19  ;;  %v2730_v42 = vadd.f32 %v15535_v58, %v12845_v14  ;;  %v4538_v33 = vrot.slane %v4536_v22, 3  ;;  %v10259_v58 = vld [vmem:[#allocation2 + $0x44] sm:$0xff]  }
 0x324   : > { %15531 = vst [vmem:[#allocation40_spill] sm:$0xff] %v13274_v21  ;;  %v3487_v44 = vmul.f32 %v3426_v15, %v3295_v3  ;;  %9260 = vmatmul.msk.bf16.gmra.mxu2 %vm4280_vm10, %v4531_v61  ;;  %v13280_v41 = vor.u32 %v4776_v12, %v4775_v53  ;;  %v15534_v21 = vshll.u32 %v13219_v1, 16  ;;  %v5146_v15 = vrot.slane %v5144_v50, 3 }
 0x325   : > { %v3154_v60 = vpop.f32.mrf.mxu0  ;;  %v5149_v61 = vrot.slane %v5147_v8, 4  ;;  %v3661_v50 = vadd.f32 %v12646_v17, %v13074_v36  ;;  %v3431_v8 = vpop.permute.xlu1 %3430  ;;  %v15537_v17 = vld [vmem:[#allocation57_spill] sm:$0xff] }
 0x326   : > { %v6706_v32 = vrot.slane %v15534_v21, 2  ;;  %v3519_v7 = vpack.c.bf16 %v3487_v44, %v3487_v44  ;;  %v3197_v20 = vadd.f32 %v3154_v60, %v2941_v2  ;;  %v4778_v19 = vsel %vm1009_vm3, %v13203_v23, %v13280_v41  ;;  %v9398_v23 = vld [vmem:[%s15037_s4 + $0x18] sm:$0xf] }
 0x327   : > { %v13291_v3 = vpop.f32.mrf.mxu2  ;;  %v4535_v21 = vrot.slane %v4533_v48, 2  ;;  %v2942_v36 = vadd.f32 %v15537_v17, %v2730_v42  ;;  %v3436_v42 = vpop.permute.xlu2 %3435 }
 0x328   : > { %v13296_v53 = vld [vmem:[#allocation2 + $0x68] sm:$0xff]  ;;  %v13298_v12 = vor.u32 %v6706_v32, %v6705_v26  ;;  %3551 = vst.msk [vmem:[#allocation2 + $0x70] sm:$0xf] %vm393_vm7, %v3519_v7  ;;  %v3264_v44 = vadd.f32 %v12915_v51, %v3197_v20  ;;  %9278 = vmatmul.msk.bf16.gmra.mxu3 %vm4280_vm10, %v4778_v19  ;;  %v6325_v32 = vsel %vm4329_vm9, %v9398_v23, 0  ;;  %v13316_v20 = vor.u32 %v5149_v61, %v5146_v15 }
 0x329   : > { %v13305_v2 = vpop.f32.mrf.mxu1  ;;  %v15157_v14 = vrot.slane %v13296_v53, 1  ;;  %6334 = vmatpush.bf16.msra.mxu3 %v6325_v32  ;;  %v15538_v15 = vrot.slane %v13219_v1, 1  ;;  %v15540_v61 = vld [vmem:[#allocation11_spill] sm:$0xff]  ;;  %v13341_v17 = vor.u32 %v4538_v33, %v4535_v21  ;;  %v5156_v21 = vshll.u32 %v10259_v58, 16  ;;  %v15545_v33 = vld [vmem:[#allocation45_spill] sm:$0xff] }
 0x32a   : > { %v3296_v26 = vmax.f32 %v3264_v44, 0.0  ;;  %v13321_v60 = vsel %vm2954_vm8, %v13221_v43, %v13298_v12  ;;  %v2731_v44 = vadd.f32 %v15540_v61, %v12880_v0  ;;  %v15541_v43 = vld [vmem:[#allocation58_spill] sm:$0xff]  ;;  %v15542_v61 = vld [vmem:[#allocation43_spill] sm:$0xff] }
 0x32b   : > { %v13314_v7 = vpop.f32.mrf.mxu3  ;;  %15536 = vst [vmem:[#allocation42_spill] sm:$0xff] %v13321_v60  ;;  %v13331_v48 = vsel %vm2742_vm5, %v15538_v15, %v15157_v14  ;;  %v3724_v23 = vadd.f32 %v15541_v43, %v3661_v50  ;;  %v5153_v50 = vshrl.u32 %v10259_v58, 16  ;;  %v15544_v58 = vshrl.u32 %v13296_v53, 16 }
 0x32c   : > { %v3488_v19 = vmul.f32 %v3431_v8, %v3296_v26  ;;  %9239 = vmatmul.msk.bf16.gmra.mxu1 %vm4280_vm10, %v12819_v28  ;;  %15539 = vst [vmem:[#allocation36_spill] sm:$0xff] %v13331_v48  ;;  %v5151_v28 = vsel %vm1009_vm3, %v13238_v40, %v13316_v20  ;;  %v2943_v43 = vadd.f32 %v15542_v61, %v2731_v44 }
 0x32d   : > { %v3157_v22 = vpop.f32.mrf.mxu0  ;;  %v3801_v14 = vadd.f32 %v13228_v24, %v3724_v23  ;;  %v6709_v60 = vrot.slane %v15544_v58, 1  ;;  %v2732_v48 = vadd.f32 %v15545_v33, %v12920_v9  ;;  %v5155_v44 = vrot.slane %v5153_v50, 3  ;;  %v13372_v23 = vld [vmem:[#allocation2 + $0x4c] sm:$0xff]  }
 0x32e   : > { %v3520_v26 = vpack.c.bf16 %v3488_v19, %v3488_v19  ;;  %v3198_v32 = vadd.f32 %v3157_v22, %v2942_v36  ;;  %v3663_v22 = vadd.f32 %v12681_v25, %v13111_v18  ;;  %v15548_v9 = vshll.u32 %v13296_v53, 16 }
 0x32f   : > { %v13336_v8 = vpop.f32.mrf.mxu2  ;;  %v13343_v29 = vld [vmem:[#allocation2 + $0x6c] sm:$0xff]  ;;  %v3836_v25 = vadd.f32 %v12823_v62, %v3801_v14  ;;  %v15549_v14 = vld [vmem:[#allocation62_spill] sm:$0xff] }
 0x330   : > { %3552 = vst.msk [vmem:[#allocation2 + $0x74] sm:$0xf] %vm393_vm7, %v3520_v26  ;;  %v3265_v0 = vadd.f32 %v12915_v51, %v3198_v32  ;;  %9289 = vmatmul.msk.bf16.gmra.mxu0 %vm4280_vm10, %v5151_v28  ;;  %v4542_v36 = vshrl.u32 %v13343_v29, 16  ;;  %v4545_v40 = vshll.u32 %v13343_v29, 16  ;;  %v4540_v26 = vsel %vm710_vm4, %v13255_v46, %v13341_v17 }
 0x331   : > { %v13350_v19 = vpop.f32.mrf.mxu1  ;;  %v5158_v46 = vrot.slane %v5156_v21, 4  ;;  %v15546_v1 = vrot.slane %v13343_v29, 3  ;;  %v6710_v62 = vrot.slane %v15548_v9, 2  ;;  %v9317_v9 = vld [vmem:[%s15037_s4 + $0x14] sm:$0xf] }
 0x332   : > { %v3297_v24 = vmax.f32 %v3265_v0, 0.0  ;;  %v4779_v28 = vrot.slane %v4542_v36, 3  ;;  %v4780_v15 = vrot.slane %v4545_v40, 4 }
 0x333   : > { %v13362_v32 = vpop.f32.mrf.mxu3 }
 0x334   : > { %15543 = vst [vmem:[#allocation29_spill] sm:$0xff] %v13362_v32  ;;  %v3489_v18 = vmul.f32 %v3436_v42, %v3297_v24  ;;  %9261 = vmatmul.msk.bf16.gmra.mxu2 %vm4280_vm10, %v4540_v26  ;;  %v13370_v61 = vor.u32 %v4780_v15, %v4779_v28  ;;  %v15547_v32 = vrot.slane %v13257_v47, 3  ;;  %v3725_v42 = vadd.f32 %v15549_v14, %v3663_v22  ;;  %v3441_v24 = vpop.permute.xlu0 %3440 }
 0x335   : > { %v3159_v0 = vpop.f32.mrf.mxu0  ;;  %v3666_v15 = vadd.f32 %v12739_v4, %v13151_v5  ;;  %v3907_v4 = vadd.f32 %v12669_v56, %v3836_v25  ;;  %v13400_v5 = vpop.permute.xlu2 %3450  ;;  %v5903_v56 = vsel %vm4329_vm9, %v9317_v9, 0 }
 0x336   : > { %v13379_v58 = vsel %vm531_vm1, %v15547_v32, %v15546_v1  ;;  %v3521_v33 = vpack.c.bf16 %v3489_v18, %v3489_v18  ;;  %v3199_v50 = vadd.f32 %v3159_v0, %v2943_v43  ;;  %v4782_v47 = vsel %vm1009_vm3, %v13280_v41, %v13370_v61  ;;  %v15550_v43 = vld [vmem:[#allocation68_spill] sm:$0xff]  ;;  %v15551_v18 = vld [vmem:[#allocation78_spill] sm:$0xff]  ;;  %5912 = vmatpush.bf16.msra.mxu2 %v5903_v56 }
 0x337   : > { %v13386_v21 = vpop.f32.mrf.mxu2  ;;  %v13391_v26 = vld [vmem:[#allocation2 + $0x70] sm:$0xff]  ;;  %v13393_v1 = vor.u32 %v6710_v62, %v6709_v60  ;;  %v3802_v32 = vadd.f32 %v13265_v37, %v3725_v42  ;;  %v2733_v28 = vadd.f32 %v15550_v43, %v12960_v57  ;;  %v2944_v0 = vadd.f32 %v15551_v18, %v2732_v48 }
 0x338   : > { %3553 = vst.msk [vmem:[#allocation2 + $0x78] sm:$0xf] %vm393_vm7, %v3521_v33  ;;  %v3266_v22 = vadd.f32 %v12915_v51, %v3199_v50  ;;  %9279 = vmatmul.msk.bf16.gmra.mxu3 %vm4280_vm10, %v4782_v47  ;;  %v13405_v60 = vor.u32 %v5158_v46, %v5155_v44  ;;  %v5162_v37 = vshrl.u32 %v13372_v23, 16  ;;  %v6475_v25 = vrot.slane %v13391_v26, 1  ;;  %v15552_v42 = vld [vmem:[#allocation51_spill] sm:$0xff] }
 0x339   : > { %v3968_v41 = vpop.f32.mrf.mxu1  ;;  %v3726_v33 = vadd.f32 %v15552_v42, %v3666_v15  ;;  %v4544_v50 = vrot.slane %v4542_v36, 2  ;;  %v4547_v48 = vrot.slane %v4545_v40, 3  ;;  %v13419_v44 = vsel %vm2954_vm8, %v13298_v12, %v13393_v1 }
 0x33a   : > { %v3298_v62 = vmax.f32 %v3266_v22, 0.0  ;;  %v3978_v14 = vadd.f32 %v3968_v41, %v3907_v4  ;;  %15553 = vst [vmem:[#allocation37_spill] sm:$0xff] %v13419_v44  ;;  %v3837_v46 = vadd.f32 %v12864_v27, %v3802_v32  ;;  %v15554_v15 = vrot.slane %v13296_v53, 1  ;;  %v15557_v41 = vld [vmem:[#allocation15_spill] sm:$0xff] }
 0x33b   : > { %v13414_v57 = vpop.f32.mrf.mxu3  ;;  %v3803_v40 = vadd.f32 %v13305_v2, %v3726_v33  ;;  %v5160_v9 = vsel %vm1009_vm3, %v13316_v20, %v13405_v60  ;;  %v3668_v20 = vadd.f32 %v12782_v30, %v13188_v59 }
 0x33c   : > { %v3490_v47 = vmul.f32 %v3441_v24, %v3298_v62  ;;  %v4020_v22 = vadd.f32 %v12981_v54, %v3978_v14  ;;  %9240 = vmatmul.msk.bf16.gmra.mxu1 %vm4280_vm10, %v12899_v63  ;;  %v13430_v36 = vsel %vm2742_vm5, %v15554_v15, %v6475_v25  ;;  %v15556_v24 = vld [vmem:[#allocation73_spill] sm:$0xff]  ;;  %v3446_v54 = vpop.permute.xlu1 %3445  ;;  %v2734_v63 = vadd.f32 %v15557_v41, %v12998_v10  ;;  %v13452_v56 = vpop.permute.xlu0 %3455 }
 0x33d   : > { %15555 = vst [vmem:[#allocation30_spill] sm:$0xff] %v13430_v36  ;;  %v3162_v4 = vpop.f32.mrf.mxu0  ;;  %v2945_v32 = vadd.f32 %v15556_v24, %v2733_v28  ;;  %v13442_v62 = vor.u32 %v4547_v48, %v4544_v50  ;;  %v5165_v14 = vshll.u32 %v13372_v23, 16  ;;  %v3908_v10 = vadd.f32 %v12725_v35, %v3837_v46 }
 0x33e   : > { %v3522_v12 = vpack.c.bf16 %v3490_v47, %v3490_v47  ;;  %v4078_v43 = vadd.f32 %v12886_v38, %v4020_v22  ;;  %v3200_v27 = vadd.f32 %v3162_v4, %v2944_v0  ;;  %v5164_v0 = vrot.slane %v5162_v37, 3  ;;  %v4097_v4 = vpop.permute.xlu2 %4096 }
 0x33f   : > { %v13437_v18 = vpop.f32.mrf.mxu2  ;;  %v13444_v2 = vld [vmem:[#allocation2 + $0x74] sm:$0xff]  ;;  %v3838_v42 = vadd.f32 %v12903_v55, %v3803_v40  ;;  %v4549_v35 = vsel %vm710_vm4, %v13341_v17, %v13442_v62  ;;  %v15160_v55 = vshrl.u32 %v13391_v26, 16  ;;  %v5167_v17 = vrot.slane %v5165_v14, 4 }
 0x340   : > { %3554 = vst.msk [vmem:[#allocation2 + $0x7c] sm:$0xf] %vm393_vm7, %v3522_v12  ;;  %v4086_v38 = vadd.f32 %v12915_v51, %v4078_v43  ;;  %v3267_v28 = vadd.f32 %v12915_v51, %v3200_v27  ;;  %9290 = vmatmul.msk.bf16.gmra.mxu0 %vm4280_vm10, %v5160_v9  ;;  %v4551_v23 = vshrl.u32 %v13444_v2, 16  ;;  %v4554_v50 = vshll.u32 %v13444_v2, 16  ;;  %v15558_v27 = vld [vmem:[#allocation53_spill] sm:$0xff] }
 0x341   : > { %v3970_v33 = vpop.f32.mrf.mxu1  ;;  %v4274_v15 = vrot.slane %v13444_v2, 3  ;;  %v15161_v43 = vshll.u32 %v13391_v26, 16  ;;  %v3727_v24 = vadd.f32 %v15558_v27, %v3668_v20  ;;  %v3909_v14 = vadd.f32 %v12788_v6, %v3838_v42  ;;  %v15560_v42 = vld [vmem:[#allocation64_spill] sm:$0xff] }
 0x342   : > { %v4090_v48 = vmax.f32 %v4086_v38, 0.0  ;;  %v3299_v47 = vmax.f32 %v3267_v28, 0.0  ;;  %v3979_v22 = vadd.f32 %v3970_v33, %v3908_v10  ;;  %v4783_v30 = vrot.slane %v4551_v23, 3 }
 0x343   : > { %v13463_v37 = vpop.f32.mrf.mxu3  ;;  %v4784_v59 = vrot.slane %v4554_v50, 4  ;;  %v15559_v38 = vrot.slane %v13343_v29, 3  ;;  %v6713_v29 = vrot.slane %v15160_v55, 1  ;;  %v4553_v27 = vrot.slane %v4551_v23, 2  ;;  %v10263_v23 = vld [vmem:[#allocation2 + $0x54] sm:$0xff]  }
 0x344   : > { %v4114_v46 = vmul.f32 %v4097_v4, %v4090_v48  ;;  %v3491_v40 = vmul.f32 %v3446_v54, %v3299_v47  ;;  %v4021_v12 = vadd.f32 %v13018_v34, %v3979_v22  ;;  %9262 = vmatmul.msk.bf16.gmra.mxu2 %vm4280_vm10, %v4549_v35  ;;  %v3804_v22 = vadd.f32 %v13350_v19, %v3727_v24  ;;  %v13497_v4 = vpop.permute.xlu1 %3460  ;;  %v15582_v55 = vld [vmem:[#allocation28_spill] sm:$0xff] }
 0x345   : > { %v3164_v41 = vpop.f32.mrf.mxu0  ;;  %v13470_v9 = vor.u32 %v4784_v59, %v4783_v30  ;;  %v13477_v28 = vsel %vm531_vm1, %v15559_v38, %v4274_v15  ;;  %v2946_v35 = vadd.f32 %v15560_v42, %v2734_v63  ;;  %v4556_v24 = vrot.slane %v4554_v50, 3 }
 0x346   : > { %v4118_v54 = vpack.c.bf16 %v4114_v46, %v4114_v46  ;;  %v3523_v10 = vpack.c.bf16 %v3491_v40, %v3491_v40  ;;  %v4079_v34 = vadd.f32 %v12940_v13, %v4021_v12  ;;  %v3201_v33 = vadd.f32 %v3164_v41, %v2945_v32  ;;  %v4102_v40 = vpop.permute.xlu0 %4101 }
 0x347   : > { %v13480_v48 = vpop.f32.mrf.mxu2  ;;  %v4786_v20 = vsel %vm1009_vm3, %v13370_v61, %v13470_v9  ;;  %v13486_v47 = vld [vmem:[#allocation2 + $0x78] sm:$0xff]  ;;  %v6714_v61 = vrot.slane %v15161_v43, 2  ;;  %v13501_v46 = vor.u32 %v5167_v17, %v5164_v0  ;;  %v5171_v42 = vshrl.u32 %v10263_v23, 16 }
 0x348   : > { %4122 = vst.msk [vmem:[#allocation2 + $0x90] sm:$0xf] %vm393_vm7, %v4118_v54  ;;  %v4087_v13 = vadd.f32 %v12915_v51, %v4079_v34  ;;  %v3268_v32 = vadd.f32 %v12915_v51, %v3201_v33  ;;  %9280 = vmatmul.msk.bf16.gmra.mxu3 %vm4280_vm10, %v4786_v20  ;;  %v6477_v41 = vrot.slane %v13486_v47, 1  ;;  %v3839_v54 = vadd.f32 %v12942_v49, %v3804_v22  ;;  %v15561_v0 = vld [vmem:[#allocation65_spill] sm:$0xff] }
 0x349   : > { %3555 = vst.msk [vmem:[#allocation2 + $0x80] sm:$0xf] %vm393_vm7, %v3523_v10  ;;  %v3973_v6 = vpop.f32.mrf.mxu1  ;;  %v13506_v38 = vor.u32 %v6714_v61, %v6713_v29  ;;  %v2735_v17 = vadd.f32 %v15561_v0, %v13039_v16  ;;  %v5169_v49 = vsel %vm1009_vm3, %v13405_v60, %v13501_v46  ;;  %v15565_v22 = vld [vmem:[#allocation17_spill] sm:$0xff] }
 0x34a   : > { %v4091_v30 = vmax.f32 %v4087_v13, 0.0  ;;  %v3300_v19 = vmax.f32 %v3268_v32, 0.0  ;;  %v3980_v59 = vadd.f32 %v3973_v6, %v3909_v14  ;;  %v15562_v14 = vld [vmem:[#allocation66_spill] sm:$0xff]  ;;  %v3910_v61 = vadd.f32 %v15565_v22, %v3839_v54 }
 0x34b   : > { %v13503_v12 = vpop.f32.mrf.mxu3  ;;  %v13533_v16 = vsel %vm2954_vm8, %v13393_v1, %v13506_v38 }
 0x34c   : > { %v4115_v10 = vmul.f32 %v4102_v40, %v4091_v30  ;;  %v3492_v34 = vmul.f32 %v13400_v5, %v3300_v19  ;;  %v4022_v63 = vadd.f32 %v13060_v39, %v3980_v59  ;;  %9241 = vmatmul.msk.bf16.gmra.mxu1 %vm4280_vm10, %v12977_v11  ;;  %v13521_v39 = vor.u32 %v4556_v24, %v4553_v27  ;;  %v4107_v40 = vpop.permute.xlu1 %4106  ;;  %v15566_v24 = vld [vmem:[#allocation46_spill] sm:$0xff] }
 0x34d   : > { %v3167_v33 = vpop.f32.mrf.mxu0  ;;  %v13528_v11 = vsel %vm2742_vm5, %v6475_v25, %v6477_v41  ;;  %15564 = vst [vmem:[#allocation47_spill] sm:$0xff] %v13533_v16  ;;  %v2947_v54 = vadd.f32 %v15566_v24, %v2735_v17 }
 0x34e   : > { %v4119_v50 = vpack.c.bf16 %v4115_v10, %v4115_v10  ;;  %v3524_v20 = vpack.c.bf16 %v3492_v34, %v3492_v34  ;;  %v4080_v29 = vadd.f32 %v15562_v14, %v4022_v63  ;;  %v3202_v13 = vadd.f32 %v3167_v33, %v2946_v35  ;;  %15563 = vst [vmem:[#allocation76_spill] sm:$0xff] %v13528_v11  ;;  %v15567_v33 = vld [vmem:[#allocation26_spill] sm:$0xff] }
 0x34f   : > { %v13516_v32 = vpop.f32.mrf.mxu2  ;;  %v5174_v35 = vshll.u32 %v10263_v23, 16 }
 0x350   : > { %4123 = vst.msk [vmem:[#allocation2 + $0x94] sm:$0xf] %vm393_vm7, %v4119_v50  ;;  %v4088_v5 = vadd.f32 %v12915_v51, %v4080_v29  ;;  %v3269_v60 = vadd.f32 %v12915_v51, %v3202_v13  ;;  %9291 = vmatmul.msk.bf16.gmra.mxu0 %vm4280_vm10, %v5169_v49  ;;  %v13540_v6 = vld [vmem:[#allocation2 + $0x7c] sm:$0xff]  ;;  %v4558_v51 = vsel %vm710_vm4, %v13442_v62, %v13521_v39  ;;  %v5173_v29 = vrot.slane %v5171_v42, 3 }
 0x351   : > { %3556 = vst.msk [vmem:[#allocation2 + $0x84] sm:$0xf] %vm393_vm7, %v3524_v20  ;;  %v3975_v25 = vpop.f32.mrf.mxu1  ;;  %v4560_v59 = vshrl.u32 %v13540_v6, 16  ;;  %v4563_v10 = vshll.u32 %v13540_v6, 16  ;;  %v4276_v34 = vrot.slane %v13540_v6, 3  ;;  %v5176_v62 = vrot.slane %v5174_v35, 4 }
 0x352   : > { %v4092_v30 = vmax.f32 %v4088_v5, 0.0  ;;  %v3301_v1 = vmax.f32 %v3269_v60, 0.0  ;;  %v3981_v19 = vadd.f32 %v3975_v25, %v3910_v61  ;;  %v15568_v5 = vld [vmem:[#allocation21_spill] sm:$0xff] }
 0x353   : > { %v13547_v27 = vpop.f32.mrf.mxu3  ;;  %v4787_v50 = vrot.slane %v4560_v59, 3  ;;  %v4788_v14 = vrot.slane %v4563_v10, 4  ;;  %v10318_v6 = vld [vmem:[#allocation4] ss:$0 sm:$0xff] }
 0x354   : > { %v4116_v63 = vmul.f32 %v4107_v40, %v4092_v30  ;;  %v3493_v0 = vmul.f32 %v13452_v56, %v3301_v1  ;;  %v4023_v23 = vadd.f32 %v15567_v33, %v3981_v19  ;;  %9263 = vmatmul.msk.bf16.gmra.mxu2 %vm4280_vm10, %v4558_v51  ;;  %v13561_v56 = vsel %vm531_vm1, %v4274_v15, %v4276_v34 }
 0x355   : > { %v3169_v20 = vpop.f32.mrf.mxu0  ;;  %v4789_v61 = vor.u32 %v4788_v14, %v4787_v50  ;;  %v4562_v33 = vrot.slane %v4560_v59, 2 }
 0x356   : > { %v4120_v13 = vpack.c.bf16 %v4116_v63, %v4116_v63  ;;  %v3525_v49 = vpack.c.bf16 %v3493_v0, %v3493_v0  ;;  %v4081_v17 = vadd.f32 %v15568_v5, %v4023_v23  ;;  %v3203_v60 = vadd.f32 %v3169_v20, %v2947_v54  ;;  %v4112_v63 = vpop.permute.xlu2 %4111  ;;  %v15570_v5 = vld [vmem:[#allocation10_spill] sm:$0xff] }
 0x357   : > { %v13556_v22 = vpop.f32.mrf.mxu2  ;;  %v4790_v1 = vsel %vm1009_vm3, %v13470_v9, %v4789_v61  ;;  %v5177_v54 = vor.u32 %v5176_v62, %v5173_v29  ;;  %v4565_v23 = vrot.slane %v4563_v10, 3 }
 0x358   : > { %4124 = vst.msk [vmem:[#allocation2 + $0x98] sm:$0xf] %vm393_vm7, %v4120_v13  ;;  %v4089_v25 = vadd.f32 %v10318_v6, %v4081_v17  ;;  %v3270_v30 = vadd.f32 %v10318_v6, %v3203_v60  ;;  %v4717_v42 = vld [vmem:[#allocation2 + $0x84] sm:$0xf]  ;;  %9281 = vmatmul.msk.bf16.gmra.mxu3 %vm4280_vm10, %v4790_v1  ;;  %v15569_v13 = vld [vmem:[#allocation25_spill] sm:$0xff] }
 0x359   : > { %v4159_v35 = vld [vmem:[#allocation2 + $0x84] sm:$0x7]  ;;  %3557 = vst.msk [vmem:[#allocation2 + $0x88] sm:$0xf] %vm393_vm7, %v3525_v49  ;;  %v4342_v19 = vpop.f32.mrf.mxu1  ;;  %v4721_v40 = vunpack.c.l.b16 %v4717_v42  ;;  %v5178_v10 = vsel %vm1009_vm3, %v13501_v46, %v5177_v54 }
 0x35a   : > { %v4229_v51 = vunpack.c.l.b16 %v4159_v35  ;;  %v4093_v24 = vmax.f32 %v4089_v25, 0.0  ;;  %v3302_v2 = vmax.f32 %v3270_v30, 0.0  ;;  %v4638_v15 = vadd.f32 %v13137_v31, %v4342_v19 }
 0x35b   : > { %v13569_v0 = vpop.f32.mrf.mxu3  ;;  %v4722_v50 = vpack.c.b16 %v4721_v40, %v4721_v40  ;;  %v4566_v30 = vor.u32 %v4565_v23, %v4562_v33  ;;  %v15571_v40 = vld [vmem:[#allocation31_spill] sm:$0xff] }
 0x35c   : > { %v4246_v20 = vpack.c.b16 %v4229_v51, %v4229_v51  ;;  %v4117_v14 = vmul.f32 %v4112_v63, %v4093_v24  ;;  %v3494_v9 = vmul.f32 %v13497_v4, %v3302_v2  ;;  %v4940_v49 = vadd.f32 %v15569_v13, %v4638_v15  ;;  %9242 = vmatmul.msk.bf16.gmra.mxu1 %vm4280_vm10, %v15570_v5  ;;  %v10265_v4 = vld [vmem:[#allocation2 + $0x5c] sm:$0xff]  }
 0x35d   : > { %v5302_v17 = vpop.f32.mrf.mxu0  ;;  %v4792_v60 = vshrl.u32 %v4722_v50, 16  ;;  %v4795_v6 = vshll.u32 %v4722_v50, 16  ;;  %v4567_v24 = vsel %vm710_vm4, %v13521_v39, %v4566_v30  ;;  %v5180_v2 = vshrl.u32 %v10265_v4, 16  ;;  %v15572_v63 = vld [vmem:[#allocation13_spill] sm:$0xff] }
 0x35e   : > { %v4121_v31 = vpack.c.bf16 %v4117_v14, %v4117_v14  ;;  %v3526_v29 = vpack.c.bf16 %v3494_v9, %v3494_v9  ;;  %v13575_v62 = vadd.f32 %v5302_v17, %v4940_v49  ;;  %v4278_v25 = vrot.slane %v4246_v20, 3 }
 0x35f   : > { %v13577_v59 = vpop.f32.mrf.mxu2  ;;  %v4794_v1 = vrot.slane %v4792_v60, 3  ;;  %v4797_v19 = vrot.slane %v4795_v6, 4  ;;  %v5183_v15 = vshll.u32 %v10265_v4, 16  ;;  %v5182_v9 = vrot.slane %v5180_v2, 3 }
 0x360   : > { %4125 = vst.msk [vmem:[#allocation2 + $0x9c] sm:$0xf] %vm393_vm7, %v4121_v31  ;;  %9292 = vmatmul.msk.bf16.gmra.mxu0 %vm4280_vm10, %v5178_v10  ;;  %v13584_v42 = vsel %vm531_vm1, %v4276_v34, %v4278_v25  ;;  %v4569_v49 = vshrl.u32 %v4246_v20, 16  ;;  %v4572_v5 = vshll.u32 %v4246_v20, 16  ;;  %v15573_v10 = vld [vmem:[#allocation39_spill] sm:$0xff] }
 0x361   : > { %3558 = vst.msk [vmem:[#allocation2 + $0x8c] sm:$0xf] %vm393_vm7, %v3526_v29  ;;  %v4344_v35 = vpop.f32.mrf.mxu1  ;;  %v4798_v23 = vor.u32 %v4797_v19, %v4794_v1  ;;  %v5185_v13 = vrot.slane %v5183_v15, 4  ;;  %v13606_v1 = vld [vmem:[#allocation2 + $0x18] sm:$0xff]   ;;  %v15575_v15 = vld [vmem:[#allocation35_spill] sm:$0xff] }
 0x362   : > { %v4640_v51 = vadd.f32 %v15571_v40, %v4344_v35  ;;  %v4571_v29 = vrot.slane %v4569_v49, 2  ;;  %v4574_v25 = vrot.slane %v4572_v5, 3  ;;  %v15574_v35 = vld [vmem:[#allocation14_spill] sm:$0xff] }
 0x363   : > { %v13590_v46 = vpop.f32.mrf.mxu3  ;;  %v4799_v39 = vsel %vm1009_vm3, %v4789_v61, %v4798_v23  ;;  %v5186_v31 = vor.u32 %v5185_v13, %v5182_v9  ;;  %v13619_v49 = vld [vmem:[#allocation2 + $0x80] sm:$0xff] }
 0x364   : > { %9264 = vmatmul.msk.bf16.gmra.mxu2 %vm4280_vm10, %v4567_v24  ;;  %v4941_v33 = vadd.f32 %v15572_v63, %v4640_v51  ;;  %v6147_v51 = vshll.u32 %v13606_v1, 16  ;;  %v10267_v24 = vld [vmem:[#allocation2 + $0x64] sm:$0xff]  }
 0x365   : > { %v5304_v34 = vpop.f32.mrf.mxu0  ;;  %v5187_v40 = vsel %vm1009_vm3, %v5177_v54, %v5186_v31  ;;  %v5189_v9 = vshrl.u32 %v10267_v24, 16  ;;  %v5192_v13 = vshll.u32 %v10267_v24, 16  ;;  %v15576_v54 = vld [vmem:[#allocation50_spill] sm:$0xff]  ;;  %v6479_v24 = vrot.slane %v13619_v49, 1 }
 0x366   : > { %v13594_v50 = vadd.f32 %v5304_v34, %v4941_v33  ;;  %v6149_v23 = vrot.slane %v6147_v51, 1 }
 0x367   : > { %v13596_v14 = vpop.f32.mrf.mxu2 }
 0x368   : > { %9282 = vmatmul.msk.bf16.gmra.mxu3 %vm4280_vm10, %v4799_v39  ;;  %v13632_v51 = vld [vmem:[#allocation2 + $0x88] sm:$0xff] }
 0x369   : > { %v4347_v17 = vpop.f32.mrf.mxu1 }
 0x36a   : > { %v4643_v60 = vadd.f32 %v13214_v52, %v4347_v17  ;;  %v4575_v52 = vor.u32 %v4574_v25, %v4571_v29  ;;  %v6145_v17 = vshrl.u32 %v13606_v1, 16 }
 0x36b   : > { %v13601_v6 = vpop.f32.mrf.mxu3 }
 0x36c   : > { %v4942_v4 = vadd.f32 %v15573_v10, %v4643_v60  ;;  %9243 = vmatmul.msk.bf16.gmra.mxu1 %vm4280_vm10, %v15574_v35  ;;  %v4576_v33 = vsel %vm710_vm4, %v4566_v30, %v4575_v52  ;;  %v15577_v60 = vld [vmem:[#allocation49_spill] sm:$0xff]  ;;  %v9760_v10 = vld [vmem:[#allocation2 + $0x10] sm:$0xff]  ;;  %v6150_v35 = vor.u32 %v6149_v23, %v6145_v17  ;;  %v6481_v17 = vrot.slane %v13632_v51, 1 }
 0x36d   : > { %v5307_v20 = vpop.f32.mrf.mxu0  ;;  %v15578_v29 = vshll.u32 %v15577_v60, 16  ;;  %v13630_v52 = vld [vmem:[#allocation2 + $0x18] sm:$0xff]  ;;  %v5723_v16 = vshrl.u32 %v9760_v10, 16 }
 0x36e   : > { %v13608_v19 = vadd.f32 %v5307_v20, %v4942_v4  ;;  %v5191_v20 = vrot.slane %v5189_v9, 3 }
 0x36f   : > { %v13610_v61 = vpop.f32.mrf.mxu2  ;;  %v6154_v25 = vrot.slane %v15578_v29, 1  ;;  %v15581_v29 = vld [vmem:[#allocation27_spill] sm:$0xff] }
 0x370   : > { %9293 = vmatmul.msk.bf16.gmra.mxu0 %vm4280_vm10, %v5187_v40  ;;  %v5194_v40 = vrot.slane %v5192_v13, 4 }
 0x371   : > { %v4349_v2 = vpop.f32.mrf.mxu1 }
 0x372   : > { %v4645_v63 = vadd.f32 %v15575_v15, %v4349_v2  ;;  %v6058_v2 = vld [vmem:[#allocation2 + $0x98] sm:$0x1]  ;;  %v6155_v15 = vsel %vm2009_vm6, %v6150_v35, %v6154_v25  ;;  %v13645_v13 = vor.u32 %v5194_v40, %v5191_v20  ;;  %v10269_v20 = vld [vmem:[#allocation2 + $0x6c] sm:$0xff]  }
 0x373   : > { %v13617_v34 = vpop.f32.mrf.mxu3 }
 0x374   : > { %9265 = vmatmul.msk.bf16.gmra.mxu2 %vm4280_vm10, %v4576_v33  ;;  %v4943_v5 = vadd.f32 %v15576_v54, %v4645_v63  ;;  %v5725_v33 = vshll.u32 %v9760_v10, 16  ;;  %v13639_v54 = vsel %vm2742_vm5, %v6477_v41, %v6479_v24  ;;  %v13652_v41 = vld [vmem:[#allocation2 + $0x90] sm:$0xff] }
 0x375   : > { %v5309_v39 = vpop.f32.mrf.mxu0  ;;  %15580 = vst [vmem:[#allocation34_spill] sm:$0xff] %v13639_v54 }
 0x376   : > { %v13626_v4 = vadd.f32 %v5309_v39, %v4943_v5  ;;  %v5730_v5 = vshll.u32 %v13630_v52, 16  ;;  %v6126_v39 = vunpack.c.l.b16 %v6058_v2  ;;  %v5196_v2 = vsel %vm1009_vm3, %v5186_v31, %v13645_v13 }
 0x377   : > { %v13628_v30 = vpop.f32.mrf.mxu2 }
 0x378   : > { %15579 = vst [vmem:[#allocation71_spill] sm:$0xff] %v13626_v4  ;;  %9459 = vmatmul.msk.bf16.vlgmr.msra.gmra.mxu3 %vm4280_vm10, %v6155_v15  ;;  %v5727_v15 = vrot.slane %v5725_v33, 1  ;;  %v15162_v4 = vshrl.u32 %v13619_v49, 16 }
 0x379   : > { %v4352_v63 = vpop.f32.mrf.mxu1 }
 0x37a   : > { %v4648_v23 = vadd.f32 %v13291_v3, %v4352_v63  ;;  %v13655_v3 = vsel %vm2742_vm5, %v6479_v24, %v6481_v17 }
 0x37b   : > { %v13643_v9 = vpop.f32.mrf.mxu3  ;;  %15583 = vst [vmem:[#allocation41_spill] sm:$0xff] %v13655_v3  ;;  %v5198_v3 = vshrl.u32 %v10269_v20, 16 }
 0x37c   : > { %v4944_v35 = vadd.f32 %v15581_v29, %v4648_v23  ;;  %9244 = vmatmul.msk.bf16.gmra.mxu1 %vm4280_vm10, %v15582_v55  ;;  %v13663_v23 = vrot.slane %v5730_v5, 1  ;;  %v13665_v29 = vpack.c.b16 %v6126_v39, %v6126_v39  ;;  %v5201_v39 = vshll.u32 %v10269_v20, 16  ;;  %v15586_v55 = vld [vmem:[#allocation40_spill] sm:$0xff] }
 0x37d   : > { %v5312_v43 = vpop.f32.mrf.mxu0 }
 0x37e   : > { %v13657_v63 = vadd.f32 %v5312_v43, %v4944_v35  ;;  %v6483_v43 = vrot.slane %v13652_v41, 1  ;;  %v5728_v35 = vor.u32 %v5727_v15, %v5723_v16  ;;  %v15587_v16 = vshrl.u32 %v13486_v47, 16 }
 0x37f   : > { %v13659_v40 = vpop.f32.mrf.mxu2 }
 0x380   : > { %15584 = vst [vmem:[#allocation52_spill] sm:$0xff] %v13657_v63  ;;  %9294 = vmatmul.msk.bf16.gmra.mxu0 %vm4280_vm10, %v5196_v2  ;;  %v13673_v31 = vsel %vm2742_vm5, %v6481_v17, %v6483_v43  ;;  %v5733_v5 = vsel %vm2009_vm6, %v5728_v35, %v13663_v23  ;;  %v6485_v2 = vrot.slane %v13665_v29, 1  ;;  %v6717_v15 = vrot.slane %v15587_v16, 1 }
 0x381   : > { %v4354_v33 = vpop.f32.mrf.mxu1  ;;  %15585 = vst [vmem:[#allocation61_spill] sm:$0xff] %v13673_v31  ;;  %v15589_v31 = vld [vmem:[#allocation69_spill] sm:$0xff]  ;;  %v15593_v35 = vshrl.u32 %v15577_v60, 16  ;;  %v5200_v63 = vrot.slane %v5198_v3, 3  ;;  %v5203_v16 = vrot.slane %v5201_v39, 4  ;;  %v15596_v3 = vshrl.u32 %v13632_v51, 16 }
 0x382   : > { %v4650_v44 = vadd.f32 %v13336_v8, %v4354_v33  ;;  %v15588_v8 = vshll.u32 %v13486_v47, 16  ;;  %v15590_v54 = vshll.u32 %v15589_v31, 16  ;;  %v13689_v36 = vsel %vm2742_vm5, %v6483_v43, %v6485_v2 }
 0x383   : > { %v13675_v10 = vpop.f32.mrf.mxu3  ;;  %15591 = vst [vmem:[#allocation55_spill] sm:$0xff] %v13689_v36  ;;  %v15163_v43 = vshll.u32 %v13632_v51, 16 }
 0x384   : > { %9382 = vmatmul.msk.bf16.vlgmr.msra.gmra.mxu2 %vm4280_vm10, %v5733_v5  ;;  %v4945_v24 = vadd.f32 %v15586_v55, %v4650_v44  ;;  %v6718_v33 = vrot.slane %v15588_v8, 2  ;;  %v6162_v11 = vrot.slane %v15590_v54, 1  ;;  %v6158_v5 = vor.u32 %v15593_v35, %v6154_v25  ;;  %v13695_v44 = vld [vmem:[#allocation2 + $0x20] sm:$0xff] }
 0x385   : > { %v5314_v17 = vpop.f32.mrf.mxu0  ;;  %v5738_v35 = vshll.u32 %v13695_v44, 16 }
 0x386   : > { %v13691_v20 = vadd.f32 %v5314_v17, %v4945_v24  ;;  %v6719_v2 = vor.u32 %v6718_v33, %v6717_v15  ;;  %v6163_v24 = vsel %vm2009_vm6, %v6158_v5, %v6162_v11  ;;  %v5204_v15 = vor.u32 %v5203_v16, %v5200_v63 }
 0x387   : > { %v13697_v55 = vpop.f32.mrf.mxu2  ;;  %v6721_v33 = vrot.slane %v15162_v4, 1  ;;  %v15595_v5 = vshll.u32 %v13619_v49, 16  ;;  %v15597_v63 = vshrl.u32 %v13652_v41, 16  ;;  %v15598_v4 = vshll.u32 %v13652_v41, 16 }
 0x388   : > { %15592 = vst [vmem:[#allocation77_spill] sm:$0xff] %v13691_v20  ;;  %9460 = vmatmul.msk.bf16.gmra.mxu3 %vm4280_vm10, %v6163_v24  ;;  %v13711_v8 = vsel %vm2954_vm8, %v13506_v38, %v6719_v2  ;;  %v6725_v24 = vrot.slane %v15596_v3, 1  ;;  %v6726_v38 = vrot.slane %v15163_v43, 2  ;;  %v5734_v3 = vshrl.u32 %v13630_v52, 16  ;;  %v10271_v43 = vld [vmem:[#allocation2 + $0x74] sm:$0xff]  }
 0x389   : > { %v4357_v17 = vpop.f32.mrf.mxu1  ;;  %15594 = vst [vmem:[#allocation57_spill] sm:$0xff] %v13711_v8  ;;  %v6722_v25 = vrot.slane %v15595_v5, 2  ;;  %v6729_v16 = vrot.slane %v15597_v63, 1  ;;  %v6730_v36 = vrot.slane %v15598_v4, 2 }
 0x38a   : > { %v4653_v39 = vadd.f32 %v13386_v21, %v4357_v17  ;;  %v6727_v20 = vor.u32 %v6726_v38, %v6725_v24  ;;  %v5736_v52 = vor.u32 %v5734_v3, %v13663_v23  ;;  %v5210_v38 = vshll.u32 %v10271_v43, 16 }
 0x38b   : > { %v13713_v54 = vpop.f32.mrf.mxu3  ;;  %v6723_v8 = vor.u32 %v6722_v25, %v6721_v33  ;;  %v13740_v33 = vor.u32 %v6730_v36, %v6729_v16  ;;  %v5207_v36 = vshrl.u32 %v10271_v43, 16  ;;  %v15604_v16 = vld [vmem:[#allocation54_spill] sm:$0xff] }
 0x38c   : > { %v4946_v21 = vadd.f32 %v13314_v7, %v4653_v39  ;;  %9245 = vmatmul.msk.bf16.gmra.mxu1 %vm4280_vm10, %v13287_v45  ;;  %v5205_v45 = vsel %vm1009_vm3, %v13645_v13, %v5204_v15  ;;  %v5740_v39 = vrot.slane %v5738_v35, 1 }
 0x38d   : > { %v5317_v17 = vpop.f32.mrf.mxu0  ;;  %v13738_v25 = vsel %vm2954_vm8, %v6719_v2, %v6723_v8  ;;  %15600 = vst [vmem:[#allocation58_spill] sm:$0xff] %v13740_v33  ;;  %v13744_v4 = vsel %vm2954_vm8, %v6723_v8, %v6727_v20  ;;  %v13749_v24 = vsel %vm2954_vm8, %v6727_v20, %v13740_v33  ;;  %v5209_v33 = vrot.slane %v5207_v36, 3 }
 0x38e   : > { %v13730_v5 = vadd.f32 %v5317_v17, %v4946_v21  ;;  %15599 = vst [vmem:[#allocation11_spill] sm:$0xff] %v13738_v25  ;;  %v5741_v2 = vsel %vm2009_vm6, %v5736_v52, %v5740_v39  ;;  %v15603_v17 = vld [vmem:[#allocation29_spill] sm:$0xff]  ;;  %v9763_v52 = vld [vmem:[#allocation2 + $0x28] sm:$0xff] }
 0x38f   : > { %v13733_v7 = vpop.f32.mrf.mxu2  ;;  %15601 = vst [vmem:[#allocation43_spill] sm:$0xff] %v13744_v4 }
 0x390   : > { %9295 = vmatmul.msk.bf16.gmra.mxu0 %vm4280_vm10, %v5205_v45  ;;  %15602 = vst [vmem:[#allocation45_spill] sm:$0xff] %v13749_v24  ;;  %v15605_v45 = vshll.u32 %v15604_v16, 16  ;;  %v5212_v24 = vrot.slane %v5210_v38, 4 }
 0x391   : > { %v4359_v21 = vpop.f32.mrf.mxu1 }
 0x392   : > { %v4655_v13 = vadd.f32 %v13437_v18, %v4359_v21  ;;  %v6170_v23 = vrot.slane %v15605_v45, 1  ;;  %v15606_v18 = vshrl.u32 %v15589_v31, 16  ;;  %v5742_v45 = vshrl.u32 %v13695_v44, 16  ;;  %v15607_v44 = vld [vmem:[#allocation59_spill] sm:$0xff] }
 0x393   : > { %v13752_v35 = vpop.f32.mrf.mxu3 }
 0x394   : > { %9383 = vmatmul.msk.bf16.gmra.mxu2 %vm4280_vm10, %v5741_v2  ;;  %v4947_v8 = vadd.f32 %v15603_v17, %v4655_v13  ;;  %v6166_v21 = vor.u32 %v15606_v18, %v6162_v11  ;;  %v5213_v17 = vor.u32 %v5212_v24, %v5209_v33 }
 0x395   : > { %v5319_v63 = vpop.f32.mrf.mxu0 }
 0x396   : > { %v13759_v3 = vadd.f32 %v5319_v63, %v4947_v8  ;;  %v6171_v43 = vsel %vm2009_vm6, %v6166_v21, %v6170_v23  ;;  %v5746_v8 = vshll.u32 %v9763_v52, 16  ;;  %v5214_v38 = vsel %vm1009_vm3, %v5204_v15, %v5213_v17 }
 0x397   : > { %v13761_v20 = vpop.f32.mrf.mxu2 }
 0x398   : > { %9461 = vmatmul.msk.bf16.gmra.mxu3 %vm4280_vm10, %v6171_v43  ;;  %v5748_v18 = vrot.slane %v5746_v8, 1  ;;  %v15608_v8 = vshll.u32 %v15607_v44, 16 }
 0x399   : > { %v4362_v4 = vpop.f32.mrf.mxu1 }
 0x39a   : > { %v4658_v13 = vadd.f32 %v13480_v48, %v4362_v4  ;;  %v10273_v48 = vld [vmem:[#allocation2 + $0x7c] sm:$0xff]   ;;  %v5744_v4 = vor.u32 %v5742_v45, %v5740_v39 }
 0x39b   : > { %v13768_v2 = vpop.f32.mrf.mxu3  ;;  %v5216_v21 = vshrl.u32 %v10273_v48, 16  ;;  %v5219_v43 = vshll.u32 %v10273_v48, 16 }
 0x39c   : > { %v4948_v63 = vadd.f32 %v13414_v57, %v4658_v13  ;;  %9246 = vmatmul.msk.bf16.gmra.mxu1 %vm4280_vm10, %v13379_v58  ;;  %v5749_v58 = vsel %vm2009_vm6, %v5744_v4, %v5748_v18  ;;  %v9764_v4 = vld [vmem:[#allocation2 + $0x30] sm:$0xff] }
 0x39d   : > { %v5322_v11 = vpop.f32.mrf.mxu0  ;;  %v5218_v45 = vrot.slane %v5216_v21, 3 }
 0x39e   : > { %v13773_v31 = vadd.f32 %v5322_v11, %v4948_v63  ;;  %v6178_v63 = vrot.slane %v15608_v8, 1  ;;  %v5750_v8 = vshrl.u32 %v9763_v52, 16  ;;  %v15611_v52 = vld [vmem:[#allocation60_spill] sm:$0xff] }
 0x39f   : > { %v13775_v36 = vpop.f32.mrf.mxu2 }
 0x3a0   : > { %9296 = vmatmul.msk.bf16.gmra.mxu0 %vm4280_vm10, %v5214_v38 }
 0x3a1   : > { %v4364_v33 = vpop.f32.mrf.mxu1 }
 0x3a2   : > { %v4660_v57 = vadd.f32 %v13516_v32, %v4364_v33  ;;  %v15609_v32 = vshrl.u32 %v15604_v16, 16  ;;  %v5221_v33 = vrot.slane %v5219_v43, 4 }
 0x3a3   : > { %v13781_v24 = vpop.f32.mrf.mxu3 }
 0x3a4   : > { %9384 = vmatmul.msk.bf16.gmra.mxu2 %vm4280_vm10, %v5749_v58  ;;  %v4949_v15 = vadd.f32 %v13463_v37, %v4660_v57  ;;  %v6174_v39 = vor.u32 %v15609_v32, %v6170_v23  ;;  %v5222_v58 = vor.u32 %v5221_v33, %v5218_v45 }
 0x3a5   : > { %v5324_v13 = vpop.f32.mrf.mxu0 }
 0x3a6   : > { %v13788_v11 = vadd.f32 %v5324_v13, %v4949_v15  ;;  %v6179_v48 = vsel %vm2009_vm6, %v6174_v39, %v6178_v63  ;;  %v5754_v15 = vshll.u32 %v9764_v4, 16  ;;  %v5223_v43 = vsel %vm1009_vm3, %v5213_v17, %v5222_v58  ;;  %v10274_v39 = vld [vmem:[#allocation2 + $0x84] sm:$0xff]  }
 0x3a7   : > { %v13790_v38 = vpop.f32.mrf.mxu2  ;;  %v5225_v33 = vshrl.u32 %v10274_v39, 16 }
 0x3a8   : > { %9462 = vmatmul.msk.bf16.gmra.mxu3 %vm4280_vm10, %v6179_v48  ;;  %v5756_v32 = vrot.slane %v5754_v15, 1  ;;  %v5228_v48 = vshll.u32 %v10274_v39, 16  ;;  %v15612_v15 = vshll.u32 %v15611_v52, 16 }
 0x3a9   : > { %v4367_v25 = vpop.f32.mrf.mxu1 }
 0x3aa   : > { %v4663_v37 = vadd.f32 %v13556_v22, %v4367_v25  ;;  %v5752_v25 = vor.u32 %v5750_v8, %v5748_v18  ;;  %v5227_v8 = vrot.slane %v5225_v33, 3 }
 0x3ab   : > { %v13797_v57 = vpop.f32.mrf.mxu3 }
 0x3ac   : > { %v4950_v13 = vadd.f32 %v13503_v12, %v4663_v37  ;;  %9247 = vmatmul.msk.bf16.gmra.mxu1 %vm4280_vm10, %v13477_v28  ;;  %v5757_v28 = vsel %vm2009_vm6, %v5752_v25, %v5756_v32  ;;  %v9765_v25 = vld [vmem:[#allocation2 + $0x38] sm:$0xff] }
 0x3ad   : > { %v5327_v16 = vpop.f32.mrf.mxu0 }
 0x3ae   : > { %v13802_v23 = vadd.f32 %v5327_v16, %v4950_v13  ;;  %v6186_v13 = vrot.slane %v15612_v15, 1 }
 0x3af   : > { %v13804_v21 = vpop.f32.mrf.mxu2 }
 0x3b0   : > { %15610 = vst [vmem:[#allocation62_spill] sm:$0xff] %v13802_v23  ;;  %9297 = vmatmul.msk.bf16.gmra.mxu0 %vm4280_vm10, %v5223_v43  ;;  %v10021_v23 = vld [vmem:[#allocation2 + $0x88] sm:$0xff]  }
 0x3b1   : > { %v4369_v22 = vpop.f32.mrf.mxu1  ;;  %v9963_v15 = vunpack.c.h.b16 %v10021_v23 }
 0x3b2   : > { %v4665_v45 = vadd.f32 %v13577_v59, %v4369_v22  ;;  %v15614_v59 = vshrl.u32 %v15607_v44, 16  ;;  %v5230_v22 = vrot.slane %v5228_v48, 4  ;;  %v5758_v48 = vshrl.u32 %v9764_v4, 16 }
 0x3b3   : > { %v13809_v12 = vpop.f32.mrf.mxu3 }
 0x3b4   : > { %9385 = vmatmul.msk.bf16.gmra.mxu2 %vm4280_vm10, %v5757_v28  ;;  %v4951_v37 = vadd.f32 %v13547_v27, %v4665_v45  ;;  %v6182_v18 = vor.u32 %v15614_v59, %v6178_v63  ;;  %v9475_v63 = vld [vmem:[%s15037_s4 + $0x1c] sm:$0xf]  ;;  %v9492_v59 = vld [vmem:[%s15037_s4 + $0x20] sm:$0xf]  ;;  %v5760_v4 = vor.u32 %v5758_v48, %v5756_v32 }
 0x3b5   : > { %v5329_v17 = vpop.f32.mrf.mxu0 }
 0x3b6   : > { %v13816_v16 = vadd.f32 %v5329_v17, %v4951_v37  ;;  %v6187_v39 = vsel %vm2009_vm6, %v6182_v18, %v6186_v13  ;;  %v5231_v37 = vor.u32 %v5230_v22, %v5227_v8  ;;  %v5762_v17 = vshll.u32 %v9765_v25, 16 }
 0x3b7   : > { %v13818_v43 = vpop.f32.mrf.mxu2  ;;  %v6791_v8 = vsel %vm4329_vm9, %v9492_v59, 0 }
 0x3b8   : > { %15613 = vst [vmem:[#allocation68_spill] sm:$0xff] %v13816_v16  ;;  %9463 = vmatmul.msk.bf16.gmra.mxu3 %vm4280_vm10, %v6187_v39  ;;  %v5764_v18 = vrot.slane %v5762_v17, 1  ;;  %6800 = vmatpush.bf16.msrb.mxu1 %v6791_v8 }
 0x3b9   : > { %v4372_v28 = vpop.f32.mrf.mxu1 }
 0x3ba   : > { %v4668_v27 = vadd.f32 %v13596_v14, %v4372_v28  ;;  %v6536_v14 = vsel %vm4329_vm9, %v9475_v63, 0  ;;  %v5765_v28 = vsel %vm2009_vm6, %v5760_v4, %v5764_v18 }
 0x3bb   : > { %v13825_v45 = vpop.f32.mrf.mxu3  ;;  %6545 = vmatpush.bf16.msra.mxu0 %v6536_v14 }
 0x3bc   : > { %v4952_v16 = vadd.f32 %v13569_v0, %v4668_v27  ;;  %9248 = vmatmul.msk.bf16.gmra.mxu1 %vm4280_vm10, %v13561_v56  ;;  %v5232_v0 = vsel %vm1009_vm3, %v5222_v58, %v5231_v37  ;;  %v5089_v56 = vpack.c.b16 %v9963_v15, %v9963_v15  ;;  %v15615_v15 = vld [vmem:[#allocation75_spill] sm:$0xff] }
 0x3bd   : > { %v5332_v44 = vpop.f32.mrf.mxu0  ;;  %v15616_v63 = vshll.u32 %v15615_v15, 16 }
 0x3be   : > { %v13833_v33 = vadd.f32 %v5332_v44, %v4952_v16  ;;  %v5234_v27 = vshrl.u32 %v5089_v56, 16  ;;  %v5237_v44 = vshll.u32 %v5089_v56, 16 }
 0x3bf   : > { %v13839_v23 = vpop.f32.mrf.mxu2  ;;  %v6194_v14 = vrot.slane %v15616_v63, 1  ;;  %v5766_v63 = vshrl.u32 %v9765_v25, 16 }
 0x3c0   : > { %9298 = vmatmul.msk.bf16.gmra.mxu0 %vm4280_vm10, %v5232_v0  ;;  %v5236_v48 = vrot.slane %v5234_v27, 3  ;;  %v5239_v8 = vrot.slane %v5237_v44, 4 }
 0x3c1   : > { %v4374_v16 = vpop.f32.mrf.mxu1 }
 0x3c2   : > { %v4670_v22 = vadd.f32 %v13610_v61, %v4374_v16  ;;  %v15617_v61 = vshrl.u32 %v15611_v52, 16  ;;  %v9766_v16 = vld [vmem:[#allocation2 + $0x40] sm:$0xff] }
 0x3c3   : > { %v13845_v39 = vpop.f32.mrf.mxu3 }
 0x3c4   : > { %9386 = vmatmul.msk.bf16.gmra.mxu2 %vm4280_vm10, %v5765_v28  ;;  %v4953_v58 = vadd.f32 %v13590_v46, %v4670_v22  ;;  %v6190_v32 = vor.u32 %v15617_v61, %v6186_v13  ;;  %v5240_v28 = vor.u32 %v5239_v8, %v5236_v48 }
 0x3c5   : > { %v5334_v17 = vpop.f32.mrf.mxu0 }
 0x3c6   : > { %v13852_v59 = vadd.f32 %v5334_v17, %v4953_v58  ;;  %v6195_v56 = vsel %vm2009_vm6, %v6190_v32, %v6194_v14  ;;  %v5770_v58 = vshll.u32 %v9766_v16, 16  ;;  %v5241_v44 = vsel %vm1009_vm3, %v5231_v37, %v5240_v28 }
 0x3c7   : > { %v13854_v0 = vpop.f32.mrf.mxu2  ;;  %v5768_v32 = vor.u32 %v5766_v63, %v5764_v18  ;;  %v15620_v18 = vshrl.u32 %v15615_v15, 16 }
 0x3c8   : > { %9464 = vmatmul.msk.bf16.gmra.mxu3 %vm4280_vm10, %v6195_v56  ;;  %v5772_v61 = vrot.slane %v5770_v58, 1 }
 0x3c9   : > { %v4377_v4 = vpop.f32.mrf.mxu1  ;;  %v6198_v58 = vor.u32 %v15620_v18, %v6194_v14 }
 0x3ca   : > { %v4673_v46 = vadd.f32 %v13628_v30, %v4377_v4  ;;  %v15618_v4 = vld [vmem:[#allocation79_spill] sm:$0xff] }
 0x3cb   : > { %v13861_v22 = vpop.f32.mrf.mxu3 }
 0x3cc   : > { %v4954_v17 = vadd.f32 %v13601_v6, %v4673_v46  ;;  %9249 = vmatmul.msk.bf16.gmra.mxu1 %vm4280_vm10, %v13584_v42  ;;  %v5773_v6 = vsel %vm2009_vm6, %v5768_v32, %v5772_v61  ;;  %v15619_v46 = vshll.u32 %v15618_v4, 16 }
 0x3cd   : > { %v5337_v52 = vpop.f32.mrf.mxu0 }
 0x3ce   : > { %v13866_v13 = vadd.f32 %v5337_v52, %v4954_v17  ;;  %v6202_v37 = vrot.slane %v15619_v46, 1 }
 0x3cf   : > { %v13868_v27 = vpop.f32.mrf.mxu2 }
 0x3d0   : > { %9299 = vmatmul.msk.bf16.gmra.mxu0 %vm4280_vm10, %v5241_v44  ;;  %v6203_v17 = vsel %vm2009_vm6, %v6198_v58, %v6202_v37 }
 0x3d1   : > { %v4379_v30 = vpop.f32.mrf.mxu1 }
 0x3d2   : > { %v4675_v48 = vadd.f32 %v13659_v40, %v4379_v30  ;;  %v9767_v40 = vld [vmem:[#allocation2 + $0x48] sm:$0xff] }
 0x3d3   : > { %v13873_v8 = vpop.f32.mrf.mxu3  ;;  %v5778_v63 = vshll.u32 %v9767_v40, 16 }
 0x3d4   : > { %9387 = vmatmul.msk.bf16.gmra.mxu2 %vm4280_vm10, %v5773_v6  ;;  %v4955_v42 = vadd.f32 %v13617_v34, %v4675_v48  ;;  %v10006_v34 = vld [vmem:[#allocation2 + $0x10] sm:$0xff]   ;;  %v15621_v6 = vld [vmem:[#allocation33_spill] sm:$0xff] }
 0x3d5   : > { %v5339_v56 = vpop.f32.mrf.mxu0  ;;  %v6454_v15 = vrot.slane %v15621_v6, 1  ;;  %v5780_v18 = vrot.slane %v5778_v63, 1 }
 0x3d6   : > { %v13880_v25 = vadd.f32 %v5339_v56, %v4955_v42  ;;  %v15622_v56 = vrot.slane %v15577_v60, 1  ;;  %v15623_v60 = vld [vmem:[#allocation16_spill] sm:$0xff] }
 0x3d7   : > { %v13882_v28 = vpop.f32.mrf.mxu2 }
 0x3d8   : > { %9465 = vmatmul.msk.bf16.gmra.mxu3 %vm4280_vm10, %v6203_v17  ;;  %v6456_v46 = vsel %vm2742_vm5, %v6454_v15, %v15622_v56 }
 0x3d9   : > { %v4382_v52 = vpop.f32.mrf.mxu1 }
 0x3da   : > { %v4678_v44 = vadd.f32 %v13697_v55, %v4382_v52  ;;  %v5774_v55 = vshrl.u32 %v9766_v16, 16 }
 0x3db   : > { %v13891_v32 = vpop.f32.mrf.mxu3 }
 0x3dc   : > { %v4956_v30 = vadd.f32 %v13643_v9, %v4678_v44  ;;  %9301 = vmatmul.msk.bf16.vlgmr.msra.gmra.mxu1 %vm4280_vm10, %v10006_v34  ;;  %v5776_v58 = vor.u32 %v5774_v55, %v5772_v61  ;;  %v15625_v61 = vshrl.u32 %v15618_v4, 16 }
 0x3dd   : > { %v5342_v48 = vpop.f32.mrf.mxu0 }
 0x3de   : > { %v13894_v14 = vadd.f32 %v5342_v48, %v4956_v30  ;;  %v5781_v52 = vsel %vm2009_vm6, %v5776_v58, %v5780_v18  ;;  %v15624_v48 = vshll.u32 %v15623_v60, 16  ;;  %v6206_v15 = vor.u32 %v15625_v61, %v6202_v37 }
 0x3df   : > { %v13896_v42 = vpop.f32.mrf.mxu2  ;;  %v5782_v37 = vshrl.u32 %v9767_v40, 16 }
 0x3e0   : > { %9476 = vmatmul.msk.bf16.vlgmr.msra.gmra.mxu0 %vm4280_vm10, %v6456_v46  ;;  %v6210_v6 = vrot.slane %v15624_v48, 1 }
 0x3e1   : > { %v4384_v9 = vpop.f32.mrf.mxu1 }
 0x3e2   : > { %v4680_v17 = vadd.f32 %v13733_v7, %v4384_v9  ;;  %v9768_v7 = vld [vmem:[#allocation2 + $0x50] sm:$0xff]  ;;  %v6211_v56 = vsel %vm2009_vm6, %v6206_v15, %v6210_v6 }
 0x3e3   : > { %v13906_v34 = vpop.f32.mrf.mxu3  ;;  %v5786_v55 = vshll.u32 %v9768_v7, 16 }
 0x3e4   : > { %9388 = vmatmul.msk.bf16.gmra.mxu2 %vm4280_vm10, %v5781_v52  ;;  %v4957_v44 = vadd.f32 %v13675_v10, %v4680_v17 }
 0x3e5   : > { %v5344_v30 = vpop.f32.mrf.mxu0 }
 0x3e6   : > { %v13910_v16 = vadd.f32 %v5344_v30, %v4957_v44  ;;  %v5788_v44 = vrot.slane %v5786_v55, 1  ;;  %v15626_v30 = vld [vmem:[#allocation56_spill] sm:$0xff] }
 0x3e7   : > { %v13912_v63 = vpop.f32.mrf.mxu2 }
 0x3e8   : > { %9466 = vmatmul.msk.bf16.gmra.mxu3 %vm4280_vm10, %v6211_v56 }
 0x3e9   : > { %v4387_v46 = vpop.f32.mrf.mxu1 }
 0x3ea   : > { %v4683_v10 = vadd.f32 %v13761_v20, %v4387_v46  ;;  %v5784_v20 = vor.u32 %v5782_v37, %v5780_v18  ;;  %v15627_v46 = vld [vmem:[#allocation32_spill] sm:$0xff]  ;;  %v15629_v18 = vshrl.u32 %v15623_v60, 16 }
 0x3eb   : > { %v13922_v58 = vpop.f32.mrf.mxu3 }
 0x3ec   : > { %v4958_v9 = vadd.f32 %v13713_v54, %v4683_v10  ;;  %9302 = vmatmul.msk.bf16.gmra.mxu1 %vm4280_vm10, %v13606_v1  ;;  %v5789_v54 = vsel %vm2009_vm6, %v5784_v20, %v5788_v44  ;;  %v15628_v10 = vshll.u32 %v15627_v46, 16 }
 0x3ed   : > { %v5347_v17 = vpop.f32.mrf.mxu0 }
 0x3ee   : > { %v13924_v52 = vadd.f32 %v5347_v17, %v4958_v9  ;;  %v6218_v40 = vrot.slane %v15628_v10, 1  ;;  %v6214_v17 = vor.u32 %v15629_v18, %v6210_v6  ;;  %v5790_v6 = vshrl.u32 %v9768_v7, 16  ;;  %v15630_v18 = vld [vmem:[#allocation72_spill] sm:$0xff] }
 0x3ef   : > { %v13926_v4 = vpop.f32.mrf.mxu2 }
 0x3f0   : > { %9477 = vmatmul.msk.bf16.gmra.mxu0 %vm4280_vm10, %v15626_v30  ;;  %v6219_v37 = vsel %vm2009_vm6, %v6214_v17, %v6218_v40 }
 0x3f1   : > { %v4389_v48 = vpop.f32.mrf.mxu1 }
 0x3f2   : > { %v4685_v61 = vadd.f32 %v13775_v36, %v4389_v48  ;;  %v9769_v36 = vld [vmem:[#allocation2 + $0x58] sm:$0xff]  ;;  %v10008_v48 = vld [vmem:[#allocation2 + $0x20] sm:$0xff]  }
 0x3f3   : > { %v13934_v15 = vpop.f32.mrf.mxu3  ;;  %v5794_v20 = vshll.u32 %v9769_v36, 16 }
 0x3f4   : > { %9389 = vmatmul.msk.bf16.gmra.mxu2 %vm4280_vm10, %v5789_v54  ;;  %v4959_v1 = vadd.f32 %v13752_v35, %v4685_v61 }
 0x3f5   : > { %v5349_v56 = vpop.f32.mrf.mxu0  ;;  %v5796_v10 = vrot.slane %v5794_v20, 1 }
 0x3f6   : > { %v13938_v55 = vadd.f32 %v5349_v56, %v4959_v1 }
 0x3f7   : > { %v13940_v9 = vpop.f32.mrf.mxu2 }
 0x3f8   : > { %9467 = vmatmul.msk.bf16.gmra.mxu3 %vm4280_vm10, %v6219_v37 }
 0x3f9   : > { %v4392_v30 = vpop.f32.mrf.mxu1 }
 0x3fa   : > { %v4688_v35 = vadd.f32 %v13790_v38, %v4392_v30  ;;  %v5792_v38 = vor.u32 %v5790_v6, %v5788_v44  ;;  %v15632_v44 = vshrl.u32 %v15627_v46, 16 }
 0x3fb   : > { %v13949_v54 = vpop.f32.mrf.mxu3 }
 0x3fc   : > { %v4960_v61 = vadd.f32 %v13768_v2, %v4688_v35  ;;  %9303 = vmatmul.msk.bf16.gmra.mxu1 %vm4280_vm10, %v10008_v48  ;;  %v5797_v2 = vsel %vm2009_vm6, %v5792_v38, %v5796_v10  ;;  %v6222_v6 = vor.u32 %v15632_v44, %v6218_v40  ;;  %v10009_v38 = vld [vmem:[#allocation2 + $0x28] sm:$0xff]   ;;  %v5798_v40 = vshrl.u32 %v9769_v36, 16 }
 0x3fd   : > { %v5352_v1 = vpop.f32.mrf.mxu0 }
 0x3fe   : > { %v13951_v56 = vadd.f32 %v5352_v1, %v4960_v61  ;;  %v15631_v61 = vshll.u32 %v13296_v53, 16 }
 0x3ff   : > { %v13953_v60 = vpop.f32.mrf.mxu2 }
 0x400   : > { %9478 = vmatmul.msk.bf16.gmra.mxu0 %vm4280_vm10, %v15630_v18  ;;  %v6226_v7 = vrot.slane %v15631_v61, 1 }
 0x401   : > { %v4394_v17 = vpop.f32.mrf.mxu1 }
 0x402   : > { %v4690_v37 = vadd.f32 %v13804_v21, %v4394_v17  ;;  %v9770_v21 = vld [vmem:[#allocation2 + $0x60] sm:$0xff]  ;;  %v6227_v18 = vsel %vm2009_vm6, %v6222_v6, %v6226_v7  ;;  %v15634_v6 = vld [vmem:[#allocation63_spill] sm:$0xff] }
 0x403   : > { %v13961_v35 = vpop.f32.mrf.mxu3 }
 0x404   : > { %9390 = vmatmul.msk.bf16.gmra.mxu2 %vm4280_vm10, %v5797_v2  ;;  %v4961_v30 = vadd.f32 %v13781_v24, %v4690_v37  ;;  %v5802_v37 = vshll.u32 %v9770_v21, 16 }
 0x405   : > { %v5354_v48 = vpop.f32.mrf.mxu0 }
 0x406   : > { %v13965_v20 = vadd.f32 %v5354_v48, %v4961_v30  ;;  %v5804_v44 = vrot.slane %v5802_v37, 1 }
 0x407   : > { %v13967_v1 = vpop.f32.mrf.mxu2 }
 0x408   : > { %9468 = vmatmul.msk.bf16.gmra.mxu3 %vm4280_vm10, %v6227_v18 }
 0x409   : > { %v4397_v17 = vpop.f32.mrf.mxu1 }
 0x40a   : > { %v4693_v24 = vadd.f32 %v13818_v43, %v4397_v17  ;;  %v5800_v43 = vor.u32 %v5798_v40, %v5796_v10  ;;  %v15636_v10 = vshrl.u32 %v13296_v53, 16 }
 0x40b   : > { %v13976_v30 = vpop.f32.mrf.mxu3 }
 0x40c   : > { %v4962_v2 = vadd.f32 %v13797_v57, %v4693_v24  ;;  %9304 = vmatmul.msk.bf16.gmra.mxu1 %vm4280_vm10, %v10009_v38  ;;  %v5805_v57 = vsel %vm2009_vm6, %v5800_v43, %v5804_v44  ;;  %v6230_v40 = vor.u32 %v15636_v10, %v6226_v7  ;;  %v10010_v43 = vld [vmem:[#allocation2 + $0x30] sm:$0xff]   ;;  %v5806_v7 = vshrl.u32 %v9770_v21, 16 }
 0x40d   : > { %v5357_v48 = vpop.f32.mrf.mxu0 }
 0x40e   : > { %v13978_v61 = vadd.f32 %v5357_v48, %v4962_v2  ;;  %v15635_v48 = vshll.u32 %v13391_v26, 16 }
 0x40f   : > { %v13980_v46 = vpop.f32.mrf.mxu2 }
 0x410   : > { %15633 = vst [vmem:[#allocation78_spill] sm:$0xff] %v13978_v61  ;;  %9479 = vmatmul.msk.bf16.gmra.mxu0 %vm4280_vm10, %v15634_v6  ;;  %v6234_v36 = vrot.slane %v15635_v48, 1 }
 0x411   : > { %v4399_v18 = vpop.f32.mrf.mxu1 }
 0x412   : > { %v4695_v17 = vadd.f32 %v13839_v23, %v4399_v18  ;;  %v9771_v23 = vld [vmem:[#allocation2 + $0x68] sm:$0xff]  ;;  %v6235_v6 = vsel %vm2009_vm6, %v6230_v40, %v6234_v36 }
 0x413   : > { %v13988_v38 = vpop.f32.mrf.mxu3  ;;  %v15638_v40 = vld [vmem:[#allocation23_spill] sm:$0xff] }
 0x414   : > { %9391 = vmatmul.msk.bf16.gmra.mxu2 %vm4280_vm10, %v5805_v57  ;;  %v4963_v24 = vadd.f32 %v13809_v12, %v4695_v17  ;;  %v5810_v17 = vshll.u32 %v9771_v23, 16 }
 0x415   : > { %v5359_v2 = vpop.f32.mrf.mxu0 }
 0x416   : > { %v13992_v37 = vadd.f32 %v5359_v2, %v4963_v24  ;;  %v5812_v10 = vrot.slane %v5810_v17, 1 }
 0x417   : > { %v13994_v61 = vpop.f32.mrf.mxu2 }
 0x418   : > { %9469 = vmatmul.msk.bf16.gmra.mxu3 %vm4280_vm10, %v6235_v6 }
 0x419   : > { %v4402_v18 = vpop.f32.mrf.mxu1 }
 0x41a   : > { %v4698_v12 = vadd.f32 %v13854_v0, %v4402_v18  ;;  %v7274_v0 = vld [vmem:[%s15037_s4] sm:$0xf] }
 0x41b   : > { %v14003_v24 = vpop.f32.mrf.mxu3  ;;  %v7359_v18 = vsel %vm4329_vm9, %v7274_v0, 0  ;;  %v9772_v0 = vld [vmem:[#allocation2 + $0x70] sm:$0xff] }
 0x41c   : > { %v4964_v57 = vadd.f32 %v13825_v45, %v4698_v12  ;;  %9305 = vmatmul.msk.bf16.gmra.mxu1 %vm4280_vm10, %v10010_v43  ;;  %v5808_v45 = vor.u32 %v5806_v7, %v5804_v44  ;;  %7368 = vmatpush.bf16.msrb.mxu3 %v7359_v18  ;;  %v15640_v7 = vshrl.u32 %v13391_v26, 16  ;;  %v10011_v18 = vld [vmem:[#allocation2 + $0x38] sm:$0xff]  }
 0x41d   : > { %v5362_v2 = vpop.f32.mrf.mxu0 }
 0x41e   : > { %v14005_v48 = vadd.f32 %v5362_v2, %v4964_v57  ;;  %v5813_v43 = vsel %vm2009_vm6, %v5808_v45, %v5812_v10  ;;  %v15639_v2 = vshll.u32 %v13486_v47, 16 }
 0x41f   : > { %v14007_v53 = vpop.f32.mrf.mxu2 }
 0x420   : > { %15637 = vst [vmem:[#allocation51_spill] sm:$0xff] %v14005_v48  ;;  %9480 = vmatmul.msk.bf16.gmra.mxu0 %vm4280_vm10, %v15638_v40  ;;  %v6242_v40 = vrot.slane %v15639_v2, 1 }
 0x421   : > { %v4404_v6 = vpop.f32.mrf.mxu1 }
 0x422   : > { %v4700_v12 = vadd.f32 %v13868_v27, %v4404_v6  ;;  %v6238_v27 = vor.u32 %v15640_v7, %v6234_v36  ;;  %v5814_v36 = vshrl.u32 %v9771_v23, 16 }
 0x423   : > { %v14019_v17 = vpop.f32.mrf.mxu3 }
 0x424   : > { %9392 = vmatmul.msk.bf16.gmra.mxu2 %vm4280_vm10, %v5813_v43  ;;  %v4965_v21 = vadd.f32 %v13845_v39, %v4700_v12  ;;  %v6243_v6 = vsel %vm2009_vm6, %v6238_v27, %v6242_v40  ;;  %v5818_v12 = vshll.u32 %v9772_v0, 16  ;;  %v15642_v27 = vld [vmem:[#allocation67_spill] sm:$0xff] }
 0x425   : > { %v5364_v57 = vpop.f32.mrf.mxu0 }
 0x426   : > { %v14023_v48 = vadd.f32 %v5364_v57, %v4965_v21  ;;  %v5820_v7 = vrot.slane %v5818_v12, 1 }
 0x427   : > { %v14025_v44 = vpop.f32.mrf.mxu2 }
 0x428   : > { %9470 = vmatmul.msk.bf16.gmra.mxu3 %vm4280_vm10, %v6243_v6 }
 0x429   : > { %v4407_v45 = vpop.f32.mrf.mxu1 }
 0x42a   : > { %v4703_v39 = vadd.f32 %v13882_v28, %v4407_v45  ;;  %v9509_v28 = vld [vmem:[%s15037_s4 + $0x4] sm:$0xf] }
 0x42b   : > { %v14034_v21 = vpop.f32.mrf.mxu3  ;;  %v7302_v45 = vsel %vm4329_vm9, %v9509_v28, 0  ;;  %v9773_v28 = vld [vmem:[#allocation2 + $0x78] sm:$0xff] }
 0x42c   : > { %v4966_v43 = vadd.f32 %v13861_v22, %v4703_v39  ;;  %9306 = vmatmul.msk.bf16.gmra.mxu1 %vm4280_vm10, %v10011_v18  ;;  %v5816_v22 = vor.u32 %v5814_v36, %v5812_v10  ;;  %7311 = vmatpush.bf16.msrb.mxu2 %v7302_v45  ;;  %v15644_v36 = vshrl.u32 %v13486_v47, 16  ;;  %v10012_v45 = vld [vmem:[#allocation2 + $0x40] sm:$0xff]  }
 0x42d   : > { %v5367_v57 = vpop.f32.mrf.mxu0 }
 0x42e   : > { %v14036_v2 = vadd.f32 %v5367_v57, %v4966_v43  ;;  %v5821_v18 = vsel %vm2009_vm6, %v5816_v22, %v5820_v7  ;;  %v15643_v57 = vshll.u32 %v13619_v49, 16 }
 0x42f   : > { %v14038_v26 = vpop.f32.mrf.mxu2 }
 0x430   : > { %15641 = vst [vmem:[#allocation73_spill] sm:$0xff] %v14036_v2  ;;  %9481 = vmatmul.msk.bf16.gmra.mxu0 %vm4280_vm10, %v15642_v27  ;;  %v6250_v27 = vrot.slane %v15643_v57, 1 }
 0x431   : > { %v4409_v6 = vpop.f32.mrf.mxu1 }
 0x432   : > { %v4705_v39 = vadd.f32 %v13896_v42, %v4409_v6  ;;  %v6246_v42 = vor.u32 %v15644_v36, %v6242_v40  ;;  %v5822_v40 = vshrl.u32 %v9772_v0, 16 }
 0x433   : > { %v14050_v12 = vpop.f32.mrf.mxu3 }
 0x434   : > { %9393 = vmatmul.msk.bf16.gmra.mxu2 %vm4280_vm10, %v5821_v18  ;;  %v4967_v23 = vadd.f32 %v13873_v8, %v4705_v39  ;;  %v6251_v6 = vsel %vm2009_vm6, %v6246_v42, %v6250_v27  ;;  %v5826_v39 = vshll.u32 %v9773_v28, 16  ;;  %v15646_v42 = vld [vmem:[#allocation12_spill] sm:$0xff] }
 0x435   : > { %v5369_v43 = vpop.f32.mrf.mxu0 }
 0x436   : > { %v14054_v2 = vadd.f32 %v5369_v43, %v4967_v23  ;;  %v5828_v36 = vrot.slane %v5826_v39, 1 }
 0x437   : > { %v14056_v10 = vpop.f32.mrf.mxu2 }
 0x438   : > { %9471 = vmatmul.msk.bf16.gmra.mxu3 %vm4280_vm10, %v6251_v6 }
 0x439   : > { %v4412_v22 = vpop.f32.mrf.mxu1 }
 0x43a   : > { %v4708_v8 = vadd.f32 %v13912_v63, %v4412_v22  ;;  %v5824_v63 = vor.u32 %v5822_v40, %v5820_v7  ;;  %v15648_v7 = vshrl.u32 %v13619_v49, 16 }
 0x43b   : > { %v14065_v23 = vpop.f32.mrf.mxu3 }
 0x43c   : > { %v4968_v18 = vadd.f32 %v13891_v32, %v4708_v8  ;;  %9307 = vmatmul.msk.bf16.gmra.mxu1 %vm4280_vm10, %v10012_v45  ;;  %15645 = vst [vmem:[#allocation15_spill] sm:$0xff] %v14065_v23  ;;  %v5829_v32 = vsel %vm2009_vm6, %v5824_v63, %v5828_v36  ;;  %v6254_v40 = vor.u32 %v15648_v7, %v6250_v27  ;;  %v10013_v63 = vld [vmem:[#allocation2 + $0x48] sm:$0xff]   ;;  %v5830_v27 = vshrl.u32 %v9773_v28, 16 }
 0x43d   : > { %v5372_v43 = vpop.f32.mrf.mxu0 }
 0x43e   : > { %v14067_v57 = vadd.f32 %v5372_v43, %v4968_v18  ;;  %v15647_v43 = vshll.u32 %v13632_v51, 16 }
 0x43f   : > { %v14069_v47 = vpop.f32.mrf.mxu2 }
 0x440   : > { %9482 = vmatmul.msk.bf16.gmra.mxu0 %vm4280_vm10, %v15646_v42  ;;  %v6258_v0 = vrot.slane %v15647_v43, 1 }
 0x441   : > { %v4414_v6 = vpop.f32.mrf.mxu1 }
 0x442   : > { %v4710_v22 = vadd.f32 %v13926_v4, %v4414_v6  ;;  %v9774_v4 = vld [vmem:[#allocation2 + $0x80] sm:$0xff]  ;;  %v6259_v42 = vsel %vm2009_vm6, %v6254_v40, %v6258_v0  ;;  %v15650_v40 = vld [vmem:[#allocation44_spill] sm:$0xff] }
 0x443   : > { %v14077_v45 = vpop.f32.mrf.mxu3 }
 0x444   : > { %9394 = vmatmul.msk.bf16.gmra.mxu2 %vm4280_vm10, %v5829_v32  ;;  %v4969_v8 = vadd.f32 %v13906_v34, %v4710_v22  ;;  %v5834_v22 = vshll.u32 %v9774_v4, 16 }
 0x445   : > { %v5374_v18 = vpop.f32.mrf.mxu0 }
 0x446   : > { %v14081_v39 = vadd.f32 %v5374_v18, %v4969_v8  ;;  %v5836_v7 = vrot.slane %v5834_v22, 1 }
 0x447   : > { %v14083_v23 = vpop.f32.mrf.mxu2 }
 0x448   : > { %9472 = vmatmul.msk.bf16.gmra.mxu3 %vm4280_vm10, %v6259_v42 }
 0x449   : > { %v4417_v6 = vpop.f32.mrf.mxu1 }
 0x44a   : > { %v4713_v34 = vadd.f32 %v13940_v9, %v4417_v6  ;;  %v5832_v9 = vor.u32 %v5830_v27, %v5828_v36  ;;  %v15652_v36 = vshll.u32 %v13652_v41, 16 }
 0x44b   : > { %v14092_v8 = vpop.f32.mrf.mxu3 }
 0x44c   : > { %v4970_v32 = vadd.f32 %v13922_v58, %v4713_v34  ;;  %9308 = vmatmul.msk.bf16.gmra.mxu1 %vm4280_vm10, %v10013_v63  ;;  %15649 = vst [vmem:[#allocation53_spill] sm:$0xff] %v14092_v8  ;;  %v5837_v58 = vsel %vm2009_vm6, %v5832_v9, %v5836_v7  ;;  %v6266_v27 = vrot.slane %v15652_v36, 1  ;;  %v10014_v9 = vld [vmem:[#allocation2 + $0x50] sm:$0xff]  }
 0x44d   : > { %v5377_v18 = vpop.f32.mrf.mxu0 }
 0x44e   : > { %v14094_v43 = vadd.f32 %v5377_v18, %v4970_v32  ;;  %v15651_v18 = vshrl.u32 %v13632_v51, 16 }
 0x44f   : > { %v14096_v49 = vpop.f32.mrf.mxu2 }
 0x450   : > { %9483 = vmatmul.msk.bf16.gmra.mxu0 %vm4280_vm10, %v15650_v40  ;;  %v6262_v28 = vor.u32 %v15651_v18, %v6258_v0  ;;  %v5838_v18 = vshrl.u32 %v9774_v4, 16  ;;  %v14133_v4 = vld [vmem:[#allocation2 + $0x88] sm:$0xf] }
 0x451   : > { %v4419_v42 = vpop.f32.mrf.mxu1 }
 0x452   : > { %v4715_v6 = vadd.f32 %v13953_v60, %v4419_v42  ;;  %v9775_v60 = vld [vmem:[#allocation2 + $0x88] sm:$0xff]  ;;  %v6267_v40 = vsel %vm2009_vm6, %v6262_v28, %v6266_v27 }
 0x453   : > { %v14104_v63 = vpop.f32.mrf.mxu3 }
 0x454   : > { %9395 = vmatmul.msk.bf16.gmra.mxu2 %vm4280_vm10, %v5837_v58  ;;  %v4971_v34 = vadd.f32 %v13934_v15, %v4715_v6  ;;  %v5842_v6 = vshll.u32 %v9775_v60, 16 }
 0x455   : > { %v5379_v32 = vpop.f32.mrf.mxu0 }
 0x456   : > { %v14108_v22 = vadd.f32 %v5379_v32, %v4971_v34  ;;  %v5844_v28 = vrot.slane %v5842_v6, 1 }
 0x457   : > { %v14110_v8 = vpop.f32.mrf.mxu2 }
 0x458   : > { %9473 = vmatmul.msk.bf16.gmra.mxu3 %vm4280_vm10, %v6267_v40  ;;  %v15654_v40 = vld [vmem:[#allocation48_spill] sm:$0xff] }
 0x459   : > { %v5492_v42 = vpop.f32.mrf.mxu1 }
 0x45a   : > { %v5572_v15 = vadd.f32 %v5492_v42, %v13575_v62  ;;  %v5840_v42 = vor.u32 %v5838_v18, %v5836_v7  ;;  %v7269_v18 = vld [vmem:[#allocation2 + $0x84] sm:$0xc] }
 0x45b   : > { %v14119_v0 = vpop.f32.mrf.mxu3 }
 0x45c   : > { %v5994_v51 = vadd.f32 %v13967_v1, %v5572_v15  ;;  %9309 = vmatmul.msk.bf16.gmra.mxu1 %vm4280_vm10, %v10014_v9  ;;  %15653 = vst [vmem:[#allocation64_spill] sm:$0xff] %v14119_v0  ;;  %v6272_v1 = vshll.u32 %v13665_v29, 16  ;;  %v5636_v9 = vld [vmem:[#allocation2 + $0x90] sm:$0x1]  ;;  %v5845_v0 = vsel %vm2009_vm6, %v5840_v42, %v5844_v28 }
 0x45d   : > { %v6547_v58 = vpop.f32.mrf.mxu0 }
 0x45e   : > { %v6416_v34 = vadd.f32 %v13949_v54, %v5994_v51 }
 0x45f   : > { %v14122_v32 = vpop.f32.mrf.mxu2 }
 0x460   : > { %v14124_v36 = vadd.f32 %v6547_v58, %v6416_v34  ;;  %9484 = vmatmul.msk.bf16.gmra.mxu0 %vm4280_vm10, %v15654_v40  ;;  %v6274_v58 = vrot.slane %v6272_v1, 1  ;;  %v5704_v34 = vunpack.c.l.b16 %v5636_v9  ;;  %v7324_v1 = vunpack.c.l.b16 %v7269_v18  ;;  %v10015_v9 = vld [vmem:[#allocation2 + $0x58] sm:$0xff]  }
 0x461   : > { %v5494_v62 = vpop.f32.mrf.mxu1 }
 0x462   : > { %v5573_v15 = vadd.f32 %v5494_v62, %v13594_v50  ;;  %v15656_v50 = vshrl.u32 %v13652_v41, 16  ;;  %v7283_v62 = vunpack.c.l.b16 %v14133_v4 }
 0x463   : > { %v14135_v6 = vpop.f32.mrf.mxu3 }
 0x464   : > { %v5995_v54 = vadd.f32 %v13980_v46, %v5573_v15  ;;  %9396 = vmatmul.msk.bf16.gmra.mxu2 %vm4280_vm10, %v5845_v0  ;;  %15655 = vst [vmem:[#allocation65_spill] sm:$0xff] %v14135_v6  ;;  %v6270_v40 = vor.u32 %v15656_v50, %v6266_v27  ;;  %v5721_v15 = vpack.c.b16 %v5704_v34, %v5704_v34  ;;  %v14146_v6 = vld [vmem:[#allocation2 + $0x8c] sm:$0xff] }
 0x465   : > { %v6549_v51 = vpop.f32.mrf.mxu0  ;;  %v15165_v34 = vshrl.u32 %v14146_v6, 16 }
 0x466   : > { %v6417_v7 = vadd.f32 %v13961_v35, %v5995_v54  ;;  %v6275_v0 = vsel %vm2009_vm6, %v6270_v40, %v6274_v58  ;;  %v7325_v54 = vpack.c.b16 %v7283_v62, %v7324_v1  ;;  %v5850_v58 = vshll.u32 %v5721_v15, 16 }
 0x467   : > { %v14138_v29 = vpop.f32.mrf.mxu2 }
 0x468   : > { %v14143_v46 = vadd.f32 %v6549_v51, %v6417_v7  ;;  %9474 = vmatmul.msk.bf16.gmra.mxu3 %vm4280_vm10, %v6275_v0  ;;  %v5846_v51 = vshrl.u32 %v9775_v60, 16  ;;  %v15166_v7 = vshll.u32 %v14146_v6, 16  ;;  %v7327_v40 = vshrl.u32 %v7325_v54, 16 }
 0x469   : > { %v5497_v42 = vpop.f32.mrf.mxu1  ;;  %v7330_v0 = vshll.u32 %v7325_v54, 16  ;;  %v7337_v60 = vrot.slane %v15165_v34, 2 }
 0x46a   : > { %v5574_v35 = vadd.f32 %v5497_v42, %v13608_v19  ;;  %v5848_v19 = vor.u32 %v5846_v51, %v5844_v28  ;;  %v7340_v15 = vrot.slane %v15166_v7, 3  ;;  %v7329_v28 = vrot.slane %v7327_v40, 2 }
 0x46b   : > { %v14152_v27 = vpop.f32.mrf.mxu3  ;;  %v7332_v51 = vrot.slane %v7330_v0, 3 }
 0x46c   : > { %v5996_v41 = vadd.f32 %v13994_v61, %v5574_v35  ;;  %9310 = vmatmul.msk.bf16.gmra.mxu1 %vm4280_vm10, %v10015_v9  ;;  %15657 = vst [vmem:[#allocation66_spill] sm:$0xff] %v14152_v27  ;;  %v15659_v61 = vld [vmem:[#allocation36_spill] sm:$0xff]  ;;  %v5852_v35 = vrot.slane %v5850_v58, 1  ;;  %v15660_v9 = vld [vmem:[#allocation71_spill] sm:$0xff] }
 0x46d   : > { %v6552_v4 = vpop.f32.mrf.mxu0  ;;  %v7333_v7 = vor.u32 %v7332_v51, %v7329_v28 }
 0x46e   : > { %v6418_v18 = vadd.f32 %v13976_v30, %v5996_v41  ;;  %v5853_v41 = vsel %vm2009_vm6, %v5848_v19, %v5852_v35  ;;  %v7275_v19 = vld [vmem:[#allocation2 + $0x84] sm:$0x8] }
 0x46f   : > { %v14157_v50 = vpop.f32.mrf.mxu2 }
 0x470   : > { %15658 = vst [vmem:[#allocation17_spill] sm:$0xff] %v14157_v50  ;;  %v14159_v42 = vadd.f32 %v6552_v4, %v6418_v18  ;;  %9485 = vmatmul.msk.bf16.gmra.mxu0 %vm4280_vm10, %v15659_v61  ;;  %v7273_v4 = vld [vmem:[#allocation2 + $0x94] sm:$0x7]  ;;  %v7341_v61 = vor.u32 %v7340_v15, %v7337_v60  ;;  %v10016_v15 = vld [vmem:[#allocation2 + $0x60] sm:$0xff]  }
 0x471   : > { %v5499_v1 = vpop.f32.mrf.mxu1  ;;  %v7286_v50 = vunpack.c.l.b16 %v7273_v4  ;;  %v15663_v60 = vld [vmem:[#allocation52_spill] sm:$0xff]  ;;  %v7291_v4 = vrot.slane %v14146_v6, 3 }
 0x472   : > { %v5575_v30 = vadd.f32 %v5499_v1, %v15660_v9  ;;  %v7342_v40 = vsel %vm710_vm4, %v7333_v7, %v7341_v61  ;;  %v7282_v9 = vunpack.c.l.b16 %v7275_v19 }
 0x473   : > { %v14171_v18 = vpop.f32.mrf.mxu3 }
 0x474   : > { %v5997_v54 = vadd.f32 %v14007_v53, %v5575_v30  ;;  %9397 = vmatmul.msk.bf16.gmra.mxu2 %vm4280_vm10, %v5853_v41  ;;  %15661 = vst [vmem:[#allocation46_spill] sm:$0xff] %v14171_v18  ;;  %v9521_v53 = vld [vmem:[%s15037_s4 + $0xc] sm:$0xf]  ;;  %v7289_v30 = vpack.c.b16 %v7286_v50, %v7286_v50  ;;  %v14189_v51 = vpack.c.b16 %v7283_v62, %v7282_v9  ;;  %v15666_v50 = vld [vmem:[#allocation30_spill] sm:$0xff] }
 0x475   : > { %v6554_v58 = vpop.f32.mrf.mxu0  ;;  %v7490_v35 = vsel %vm4329_vm9, %v9521_v53, 0 }
 0x476   : > { %v6419_v34 = vadd.f32 %v13988_v38, %v5997_v54  ;;  %7499 = vmatpush.bf16.msra.mxu3 %v7490_v35  ;;  %v7347_v53 = vshll.u32 %v7289_v30, 16  ;;  %v7290_v62 = vrot.slane %v14189_v51, 3 }
 0x477   : > { %v14174_v27 = vpop.f32.mrf.mxu2 }
 0x478   : > { %15662 = vst [vmem:[#allocation26_spill] sm:$0xff] %v14174_v27  ;;  %v14176_v1 = vadd.f32 %v6554_v58, %v6419_v34  ;;  %9516 = vmatmul.msk.bf16.vlgmr.msrb.gmra.mxu3 %vm4280_vm10, %v7342_v40  ;;  %v7344_v58 = vshrl.u32 %v7289_v30, 16 }
 0x479   : > { %v5502_v0 = vpop.f32.mrf.mxu1 }
 0x47a   : > { %v5576_v38 = vadd.f32 %v5502_v0, %v15663_v60  ;;  %v15667_v0 = vld [vmem:[#allocation77_spill] sm:$0xff]  ;;  %v7292_v60 = vsel %vm531_vm1, %v7290_v62, %v7291_v4 }
 0x47b   : > { %v14187_v41 = vpop.f32.mrf.mxu3 }
 0x47c   : > { %v5998_v34 = vadd.f32 %v14025_v44, %v5576_v38  ;;  %9311 = vmatmul.msk.bf16.gmra.mxu1 %vm4280_vm10, %v10016_v15  ;;  %15664 = vst [vmem:[#allocation21_spill] sm:$0xff] %v14187_v41  ;;  %v9518_v44 = vld [vmem:[%s15037_s4 + $0x8] sm:$0xf]  ;;  %v7346_v38 = vrot.slane %v7344_v58, 2  ;;  %v7349_v15 = vrot.slane %v7347_v53, 3 }
 0x47d   : > { %v6557_v28 = vpop.f32.mrf.mxu0 }
 0x47e   : > { %v6420_v7 = vadd.f32 %v14003_v24, %v5998_v34  ;;  %v7413_v24 = vsel %vm4329_vm9, %v9518_v44, 0  ;;  %v7350_v44 = vor.u32 %v7349_v15, %v7346_v38 }
 0x47f   : > { %v14192_v54 = vpop.f32.mrf.mxu2  ;;  %7422 = vmatpush.bf16.msra.mxu2 %v7413_v24  ;;  %v10017_v24 = vld [vmem:[#allocation2 + $0x68] sm:$0xff]  }
 0x480   : > { %15665 = vst [vmem:[#allocation25_spill] sm:$0xff] %v14192_v54  ;;  %v14195_v19 = vadd.f32 %v6557_v28, %v6420_v7  ;;  %9486 = vmatmul.msk.bf16.gmra.mxu0 %vm4280_vm10, %v15666_v50  ;;  %v10201_v50 = vld [vmem:[#allocation2 + $0x8c] sm:$0x8]  ;;  %v7351_v62 = vsel %vm710_vm4, %v7341_v61, %v7350_v44 }
 0x481   : > { %v5504_v40 = vpop.f32.mrf.mxu1 }
 0x482   : > { %v5577_v35 = vadd.f32 %v5504_v40, %v15667_v0  ;;  %v10276_v40 = vld [vmem:[#allocation2 + $0x8c] sm:$0xf0]   ;;  %v10277_v0 = vld [vmem:[#allocation2 + $0x94] sm:$0xff]  }
 0x483   : > { %v14208_v34 = vpop.f32.mrf.mxu3  ;;  %v10202_v53 = vor.u32 %v10276_v40, %v10201_v50 }
 0x484   : > { %v5999_v9 = vadd.f32 %v14038_v26, %v5577_v35  ;;  %9514 = vmatmul.msk.bf16.vlgmr.msrb.gmra.mxu2 %vm4280_vm10, %v7292_v60  ;;  %15668 = vst [vmem:[#allocation10_spill] sm:$0xff] %v14208_v34  ;;  %v9553_v34 = vld [vmem:[#allocation3 + $0x4] sm:$0xc] }
 0x485   : > { %v6559_v28 = vpop.f32.mrf.mxu0  ;;  %v7458_v38 = vshrl.u32 %v10202_v53, 16  ;;  %v7461_v15 = vshll.u32 %v10202_v53, 16 }
 0x486   : > { %v6421_v7 = vadd.f32 %v14019_v17, %v5999_v9 }
 0x487   : > { %v14211_v41 = vpop.f32.mrf.mxu2  ;;  %v7460_v40 = vrot.slane %v7458_v38, 3 }
 0x488   : > { %15669 = vst [vmem:[#allocation31_spill] sm:$0xff] %v14211_v41  ;;  %v14213_v18 = vadd.f32 %v6559_v28, %v6421_v7  ;;  %9517 = vmatmul.msk.bf16.gmra.mxu3 %vm4280_vm10, %v7351_v62  ;;  %v7466_v28 = vshrl.u32 %v10277_v0, 16  ;;  %v7469_v7 = vshll.u32 %v10277_v0, 16  ;;  %v7463_v62 = vrot.slane %v7461_v15, 4 }
 0x489   : > { %v5507_v58 = vpop.f32.mrf.mxu1 }
 0x48a   : > { %v5578_v26 = vadd.f32 %v5507_v58, %v13730_v5  ;;  %v15672_v5 = vld [vmem:[#allocation76_spill] sm:$0xff] }
 0x48b   : > { %v14220_v17 = vpop.f32.mrf.mxu3 }
 0x48c   : > { %v6000_v35 = vadd.f32 %v14056_v10, %v5578_v26  ;;  %9312 = vmatmul.msk.bf16.gmra.mxu1 %vm4280_vm10, %v10017_v24  ;;  %15670 = vst [vmem:[#allocation13_spill] sm:$0xff] %v14220_v17  ;;  %v7293_v10 = vrot.slane %v7289_v30, 3  ;;  %v14230_v26 = vld [vmem:[#allocation2 + $0x98] sm:$0xff]   ;;  %v7471_v24 = vrot.slane %v7469_v7, 4 }
 0x48d   : > { %v6562_v60 = vpop.f32.mrf.mxu0 }
 0x48e   : > { %v6422_v9 = vadd.f32 %v14034_v21, %v6000_v35  ;;  %v7294_v53 = vsel %vm531_vm1, %v7291_v4, %v7293_v10  ;;  %v7468_v21 = vrot.slane %v7466_v28, 3  ;;  %v7386_v4 = vshrl.u32 %v14189_v51, 16 }
 0x48f   : > { %v14223_v61 = vpop.f32.mrf.mxu2 }
 0x490   : > { %15671 = vst [vmem:[#allocation39_spill] sm:$0xff] %v14223_v61  ;;  %v14225_v50 = vadd.f32 %v6562_v60, %v6422_v9  ;;  %9487 = vmatmul.msk.bf16.gmra.mxu0 %vm4280_vm10, %v15672_v5  ;;  %v7464_v60 = vor.u32 %v7463_v62, %v7460_v40  ;;  %v9975_v9 = vunpack.c.h.b16 %v14230_v26  ;;  %v10018_v62 = vld [vmem:[#allocation2 + $0x70] sm:$0xff]  }
 0x491   : > { %v5509_v44 = vpop.f32.mrf.mxu1 }
 0x492   : > { %v5579_v58 = vadd.f32 %v5509_v44, %v13759_v3  ;;  %v7472_v3 = vor.u32 %v7471_v24, %v7468_v21  ;;  %v7389_v44 = vshll.u32 %v14189_v51, 16  ;;  %v7456_v10 = vpack.c.b16 %v9975_v9, %v9975_v9 }
 0x493   : > { %v14235_v0 = vpop.f32.mrf.mxu3  ;;  %v15676_v21 = vshll.u32 %v14146_v6, 16  ;;  %v7388_v51 = vrot.slane %v7386_v4, 3 }
 0x494   : > { %v6001_v35 = vadd.f32 %v14069_v47, %v5579_v58  ;;  %9515 = vmatmul.msk.bf16.gmra.mxu2 %vm4280_vm10, %v7294_v53  ;;  %15673 = vst [vmem:[#allocation14_spill] sm:$0xff] %v14235_v0  ;;  %v9527_v47 = vld [vmem:[%s15037_s4 + $0x14] sm:$0xf]  ;;  %v7473_v28 = vsel %vm1009_vm3, %v7464_v60, %v7472_v3  ;;  %v15675_v58 = vshrl.u32 %v14146_v6, 16  ;;  %v7391_v60 = vrot.slane %v7389_v44, 4 }
 0x495   : > { %v6564_v38 = vpop.f32.mrf.mxu0  ;;  %v7394_v24 = vrot.slane %v15676_v21, 4  ;;  %v7475_v9 = vshrl.u32 %v7456_v10, 16  ;;  %v9524_v6 = vld [vmem:[%s15037_s4 + $0x10] sm:$0xf] }
 0x496   : > { %v6423_v30 = vadd.f32 %v14050_v12, %v6001_v35  ;;  %v7596_v12 = vsel %vm4329_vm9, %v9527_v47, 0  ;;  %v7393_v53 = vrot.slane %v15675_v58, 3  ;;  %v7525_v4 = vsel %vm4329_vm9, %v9524_v6, 0 }
 0x497   : > { %v14239_v15 = vpop.f32.mrf.mxu2  ;;  %7605 = vmatpush.bf16.msrb.mxu3 %v7596_v12  ;;  %v7477_v58 = vrot.slane %v7475_v9, 3  ;;  %7534 = vmatpush.bf16.msrb.mxu2 %v7525_v4 }
 0x498   : > { %15674 = vst [vmem:[#allocation35_spill] sm:$0xff] %v14239_v15  ;;  %v14241_v5 = vadd.f32 %v6564_v38, %v6423_v30  ;;  %9522 = vmatmul.msk.bf16.vlgmr.msra.gmra.mxu3 %vm4280_vm10, %v7473_v28  ;;  %v7478_v30 = vshll.u32 %v7456_v10, 16  ;;  %v7380_v38 = vld [vmem:[#allocation2 + $0x94] sm:$0xf]  ;;  %v15679_v28 = vld [vmem:[#allocation34_spill] sm:$0xff] }
 0x499   : > { %v5512_v7 = vpop.f32.mrf.mxu1 }
 0x49a   : > { %v14252_v40 = vadd.f32 %v5512_v7, %v13773_v31  ;;  %v7395_v31 = vor.u32 %v7394_v24, %v7393_v53  ;;  %v7383_v7 = vunpack.c.l.b16 %v7380_v38  ;;  %v7480_v21 = vrot.slane %v7478_v30, 4 }
 0x49b   : > { %v14259_v35 = vpop.f32.mrf.mxu3 }
 0x49c   : > { %9313 = vmatmul.msk.bf16.gmra.mxu1 %vm4280_vm10, %v10018_v62  ;;  %15677 = vst [vmem:[#allocation50_spill] sm:$0xff] %v14259_v35  ;;  %v7392_v62 = vor.u32 %v7391_v60, %v7388_v51  ;;  %v7481_v24 = vor.u32 %v7480_v21, %v7477_v58  ;;  %v7384_v38 = vpack.c.b16 %v7383_v7, %v7383_v7  ;;  %v9793_v21 = vld [vmem:[#allocation2 + $0x98] sm:$0xff] }
 0x49d   : > { %v14518_v54 = vpop.f32.mrf.mxu0 }
 0x49e   : > { %v7396_v10 = vsel %vm1009_vm3, %v7392_v62, %v7395_v31  ;;  %v7482_v51 = vsel %vm1009_vm3, %v7472_v3, %v7481_v24  ;;  %v7398_v9 = vshrl.u32 %v7384_v38, 16  ;;  %v7401_v30 = vshll.u32 %v7384_v38, 16  ;;  %v9792_v62 = vld [vmem:[#allocation2 + $0x90] sm:$0xff]  ;;  %v15685_v24 = vld [vmem:[#allocation41_spill] sm:$0xff] }
 0x49f   : > { %v14261_v47 = vpop.f32.mrf.mxu2  ;;  %v7572_v3 = vshll.u32 %v9792_v62, 16 }
 0x4a0   : > { %15678 = vst [vmem:[#allocation49_spill] sm:$0xff] %v14261_v47  ;;  %9488 = vmatmul.msk.bf16.gmra.mxu0 %vm4280_vm10, %v15679_v28  ;;  %v7400_v58 = vrot.slane %v7398_v9, 3  ;;  %v7403_v7 = vrot.slane %v7401_v30, 4  ;;  %v7570_v30 = vshrl.u32 %v9792_v62, 16 }
 0x4a1   : > { %v5514_v12 = vpop.f32.mrf.mxu1 }
 0x4a2   : > { %v14270_v44 = vadd.f32 %v5514_v12, %v13788_v11  ;;  %v15682_v11 = vld [vmem:[#allocation62_spill] sm:$0xff]  ;;  %v10019_v12 = vld [vmem:[#allocation2 + $0x78] sm:$0xff]  }
 0x4a3   : > { %v14274_v53 = vpop.f32.mrf.mxu3 }
 0x4a4   : > { %9519 = vmatmul.msk.bf16.vlgmr.msra.gmra.mxu2 %vm4280_vm10, %v7396_v10  ;;  %15680 = vst [vmem:[#allocation27_spill] sm:$0xff] %v14274_v53  ;;  %v7577_v53 = vshll.u32 %v9793_v21, 16 }
 0x4a7   : > { %v14276_v28 = vpop.f32.mrf.mxu2 }
 0x4a8   : > { %15681 = vst [vmem:[#allocation28_spill] sm:$0xff] %v14276_v28  ;;  %9523 = vmatmul.msk.bf16.gmra.mxu3 %vm4280_vm10, %v7482_v51  ;;  %v7404_v51 = vor.u32 %v7403_v7, %v7400_v58  ;;  %v9545_v58 = vld [vmem:[%s15037_s4 + $0x1c] sm:$0xf] }
 0x4a9   : > { %v5517_v60 = vpop.f32.mrf.mxu1 }
 0x4aa   : > { %v14281_v6 = vadd.f32 %v5517_v60, %v15682_v11  ;;  %v15686_v60 = vld [vmem:[#allocation68_spill] sm:$0xff]  ;;  %v7405_v35 = vsel %vm1009_vm3, %v7395_v31, %v7404_v51  ;;  %v7709_v31 = vsel %vm4329_vm9, %v9545_v58, 0 }
 0x4ab   : > { %v14284_v4 = vpop.f32.mrf.mxu3  ;;  %7718 = vmatpush.bf16.msra.mxu3 %v7709_v31  ;;  %v10026_v58 = vld [vmem:[#allocation2 + $0x90] sm:$0xff]  }
 0x4ac   : > { %9314 = vmatmul.msk.bf16.gmra.mxu1 %vm4280_vm10, %v10019_v12  ;;  %15683 = vst [vmem:[#allocation40_spill] sm:$0xff] %v14284_v4  ;;  %v7574_v12 = vrot.slane %v7572_v3, 1  ;;  %v7579_v4 = vrot.slane %v7577_v53, 1  ;;  %v10020_v53 = vld [vmem:[#allocation2 + $0x80] sm:$0xff]  }
 0x4ae   : > { %v7575_v0 = vor.u32 %v7574_v12, %v7570_v30 }
 0x4af   : > { %v14286_v10 = vpop.f32.mrf.mxu2 }
 0x4b0   : > { %15684 = vst [vmem:[#allocation69_spill] sm:$0xff] %v14286_v10  ;;  %9489 = vmatmul.msk.bf16.gmra.mxu0 %vm4280_vm10, %v15685_v24  ;;  %v7554_v10 = vld [vmem:[#allocation2 + $0xa0] sm:$0x1]  ;;  %v7580_v7 = vsel %vm2009_vm6, %v7575_v0, %v7579_v4  ;;  %v9538_v0 = vld [vmem:[%s15037_s4 + $0x18] sm:$0xf] }
 0x4b1   : > { %v5519_v38 = vpop.f32.mrf.mxu1 }
 0x4b2   : > { %v14291_v11 = vadd.f32 %v5519_v38, %v15686_v60  ;;  %v7565_v38 = vunpack.c.l.b16 %v7554_v10  ;;  %v15691_v60 = vld [vmem:[#allocation61_spill] sm:$0xff] }
 0x4b3   : > { %v14295_v9 = vpop.f32.mrf.mxu3 }
 0x4b4   : > { %9520 = vmatmul.msk.bf16.gmra.mxu2 %vm4280_vm10, %v7405_v35  ;;  %15687 = vst [vmem:[#allocation29_spill] sm:$0xff] %v14295_v9  ;;  %v7568_v3 = vpack.c.b16 %v7565_v38, %v7565_v38 }
 0x4b6   : > { %v7585_v12 = vshll.u32 %v7568_v3, 16 }
 0x4b7   : > { %v14297_v28 = vpop.f32.mrf.mxu2 }
 0x4b8   : > { %15688 = vst [vmem:[#allocation54_spill] sm:$0xff] %v14297_v28  ;;  %9536 = vmatmul.msk.bf16.vlgmr.msrb.gmra.mxu3 %vm4280_vm10, %v7580_v7  ;;  %v7581_v7 = vshrl.u32 %v9793_v21, 16  ;;  %v7587_v31 = vrot.slane %v7585_v12, 1  ;;  %v10030_v12 = vld [vmem:[#allocation2 + $0x98] sm:$0xe] }
 0x4b9   : > { %v5522_v24 = vpop.f32.mrf.mxu1 }
 0x4ba   : > { %v14306_v35 = vadd.f32 %v5522_v24, %v13833_v33  ;;  %v7667_v33 = vsel %vm4329_vm9, %v9538_v0, 0  ;;  %v7583_v38 = vor.u32 %v7581_v7, %v7579_v4  ;;  %v10029_v0 = vld [vmem:[#allocation2 + $0x98] sm:$0xf0]  ;;  %v15698_v4 = vld [vmem:[#allocation55_spill] sm:$0xff] }
 0x4bb   : > { %v14309_v62 = vpop.f32.mrf.mxu3  ;;  %7676 = vmatpush.bf16.msra.mxu2 %v7667_v33  ;;  %v10031_v7 = vor.u32 %v10030_v12, %v10029_v0 }
 0x4bc   : > { %9315 = vmatmul.msk.bf16.gmra.mxu1 %vm4280_vm10, %v10020_v53  ;;  %15689 = vst [vmem:[#allocation59_spill] sm:$0xff] %v14309_v62 }
 0x4bf   : > { %v14311_v51 = vpop.f32.mrf.mxu2 }
 0x4c0   : > { %15690 = vst [vmem:[#allocation60_spill] sm:$0xff] %v14311_v51  ;;  %9490 = vmatmul.msk.bf16.gmra.mxu0 %vm4280_vm10, %v15691_v60  ;;  %v7588_v60 = vsel %vm2009_vm6, %v7583_v38, %v7587_v31 }
 0x4c1   : > { %v5524_v10 = vpop.f32.mrf.mxu1 }
 0x4c2   : > { %v14320_v30 = vadd.f32 %v5524_v10, %v13852_v59  ;;  %v10319_v59 = vld [vmem:[#allocation2 + $0x88] sm:$0xff]  }
 0x4c3   : > { %v14323_v24 = vpop.f32.mrf.mxu3 }
 0x4c4   : > { %15692 = vst [vmem:[#allocation75_spill] sm:$0xff] %v14320_v30  ;;  %9525 = vmatmul.msk.bf16.vlgmr.msrb.gmra.mxu2 %vm4280_vm10, %v10026_v58  ;;  %v9794_v58 = vld [vmem:[#allocation2 + $0xa0] sm:$0xff] }
 0x4c5   : > { %15693 = vst [vmem:[#allocation79_spill] sm:$0xff] %v14323_v24  ;;  %v7698_v31 = vrot.slane %v9794_v58, 1  ;;  %v15703_v24 = vld [vmem:[#allocation19_spill] sm:$0xff] }
 0x4c7   : > { %v14325_v53 = vpop.f32.mrf.mxu2 }
 0x4c8   : > { %15694 = vst [vmem:[#allocation33_spill] sm:$0xff] %v14325_v53  ;;  %9537 = vmatmul.msk.bf16.gmra.mxu3 %vm4280_vm10, %v7588_v60 }
 0x4c9   : > { %v5527_v62 = vpop.f32.mrf.mxu1 }
 0x4ca   : > { %v14330_v3 = vadd.f32 %v5527_v62, %v13866_v13  ;;  %v7697_v62 = vrot.slane %v10031_v7, 1 }
 0x4cb   : > { %v14333_v21 = vpop.f32.mrf.mxu3 }
 0x4cc   : > { %15695 = vst [vmem:[#allocation16_spill] sm:$0xff] %v14330_v3  ;;  %9316 = vmatmul.msk.bf16.gmra.mxu1 %vm4280_vm10, %v10319_v59  ;;  %v7643_v59 = vshll.u32 %v14230_v26, 16 }
 0x4cd   : > { %15696 = vst [vmem:[#allocation56_spill] sm:$0xff] %v14333_v21 }
 0x4ce   : > { %v7645_v12 = vrot.slane %v7643_v59, 1 }
 0x4cf   : > { %v14335_v10 = vpop.f32.mrf.mxu2 }
 0x4d0   : > { %15697 = vst [vmem:[#allocation32_spill] sm:$0xff] %v14335_v10  ;;  %9491 = vmatmul.msk.bf16.gmra.mxu0 %vm4280_vm10, %v15698_v4  ;;  %v7699_v4 = vsel %vm2742_vm5, %v7697_v62, %v7698_v31 }
 0x4d1   : > { %v5529_v33 = vpop.f32.mrf.mxu1 }
 0x4d2   : > { %v14340_v38 = vadd.f32 %v5529_v33, %v13880_v25  ;;  %v7625_v25 = vld [vmem:[#allocation2 + $0xa8] sm:$0x1]  ;;  %v7648_v33 = vshll.u32 %v9794_v58, 16 }
 0x4d3   : > { %v14344_v13 = vpop.f32.mrf.mxu3  ;;  %v7636_v10 = vunpack.c.l.b16 %v7625_v25 }
 0x4d4   : > { %15699 = vst [vmem:[#allocation72_spill] sm:$0xff] %v14340_v38  ;;  %9526 = vmatmul.msk.bf16.gmra.mxu2 %vm4280_vm10, %v14230_v26  ;;  %v7650_v9 = vrot.slane %v7648_v33, 1 }
 0x4d5   : > { %15700 = vst [vmem:[#allocation63_spill] sm:$0xff] %v14344_v13 }
 0x4d7   : > { %v14346_v60 = vpop.f32.mrf.mxu2 }
 0x4d8   : > { %15701 = vst [vmem:[#allocation23_spill] sm:$0xff] %v14346_v60  ;;  %9546 = vmatmul.msk.bf16.vlgmr.msra.gmra.mxu3 %vm4280_vm10, %v7699_v4  ;;  %v7641_v60 = vshrl.u32 %v14230_v26, 16  ;;  %v7639_v4 = vpack.c.b16 %v7636_v10, %v7636_v10 }
 0x4d9   : > { %v5532_v21 = vpop.f32.mrf.mxu1 }
 0x4da   : > { %v14352_v0 = vadd.f32 %v5532_v21, %v13894_v14  ;;  %v7646_v62 = vor.u32 %v7645_v12, %v7641_v60  ;;  %v9548_v14 = vld [vmem:[%s15037_s4 + $0x20] sm:$0xf]  ;;  %v7700_v26 = vrot.slane %v7639_v4, 1 }
 0x4db   : > { %v14356_v13 = vpop.f32.mrf.mxu3  ;;  %v7767_v59 = vsel %vm4329_vm9, %v9548_v14, 0  ;;  %v15710_v14 = vld [vmem:[#allocation20_spill] sm:$0xff] }
 0x4dc   : > { %15702 = vst [vmem:[#allocation67_spill] sm:$0xff] %v14352_v0  ;;  %9493 = vmatmul.msk.bf16.vlgmr.msrb.gmra.mxu1 %vm4280_vm10, %v15703_v24  ;;  %7776 = vmatpush.bf16.msrb.mxu2 %v7767_v59  ;;  %v7651_v24 = vsel %vm2009_vm6, %v7646_v62, %v7650_v9  ;;  %v7701_v12 = vsel %vm2742_vm5, %v7698_v31, %v7700_v26 }
 0x4dd   : > { %15704 = vst [vmem:[#allocation12_spill] sm:$0xff] %v14356_v13 }
 0x4df   : > { %v14359_v53 = vpop.f32.mrf.mxu2 }
 0x4e0   : > { %15705 = vst [vmem:[#allocation44_spill] sm:$0xff] %v14359_v53  ;;  %v7656_v53 = vshll.u32 %v7639_v4, 16 }
 0x4e1   : > { %v5534_v21 = vpop.f32.mrf.mxu1 }
 0x4e2   : > { %v14366_v51 = vadd.f32 %v5534_v21, %v13910_v16  ;;  %v7652_v16 = vshrl.u32 %v9794_v58, 16  ;;  %v7658_v21 = vrot.slane %v7656_v53, 1  ;;  %v7740_v58 = vshrl.u32 %v10031_v7, 16 }
 0x4e3   : > { %v14370_v25 = vpop.f32.mrf.mxu3 }
 0x4e4   : > { %15706 = vst [vmem:[#allocation48_spill] sm:$0xff] %v14366_v51  ;;  %9543 = vmatmul.msk.bf16.vlgmr.msra.gmra.mxu2 %vm4280_vm10, %v7651_v24  ;;  %v7654_v62 = vor.u32 %v7652_v16, %v7650_v9 }
 0x4e5   : > { %15707 = vst [vmem:[#allocation36_spill] sm:$0xff] %v14370_v25 }
 0x4e6   : > { %v7659_v31 = vsel %vm2009_vm6, %v7654_v62, %v7658_v21  ;;  %v7748_v62 = vrot.slane %v7648_v33, 2  ;;  %v15717_v21 = vld [vmem:[#allocation22_spill] sm:$0xff] }
 0x4e7   : > { %v14372_v60 = vpop.f32.mrf.mxu2 }
 0x4e8   : > { %15708 = vst [vmem:[#allocation71_spill] sm:$0xff] %v14372_v60  ;;  %9547 = vmatmul.msk.bf16.gmra.mxu3 %vm4280_vm10, %v7701_v12  ;;  %v7734_v12 = vld [vmem:[#allocation2 + $0xa8] sm:$0x3] }
 0x4e9   : > { %v5537_v13 = vpop.f32.mrf.mxu1 }
 0x4ea   : > { %v14376_v10 = vadd.f32 %v5537_v13, %v13924_v52  ;;  %v7743_v13 = vshll.u32 %v10031_v7, 16 }
 0x4eb   : > { %v14381_v59 = vpop.f32.mrf.mxu3 }
 0x4ec   : > { %15709 = vst [vmem:[#allocation52_spill] sm:$0xff] %v14376_v10  ;;  %9494 = vmatmul.msk.bf16.gmra.mxu1 %vm4280_vm10, %v15710_v14  ;;  %v7747_v14 = vrot.slane %v7652_v16, 1 }
 0x4ed   : > { %15711 = vst [vmem:[#allocation30_spill] sm:$0xff] %v14381_v59  ;;  %v7742_v59 = vrot.slane %v7740_v58, 1 }
 0x4ef   : > { %v14383_v24 = vpop.f32.mrf.mxu2 }
 0x4f0   : > { %15712 = vst [vmem:[#allocation77_spill] sm:$0xff] %v14383_v24  ;;  %v7745_v24 = vrot.slane %v7743_v13, 2 }
 0x4f1   : > { %v5539_v25 = vpop.f32.mrf.mxu1 }
 0x4f2   : > { %v14387_v4 = vadd.f32 %v5539_v25, %v13938_v55  ;;  %v7737_v55 = vunpack.c.l.b16 %v7734_v12 }
 0x4f3   : > { %v14392_v26 = vpop.f32.mrf.mxu3 }
 0x4f4   : > { %15713 = vst [vmem:[#allocation76_spill] sm:$0xff] %v14387_v4  ;;  %9544 = vmatmul.msk.bf16.gmra.mxu2 %vm4280_vm10, %v7659_v31  ;;  %v7746_v31 = vor.u32 %v7745_v24, %v7742_v59  ;;  %v7738_v60 = vpack.c.b16 %v7737_v55, %v7737_v55  ;;  %v15722_v24 = vld [vmem:[#allocation74_spill] sm:$0xff] }
 0x4f5   : > { %15715 = vst [vmem:[#allocation62_spill] sm:$0xff] %v14392_v26  ;;  %v15738_v4 = vld [vmem:[#allocation42_spill] sm:$0xff] }
 0x4f6   : > { %v7752_v16 = vshrl.u32 %v7738_v60, 16  ;;  %v7755_v33 = vshll.u32 %v7738_v60, 16 }
 0x4f7   : > { %v14390_v52 = vpop.f32.mrf.mxu2 }
 0x4f8   : > { %15714 = vst [vmem:[#allocation34_spill] sm:$0xff] %v14390_v52  ;;  %v7749_v52 = vor.u32 %v7748_v62, %v7747_v14  ;;  %v7754_v12 = vrot.slane %v7752_v16, 1  ;;  %v7757_v28 = vrot.slane %v7755_v33, 2  ;;  %v15724_v16 = vld [vmem:[#allocation51_spill] sm:$0xff] }
 0x4f9   : > { %v5542_v9 = vpop.f32.mrf.mxu1 }
 0x4fa   : > { %v14395_v53 = vadd.f32 %v5542_v9, %v13951_v56  ;;  %v7750_v9 = vsel %vm2954_vm8, %v7746_v31, %v7749_v52  ;;  %v7758_v14 = vor.u32 %v7757_v28, %v7754_v12 }
 0x4fb   : > { %v7370_v56 = vpop.f32.mrf.mxu3 }
 0x4fc   : > { %15716 = vst [vmem:[#allocation41_spill] sm:$0xff] %v14395_v53  ;;  %9495 = vmatmul.msk.bf16.gmra.mxu1 %vm4280_vm10, %v15717_v21  ;;  %v7759_v31 = vsel %vm2954_vm8, %v7749_v52, %v7758_v14 }
 0x4ff   : > { %v14399_v25 = vpop.f32.mrf.mxu2 }
 0x500   : > { %15718 = vst [vmem:[#allocation68_spill] sm:$0xff] %v14399_v25  ;;  %v15720_v25 = vld [vmem:[#allocation78_spill] sm:$0xff] }
 0x501   : > { %v5544_v7 = vpop.f32.mrf.mxu1 }
 0x502   : > { %v14402_v26 = vadd.f32 %v5544_v7, %v13965_v20 }
 0x503   : > { %v14411_v20 = vpop.f32.mrf.mxu3 }
 0x504   : > { %15719 = vst [vmem:[#allocation61_spill] sm:$0xff] %v14402_v26  ;;  %9549 = vmatmul.msk.bf16.vlgmr.msrb.gmra.mxu2 %vm4280_vm10, %v7750_v9 }
 0x507   : > { %v7313_v58 = vpop.f32.mrf.mxu2 }
 0x508   : > { %v7371_v13 = vadd.f32 %v7370_v56, %v7313_v58  ;;  %v15726_v58 = vld [vmem:[#allocation70_spill] sm:$0xff] }
 0x509   : > { %v5547_v21 = vpop.f32.mrf.mxu1 }
 0x50a   : > { %v14407_v59 = vadd.f32 %v5547_v21, %v15720_v25 }
 0x50b   : > { %v7375_v7 = vpop.f32.mrf.mxu3 }
 0x50c   : > { %15721 = vst [vmem:[#allocation55_spill] sm:$0xff] %v14407_v59  ;;  %9496 = vmatmul.msk.bf16.gmra.mxu1 %vm4280_vm10, %v15722_v24 }
 0x50f   : > { %v14413_v62 = vpop.f32.mrf.mxu2 }
 0x511   : > { %v5549_v55 = vpop.f32.mrf.mxu1 }
 0x512   : > { %v14417_v60 = vadd.f32 %v5549_v55, %v13992_v37  ;;  %v15728_v55 = vld [vmem:[#allocation73_spill] sm:$0xff] }
 0x513   : > { %v14430_v37 = vpop.f32.mrf.mxu3 }
 0x514   : > { %15723 = vst [vmem:[#allocation19_spill] sm:$0xff] %v14417_v60  ;;  %9550 = vmatmul.msk.bf16.gmra.mxu2 %vm4280_vm10, %v7759_v31 }
 0x517   : > { %v7318_v56 = vpop.f32.mrf.mxu2 }
 0x518   : > { %v7376_v25 = vadd.f32 %v7375_v7, %v7318_v56  ;;  %v15730_v7 = vld [vmem:[#allocation18_spill] sm:$0xff] }
 0x519   : > { %v5552_v9 = vpop.f32.mrf.mxu1 }
 0x51a   : > { %v14421_v33 = vadd.f32 %v5552_v9, %v15724_v16 }
 0x51b   : > { %v14439_v56 = vpop.f32.mrf.mxu3 }
 0x51c   : > { %15725 = vst [vmem:[#allocation20_spill] sm:$0xff] %v14421_v33  ;;  %9497 = vmatmul.msk.bf16.gmra.mxu1 %vm4280_vm10, %v15726_v58 }
 0x51f   : > { %v14425_v28 = vpop.f32.mrf.mxu2 }
 0x521   : > { %v5554_v21 = vpop.f32.mrf.mxu1 }
 0x522   : > { %v14428_v52 = vadd.f32 %v5554_v21, %v14023_v48 }
 0x524   : > { %15727 = vst [vmem:[#allocation22_spill] sm:$0xff] %v14428_v52 }
 0x527   : > { %v7424_v12 = vpop.f32.mrf.mxu2 }
 0x528   : > { %v14432_v24 = vadd.f32 %v7424_v12, %v7371_v13  ;;  %v9812_v13 = vld [vmem:[%s15041_s8 + $0x8] sm:$0xff]  ;;  %v14451_v12 = vpop.f32.mrf.mxu3 }
 0x529   : > { %v5557_v14 = vpop.f32.mrf.mxu1  ;;  %8372 = vmatpush.bf16.msrb.mxu0 %v9812_v13 }
 0x52a   : > { %v14435_v31 = vadd.f32 %v5557_v14, %v15728_v55 }
 0x52c   : > { %15729 = vst [vmem:[#allocation78_spill] sm:$0xff] %v14435_v31  ;;  %9498 = vmatmul.msk.bf16.gmra.mxu1 %vm4280_vm10, %v15730_v7  ;;  %v7016_v7 = vpop.permute.xlu0 %7015  ;;  %v15733_v31 = vld [vmem:[#allocation24_spill] sm:$0xff] }
 0x52f   : > { %v14441_v9 = vpop.f32.mrf.mxu2 }
 0x530   : > { %v14463_v13 = vpop.f32.mrf.mxu3 }
 0x531   : > { %v5559_v16 = vpop.f32.mrf.mxu1 }
 0x532   : > { %v14444_v48 = vadd.f32 %v5559_v16, %v14054_v2  ;;  %v7021_v16 = vpop.permute.xlu1 %7020 }
 0x534   : > { %15731 = vst [vmem:[#allocation74_spill] sm:$0xff] %v14444_v48 }
 0x537   : > { %v7429_v58 = vpop.f32.mrf.mxu2 }
 0x538   : > { %v14449_v21 = vadd.f32 %v7429_v58, %v7376_v25  ;;  %v14465_v25 = vpop.permute.xlu0 %7030 }
 0x539   : > { %v5562_v14 = vpop.f32.mrf.mxu1 }
 0x53a   : > { %v14454_v55 = vadd.f32 %v5562_v14, %v14067_v57  ;;  %v14469_v57 = vpop.permute.xlu1 %7035 }
 0x53c   : > { %15732 = vst [vmem:[#allocation51_spill] sm:$0xff] %v14454_v55  ;;  %9499 = vmatmul.msk.bf16.gmra.mxu1 %vm4280_vm10, %v15733_v31  ;;  %v15736_v31 = vld [vmem:[#allocation38_spill] sm:$0xff]  ;;  %v14476_v55 = vpop.f32.mrf.mxu3 }
 0x53f   : > { %v14458_v2 = vpop.f32.mrf.mxu2 }
 0x540   : > { %v14478_v60 = vpop.permute.xlu0 %7045 }
 0x541   : > { %v5564_v48 = vpop.f32.mrf.mxu1 }
 0x542   : > { %v14461_v52 = vadd.f32 %v5564_v48, %v14081_v39  ;;  %v14485_v59 = vpop.permute.xlu1 %7050 }
 0x544   : > { %15734 = vst [vmem:[#allocation70_spill] sm:$0xff] %v14461_v52  ;;  %v14487_v26 = vpop.f32.mrf.mxu3 }
 0x547   : > { %v14467_v58 = vpop.f32.mrf.mxu2 }
 0x549   : > { %v5567_v33 = vpop.f32.mrf.mxu1 }
 0x54a   : > { %v14472_v14 = vadd.f32 %v5567_v33, %v14094_v43  ;;  %v14491_v43 = vld [vmem:[#allocation6] ss:$0 sm:$0xff]  ;;  %v14493_v33 = vpop.permute.xlu0 %7060 }
 0x54c   : > { %15735 = vst [vmem:[#allocation73_spill] sm:$0xff] %v14472_v14  ;;  %9500 = vmatmul.msk.bf16.gmra.mxu1 %vm4280_vm10, %v15736_v31 }
 0x54f   : > { %v14480_v39 = vpop.f32.mrf.mxu2 }
 0x551   : > { %v5569_v48 = vpop.f32.mrf.mxu1 }
 0x552   : > { %v14483_v52 = vadd.f32 %v5569_v48, %v14108_v22  ;;  %v7871_v22 = vld [vmem:[%s15039_s6] sm:$0xf]  ;;  %v14510_v51 = vpop.permute.xlu0 %7075 }
 0x553   : > { %v8159_v48 = vsel %vm4329_vm9, %v7871_v22, 0  ;;  %15740 = vst [vmem:[#allocation38_spill] sm:$0xff] %v14510_v51 }
 0x554   : > { %15737 = vst [vmem:[#allocation18_spill] sm:$0xff] %v14483_v52  ;;  %v14503_v52 = vpop.permute.xlu1 %7065  ;;  %8168 = vmatpush.bf16.msrb.mxu3 %v8159_v48 }
 0x555   : > { %15739 = vst [vmem:[#allocation24_spill] sm:$0xff] %v14503_v52 }
 0x557   : > { %v14489_v53 = vpop.f32.mrf.mxu2 }
 0x559   : > { %v6802_v31 = vpop.f32.mrf.mxu1 }
 0x55a   : > { %v6882_v14 = vadd.f32 %v6802_v31, %v14124_v36  ;;  %v9795_v36 = vld [vmem:[#allocation3 + $0x4] sm:$0xf0]  ;;  %v14507_v31 = vpop.f32.mrf.mxu3 }
 0x55b   : > { %v9554_v41 = vor.u32 %v9795_v36, %v9553_v34 }
 0x55c   : > { %v6949_v47 = vadd.f32 %v14491_v43, %v6882_v14  ;;  %9501 = vmatmul.msk.bf16.gmra.mxu1 %vm4280_vm10, %v15738_v4 }
 0x55d   : > { %v7959_v0 = vshrl.u32 %v9554_v41, 16 }
 0x55e   : > { %v6981_v17 = vmax.f32 %v6949_v47, 0.0 }
 0x55f   : > { %v14505_v15 = vpop.f32.mrf.mxu2 }
 0x560   : > { %v7173_v10 = vmul.f32 %v7016_v7, %v6981_v17  ;;  %v7962_v17 = vshll.u32 %v9554_v41, 16  ;;  %v14516_v7 = vpop.permute.xlu1 %7080  ;;  %v14527_v41 = vpop.permute.xlu0 %7090 }
 0x561   : > { %v6804_v14 = vpop.f32.mrf.mxu1  ;;  %15741 = vst [vmem:[#allocation42_spill] sm:$0xff] %v14516_v7 }
 0x562   : > { %v7205_v61 = vpack.c.bf16 %v7173_v10, %v7173_v10  ;;  %v6883_v4 = vadd.f32 %v6804_v14, %v14143_v46  ;;  %v14521_v14 = vpop.f32.mrf.mxu3  ;;  %v7964_v36 = vrot.slane %v7962_v17, 3 }
 0x564   : > { %7237 = vst.msk [vmem:[#allocation3 + $0x10] sm:$0xf] %vm393_vm7, %v7205_v61  ;;  %v6950_v22 = vadd.f32 %v14491_v43, %v6883_v4  ;;  %v7961_v61 = vrot.slane %v7959_v0, 2 }
 0x566   : > { %v6982_v47 = vmax.f32 %v6950_v22, 0.0  ;;  %v15742_v22 = vld [vmem:[#allocation37_spill] sm:$0xff] }
 0x567   : > { %v14514_v48 = vpop.f32.mrf.mxu2  ;;  %15743 = vst [vmem:[#allocation37_spill] sm:$0xff] %v14527_v41 }
 0x568   : > { %v7174_v38 = vmul.f32 %v7021_v16, %v6982_v47 }
 0x569   : > { %v6807_v10 = vpop.f32.mrf.mxu1 }
 0x56a   : > { %v7206_v27 = vpack.c.bf16 %v7174_v38, %v7174_v38  ;;  %v6884_v46 = vadd.f32 %v6807_v10, %v14159_v42  ;;  %v7026_v38 = vpop.permute.xlu2 %7025  ;;  %v7965_v42 = vor.u32 %v7964_v36, %v7961_v61  ;;  %v14542_v36 = vpop.permute.xlu0 %7105 }
 0x56b   : > { %v9796_v34 = vld [vmem:[#allocation3 + $0xc] sm:$0xff] }
 0x56c   : > { %7238 = vst.msk [vmem:[#allocation3 + $0x14] sm:$0xf] %vm393_vm7, %v7206_v27  ;;  %v6951_v4 = vadd.f32 %v14491_v43, %v6884_v46  ;;  %9502 = vmatmul.msk.bf16.gmra.mxu1 %vm4280_vm10, %v15742_v22  ;;  %v7967_v7 = vshrl.u32 %v9796_v34, 16  ;;  %v7970_v16 = vshll.u32 %v9796_v34, 16  ;;  %v14531_v27 = vpop.permute.xlu1 %7095  ;;  %v14533_v46 = vpop.f32.mrf.mxu0 }
 0x56e   : > { %v6983_v47 = vmax.f32 %v6951_v4, 0.0  ;;  %v7969_v10 = vrot.slane %v7967_v7, 2  ;;  %v7972_v3 = vrot.slane %v7970_v16, 3  ;;  %v14540_v7 = vpop.f32.mrf.mxu3 }
 0x56f   : > { %v14529_v51 = vpop.f32.mrf.mxu2 }
 0x570   : > { %v7175_v0 = vmul.f32 %v7026_v38, %v6983_v47  ;;  %v7973_v30 = vor.u32 %v7972_v3, %v7969_v10  ;;  %v7373_v10 = vadd.f32 %v14411_v20, %v14413_v62 }
 0x571   : > { %v6809_v17 = vpop.f32.mrf.mxu1 }
 0x572   : > { %v7207_v52 = vpack.c.bf16 %v7175_v0, %v7175_v0  ;;  %v6885_v22 = vadd.f32 %v6809_v17, %v14176_v1  ;;  %v7974_v41 = vsel %vm710_vm4, %v7965_v42, %v7973_v30  ;;  %v7511_v1 = vadd.f32 %v14439_v56, %v14432_v24  ;;  %v15744_v17 = vld [vmem:[#allocation47_spill] sm:$0xff] }
 0x573   : > { %9615 = vmatmul.msk.bf16.vlgmr.msrb.gmra.mxu3 %vm4280_vm10, %v7974_v41 }
 0x574   : > { %7239 = vst.msk [vmem:[#allocation3 + $0x18] sm:$0xf] %vm393_vm7, %v7207_v52  ;;  %v6952_v34 = vadd.f32 %v14491_v43, %v6885_v22  ;;  %v14550_v42 = vpop.permute.xlu1 %7110  ;;  %v14552_v41 = vpop.f32.mrf.mxu0  ;;  %v7546_v0 = vadd.f32 %v14467_v58, %v7511_v1 }
 0x575   : > { %v14566_v58 = vpop.permute.xlu0 %7160 }
 0x576   : > { %v6984_v61 = vmax.f32 %v6952_v34, 0.0  ;;  %v7720_v34 = vpop.f32.mrf.mxu3  ;;  %v7617_v20 = vadd.f32 %v14487_v26, %v7546_v0 }
 0x577   : > { %v14544_v3 = vpop.f32.mrf.mxu2 }
 0x578   : > { %v7176_v4 = vmul.f32 %v14465_v25, %v6984_v61 }
 0x579   : > { %v6812_v16 = vpop.f32.mrf.mxu1 }
 0x57a   : > { %v7208_v47 = vpack.c.bf16 %v7176_v4, %v7176_v4  ;;  %v6886_v52 = vadd.f32 %v6812_v16, %v14195_v19  ;;  %v7435_v19 = vadd.f32 %v14441_v9, %v7373_v10 }
 0x57b   : > { %v9797_v38 = vld [vmem:[#allocation3 + $0x14] sm:$0xff] }
 0x57c   : > { %7240 = vst.msk [vmem:[#allocation3 + $0x1c] sm:$0xf] %vm393_vm7, %v7208_v47  ;;  %v6953_v25 = vadd.f32 %v14491_v43, %v6886_v52  ;;  %9503 = vmatmul.msk.bf16.gmra.mxu1 %vm4280_vm10, %v15744_v17  ;;  %v7976_v24 = vshrl.u32 %v9797_v38, 16  ;;  %v7979_v56 = vshll.u32 %v9797_v38, 16  ;;  %v7512_v52 = vadd.f32 %v14451_v12, %v7435_v19  ;;  %v14578_v0 = vpop.f32.mrf.mxu0 }
 0x57d   : > { %v7688_v38 = vadd.f32 %v14514_v48, %v7617_v20  ;;  %v7041_v48 = vpop.permute.xlu2 %7040 }
 0x57e   : > { %v6985_v22 = vmax.f32 %v6953_v25, 0.0  ;;  %v7978_v4 = vrot.slane %v7976_v24, 2  ;;  %v7981_v16 = vrot.slane %v7979_v56, 3  ;;  %v7547_v25 = vadd.f32 %v14480_v39, %v7512_v52  ;;  %v7807_v52 = vpop.permute.xlu0 %7806 }
 0x57f   : > { %v14562_v61 = vpop.f32.mrf.mxu2  ;;  %v7730_v24 = vadd.f32 %v7720_v34, %v7688_v38  ;;  %v7513_v39 = vadd.f32 %v14463_v13, %v14449_v21  ;;  %v7378_v34 = vadd.f32 %v14430_v37, %v14425_v28  ;;  %v15745_v13 = vld [vmem:[#allocation57_spill] sm:$0xff]  ;;  %v6002_v28 = vadd.f32 %v14083_v23, %v14252_v40 }
 0x580   : > { %v7177_v62 = vmul.f32 %v14469_v57, %v6985_v22  ;;  %v7982_v47 = vor.u32 %v7981_v16, %v7978_v4  ;;  %v14576_v57 = vpop.permute.xlu1 %7165  ;;  %v7722_v22 = vpop.f32.mrf.mxu3 }
 0x581   : > { %v6814_v1 = vpop.f32.mrf.mxu1 }
 0x582   : > { %v7209_v17 = vpack.c.bf16 %v7177_v62, %v7177_v62  ;;  %v6887_v9 = vadd.f32 %v6814_v1, %v14213_v18  ;;  %v7983_v10 = vsel %vm710_vm4, %v7973_v30, %v7982_v47  ;;  %v7618_v18 = vadd.f32 %v14507_v31, %v7547_v25 }
 0x583   : > { %9616 = vmatmul.msk.bf16.gmra.mxu3 %vm4280_vm10, %v7983_v10  ;;  %v7548_v31 = vadd.f32 %v14489_v53, %v7513_v39 }
 0x584   : > { %7241 = vst.msk [vmem:[#allocation3 + $0x20] sm:$0xf] %vm393_vm7, %v7209_v17  ;;  %v6954_v26 = vadd.f32 %v14491_v43, %v6887_v9  ;;  %v7689_v16 = vadd.f32 %v14529_v51, %v7618_v18  ;;  %v7437_v51 = vadd.f32 %v14458_v2, %v7378_v34 }
 0x586   : > { %v6986_v12 = vmax.f32 %v6954_v26, 0.0  ;;  %v7731_v26 = vadd.f32 %v7722_v22, %v7689_v16 }
 0x587   : > { %v7778_v56 = vpop.f32.mrf.mxu2 }
 0x588   : > { %v7178_v19 = vmul.f32 %v7041_v48, %v6986_v12  ;;  %v7788_v30 = vadd.f32 %v7778_v56, %v7730_v24  ;;  %v14596_v24 = vpop.permute.xlu1 %7120  ;;  %v14598_v48 = vpop.f32.mrf.mxu0  ;;  %v7619_v56 = vadd.f32 %v14521_v14, %v7548_v31 }
 0x589   : > { %v6817_v4 = vpop.f32.mrf.mxu1  ;;  %v7725_v39 = vpop.f32.mrf.mxu3 }
 0x58a   : > { %v7210_v20 = vpack.c.bf16 %v7178_v19, %v7178_v19  ;;  %v7796_v62 = vadd.f32 %v14491_v43, %v7788_v30  ;;  %v6888_v1 = vadd.f32 %v6817_v4, %v14225_v50  ;;  %v7514_v30 = vadd.f32 %v14476_v55, %v7437_v51 }
 0x58b   : > { %v9798_v38 = vld [vmem:[#allocation3 + $0x1c] sm:$0xff]  ;;  %v7690_v23 = vadd.f32 %v14544_v3, %v7619_v56  ;;  %v7812_v3 = vpop.permute.xlu0 %7811 }
 0x58c   : > { %7242 = vst.msk [vmem:[#allocation3 + $0x24] sm:$0xf] %vm393_vm7, %v7210_v20  ;;  %v7800_v17 = vmax.f32 %v7796_v62, 0.0  ;;  %v6955_v21 = vadd.f32 %v14491_v43, %v6888_v1  ;;  %9504 = vmatmul.msk.bf16.gmra.mxu1 %vm4280_vm10, %v15745_v13  ;;  %v7985_v9 = vshrl.u32 %v9798_v38, 16  ;;  %v7988_v10 = vshll.u32 %v9798_v38, 16  ;;  %v15746_v62 = vld [vmem:[#allocation15_spill] sm:$0xff] }
 0x58d   : > { %v6424_v14 = vadd.f32 %v15746_v62, %v6002_v28  ;;  %v7732_v34 = vadd.f32 %v7725_v39, %v7690_v23  ;;  %v6004_v23 = vadd.f32 %v14110_v8, %v14281_v6 }
 0x58e   : > { %v7824_v50 = vmul.f32 %v7807_v52, %v7800_v17  ;;  %v6987_v25 = vmax.f32 %v6955_v21, 0.0  ;;  %v7987_v53 = vrot.slane %v7985_v9, 2  ;;  %v7990_v12 = vrot.slane %v7988_v10, 3 }
 0x58f   : > { %v7780_v37 = vpop.f32.mrf.mxu2  ;;  %v6635_v17 = vadd.f32 %v14518_v54, %v6424_v14 }
 0x590   : > { %v7828_v18 = vpack.c.bf16 %v7824_v50, %v7824_v50  ;;  %v7179_v2 = vmul.f32 %v14478_v60, %v6987_v25  ;;  %v7789_v19 = vadd.f32 %v7780_v37, %v7731_v26  ;;  %v7991_v4 = vor.u32 %v7990_v12, %v7987_v53  ;;  %v7817_v10 = vpop.permute.xlu1 %7816  ;;  %v15747_v53 = vld [vmem:[#allocation11_spill] sm:$0xff] }
 0x591   : > { %v6819_v22 = vpop.f32.mrf.mxu1  ;;  %v7549_v60 = vadd.f32 %v14505_v15, %v7514_v30 }
 0x592   : > { %7832 = vst.msk [vmem:[#allocation3 + $0x90] sm:$0xf] %vm393_vm7, %v7828_v18  ;;  %v7211_v40 = vpack.c.bf16 %v7179_v2, %v7179_v2  ;;  %v7797_v16 = vadd.f32 %v14491_v43, %v7789_v19  ;;  %v6889_v20 = vadd.f32 %v6819_v22, %v14241_v5  ;;  %v7992_v1 = vsel %vm710_vm4, %v7982_v47, %v7991_v4  ;;  %v7056_v19 = vpop.permute.xlu2 %7055 }
 0x593   : > { %9617 = vmatmul.msk.bf16.gmra.mxu3 %vm4280_vm10, %v7992_v1  ;;  %v6003_v5 = vadd.f32 %v14096_v49, %v14270_v44  ;;  %v7620_v47 = vadd.f32 %v14540_v7, %v7549_v60  ;;  %v14622_v49 = vpop.f32.mrf.mxu0  ;;  %v7727_v44 = vpop.f32.mrf.mxu3 }
 0x594   : > { %7243 = vst.msk [vmem:[#allocation3 + $0x28] sm:$0xf] %vm393_vm7, %v7211_v40  ;;  %v7801_v55 = vmax.f32 %v7797_v16, 0.0  ;;  %v6956_v52 = vadd.f32 %v14491_v43, %v6889_v20 }
 0x595   : > { %v7691_v50 = vadd.f32 %v14562_v61, %v7620_v47  ;;  %v6425_v28 = vadd.f32 %v14077_v45, %v6003_v5 }
 0x596   : > { %v7825_v38 = vmul.f32 %v7812_v3, %v7801_v55  ;;  %v6988_v31 = vmax.f32 %v6956_v52, 0.0 }
 0x597   : > { %v7783_v21 = vpop.f32.mrf.mxu2  ;;  %v7733_v56 = vadd.f32 %v7727_v44, %v7691_v50  ;;  %v6636_v45 = vadd.f32 %v14533_v46, %v6425_v28  ;;  %v15748_v46 = vld [vmem:[#allocation53_spill] sm:$0xff]  ;;  %v6006_v44 = vadd.f32 %v14138_v29, %v14306_v35 }
 0x598   : > { %v7829_v15 = vpack.c.bf16 %v7825_v38, %v7825_v38  ;;  %v7180_v13 = vmul.f32 %v14485_v59, %v6988_v31  ;;  %v7790_v51 = vadd.f32 %v7783_v21, %v7732_v34  ;;  %v6426_v3 = vadd.f32 %v15748_v46, %v6004_v23  ;;  %v7822_v6 = vpop.permute.xlu1 %7821  ;;  %v15755_v46 = vld [vmem:[#allocation45_spill] sm:$0xff] }
 0x599   : > { %v6822_v9 = vpop.f32.mrf.mxu1  ;;  %v6005_v21 = vadd.f32 %v14122_v32, %v14291_v11 }
 0x59a   : > { %7833 = vst.msk [vmem:[#allocation3 + $0x94] sm:$0xf] %vm393_vm7, %v7829_v15  ;;  %v7212_v25 = vpack.c.bf16 %v7180_v13, %v7180_v13  ;;  %v7798_v26 = vadd.f32 %v14491_v43, %v7790_v51  ;;  %v6890_v54 = vadd.f32 %v6822_v9, %v6635_v17  ;;  %v6637_v5 = vadd.f32 %v14552_v41, %v6426_v3 }
 0x59b   : > { %v9799_v7 = vld [vmem:[#allocation3 + $0x24] sm:$0xff]  ;;  %v14638_v38 = vpop.f32.mrf.mxu0 }
 0x59c   : > { %7244 = vst.msk [vmem:[#allocation3 + $0x2c] sm:$0xf] %vm393_vm7, %v7212_v25  ;;  %v7802_v59 = vmax.f32 %v7798_v26, 0.0  ;;  %v6957_v37 = vadd.f32 %v14491_v43, %v6890_v54  ;;  %9505 = vmatmul.msk.bf16.gmra.mxu1 %vm4280_vm10, %v15747_v53  ;;  %v7994_v61 = vshrl.u32 %v9799_v7, 16  ;;  %v7997_v12 = vshll.u32 %v9799_v7, 16  ;;  %v15749_v25 = vld [vmem:[#allocation43_spill] sm:$0xff] }
 0x59e   : > { %v7826_v18 = vmul.f32 %v7817_v10, %v7802_v59  ;;  %v6989_v2 = vmax.f32 %v6957_v37, 0.0  ;;  %v7996_v39 = vrot.slane %v7994_v61, 2  ;;  %v7999_v22 = vrot.slane %v7997_v12, 3 }
 0x59f   : > { %v7785_v30 = vpop.f32.mrf.mxu2  ;;  %v6427_v10 = vadd.f32 %v14104_v63, %v6005_v21  ;;  %v15750_v63 = vld [vmem:[#allocation24_spill] sm:$0xff] }
 0x5a0   : > { %v7830_v40 = vpack.c.bf16 %v7826_v18, %v7826_v18  ;;  %v7181_v16 = vmul.f32 %v7056_v19, %v6989_v2  ;;  %v7791_v20 = vadd.f32 %v7785_v30, %v7733_v56  ;;  %v8000_v14 = vor.u32 %v7999_v22, %v7996_v39  ;;  %v15751_v56 = vld [vmem:[#allocation64_spill] sm:$0xff]  ;;  %v15752_v30 = vld [vmem:[#allocation75_spill] sm:$0xff]  ;;  %v15753_v39 = vld [vmem:[#allocation17_spill] sm:$0xff] }
 0x5a1   : > { %v6824_v62 = vpop.f32.mrf.mxu1  ;;  %v6638_v28 = vadd.f32 %v14578_v0, %v6427_v10  ;;  %v6428_v18 = vadd.f32 %v15751_v56, %v6006_v44  ;;  %v6659_v0 = vld [vmem:[#allocation2 + $0x98] sm:$0x3]  ;;  %v6007_v22 = vadd.f32 %v15753_v39, %v15752_v30 }
 0x5a2   : > { %7834 = vst.msk [vmem:[#allocation3 + $0x98] sm:$0xf] %vm393_vm7, %v7830_v40  ;;  %v7213_v1 = vpack.c.bf16 %v7181_v16, %v7181_v16  ;;  %v7799_v60 = vadd.f32 %v14491_v43, %v7791_v20  ;;  %v6891_v55 = vadd.f32 %v6824_v62, %v6636_v45  ;;  %v8001_v52 = vsel %vm710_vm4, %v7991_v4, %v8000_v14  ;;  %v7071_v45 = vpop.permute.xlu2 %7070 }
 0x5a3   : > { %9618 = vmatmul.msk.bf16.gmra.mxu3 %vm4280_vm10, %v8001_v52  ;;  %v14650_v26 = vpop.f32.mrf.mxu0  ;;  %v6663_v29 = vunpack.c.l.b16 %v6659_v0  ;;  %v6639_v35 = vadd.f32 %v14598_v48, %v6428_v18  ;;  %v9811_v48 = vld [vmem:[%s15041_s8] sm:$0xff] }
 0x5a4   : > { %7245 = vst.msk [vmem:[#allocation3 + $0x30] sm:$0xf] %vm393_vm7, %v7213_v1  ;;  %v7803_v34 = vmax.f32 %v7799_v60, 0.0  ;;  %v6958_v8 = vadd.f32 %v14491_v43, %v6891_v55  ;;  %v15754_v60 = vld [vmem:[#allocation65_spill] sm:$0xff]  ;;  %8373 = vmatpush.bf16.msrb.mxu0 %v9811_v48  ;;  %v15763_v0 = vld [vmem:[#allocation58_spill] sm:$0xff] }
 0x5a5   : > { %v6664_v1 = vpack.c.b16 %v6663_v29, %v6663_v29  ;;  %v6429_v55 = vadd.f32 %v15754_v60, %v6007_v22  ;;  %v15764_v29 = vld [vmem:[#allocation46_spill] sm:$0xff]  ;;  %v15766_v60 = vld [vmem:[#allocation31_spill] sm:$0xff] }
 0x5a6   : > { %v7827_v31 = vmul.f32 %v7822_v6, %v7803_v34  ;;  %v6990_v17 = vmax.f32 %v6958_v8, 0.0 }
 0x5a7   : > { %v6640_v21 = vadd.f32 %v14622_v49, %v6429_v55 }
 0x5a8   : > { %v7831_v4 = vpack.c.bf16 %v7827_v31, %v7827_v31  ;;  %v7182_v47 = vmul.f32 %v14493_v33, %v6990_v17  ;;  %v6734_v17 = vshrl.u32 %v6664_v1, 16 }
 0x5a9   : > { %v6827_v15 = vpop.f32.mrf.mxu1 }
 0x5aa   : > { %7835 = vst.msk [vmem:[#allocation3 + $0x9c] sm:$0xf] %vm393_vm7, %v7831_v4  ;;  %v7214_v13 = vpack.c.bf16 %v7182_v47, %v7182_v47  ;;  %v6892_v51 = vadd.f32 %v6827_v15, %v6637_v5  ;;  %v6737_v5 = vshll.u32 %v6664_v1, 16  ;;  %v15756_v4 = vld [vmem:[#allocation16_spill] sm:$0xff]  ;;  %v15757_v47 = vld [vmem:[#allocation26_spill] sm:$0xff]  ;;  %v15765_v1 = vld [vmem:[#allocation67_spill] sm:$0xff] }
 0x5ab   : > { %v9800_v9 = vld [vmem:[#allocation3 + $0x2c] sm:$0xff]  ;;  %v14664_v40 = vpop.f32.mrf.mxu0  ;;  %v6008_v15 = vadd.f32 %v15757_v47, %v15756_v4  ;;  %v6010_v55 = vadd.f32 %v15766_v60, %v15765_v1  ;;  %v15768_v4 = vld [vmem:[#allocation48_spill] sm:$0xff]  ;;  %v15769_v47 = vld [vmem:[#allocation39_spill] sm:$0xff] }
 0x5ac   : > { %7246 = vst.msk [vmem:[#allocation3 + $0x34] sm:$0xf] %vm393_vm7, %v7214_v13  ;;  %v6959_v50 = vadd.f32 %v14491_v43, %v6892_v51  ;;  %9506 = vmatmul.msk.bf16.gmra.mxu1 %vm4280_vm10, %v15749_v25  ;;  %v8003_v41 = vshrl.u32 %v9800_v9, 16  ;;  %v8006_v32 = vshll.u32 %v9800_v9, 16  ;;  %v15758_v13 = vld [vmem:[#allocation38_spill] sm:$0xff] }
 0x5ad   : > { %v15777_v60 = vld [vmem:[#allocation14_spill] sm:$0xff] }
 0x5ae   : > { %v6991_v11 = vmax.f32 %v6959_v50, 0.0  ;;  %v8005_v33 = vrot.slane %v8003_v41, 2  ;;  %v8008_v54 = vrot.slane %v8006_v32, 3 }
 0x5b0   : > { %v7183_v7 = vmul.f32 %v15750_v63, %v6991_v11  ;;  %v8009_v37 = vor.u32 %v8008_v54, %v8005_v33  ;;  %v6736_v11 = vrot.slane %v6734_v17, 1  ;;  %v6739_v33 = vrot.slane %v6737_v5, 2  ;;  %v15759_v54 = vld [vmem:[#allocation66_spill] sm:$0xff] }
 0x5b1   : > { %v6829_v59 = vpop.f32.mrf.mxu1 }
 0x5b2   : > { %v7215_v53 = vpack.c.bf16 %v7183_v7, %v7183_v7  ;;  %v6893_v61 = vadd.f32 %v6829_v59, %v6638_v28  ;;  %v8010_v12 = vsel %vm710_vm4, %v8000_v14, %v8009_v37  ;;  %v6430_v28 = vadd.f32 %v15759_v54, %v6008_v15  ;;  %v15760_v59 = vld [vmem:[#allocation72_spill] sm:$0xff] }
 0x5b3   : > { %9619 = vmatmul.msk.bf16.gmra.mxu3 %vm4280_vm10, %v8010_v12  ;;  %v6589_v41 = vpop.f32.mrf.mxu0  ;;  %v6740_v63 = vor.u32 %v6739_v33, %v6736_v11  ;;  %v15762_v12 = vld [vmem:[#allocation42_spill] sm:$0xff]  ;;  %v6011_v15 = vadd.f32 %v15769_v47, %v15768_v4 }
 0x5b4   : > { %7247 = vst.msk [vmem:[#allocation3 + $0x38] sm:$0xf] %vm393_vm7, %v7215_v53  ;;  %v6960_v2 = vadd.f32 %v14491_v43, %v6893_v61  ;;  %v6641_v7 = vadd.f32 %v14638_v38, %v6430_v28  ;;  %v15761_v53 = vld [vmem:[#allocation25_spill] sm:$0xff] }
 0x5b5   : > { %v6009_v61 = vadd.f32 %v15761_v53, %v15760_v59  ;;  %v15773_v59 = vld [vmem:[#allocation35_spill] sm:$0xff] }
 0x5b6   : > { %v6992_v19 = vmax.f32 %v6960_v2, 0.0 }
 0x5b8   : > { %v7184_v23 = vmul.f32 %v7071_v45, %v6992_v19  ;;  %v6741_v19 = vsel %vm2954_vm8, %v15763_v0, %v6740_v63 }
 0x5b9   : > { %v6832_v16 = vpop.f32.mrf.mxu1 }
 0x5ba   : > { %v7216_v20 = vpack.c.bf16 %v7184_v23, %v7184_v23  ;;  %v6894_v62 = vadd.f32 %v6832_v16, %v6639_v35  ;;  %v6431_v35 = vadd.f32 %v15764_v29, %v6009_v61  ;;  %v7086_v16 = vpop.permute.xlu2 %7085 }
 0x5bb   : > { %v9801_v14 = vld [vmem:[#allocation3 + $0x34] sm:$0xff]  ;;  %v6592_v38 = vpop.f32.mrf.mxu0 }
 0x5bc   : > { %7248 = vst.msk [vmem:[#allocation3 + $0x3c] sm:$0xf] %vm393_vm7, %v7216_v20  ;;  %v6961_v52 = vadd.f32 %v14491_v43, %v6894_v62  ;;  %9507 = vmatmul.msk.bf16.gmra.mxu1 %vm4280_vm10, %v15755_v46  ;;  %v8012_v3 = vshrl.u32 %v9801_v14, 16  ;;  %v8015_v34 = vshll.u32 %v9801_v14, 16  ;;  %v6642_v14 = vadd.f32 %v14650_v26, %v6431_v35 }
 0x5be   : > { %v6993_v8 = vmax.f32 %v6961_v52, 0.0  ;;  %v8014_v6 = vrot.slane %v8012_v3, 2  ;;  %v8017_v31 = vrot.slane %v8015_v34, 3 }
 0x5c0   : > { %v7185_v51 = vmul.f32 %v15758_v13, %v6993_v8  ;;  %v8018_v10 = vor.u32 %v8017_v31, %v8014_v6  ;;  %v15767_v6 = vld [vmem:[#allocation21_spill] sm:$0xff] }
 0x5c1   : > { %v6834_v9 = vpop.f32.mrf.mxu1  ;;  %v6432_v31 = vadd.f32 %v15767_v6, %v6010_v55  ;;  %v15770_v13 = vld [vmem:[#allocation37_spill] sm:$0xff] }
 0x5c2   : > { %v7217_v50 = vpack.c.bf16 %v7185_v51, %v7185_v51  ;;  %v6895_v25 = vadd.f32 %v6834_v9, %v6640_v21  ;;  %v8019_v32 = vsel %vm710_vm4, %v8009_v37, %v8018_v10  ;;  %v7101_v35 = vpop.permute.xlu2 %7100  ;;  %v15778_v6 = vld [vmem:[#allocation41_spill] sm:$0xff] }
 0x5c3   : > { %9620 = vmatmul.msk.bf16.gmra.mxu3 %vm4280_vm10, %v8019_v32  ;;  %v6594_v26 = vpop.f32.mrf.mxu0  ;;  %v6643_v21 = vadd.f32 %v14664_v40, %v6432_v31  ;;  %v15771_v32 = vld [vmem:[#allocation10_spill] sm:$0xff]  ;;  %v15779_v31 = vld [vmem:[#allocation28_spill] sm:$0xff] }
 0x5c4   : > { %7249 = vst.msk [vmem:[#allocation3 + $0x40] sm:$0xf] %vm393_vm7, %v7217_v50  ;;  %v6962_v49 = vadd.f32 %v14491_v43, %v6895_v25  ;;  %v6433_v11 = vadd.f32 %v15771_v32, %v6011_v15 }
 0x5c6   : > { %v6994_v44 = vmax.f32 %v6962_v49, 0.0  ;;  %v6644_v63 = vadd.f32 %v6589_v41, %v6433_v11  ;;  %v15781_v11 = vld [vmem:[#allocation61_spill] sm:$0xff] }
 0x5c8   : > { %v7186_v56 = vmul.f32 %v15762_v12, %v6994_v44 }
 0x5c9   : > { %v6837_v37 = vpop.f32.mrf.mxu1 }
 0x5ca   : > { %v7218_v18 = vpack.c.bf16 %v7186_v56, %v7186_v56  ;;  %v6896_v2 = vadd.f32 %v6837_v37, %v6641_v7  ;;  %v15772_v7 = vld [vmem:[#allocation52_spill] sm:$0xff] }
 0x5cb   : > { %v9802_v45 = vld [vmem:[#allocation3 + $0x3c] sm:$0xff]  ;;  %v6012_v53 = vadd.f32 %v15773_v59, %v15772_v7  ;;  %v6597_v12 = vpop.f32.mrf.mxu0 }
 0x5cc   : > { %7250 = vst.msk [vmem:[#allocation3 + $0x44] sm:$0xf] %vm393_vm7, %v7218_v18  ;;  %v6963_v30 = vadd.f32 %v14491_v43, %v6896_v2  ;;  %9508 = vmatmul.msk.bf16.gmra.mxu1 %vm4280_vm10, %v6741_v19  ;;  %v8021_v39 = vshrl.u32 %v9802_v45, 16  ;;  %v8024_v22 = vshll.u32 %v9802_v45, 16  ;;  %v15774_v19 = vld [vmem:[#allocation13_spill] sm:$0xff]  ;;  %v15783_v59 = vld [vmem:[#allocation27_spill] sm:$0xff] }
 0x5cd   : > { %v6434_v45 = vadd.f32 %v15774_v19, %v6012_v53 }
 0x5ce   : > { %v6995_v23 = vmax.f32 %v6963_v30, 0.0  ;;  %v8023_v20 = vrot.slane %v8021_v39, 2  ;;  %v8026_v62 = vrot.slane %v8024_v22, 3  ;;  %v15775_v39 = vld [vmem:[#allocation76_spill] sm:$0xff] }
 0x5cf   : > { %v6645_v30 = vadd.f32 %v6592_v38, %v6434_v45 }
 0x5d0   : > { %v7187_v52 = vmul.f32 %v7086_v16, %v6995_v23  ;;  %v8027_v48 = vor.u32 %v8026_v62, %v8023_v20 }
 0x5d1   : > { %v6839_v46 = vpop.f32.mrf.mxu1 }
 0x5d2   : > { %v7219_v3 = vpack.c.bf16 %v7187_v52, %v7187_v52  ;;  %v6897_v34 = vadd.f32 %v6839_v46, %v6642_v14  ;;  %v8028_v8 = vsel %vm710_vm4, %v8018_v10, %v8027_v48 }
 0x5d3   : > { %9621 = vmatmul.msk.bf16.gmra.mxu3 %vm4280_vm10, %v8028_v8  ;;  %v6599_v14 = vpop.f32.mrf.mxu0 }
 0x5d4   : > { %7251 = vst.msk [vmem:[#allocation3 + $0x48] sm:$0xf] %vm393_vm7, %v7219_v3  ;;  %v6964_v17 = vadd.f32 %v14491_v43, %v6897_v34 }
 0x5d6   : > { %v6996_v5 = vmax.f32 %v6964_v17, 0.0  ;;  %v6014_v17 = vadd.f32 %v15779_v31, %v15778_v6 }
 0x5d8   : > { %v7188_v51 = vmul.f32 %v15770_v13, %v6996_v5 }
 0x5d9   : > { %v6842_v9 = vpop.f32.mrf.mxu1 }
 0x5da   : > { %v7220_v50 = vpack.c.bf16 %v7188_v51, %v7188_v51  ;;  %v6898_v10 = vadd.f32 %v6842_v9, %v6643_v21  ;;  %v15780_v51 = vld [vmem:[#allocation50_spill] sm:$0xff] }
 0x5db   : > { %v9803_v25 = vld [vmem:[#allocation3 + $0x44] sm:$0xff]  ;;  %v6436_v9 = vadd.f32 %v15780_v51, %v6014_v17 }
 0x5dc   : > { %7252 = vst.msk [vmem:[#allocation3 + $0x4c] sm:$0xf] %vm393_vm7, %v7220_v50  ;;  %v6965_v33 = vadd.f32 %v14491_v43, %v6898_v10  ;;  %v8030_v54 = vshrl.u32 %v9803_v25, 16  ;;  %v8033_v28 = vshll.u32 %v9803_v25, 16 }
 0x5dd   : > { %v6647_v32 = vadd.f32 %v6597_v12, %v6436_v9 }
 0x5de   : > { %v6997_v49 = vmax.f32 %v6965_v33, 0.0  ;;  %v8032_v44 = vrot.slane %v8030_v54, 2  ;;  %v8035_v40 = vrot.slane %v8033_v28, 3  ;;  %v7116_v28 = vpop.permute.xlu2 %7115 }
 0x5e0   : > { %v7189_v61 = vmul.f32 %v14531_v27, %v6997_v49  ;;  %v8036_v37 = vor.u32 %v8035_v40, %v8032_v44  ;;  %v15776_v27 = vld [vmem:[#allocation49_spill] sm:$0xff] }
 0x5e1   : > { %v6844_v56 = vpop.f32.mrf.mxu1  ;;  %v6013_v22 = vadd.f32 %v15776_v27, %v15775_v39  ;;  %v14735_v40 = vld [vmem:[%s15040_s7] ss:$0 sm:$0xff] }
 0x5e2   : > { %v7221_v18 = vpack.c.bf16 %v7189_v61, %v7189_v61  ;;  %v6899_v2 = vadd.f32 %v6844_v56, %v6644_v63  ;;  %v8037_v0 = vsel %vm710_vm4, %v8027_v48, %v8036_v37 }
 0x5e3   : > { %9622 = vmatmul.msk.bf16.gmra.mxu3 %vm4280_vm10, %v8037_v0  ;;  %v6435_v55 = vadd.f32 %v15777_v60, %v6013_v22 }
 0x5e4   : > { %7253 = vst.msk [vmem:[#allocation3 + $0x50] sm:$0xf] %vm393_vm7, %v7221_v18  ;;  %v6966_v29 = vadd.f32 %v14491_v43, %v6899_v2 }
 0x5e5   : > { %v6646_v8 = vadd.f32 %v6594_v26, %v6435_v55  ;;  %v6602_v26 = vpop.f32.mrf.mxu0  ;;  %v15786_v55 = vld [vmem:[#allocation40_spill] sm:$0xff] }
 0x5e6   : > { %v6998_v41 = vmax.f32 %v6966_v29, 0.0  ;;  %v15784_v29 = vld [vmem:[#allocation55_spill] sm:$0xff] }
 0x5e8   : > { %v7190_v23 = vmul.f32 %v7101_v35, %v6998_v41  ;;  %v15785_v41 = vld [vmem:[#allocation54_spill] sm:$0xff] }
 0x5e9   : > { %v6847_v16 = vpop.f32.mrf.mxu1  ;;  %v6016_v35 = vadd.f32 %v15785_v41, %v15784_v29 }
 0x5ea   : > { %v7222_v20 = vpack.c.bf16 %v7190_v23, %v7190_v23  ;;  %v6900_v62 = vadd.f32 %v6847_v16, %v6645_v30 }
 0x5eb   : > { %v9804_v1 = vld [vmem:[#allocation3 + $0x4c] sm:$0xff] }
 0x5ec   : > { %7254 = vst.msk [vmem:[#allocation3 + $0x54] sm:$0xf] %vm393_vm7, %v7222_v20  ;;  %v6967_v52 = vadd.f32 %v14491_v43, %v6900_v62  ;;  %v8039_v46 = vshrl.u32 %v9804_v1, 16  ;;  %v8042_v48 = vshll.u32 %v9804_v1, 16  ;;  %v14744_v1 = vpop.permute.xlu2 %7170 }
 0x5ed   : > { %v6604_v18 = vpop.f32.mrf.mxu0 }
 0x5ee   : > { %v6999_v3 = vmax.f32 %v6967_v52, 0.0  ;;  %v8041_v34 = vrot.slane %v8039_v46, 2  ;;  %v8044_v38 = vrot.slane %v8042_v48, 3  ;;  %v6438_v52 = vadd.f32 %v15786_v55, %v6016_v35  ;;  %v15793_v35 = vld [vmem:[#allocation22_spill] sm:$0xff] }
 0x5f0   : > { %v7191_v5 = vmul.f32 %v14542_v36, %v6999_v3  ;;  %v8045_v4 = vor.u32 %v8044_v38, %v8041_v34  ;;  %v15782_v36 = vld [vmem:[#allocation69_spill] sm:$0xff]  ;;  %v6649_v34 = vadd.f32 %v6602_v26, %v6438_v52  ;;  %v15787_v38 = vld [vmem:[#allocation19_spill] sm:$0xff] }
 0x5f1   : > { %v6849_v21 = vpop.f32.mrf.mxu1  ;;  %v6015_v33 = vadd.f32 %v15782_v36, %v15781_v11 }
 0x5f2   : > { %v7223_v47 = vpack.c.bf16 %v7191_v5, %v7191_v5  ;;  %v6901_v15 = vadd.f32 %v6849_v21, %v6646_v8  ;;  %v8046_v13 = vsel %vm710_vm4, %v8036_v37, %v8045_v4  ;;  %v15788_v8 = vld [vmem:[#allocation60_spill] sm:$0xff] }
 0x5f3   : > { %9623 = vmatmul.msk.bf16.gmra.mxu3 %vm4280_vm10, %v8046_v13  ;;  %v6437_v53 = vadd.f32 %v15783_v59, %v6015_v33  ;;  %v6017_v6 = vadd.f32 %v15788_v8, %v15787_v38  ;;  %v15790_v33 = vld [vmem:[#allocation20_spill] sm:$0xff] }
 0x5f4   : > { %7255 = vst.msk [vmem:[#allocation3 + $0x58] sm:$0xf] %vm393_vm7, %v7223_v47  ;;  %v6968_v50 = vadd.f32 %v14491_v43, %v6901_v15  ;;  %v15789_v15 = vld [vmem:[#allocation29_spill] sm:$0xff]  ;;  %v7126_v9 = vpop.permute.xlu2 %7125 }
 0x5f5   : > { %v6648_v45 = vadd.f32 %v6599_v14, %v6437_v53  ;;  %v6607_v17 = vpop.f32.mrf.mxu0  ;;  %v6439_v13 = vadd.f32 %v15789_v15, %v6017_v6 }
 0x5f6   : > { %v7000_v10 = vmax.f32 %v6968_v50, 0.0  ;;  %v8170_v25 = vpop.f32.mrf.mxu3 }
 0x5f7   : > { %v6650_v36 = vadd.f32 %v6604_v18, %v6439_v13 }
 0x5f8   : > { %v7192_v54 = vmul.f32 %v14550_v42, %v7000_v10  ;;  %v8171_v42 = vadd.f32 %v14735_v40, %v8170_v25 }
 0x5f9   : > { %v6852_v49 = vpop.f32.mrf.mxu1 }
 0x5fa   : > { %v7224_v44 = vpack.c.bf16 %v7192_v54, %v7192_v54  ;;  %v6902_v63 = vadd.f32 %v6852_v49, %v6647_v32  ;;  %v8250_v23 = vmax.f32 %v8171_v42, 0.0  ;;  %v15791_v54 = vld [vmem:[#allocation33_spill] sm:$0xff] }
 0x5fb   : > { %v9805_v7 = vld [vmem:[#allocation3 + $0x54] sm:$0xff] }
 0x5fc   : > { %7256 = vst.msk [vmem:[#allocation3 + $0x5c] sm:$0xf] %vm393_vm7, %v7224_v44  ;;  %v6969_v61 = vadd.f32 %v14491_v43, %v6902_v63  ;;  %v8048_v12 = vshrl.u32 %v9805_v7, 16  ;;  %v8051_v56 = vshll.u32 %v9805_v7, 16 }
 0x5fe   : > { %v7001_v37 = vmax.f32 %v6969_v61, 0.0  ;;  %v8172_v2 = vpop.f32.mrf.mxu3  ;;  %v8050_v0 = vrot.slane %v8048_v12, 2  ;;  %v8053_v19 = vrot.slane %v8051_v56, 3  ;;  %v6609_v56 = vpop.f32.mrf.mxu0 }
 0x5ff   : > { %v8173_v39 = vadd.f32 %v14735_v40, %v8172_v2 }
 0x600   : > { %v7193_v30 = vmul.f32 %v7116_v28, %v7001_v37  ;;  %v8054_v22 = vor.u32 %v8053_v19, %v8050_v0  ;;  %v6018_v28 = vadd.f32 %v15791_v54, %v15790_v33  ;;  %v15792_v37 = vld [vmem:[#allocation59_spill] sm:$0xff] }
 0x601   : > { %v6854_v27 = vpop.f32.mrf.mxu1  ;;  %v8251_v20 = vmax.f32 %v8173_v39, 0.0 }
 0x602   : > { %v7225_v16 = vpack.c.bf16 %v7193_v30, %v7193_v30  ;;  %v6903_v62 = vadd.f32 %v6854_v27, %v6648_v45  ;;  %v8055_v60 = vsel %vm710_vm4, %v8045_v4, %v8054_v22  ;;  %v6440_v2 = vadd.f32 %v15792_v37, %v6018_v28  ;;  %v7131_v45 = vpop.permute.xlu2 %7130  ;;  %v15794_v30 = vld [vmem:[#allocation32_spill] sm:$0xff] }
 0x603   : > { %v8282_v14 = vpack.c.bf16 %v8251_v20, %v8250_v23  ;;  %9624 = vmatmul.msk.bf16.gmra.mxu3 %vm4280_vm10, %v8055_v60  ;;  %v6019_v39 = vadd.f32 %v15794_v30, %v15793_v35 }
 0x604   : > { %7257 = vst.msk [vmem:[#allocation3 + $0x60] sm:$0xf] %vm393_vm7, %v7225_v16  ;;  %v6970_v46 = vadd.f32 %v14491_v43, %v6903_v62  ;;  %v6651_v41 = vadd.f32 %v6607_v17, %v6440_v2  ;;  %v15795_v62 = vld [vmem:[#allocation79_spill] sm:$0xff]  ;;  %v15796_v17 = vld [vmem:[#allocation78_spill] sm:$0xff] }
 0x605   : > { %9639 = vmatmul.msk.bf16.vlgmr.msrb.gmra.mxu0 %vm8317_vm11, %v8282_v14  ;;  %v6441_v60 = vadd.f32 %v15795_v62, %v6019_v39 }
 0x606   : > { %v7002_v48 = vmax.f32 %v6970_v46, 0.0  ;;  %v8175_v3 = vpop.f32.mrf.mxu3  ;;  %v6612_v52 = vpop.f32.mrf.mxu0 }
 0x607   : > { %v8176_v26 = vadd.f32 %v14735_v40, %v8175_v3 }
 0x608   : > { %v7194_v31 = vmul.f32 %v14596_v24, %v7002_v48 }
 0x609   : > { %v6857_v5 = vpop.f32.mrf.mxu1  ;;  %v8252_v59 = vmax.f32 %v8176_v26, 0.0 }
 0x60a   : > { %v7226_v21 = vpack.c.bf16 %v7194_v31, %v7194_v31  ;;  %v6904_v4 = vadd.f32 %v6857_v5, %v6649_v34  ;;  %v7136_v34 = vpop.permute.xlu0 %7135  ;;  %v6652_v31 = vadd.f32 %v6609_v56, %v6441_v60  ;;  %v15797_v5 = vld [vmem:[#allocation23_spill] sm:$0xff] }
 0x60b   : > { %v9806_v47 = vld [vmem:[#allocation3 + $0x5c] sm:$0xff] }
 0x60c   : > { %7258 = vst.msk [vmem:[#allocation3 + $0x64] sm:$0xf] %vm393_vm7, %v7226_v21  ;;  %v6971_v51 = vadd.f32 %v14491_v43, %v6904_v4  ;;  %v8057_v50 = vshrl.u32 %v9806_v47, 16  ;;  %v8060_v10 = vshll.u32 %v9806_v47, 16  ;;  %v6020_v21 = vadd.f32 %v15797_v5, %v15796_v17 }
 0x60e   : > { %v7003_v25 = vmax.f32 %v6971_v51, 0.0  ;;  %v8177_v32 = vpop.f32.mrf.mxu3  ;;  %v8059_v11 = vrot.slane %v8057_v50, 2  ;;  %v8062_v24 = vrot.slane %v8060_v10, 3  ;;  %v6614_v54 = vpop.f32.mrf.mxu0 }
 0x60f   : > { %v8178_v44 = vadd.f32 %v14735_v40, %v8177_v32 }
 0x610   : > { %v7195_v49 = vmul.f32 %v7126_v9, %v7003_v25  ;;  %v8063_v7 = vor.u32 %v8062_v24, %v8059_v11  ;;  %v15798_v25 = vld [vmem:[#allocation56_spill] sm:$0xff] }
 0x611   : > { %v6859_v63 = vpop.f32.mrf.mxu1  ;;  %v8253_v61 = vmax.f32 %v8178_v44, 0.0  ;;  %v6442_v32 = vadd.f32 %v15798_v25, %v6020_v21  ;;  %v15799_v44 = vld [vmem:[#allocation74_spill] sm:$0xff]  ;;  %v7151_v21 = vpop.permute.xlu1 %7150 }
 0x612   : > { %v7227_v53 = vpack.c.bf16 %v7195_v49, %v7195_v49  ;;  %v6905_v12 = vadd.f32 %v6859_v63, %v6650_v36  ;;  %v8064_v42 = vsel %vm710_vm4, %v8054_v22, %v8063_v7  ;;  %v7141_v36 = vpop.permute.xlu2 %7140  ;;  %v15800_v63 = vld [vmem:[#allocation44_spill] sm:$0xff] }
 0x613   : > { %v8283_v18 = vpack.c.bf16 %v8253_v61, %v8252_v59  ;;  %9625 = vmatmul.msk.bf16.gmra.mxu3 %vm4280_vm10, %v8064_v42  ;;  %v6653_v49 = vadd.f32 %v6612_v52, %v6442_v32  ;;  %v6021_v59 = vadd.f32 %v15800_v63, %v15799_v44  ;;  %v15801_v42 = vld [vmem:[#allocation63_spill] sm:$0xff] }
 0x614   : > { %7259 = vst.msk [vmem:[#allocation3 + $0x68] sm:$0xf] %vm393_vm7, %v7227_v53  ;;  %v6972_v0 = vadd.f32 %v14491_v43, %v6905_v12 }
 0x615   : > { %9640 = vmatmul.msk.bf16.gmra.mxu0 %vm8317_vm11, %v8283_v18  ;;  %v6443_v37 = vadd.f32 %v15801_v42, %v6021_v59 }
 0x616   : > { %v7004_v19 = vmax.f32 %v6972_v0, 0.0  ;;  %v8180_v29 = vpop.f32.mrf.mxu3  ;;  %v6617_v62 = vpop.f32.mrf.mxu0 }
 0x617   : > { %v8181_v48 = vadd.f32 %v14735_v40, %v8180_v29  ;;  %v7146_v29 = vpop.permute.xlu0 %7145  ;;  %v6654_v39 = vadd.f32 %v6614_v54, %v6443_v37 }
 0x618   : > { %v7196_v27 = vmul.f32 %v7131_v45, %v7004_v19 }
 0x619   : > { %v6862_v22 = vpop.f32.mrf.mxu1  ;;  %v8254_v51 = vmax.f32 %v8181_v48, 0.0 }
 0x61a   : > { %v7228_v23 = vpack.c.bf16 %v7196_v27, %v7196_v27  ;;  %v6906_v16 = vadd.f32 %v6862_v22, %v6651_v41  ;;  %v15802_v27 = vld [vmem:[#allocation51_spill] sm:$0xff]  ;;  %v7156_v44 = vpop.permute.xlu2 %7155 }
 0x61b   : > { %v9807_v20 = vld [vmem:[#allocation3 + $0x64] sm:$0xff]  ;;  %v15803_v22 = vld [vmem:[#allocation71_spill] sm:$0xff] }
 0x61c   : > { %7260 = vst.msk [vmem:[#allocation3 + $0x6c] sm:$0xf] %vm393_vm7, %v7228_v23  ;;  %v6973_v55 = vadd.f32 %v14491_v43, %v6906_v16  ;;  %v8066_v14 = vshrl.u32 %v9807_v20, 16  ;;  %v8069_v46 = vshll.u32 %v9807_v20, 16  ;;  %v6022_v23 = vadd.f32 %v15803_v22, %v15802_v27 }
 0x61e   : > { %v7005_v3 = vmax.f32 %v6973_v55, 0.0  ;;  %v8182_v38 = vpop.f32.mrf.mxu3  ;;  %v8068_v8 = vrot.slane %v8066_v14, 2  ;;  %v8071_v6 = vrot.slane %v8069_v46, 3  ;;  %v6619_v25 = vpop.f32.mrf.mxu0 }
 0x61f   : > { %v8183_v47 = vadd.f32 %v14735_v40, %v8182_v38 }
 0x620   : > { %v7197_v4 = vmul.f32 %v7136_v34, %v7005_v3  ;;  %v8072_v13 = vor.u32 %v8071_v6, %v8068_v8  ;;  %v15804_v3 = vld [vmem:[#allocation12_spill] sm:$0xff]  ;;  %v14795_v8 = vld [vmem:[#allocation6] ss:$0 sm:$0xff] }
 0x621   : > { %v6864_v15 = vpop.f32.mrf.mxu1  ;;  %v8255_v50 = vmax.f32 %v8183_v47, 0.0  ;;  %v6444_v34 = vadd.f32 %v15804_v3, %v6022_v23  ;;  %v15813_v3 = vld [vmem:[#allocation62_spill] sm:$0xff] }
 0x622   : > { %v7229_v9 = vpack.c.bf16 %v7197_v4, %v7197_v4  ;;  %v6907_v10 = vadd.f32 %v6864_v15, %v6652_v31  ;;  %v8073_v26 = vsel %vm710_vm4, %v8063_v7, %v8072_v13  ;;  %v8498_v31 = vld [vmem:[%s15039_s6] sm:$0xf]  ;;  %v15805_v15 = vld [vmem:[#allocation70_spill] sm:$0xff] }
 0x623   : > { %v8284_v11 = vpack.c.bf16 %v8255_v50, %v8254_v51  ;;  %9626 = vmatmul.msk.bf16.gmra.mxu3 %vm4280_vm10, %v8073_v26  ;;  %v8584_v17 = vsel %vm4329_vm9, %v8498_v31, 0  ;;  %v6655_v47 = vadd.f32 %v6617_v62, %v6444_v34  ;;  %v15811_v62 = vld [vmem:[#allocation18_spill] sm:$0xff] }
 0x624   : > { %7261 = vst.msk [vmem:[#allocation3 + $0x70] sm:$0xf] %vm393_vm7, %v7229_v9  ;;  %v6974_v24 = vadd.f32 %v14491_v43, %v6907_v10  ;;  %8593 = vmatpush.bf16.msra.mxu2 %v8584_v17 }
 0x625   : > { %9641 = vmatmul.msk.bf16.gmra.mxu0 %vm8317_vm11, %v8284_v11  ;;  %v15807_v11 = vld [vmem:[#allocation36_spill] sm:$0xff] }
 0x626   : > { %v7006_v33 = vmax.f32 %v6974_v24, 0.0  ;;  %v8185_v28 = vpop.f32.mrf.mxu3  ;;  %v6622_v22 = vpop.f32.mrf.mxu0 }
 0x627   : > { %v8186_v19 = vadd.f32 %v14735_v40, %v8185_v28 }
 0x628   : > { %v7198_v7 = vmul.f32 %v7141_v36, %v7006_v33 }
 0x629   : > { %v6867_v53 = vpop.f32.mrf.mxu1 }
 0x62a   : > { %v7230_v61 = vpack.c.bf16 %v7198_v7, %v7198_v7  ;;  %v6908_v12 = vadd.f32 %v6867_v53, %v6653_v49 }
 0x62b   : > { %v9808_v56 = vld [vmem:[#allocation3 + $0x6c] sm:$0xff] }
 0x62c   : > { %7262 = vst.msk [vmem:[#allocation3 + $0x74] sm:$0xf] %vm393_vm7, %v7230_v61  ;;  %v6975_v2 = vadd.f32 %v14491_v43, %v6908_v12  ;;  %v8075_v18 = vshrl.u32 %v9808_v56, 16  ;;  %v8078_v0 = vshll.u32 %v9808_v56, 16  ;;  %v8256_v43 = vmax.f32 %v8186_v19, 0.0  ;;  %v15808_v61 = vld [vmem:[#allocation73_spill] sm:$0xff] }
 0x62d   : > { %v15809_v12 = vld [vmem:[#allocation34_spill] sm:$0xff] }
 0x62e   : > { %v7007_v45 = vmax.f32 %v6975_v2, 0.0  ;;  %v8187_v41 = vpop.f32.mrf.mxu3  ;;  %v8077_v35 = vrot.slane %v8075_v18, 2  ;;  %v8080_v30 = vrot.slane %v8078_v0, 3  ;;  %v6024_v56 = vadd.f32 %v15809_v12, %v15808_v61 }
 0x62f   : > { %v8188_v20 = vadd.f32 %v14735_v40, %v8187_v41 }
 0x630   : > { %v7199_v16 = vmul.f32 %v7146_v29, %v7007_v45  ;;  %v8081_v55 = vor.u32 %v8080_v30, %v8077_v35  ;;  %v15810_v35 = vld [vmem:[#allocation30_spill] sm:$0xff] }
 0x631   : > { %v6869_v60 = vpop.f32.mrf.mxu1  ;;  %v8257_v14 = vmax.f32 %v8188_v20, 0.0  ;;  %v6446_v30 = vadd.f32 %v15810_v35, %v6024_v56 }
 0x632   : > { %v7231_v52 = vpack.c.bf16 %v7199_v16, %v7199_v16  ;;  %v6909_v46 = vadd.f32 %v6869_v60, %v6654_v39  ;;  %v8082_v48 = vsel %vm710_vm4, %v8072_v13, %v8081_v55  ;;  %v15806_v13 = vld [vmem:[#allocation77_spill] sm:$0xff]  ;;  %v15812_v60 = vld [vmem:[#allocation68_spill] sm:$0xff] }
 0x633   : > { %v8285_v38 = vpack.c.bf16 %v8257_v14, %v8256_v43  ;;  %9627 = vmatmul.msk.bf16.gmra.mxu3 %vm4280_vm10, %v8082_v48  ;;  %v6023_v51 = vadd.f32 %v15806_v13, %v15805_v15  ;;  %v6657_v20 = vadd.f32 %v6622_v22, %v6446_v30  ;;  %v6025_v43 = vadd.f32 %v15812_v60, %v15811_v62 }
 0x634   : > { %7263 = vst.msk [vmem:[#allocation3 + $0x78] sm:$0xf] %vm393_vm7, %v7231_v52  ;;  %v6976_v6 = vadd.f32 %v14795_v8, %v6909_v46 }
 0x635   : > { %9642 = vmatmul.msk.bf16.gmra.mxu0 %vm8317_vm11, %v8285_v38  ;;  %v6445_v24 = vadd.f32 %v15807_v11, %v6023_v51  ;;  %v6447_v34 = vadd.f32 %v15813_v3, %v6025_v43 }
 0x636   : > { %v7008_v5 = vmax.f32 %v6976_v6, 0.0  ;;  %v8190_v4 = vpop.f32.mrf.mxu3 }
 0x637   : > { %v8191_v28 = vadd.f32 %v14735_v40, %v8190_v4  ;;  %v6656_v53 = vadd.f32 %v6619_v25, %v6445_v24 }
 0x638   : > { %v7200_v9 = vmul.f32 %v7151_v21, %v7008_v5  ;;  %v6624_v21 = vpop.f32.mrf.mxu0 }
 0x639   : > { %v6872_v50 = vpop.f32.mrf.mxu1  ;;  %v8258_v0 = vmax.f32 %v8191_v28, 0.0 }
 0x63a   : > { %v7232_v10 = vpack.c.bf16 %v7200_v9, %v7200_v9  ;;  %v6910_v26 = vadd.f32 %v6872_v50, %v6655_v47 }
 0x63b   : > { %v9809_v32 = vld [vmem:[#allocation3 + $0x74] sm:$0xff] }
 0x63c   : > { %7264 = vst.msk [vmem:[#allocation3 + $0x7c] sm:$0xf] %vm393_vm7, %v7232_v10  ;;  %v6977_v36 = vadd.f32 %v14795_v8, %v6910_v26  ;;  %v8084_v33 = vshrl.u32 %v9809_v32, 16  ;;  %v8087_v54 = vshll.u32 %v9809_v32, 16 }
 0x63e   : > { %v7009_v49 = vmax.f32 %v6977_v36, 0.0  ;;  %v8192_v63 = vpop.f32.mrf.mxu3  ;;  %v8086_v59 = vrot.slane %v8084_v33, 2  ;;  %v8089_v7 = vrot.slane %v8087_v54, 3 }
 0x63f   : > { %v8193_v37 = vadd.f32 %v14735_v40, %v8192_v63 }
 0x640   : > { %v7201_v42 = vmul.f32 %v7156_v44, %v7009_v49  ;;  %v8090_v18 = vor.u32 %v8089_v7, %v8086_v59 }
 0x641   : > { %v6874_v2 = vpop.f32.mrf.mxu1  ;;  %v8259_v45 = vmax.f32 %v8193_v37, 0.0 }
 0x642   : > { %v7233_v19 = vpack.c.bf16 %v7201_v42, %v7201_v42  ;;  %v6911_v29 = vadd.f32 %v6874_v2, %v6656_v53  ;;  %v8091_v41 = vsel %vm710_vm4, %v8081_v55, %v8090_v18 }
 0x643   : > { %v8286_v39 = vpack.c.bf16 %v8259_v45, %v8258_v0  ;;  %9628 = vmatmul.msk.bf16.gmra.mxu3 %vm4280_vm10, %v8091_v41 }
 0x644   : > { %7265 = vst.msk [vmem:[#allocation3 + $0x80] sm:$0xf] %vm393_vm7, %v7233_v19  ;;  %v6978_v27 = vadd.f32 %v14795_v8, %v6911_v29 }
 0x645   : > { %9643 = vmatmul.msk.bf16.gmra.mxu0 %vm8317_vm11, %v8286_v39 }
 0x646   : > { %v7010_v23 = vmax.f32 %v6978_v27, 0.0  ;;  %v8195_v16 = vpop.f32.mrf.mxu3 }
 0x647   : > { %v8196_v17 = vadd.f32 %v14735_v40, %v8195_v16 }
 0x648   : > { %v7202_v55 = vmul.f32 %v14566_v58, %v7010_v23  ;;  %v6658_v58 = vadd.f32 %v6624_v21, %v6447_v34 }
 0x649   : > { %v6877_v52 = vpop.f32.mrf.mxu1  ;;  %v8260_v10 = vmax.f32 %v8196_v17, 0.0 }
 0x64a   : > { %v7234_v14 = vpack.c.bf16 %v7202_v55, %v7202_v55  ;;  %v6912_v46 = vadd.f32 %v6877_v52, %v6657_v20  ;;  %v9815_v55 = vld [vmem:[#allocation3 + $0x94] sm:$0xff] }
 0x64b   : > { %v9810_v48 = vld [vmem:[#allocation3 + $0x7c] sm:$0xff]  ;;  %v8545_v3 = vshll.u32 %v9815_v55, 16 }
 0x64c   : > { %7266 = vst.msk [vmem:[#allocation3 + $0x84] sm:$0xf] %vm393_vm7, %v7234_v14  ;;  %v6979_v38 = vadd.f32 %v14795_v8, %v6912_v46  ;;  %v8093_v6 = vshrl.u32 %v9810_v48, 16  ;;  %v8096_v31 = vshll.u32 %v9810_v48, 16  ;;  %v8542_v48 = vshrl.u32 %v9815_v55, 16 }
 0x64d   : > { %v8547_v17 = vrot.slane %v8545_v3, 3 }
 0x64e   : > { %v7011_v5 = vmax.f32 %v6979_v38, 0.0  ;;  %v8197_v4 = vpop.f32.mrf.mxu3  ;;  %v8095_v47 = vrot.slane %v8093_v6, 2  ;;  %v8098_v15 = vrot.slane %v8096_v31, 3  ;;  %v8544_v31 = vrot.slane %v8542_v48, 2 }
 0x64f   : > { %v8198_v51 = vadd.f32 %v14735_v40, %v8197_v4 }
 0x650   : > { %v7203_v13 = vmul.f32 %v14576_v57, %v7011_v5  ;;  %v8099_v50 = vor.u32 %v8098_v15, %v8095_v47  ;;  %v8548_v21 = vor.u32 %v8547_v17, %v8544_v31  ;;  %v9816_v47 = vld [vmem:[#allocation3 + $0x9c] sm:$0xff]  ;;  %v9818_v17 = vld [vmem:[%s15041_s8] sm:$0xff] }
 0x651   : > { %v6879_v9 = vpop.f32.mrf.mxu1  ;;  %v8261_v25 = vmax.f32 %v8198_v51, 0.0  ;;  %v8554_v51 = vshll.u32 %v9816_v47, 16 }
 0x652   : > { %v7235_v26 = vpack.c.bf16 %v7203_v13, %v7203_v13  ;;  %v6913_v32 = vadd.f32 %v6879_v9, %v6658_v58  ;;  %v8100_v11 = vsel %vm710_vm4, %v8090_v18, %v8099_v50  ;;  %v8551_v13 = vshrl.u32 %v9816_v47, 16 }
 0x653   : > { %v7870_v24 = vld [vmem:[#allocation3 + $0x84] sm:$0x7]  ;;  %v8287_v36 = vpack.c.bf16 %v8261_v25, %v8260_v10  ;;  %9629 = vmatmul.msk.bf16.gmra.mxu3 %vm4280_vm10, %v8100_v11  ;;  %v8556_v11 = vrot.slane %v8554_v51, 3 }
 0x654   : > { %7267 = vst.msk [vmem:[#allocation3 + $0x88] sm:$0xf] %vm393_vm7, %v7235_v26  ;;  %v6980_v33 = vadd.f32 %v14795_v8, %v6913_v32  ;;  %v7940_v54 = vunpack.c.l.b16 %v7870_v24  ;;  %v9657_v56 = vld [vmem:[#allocation3 + $0x84] sm:$0xc]  ;;  %v8553_v32 = vrot.slane %v8551_v13, 2 }
 0x655   : > { %9644 = vmatmul.msk.bf16.gmra.mxu0 %vm8317_vm11, %v8287_v36 }
 0x656   : > { %v7012_v57 = vmax.f32 %v6980_v33, 0.0  ;;  %v7957_v28 = vpack.c.b16 %v7940_v54, %v7940_v54  ;;  %v8200_v49 = vpop.f32.mrf.mxu3  ;;  %v8557_v54 = vor.u32 %v8556_v11, %v8553_v32 }
 0x657   : > { %v8201_v42 = vadd.f32 %v14735_v40, %v8200_v49 }
 0x658   : > { %v7204_v44 = vmul.f32 %v14744_v1, %v7012_v57  ;;  %v8102_v63 = vshrl.u32 %v7957_v28, 16  ;;  %v8105_v59 = vshll.u32 %v7957_v28, 16  ;;  %v9673_v57 = vld [vmem:[#allocation3 + $0xa4] sm:$0xf]  ;;  %v9817_v28 = vld [vmem:[#allocation3 + $0xa4] sm:$0x10] }
 0x659   : > { %v8262_v45 = vmax.f32 %v8201_v42, 0.0 }
 0x65a   : > { %v7236_v7 = vpack.c.bf16 %v7204_v44, %v7204_v44  ;;  %v8104_v53 = vrot.slane %v8102_v63, 2  ;;  %v8107_v61 = vrot.slane %v8105_v59, 3  ;;  %v8558_v44 = vsel %vm710_vm4, %v8548_v21, %v8557_v54 }
 0x65b   : > { %v9813_v12 = vld [vmem:[#allocation3 + $0x84] sm:$0xf0]  ;;  %v9674_v63 = vor.u32 %v9817_v28, %v9673_v57 }
 0x65c   : > { %7268 = vst.msk [vmem:[#allocation3 + $0x8c] sm:$0xf] %vm393_vm7, %v7236_v7  ;;  %v9658_v8 = vor.u32 %v9813_v12, %v9657_v56  ;;  %v8108_v2 = vor.u32 %v8107_v61, %v8104_v53  ;;  %v9819_v53 = vld [vmem:[%s15041_s8 + $0x8] sm:$0xff] }
 0x65d   : > { %v8560_v12 = vshrl.u32 %v9674_v63, 16  ;;  %v8563_v56 = vshll.u32 %v9674_v63, 16  ;;  %8670 = vmatpush.bf16.msrb.mxu2 %v9819_v53 }
 0x65e   : > { %v8202_v37 = vpop.f32.mrf.mxu3  ;;  %v8525_v0 = vshrl.u32 %v9658_v8, 16  ;;  %v8528_v19 = vshll.u32 %v9658_v8, 16  ;;  %v8109_v29 = vsel %vm710_vm4, %v8099_v50, %v8108_v2  ;;  %v14854_v50 = vld [vmem:[%s15042_s9] ss:$0 sm:$0xff] }
 0x65f   : > { %v8203_v18 = vadd.f32 %v14735_v40, %v8202_v37 }
 0x660   : > { %v8527_v30 = vrot.slane %v8525_v0, 2  ;;  %v8530_v39 = vrot.slane %v8528_v19, 3  ;;  %v8565_v0 = vrot.slane %v8563_v56, 3 }
 0x661   : > { %v8263_v1 = vmax.f32 %v8203_v18, 0.0  ;;  %v8562_v18 = vrot.slane %v8560_v12, 2  ;;  %8671 = vmatpush.bf16.msrb.mxu2 %v9818_v17 }
 0x662   : > { %v8531_v62 = vor.u32 %v8530_v39, %v8527_v30 }
 0x663   : > { %v9814_v41 = vld [vmem:[#allocation3 + $0x8c] sm:$0xff]  ;;  %v8288_v35 = vpack.c.bf16 %v8263_v1, %v8262_v45  ;;  %9630 = vmatmul.msk.bf16.gmra.mxu3 %vm4280_vm10, %v8109_v29  ;;  %v8566_v29 = vor.u32 %v8565_v0, %v8562_v18 }
 0x664   : > { %v8533_v27 = vshrl.u32 %v9814_v41, 16  ;;  %v8536_v22 = vshll.u32 %v9814_v41, 16 }
 0x665   : > { %9645 = vmatmul.msk.bf16.gmra.mxu0 %vm8317_vm11, %v8288_v35  ;;  %v8567_v35 = vsel %vm710_vm4, %v8557_v54, %v8566_v29 }
 0x666   : > { %v8205_v23 = vpop.f32.mrf.mxu3  ;;  %v8535_v16 = vrot.slane %v8533_v27, 2  ;;  %v8538_v20 = vrot.slane %v8536_v22, 3 }
 0x667   : > { %v8206_v52 = vadd.f32 %v14735_v40, %v8205_v23 }
 0x668   : > { %v8539_v60 = vor.u32 %v8538_v20, %v8535_v16 }
 0x669   : > { %v8264_v34 = vmax.f32 %v8206_v52, 0.0 }
 0x66a   : > { %v8540_v43 = vsel %vm710_vm4, %v8531_v62, %v8539_v60  ;;  %v8549_v4 = vsel %vm710_vm4, %v8539_v60, %v8548_v21 }
 0x66b   : > { %9675 = vmatmul.msk.bf16.vlgmr.msra.gmra.mxu2 %vm4280_vm10, %v8540_v43 }
 0x66e   : > { %v8207_v14 = vpop.f32.mrf.mxu3 }
 0x66f   : > { %v8208_v46 = vadd.f32 %v14735_v40, %v8207_v14 }
 0x671   : > { %v8265_v38 = vmax.f32 %v8208_v46, 0.0 }
 0x673   : > { %v8289_v6 = vpack.c.bf16 %v8265_v38, %v8264_v34 }
 0x675   : > { %9646 = vmatmul.msk.bf16.gmra.mxu0 %vm8317_vm11, %v8289_v6 }
 0x676   : > { %v8210_v5 = vpop.f32.mrf.mxu3 }
 0x677   : > { %v8211_v15 = vadd.f32 %v14735_v40, %v8210_v5 }
 0x679   : > { %v8266_v10 = vmax.f32 %v8211_v15, 0.0 }
 0x67b   : > { %9676 = vmatmul.msk.bf16.gmra.mxu2 %vm4280_vm10, %v8549_v4 }
 0x67e   : > { %v8212_v58 = vpop.f32.mrf.mxu3 }
 0x67f   : > { %v8213_v9 = vadd.f32 %v14735_v40, %v8212_v58 }
 0x681   : > { %v8267_v26 = vmax.f32 %v8213_v9, 0.0 }
 0x682   : > { %v8375_v25 = vpop.f32.mrf.mxu0 }
 0x683   : > { %v8290_v24 = vpack.c.bf16 %v8267_v26, %v8266_v10  ;;  %v8376_v36 = vadd.f32 %v14854_v50, %v8375_v25 }
 0x685   : > { %8456 = vst.msk [vmem:[%s14859_s26] sm:$0xff] %vm8455_vm12, %v8376_v36  ;;  %9647 = vmatmul.msk.bf16.gmra.mxu0 %vm8317_vm11, %v8290_v24 }
 0x686   : > { %v8215_v33 = vpop.f32.mrf.mxu3 }
 0x687   : > { %v8216_v7 = vadd.f32 %v14735_v40, %v8215_v33 }
 0x689   : > { %v8268_v42 = vmax.f32 %v8216_v7, 0.0 }
 0x68a   : > { %v8377_v49 = vpop.f32.mrf.mxu0 }
 0x68b   : > { %v8378_v59 = vadd.f32 %v14854_v50, %v8377_v49  ;;  %9677 = vmatmul.msk.bf16.gmra.mxu2 %vm4280_vm10, %v8558_v44 }
 0x68d   : > { %8457 = vst.msk [vmem:[%s14859_s26 + $0x8] sm:$0xff] %vm8455_vm12, %v8378_v59 }
 0x68e   : > { %v8217_v61 = vpop.f32.mrf.mxu3 }
 0x68f   : > { %v8218_v8 = vadd.f32 %v14735_v40, %v8217_v61 }
 0x691   : > { %v8269_v37 = vmax.f32 %v8218_v8, 0.0 }
 0x692   : > { %v8380_v2 = vpop.f32.mrf.mxu0 }
 0x693   : > { %v8291_v19 = vpack.c.bf16 %v8269_v37, %v8268_v42  ;;  %v8381_v45 = vadd.f32 %v14854_v50, %v8380_v2 }
 0x695   : > { %8458 = vst.msk [vmem:[%s14859_s26 + $0x10] sm:$0xff] %vm8455_vm12, %v8381_v45  ;;  %9648 = vmatmul.msk.bf16.gmra.mxu0 %vm8317_vm11, %v8291_v19 }
 0x696   : > { %v8220_v1 = vpop.f32.mrf.mxu3 }
 0x697   : > { %v8221_v39 = vadd.f32 %v14735_v40, %v8220_v1 }
 0x699   : > { %v8270_v23 = vmax.f32 %v8221_v39, 0.0 }
 0x69a   : > { %v8382_v41 = vpop.f32.mrf.mxu0 }
 0x69b   : > { %v8383_v30 = vadd.f32 %v14854_v50, %v8382_v41  ;;  %9678 = vmatmul.msk.bf16.gmra.mxu2 %vm4280_vm10, %v8567_v35 }
 0x69d   : > { %8459 = vst.msk [vmem:[%s14859_s26 + $0x18] sm:$0xff] %vm8455_vm12, %v8383_v30 }
 0x69e   : > { %v8222_v27 = vpop.f32.mrf.mxu3 }
 0x69f   : > { %v8223_v22 = vadd.f32 %v14735_v40, %v8222_v27 }
 0x6a1   : > { %v8271_v16 = vmax.f32 %v8223_v22, 0.0 }
 0x6a2   : > { %v8385_v20 = vpop.f32.mrf.mxu0 }
 0x6a3   : > { %v8292_v62 = vpack.c.bf16 %v8271_v16, %v8270_v23  ;;  %v8386_v60 = vadd.f32 %v14854_v50, %v8385_v20 }
 0x6a5   : > { %8460 = vst.msk [vmem:[%s14859_s26 + $0x20] sm:$0xff] %vm8455_vm12, %v8386_v60  ;;  %9649 = vmatmul.msk.bf16.gmra.mxu0 %vm8317_vm11, %v8292_v62 }
 0x6a6   : > { %v8225_v43 = vpop.f32.mrf.mxu3 }
 0x6a7   : > { %v8226_v14 = vadd.f32 %v14735_v40, %v8225_v43 }
 0x6a9   : > { %v8272_v3 = vmax.f32 %v8226_v14, 0.0 }
 0x6aa   : > { %v8387_v55 = vpop.f32.mrf.mxu0 }
 0x6ab   : > { %v8388_v52 = vadd.f32 %v14854_v50, %v8387_v55  ;;  %9679 = vmatmul.msk.bf16.gmra.mxu2 %vm4280_vm10, %v8566_v29 }
 0x6ad   : > { %8461 = vst.msk [vmem:[%s14859_s26 + $0x28] sm:$0xff] %vm8455_vm12, %v8388_v52 }
 0x6ae   : > { %v8227_v46 = vpop.f32.mrf.mxu3 }
 0x6af   : > { %v8228_v48 = vadd.f32 %v14735_v40, %v8227_v46 }
 0x6b1   : > { %v8273_v34 = vmax.f32 %v8228_v48, 0.0 }
 0x6b2   : > { %v8390_v38 = vpop.f32.mrf.mxu0 }
 0x6b3   : > { %v8293_v6 = vpack.c.bf16 %v8273_v34, %v8272_v3  ;;  %v8391_v31 = vadd.f32 %v14854_v50, %v8390_v38 }
 0x6b5   : > { %8462 = vst.msk [vmem:[%s14859_s26 + $0x30] sm:$0xff] %vm8455_vm12, %v8391_v31  ;;  %9650 = vmatmul.msk.bf16.gmra.mxu0 %vm8317_vm11, %v8293_v6 }
 0x6b6   : > { %v8230_v5 = vpop.f32.mrf.mxu3 }
 0x6b7   : > { %v8231_v47 = vadd.f32 %v14735_v40, %v8230_v5 }
 0x6b9   : > { %v8274_v13 = vmax.f32 %v8231_v47, 0.0 }
 0x6ba   : > { %v8392_v21 = vpop.f32.mrf.mxu0 }
 0x6bb   : > { %v8393_v4 = vadd.f32 %v14854_v50, %v8392_v21 }
 0x6bd   : > { %8463 = vst.msk [vmem:[%s14859_s26 + $0x38] sm:$0xff] %vm8455_vm12, %v8393_v4 }
 0x6be   : > { %v8232_v15 = vpop.f32.mrf.mxu3 }
 0x6bf   : > { %v8233_v58 = vadd.f32 %v14735_v40, %v8232_v15 }
 0x6c1   : > { %v8275_v51 = vmax.f32 %v8233_v58, 0.0 }
 0x6c2   : > { %v8395_v9 = vpop.f32.mrf.mxu0 }
 0x6c3   : > { %v8294_v10 = vpack.c.bf16 %v8275_v51, %v8274_v13  ;;  %v8396_v26 = vadd.f32 %v14854_v50, %v8395_v9 }
 0x6c5   : > { %8464 = vst.msk [vmem:[%s14859_s26 + $0x40] sm:$0xff] %vm8455_vm12, %v8396_v26  ;;  %9651 = vmatmul.msk.bf16.gmra.mxu0 %vm8317_vm11, %v8294_v10 }
 0x6c6   : > { %v8235_v25 = vpop.f32.mrf.mxu3 }
 0x6c7   : > { %v8236_v24 = vadd.f32 %v14735_v40, %v8235_v25 }
 0x6c9   : > { %v8276_v54 = vmax.f32 %v8236_v24, 0.0 }
 0x6ca   : > { %v8397_v32 = vpop.f32.mrf.mxu0 }
 0x6cb   : > { %v8398_v11 = vadd.f32 %v14854_v50, %v8397_v32 }
 0x6cd   : > { %8465 = vst.msk [vmem:[%s14859_s26 + $0x48] sm:$0xff] %vm8455_vm12, %v8398_v11 }
 0x6ce   : > { %v8237_v36 = vpop.f32.mrf.mxu3 }
 0x6cf   : > { %v8238_v33 = vadd.f32 %v14735_v40, %v8237_v36 }
 0x6d1   : > { %v8277_v57 = vmax.f32 %v8238_v33, 0.0 }
 0x6d2   : > { %v8400_v28 = vpop.f32.mrf.mxu0 }
 0x6d3   : > { %v8295_v49 = vpack.c.bf16 %v8277_v57, %v8276_v54  ;;  %v8401_v44 = vadd.f32 %v14854_v50, %v8400_v28 }
 0x6d5   : > { %8466 = vst.msk [vmem:[%s14859_s26 + $0x50] sm:$0xff] %vm8455_vm12, %v8401_v44  ;;  %9652 = vmatmul.msk.bf16.gmra.mxu0 %vm8317_vm11, %v8295_v49 }
 0x6d6   : > { %v8240_v63 = vpop.f32.mrf.mxu3 }
 0x6d7   : > { %v8241_v53 = vadd.f32 %v14735_v40, %v8240_v63 }
 0x6d9   : > { %v8278_v56 = vmax.f32 %v8241_v53, 0.0 }
 0x6da   : > { %v8402_v59 = vpop.f32.mrf.mxu0 }
 0x6db   : > { %v8403_v7 = vadd.f32 %v14854_v50, %v8402_v59 }
 0x6dd   : > { %8467 = vst.msk [vmem:[%s14859_s26 + $0x58] sm:$0xff] %vm8455_vm12, %v8403_v7 }
 0x6de   : > { %v8242_v61 = vpop.f32.mrf.mxu3 }
 0x6df   : > { %v8243_v12 = vadd.f32 %v14735_v40, %v8242_v61 }
 0x6e1   : > { %v8279_v8 = vmax.f32 %v8243_v12, 0.0 }
 0x6e2   : > { %v8405_v42 = vpop.f32.mrf.mxu0 }
 0x6e3   : > { %v8296_v37 = vpack.c.bf16 %v8279_v8, %v8278_v56  ;;  %v8406_v2 = vadd.f32 %v14854_v50, %v8405_v42 }
 0x6e5   : > { %8468 = vst.msk [vmem:[%s14859_s26 + $0x60] sm:$0xff] %vm8455_vm12, %v8406_v2  ;;  %9653 = vmatmul.msk.bf16.gmra.mxu0 %vm8317_vm11, %v8296_v37 }
 0x6e6   : > { %v8245_v18 = vpop.f32.mrf.mxu3 }
 0x6e7   : > { %v8246_v45 = vadd.f32 %v14735_v40, %v8245_v18 }
 0x6e9   : > { %v8280_v35 = vmax.f32 %v8246_v45, 0.0 }
 0x6ea   : > { %v8407_v0 = vpop.f32.mrf.mxu0 }
 0x6eb   : > { %v8408_v19 = vadd.f32 %v14854_v50, %v8407_v0 }
 0x6ed   : > { %8469 = vst.msk [vmem:[%s14859_s26 + $0x68] sm:$0xff] %vm8455_vm12, %v8408_v19 }
 0x6ee   : > { %v8247_v1 = vpop.f32.mrf.mxu3  ;;  %v8595_v29 = vpop.f32.mrf.mxu2 }
 0x6ef   : > { %v8248_v41 = vadd.f32 %v14735_v40, %v8247_v1  ;;  %v8596_v23 = vadd.f32 %v14735_v40, %v8595_v29 }
 0x6f1   : > { %v8281_v30 = vmax.f32 %v8248_v41, 0.0  ;;  %v8619_v62 = vmax.f32 %v8596_v23, 0.0 }
 0x6f2   : > { %v8410_v39 = vpop.f32.mrf.mxu0 }
 0x6f3   : > { %v8297_v27 = vpack.c.bf16 %v8281_v30, %v8280_v35  ;;  %v8411_v22 = vadd.f32 %v14854_v50, %v8410_v39 }
 0x6f5   : > { %8470 = vst.msk [vmem:[%s14859_s26 + $0x70] sm:$0xff] %vm8455_vm12, %v8411_v22  ;;  %9654 = vmatmul.msk.bf16.gmra.mxu0 %vm8317_vm11, %v8297_v27 }
 0x6f6   : > { %v8597_v16 = vpop.f32.mrf.mxu2 }
 0x6f7   : > { %v8598_v20 = vadd.f32 %v14735_v40, %v8597_v16 }
 0x6f9   : > { %v8620_v60 = vmax.f32 %v8598_v20, 0.0 }
 0x6fa   : > { %v8412_v43 = vpop.f32.mrf.mxu0 }
 0x6fb   : > { %v8628_v55 = vpack.c.bf16 %v8620_v60, %v8619_v62  ;;  %v8413_v52 = vadd.f32 %v14854_v50, %v8412_v43 }
 0x6fd   : > { %8471 = vst.msk [vmem:[%s14859_s26 + $0x78] sm:$0xff] %vm8455_vm12, %v8413_v52  ;;  %9688 = vmatmul.msk.bf16.vlgmr.msrb.gmra.mxu2 %vm8317_vm11, %v8628_v55 }
 0x6fe   : > { %v8600_v14 = vpop.f32.mrf.mxu2 }
 0x6ff   : > { %v8601_v3 = vadd.f32 %v14735_v40, %v8600_v14 }
 0x701   : > { %v8621_v6 = vmax.f32 %v8601_v3, 0.0 }
 0x702   : > { %v8415_v46 = vpop.f32.mrf.mxu0 }
 0x703   : > { %v8416_v48 = vadd.f32 %v14854_v50, %v8415_v46 }
 0x705   : > { %8472 = vst.msk [vmem:[%s14859_s26 + $0x80] sm:$0xff] %vm8455_vm12, %v8416_v48 }
 0x706   : > { %v8602_v34 = vpop.f32.mrf.mxu2 }
 0x707   : > { %v8603_v38 = vadd.f32 %v14735_v40, %v8602_v34 }
 0x709   : > { %v8622_v31 = vmax.f32 %v8603_v38, 0.0 }
 0x70a   : > { %v8417_v17 = vpop.f32.mrf.mxu0 }
 0x70b   : > { %v8629_v5 = vpack.c.bf16 %v8622_v31, %v8621_v6  ;;  %v8418_v21 = vadd.f32 %v14854_v50, %v8417_v17 }
 0x70d   : > { %8473 = vst.msk [vmem:[%s14859_s26 + $0x88] sm:$0xff] %vm8455_vm12, %v8418_v21  ;;  %9689 = vmatmul.msk.bf16.gmra.mxu2 %vm8317_vm11, %v8629_v5 }
 0x70e   : > { %v8605_v4 = vpop.f32.mrf.mxu2 }
 0x70f   : > { %v8606_v58 = vadd.f32 %v14735_v40, %v8605_v4 }
 0x711   : > { %v8623_v9 = vmax.f32 %v8606_v58, 0.0 }
 0x712   : > { %v8420_v47 = vpop.f32.mrf.mxu0 }
 0x713   : > { %v8421_v15 = vadd.f32 %v14854_v50, %v8420_v47 }
 0x715   : > { %8474 = vst.msk [vmem:[%s14859_s26 + $0x90] sm:$0xff] %vm8455_vm12, %v8421_v15 }
 0x716   : > { %v8607_v13 = vpop.f32.mrf.mxu2 }
 0x717   : > { %v8608_v51 = vadd.f32 %v14735_v40, %v8607_v13 }
 0x719   : > { %v8624_v10 = vmax.f32 %v8608_v51, 0.0 }
 0x71a   : > { %v8422_v26 = vpop.f32.mrf.mxu0 }
 0x71b   : > { %v8630_v25 = vpack.c.bf16 %v8624_v10, %v8623_v9  ;;  %v8423_v32 = vadd.f32 %v14854_v50, %v8422_v26 }
 0x71d   : > { %8475 = vst.msk [vmem:[%s14859_s26 + $0x98] sm:$0xff] %vm8455_vm12, %v8423_v32  ;;  %9690 = vmatmul.msk.bf16.gmra.mxu2 %vm8317_vm11, %v8630_v25 }
 0x71e   : > { %v8610_v11 = vpop.f32.mrf.mxu2 }
 0x71f   : > { %v8611_v33 = vadd.f32 %v14735_v40, %v8610_v11 }
 0x721   : > { %v8625_v28 = vmax.f32 %v8611_v33, 0.0 }
 0x722   : > { %v8425_v24 = vpop.f32.mrf.mxu0 }
 0x723   : > { %v8426_v36 = vadd.f32 %v14854_v50, %v8425_v24 }
 0x725   : > { %8476 = vst.msk [vmem:[%s14859_s26 + $0xa0] sm:$0xff] %vm8455_vm12, %v8426_v36 }
 0x726   : > { %v8612_v54 = vpop.f32.mrf.mxu2 }
 0x727   : > { %v8613_v57 = vadd.f32 %v14735_v40, %v8612_v54 }
 0x729   : > { %v8626_v49 = vmax.f32 %v8613_v57, 0.0 }
 0x72a   : > { %v8427_v44 = vpop.f32.mrf.mxu0 }
 0x72b   : > { %v8631_v63 = vpack.c.bf16 %v8626_v49, %v8625_v28  ;;  %v8428_v59 = vadd.f32 %v14854_v50, %v8427_v44 }
 0x72d   : > { %8477 = vst.msk [vmem:[%s14859_s26 + $0xa8] sm:$0xff] %vm8455_vm12, %v8428_v59  ;;  %9691 = vmatmul.msk.bf16.gmra.mxu2 %vm8317_vm11, %v8631_v63 }
 0x72e   : > { %v8615_v7 = vpop.f32.mrf.mxu2 }
 0x72f   : > { %v8616_v53 = vadd.f32 %v14735_v40, %v8615_v7 }
 0x731   : > { %v8627_v56 = vmax.f32 %v8616_v53, 0.0 }
 0x732   : > { %v8430_v61 = vpop.f32.mrf.mxu0 }
 0x733   : > { %v8431_v12 = vadd.f32 %v14854_v50, %v8430_v61  ;;  %v8632_v42 = vpack.c.bf16 %v8627_v56, %v8627_v56 }
 0x735   : > { %8478 = vst.msk [vmem:[%s14859_s26 + $0xb0] sm:$0xff] %vm8455_vm12, %v8431_v12 }
 0x736   : > { %v8617_v8 = vpop.f32.mrf.mxu2 }
 0x73a   : > { %v8432_v37 = vpop.f32.mrf.mxu0 }
 0x73b   : > { %v8433_v2 = vadd.f32 %v14854_v50, %v8432_v37 }
 0x73d   : > { %8479 = vst.msk [vmem:[%s14859_s26 + $0xb8] sm:$0xff] %vm8455_vm12, %v8433_v2  ;;  %9692 = vmatmul.msk.bf16.gmra.mxu2 %vm8317_vm11, %v8632_v42 }
 0x742   : > { %v8435_v40 = vpop.f32.mrf.mxu0 }
 0x743   : > { %v8436_v18 = vadd.f32 %v14854_v50, %v8435_v40 }
 0x745   : > { %8480 = vst.msk [vmem:[%s14859_s26 + $0xc0] sm:$0xff] %vm8455_vm12, %v8436_v18 }
 0x74a   : > { %v8437_v0 = vpop.f32.mrf.mxu0 }
 0x74b   : > { %v8438_v19 = vadd.f32 %v14854_v50, %v8437_v0 }
 0x74d   : > { %8481 = vst.msk [vmem:[%s14859_s26 + $0xc8] sm:$0xff] %vm8455_vm12, %v8438_v19 }
 0x752   : > { %v8440_v45 = vpop.f32.mrf.mxu0 }
 0x753   : > { %v8441_v1 = vadd.f32 %v14854_v50, %v8440_v45 }
 0x755   : > { %8482 = vst.msk [vmem:[%s14859_s26 + $0xd0] sm:$0xff] %vm8455_vm12, %v8441_v1 }
 0x75a   : > { %v8442_v29 = vpop.f32.mrf.mxu0 }
 0x75b   : > { %v8443_v41 = vadd.f32 %v14854_v50, %v8442_v29 }
 0x75d   : > { %8483 = vst.msk [vmem:[%s14859_s26 + $0xd8] sm:$0xff] %vm8455_vm12, %v8443_v41 }
 0x762   : > { %v8445_v35 = vpop.f32.mrf.mxu0 }
 0x763   : > { %v8446_v30 = vadd.f32 %v14854_v50, %v8445_v35 }
 0x765   : > { %8484 = vst.msk [vmem:[%s14859_s26 + $0xe0] sm:$0xff] %vm8455_vm12, %v8446_v30 }
 0x76a   : > { %v8447_v39 = vpop.f32.mrf.mxu0 }
 0x76b   : > { %v8448_v27 = vadd.f32 %v14854_v50, %v8447_v39 }
 0x76d   : > { %8485 = vst.msk [vmem:[%s14859_s26 + $0xe8] sm:$0xff] %vm8455_vm12, %v8448_v27 }
 0x772   : > { %v8450_v22 = vpop.f32.mrf.mxu0 }
 0x773   : > { %v8451_v23 = vadd.f32 %v14854_v50, %v8450_v22 }
 0x775   : > { %8486 = vst.msk [vmem:[%s14859_s26 + $0xf0] sm:$0xff] %vm8455_vm12, %v8451_v23 }
 0x77a   : > { %v8452_v16 = vpop.f32.mrf.mxu0 }
 0x77b   : > { %v8453_v20 = vadd.f32 %v14854_v50, %v8452_v16 }
 0x77d   : > { %8487 = vst.msk [vmem:[%s14859_s26 + $0xf8] sm:$0xff] %vm8455_vm12, %v8453_v20 }
 0x780   : > { %v8673_v62 = vpop.f32.mrf.mxu2 }
 0x781   : > { %v8674_v60 = vadd.f32 %v14854_v50, %v8673_v62 }
 0x783   : > { %8697 = vst.msk [vmem:[%s14859_s26 + $0x100] sm:$0xff] %vm8455_vm12, %v8674_v60 }
 0x788   : > { %v8675_v43 = vpop.f32.mrf.mxu2 }
 0x789   : > { %v8676_v55 = vadd.f32 %v14854_v50, %v8675_v43 }
 0x78b   : > { %8698 = vst.msk [vmem:[%s14859_s26 + $0x108] sm:$0xff] %vm8455_vm12, %v8676_v55 }
 0x790   : > { %v8678_v52 = vpop.f32.mrf.mxu2 }
 0x791   : > { %v8679_v14 = vadd.f32 %v14854_v50, %v8678_v52 }
 0x793   : > { %8699 = vst.msk [vmem:[%s14859_s26 + $0x110] sm:$0xff] %vm8455_vm12, %v8679_v14 }
 0x798   : > { %v8680_v46 = vpop.f32.mrf.mxu2 }
 0x799   : > { %v8681_v48 = vadd.f32 %v14854_v50, %v8680_v46 }
 0x79b   : > { %8700 = vst.msk [vmem:[%s14859_s26 + $0x118] sm:$0xff] %vm8455_vm12, %v8681_v48 }
 0x7a0   : > { %v8683_v3 = vpop.f32.mrf.mxu2 }
 0x7a1   : > { %v8684_v34 = vadd.f32 %v14854_v50, %v8683_v3 }
 0x7a3   : > { %8701 = vst.msk [vmem:[%s14859_s26 + $0x120] sm:$0xff] %vm8455_vm12, %v8684_v34 }
 0x7a8   : > { %v8685_v38 = vpop.f32.mrf.mxu2 }
 0x7a9   : > { %v8686_v6 = vadd.f32 %v14854_v50, %v8685_v38 }
 0x7ab   : > { %8702 = vst.msk [vmem:[%s14859_s26 + $0x128] sm:$0xff] %vm8455_vm12, %v8686_v6 }
 0x7b0   : > { %v8688_v31 = vpop.f32.mrf.mxu2 }
 0x7b1   : > { %v8689_v17 = vadd.f32 %v14854_v50, %v8688_v31 }
 0x7b3   : > { %8703 = vst.msk [vmem:[%s14859_s26 + $0x130] sm:$0xff] %vm8455_vm12, %v8689_v17 }
 0x7b8   : > { %v8690_v5 = vpop.f32.mrf.mxu2 }
 0x7b9   : > { %v8691_v21 = vadd.f32 %v14854_v50, %v8690_v5 }
 0x7bb   : > { %8704 = vst.msk [vmem:[%s14859_s26 + $0x138] sm:$0xff] %vm8455_vm12, %v8691_v21 }
 0x7c0   : > { %v8693_v4 = vpop.f32.mrf.mxu2 }
 0x7c1   : > { %v8694_v47 = vadd.f32 %v14854_v50, %v8693_v4 }
 0x7c3   : > { %8706 = vst.msk [vmem:[%s14859_s26 + $0x140] sm:$0xf] %vm8705_vm13, %v8694_v47 }
 0x7c8   : > { %v8695_v15 = vpop.f32.mrf.mxu2 }
 0x7c9 PF: > { %s22_s13 = sadd.s32 1, %s10395_s13  }
 0x7ca   : > { %p19_p8 = scmp.ge.s32.totalorder %s22_s13, 4  }
 0x7cc   :  { %21 = sbr.rel (!%p19_p8) target bundleno = 2 (0x2), region = 115 }
 0x7d1   :  { %8728 = vsyncpa [#allocation5], 1 }
 0x7d2   :  { %8730 = vsyncpa [#allocation5 + $0x1], 1 }
 0x7d3   :  { %8731 = vsyncpa [#allocation7], 1 }

</bundles_post_ra>
